<compile_context>
chip_gen: v5e
topology: v5e:2x2
jax: 0.10.0
libtpu: 0.0.40
codegen_flags: <defaults>
</compile_context>

<pallas_src>
import jax
import jax.numpy as jnp
from jax.experimental import pallas as pl
from jax.experimental.pallas import tpu as pltpu


_VMEM_LIMIT = 32 * 1024 * 1024  # largest per-call footprint here is ~7 MiB; safe on v5e/v6e/v7x


def _compiler_params():
    return pltpu.CompilerParams(
        dimension_semantics=("parallel",),
        vmem_limit_bytes=_VMEM_LIMIT,
    )


def _round_up(x, k):
    return (x + k - 1) // k * k


def _pick_block_rows(m, target):
    """Row block size: multiple of 8, <= ~target, roughly dividing m (so the trailing grid
    step isn't mostly masked), and giving >= 2 grid steps when m allows (v7x megacore)."""
    if m <= 16:
        return m                                  # tiny call (e.g. the head at small batch)
    nsteps = max(2, pl.cdiv(m, target))
    bm = _round_up(pl.cdiv(m, nsteps), 8)
    return bm if bm < m else m


# ----------------------------------------------------------------------------- kernels

def _smish(x):
    # Smish(x) = x * tanh(log(1 + sigmoid(x)))
    #          = x * (s^2 + 2s) / (s^2 + 2s + 2),   s = sigmoid(x)
    s = pl.reciprocal(1.0 + jnp.exp(-x), approx=True)      # EUP exp + EUP approx recip
    u = s * (s + 2.0)
    return x * u * pl.reciprocal(u + 2.0, approx=True)


def _conv_bn_smish_pool_kernel(p_ref, w_ref, shift_ref, o_ref):
    """out = max_k smish(P[k] @ w + shift), k over the 4 (dh, dw) pool parities.

    p_ref: (4, bm, K) bf16 parity patches, w_ref: (K, N) bf16 with BN scale folded in,
    shift_ref: (1, N) f32, o_ref: (bm, N)."""
    shift = shift_ref[...]
    out = None
    for k in range(4):
        y = jnp.dot(p_ref[k], w_ref[...], preferred_element_type=jnp.float32) + shift
        a = _smish(y)
        out = a if out is None else jnp.maximum(out, a)
    o_ref[...] = out.astype(o_ref.dtype)


def _matmul_bn_smish_kernel(x_ref, w_ref, shift_ref, o_ref):
    """y = smish(x @ w + shift); BN scale folded into w, shift folds bias + BN."""
    y = jnp.dot(x_ref[...], w_ref[...], preferred_element_type=jnp.float32) + shift_ref[...]
    o_ref[...] = _smish(y).astype(o_ref.dtype)


def _head_kernel(x_ref, w1_ref, shift_ref, w2_ref, b2_ref, o_ref):
    """log_softmax( smish(x @ w1 + shift) @ w2 + b2 ): fused fc1 + bn4 + smish + fc2."""
    h = jnp.dot(x_ref[...], w1_ref[...], preferred_element_type=jnp.float32) + shift_ref[...]
    h = _smish(h)
    y = jnp.dot(h.astype(w2_ref.dtype), w2_ref[...],
                preferred_element_type=jnp.float32) + b2_ref[...]
    m = jnp.max(y, axis=-1, keepdims=True)
    z = y - m
    o_ref[...] = (z - jnp.log(jnp.sum(jnp.exp(z), axis=-1, keepdims=True))).astype(o_ref.dtype)


# ----------------------------------------------------------------------------- wrappers

def conv_bn_smish_pool(p, w, shift, *, block_m=512, out_dtype=jnp.bfloat16):
    """p: (4, M, K) parity patches -> (M, N) pooled, activated conv output (rows = (b,p,q))."""
    _, m, k = p.shape
    n = w.shape[1]
    bm = _pick_block_rows(m, block_m)
    grid = (pl.cdiv(m, bm),)
    return pl.pallas_call(
        _conv_bn_smish_pool_kernel,
        out_shape=jax.ShapeDtypeStruct((m, n), out_dtype),
        grid_spec=pltpu.PrefetchScalarGridSpec(
            num_scalar_prefetch=0,
            grid=grid,
            in_specs=[
                pl.BlockSpec((4, bm, k), lambda i: (0, i, 0)),
                pl.BlockSpec((k, n), lambda i: (0, 0)),
                pl.BlockSpec((1, n), lambda i: (0, 0)),
            ],
            out_specs=pl.BlockSpec((bm, n), lambda i: (i, 0)),
        ),
        compiler_params=_compiler_params(),
    )(p, w, shift)


def matmul_bn_smish(x, w, shift, *, block_m=512, out_dtype=jnp.bfloat16):
    m, k = x.shape
    n = w.shape[1]
    bm = _pick_block_rows(m, block_m)
    grid = (pl.cdiv(m, bm),)
    return pl.pallas_call(
        _matmul_bn_smish_kernel,
        out_shape=jax.ShapeDtypeStruct((m, n), out_dtype),
        grid_spec=pltpu.PrefetchScalarGridSpec(
            num_scalar_prefetch=0,
            grid=grid,
            in_specs=[
                pl.BlockSpec((bm, k), lambda i: (i, 0)),
                pl.BlockSpec((k, n), lambda i: (0, 0)),
                pl.BlockSpec((1, n), lambda i: (0, 0)),
            ],
            out_specs=pl.BlockSpec((bm, n), lambda i: (i, 0)),
        ),
        compiler_params=_compiler_params(),
    )(x, w, shift)


def head_fc(x, w1, shift, w2, b2, *, block_m=256):
    m, k = x.shape
    nh = w1.shape[1]
    no = w2.shape[1]
    bm = _pick_block_rows(m, block_m)
    grid = (pl.cdiv(m, bm),)
    return pl.pallas_call(
        _head_kernel,
        out_shape=jax.ShapeDtypeStruct((m, no), jnp.float32),
        grid_spec=pltpu.PrefetchScalarGridSpec(
            num_scalar_prefetch=0,
            grid=grid,
            in_specs=[
                pl.BlockSpec((bm, k), lambda i: (i, 0)),
                pl.BlockSpec((k, nh), lambda i: (0, 0)),
                pl.BlockSpec((1, nh), lambda i: (0, 0)),
                pl.BlockSpec((nh, no), lambda i: (0, 0)),
                pl.BlockSpec((1, no), lambda i: (0, 0)),
            ],
            out_specs=pl.BlockSpec((bm, no), lambda i: (i, 0)),
        ),
        compiler_params=_compiler_params(),
    )(x, w1, shift, w2, b2)


# ----------------------------------------------------------------------------- glue

def _im2col_nhwc(x_nhwc):
    """3x3, stride 1, padding 1 patches, kept spatial: (B, H, W, 9*Cin), (kh, kw, cin) order."""
    b, h, w, c = x_nhwc.shape
    xp = jnp.pad(x_nhwc, ((0, 0), (1, 1), (1, 1), (0, 0)))
    cols = [xp[:, i:i + h, j:j + w, :] for i in range(3) for j in range(3)]
    return jnp.concatenate(cols, axis=-1)


def im2col_3x3(x_nhwc):
    """(B*H*W, 9*Cin) patch matrix (rows ordered (b, h, w))."""
    b, h, w, c = x_nhwc.shape
    return _im2col_nhwc(x_nhwc).reshape(b * h * w, 9 * c)


def im2col_pool_parities(x_nhwc):
    """Patch matrices for the four (dh, dw) parities of a 2x2 max-pool window.

    Returns (4, B*(H/2)*(W/2), 9*Cin); parity k's rows are the output pixels (2p+dh, 2q+dw)
    in (b, p, q) order, so max over k after the conv epilogue == MaxPool2d(2)."""
    b, h, w, c = x_nhwc.shape
    patches = _im2col_nhwc(x_nhwc)                                   # (B, H, W, 9C)
    rows = b * (h // 2) * (w // 2)
    par = [patches[:, dh::2, dw::2, :].reshape(rows, 9 * c)
           for dh in (0, 1) for dw in (0, 1)]
    return jnp.stack(par, axis=0)                                    # (4, rows, 9C)


def conv_weight_to_mat(w_oihw):
    """PyTorch (Cout, Cin, KH, KW) -> (KH*KW*Cin, Cout), matching im2col column ordering."""
    cout = w_oihw.shape[0]
    return jnp.transpose(w_oihw, (2, 3, 1, 0)).reshape(-1, cout)


def fold_bn_into_weight(w_mat, bias, gamma, beta, mean, var, eps=1e-5):
    """Fold BatchNorm(eval) scale into the bf16 weight columns; return (w_bf16, shift_f32)."""
    scale = gamma / jnp.sqrt(var + eps)
    w_folded = (w_mat.astype(jnp.float32) * scale[None, :]).astype(jnp.bfloat16)
    shift = (beta + (bias - mean) * scale)[None, :].astype(jnp.float32)
    return w_folded, shift


def pack_params(p, eps=1e-5):
    """One-time weight repack + BN fold, done OUTSIDE the jitted forward (bf16 matmul operands)."""
    f = {}
    for idx, name in ((1, "conv1"), (2, "conv2"), (3, "conv3")):
        wmat = conv_weight_to_mat(p[f"{name}_w"])
        f[f"w{idx}"], f[f"t{idx}"] = fold_bn_into_weight(
            wmat, p[f"{name}_b"], p[f"bn{idx}_gamma"], p[f"bn{idx}_beta"],
            p[f"bn{idx}_mean"], p[f"bn{idx}_var"], eps)
    # fc1 stored (256, 6272) with PyTorch NCHW-flatten column order (c, h, w).
    # Pre-permute to NHWC (h, w, c) row order + transpose so the forward pass can feed the
    # NHWC activation directly (no per-call transpose of the 6272-wide activation).
    w1 = jnp.transpose(p["fc1_w"].reshape(256, 128, 7, 7), (2, 3, 1, 0)).reshape(7 * 7 * 128, 256)
    f["fc1_w"], f["t4"] = fold_bn_into_weight(
        w1, p["fc1_b"], p["bn4_gamma"], p["bn4_beta"], p["bn4_mean"], p["bn4_var"], eps)
    f["fc2_w"] = p["fc2_w"].T.astype(jnp.bfloat16)
    f["fc2_b"] = p["fc2_b"][None, :].astype(jnp.float32)
    return f


def init_params(key):
    ks = jax.random.split(key, 16)
    p = {}
    p["conv1_w"] = 0.1 * jax.random.normal(ks[0], (32, 1, 3, 3), jnp.float32)
    p["conv1_b"] = 0.05 * jax.random.normal(ks[1], (32,), jnp.float32)
    p["conv2_w"] = 0.05 * jax.random.normal(ks[2], (64, 32, 3, 3), jnp.float32)
    p["conv2_b"] = 0.05 * jax.random.normal(ks[3], (64,), jnp.float32)
    p["conv3_w"] = 0.05 * jax.random.normal(ks[4], (128, 64, 3, 3), jnp.float32)
    p["conv3_b"] = 0.05 * jax.random.normal(ks[5], (128,), jnp.float32)
    p["fc1_w"] = 0.02 * jax.random.normal(ks[6], (256, 128 * 7 * 7), jnp.float32)
    p["fc1_b"] = 0.05 * jax.random.normal(ks[7], (256,), jnp.float32)
    p["fc2_w"] = 0.05 * jax.random.normal(ks[8], (10, 256), jnp.float32)
    p["fc2_b"] = 0.05 * jax.random.normal(ks[9], (10,), jnp.float32)
    for name, n, ki in (("bn1", 32, 10), ("bn2", 64, 11), ("bn3", 128, 12), ("bn4", 256, 13)):
        sub = jax.random.split(ks[ki], 4)
        p[f"{name}_gamma"] = 1.0 + 0.1 * jax.random.normal(sub[0], (n,), jnp.float32)
        p[f"{name}_beta"] = 0.1 * jax.random.normal(sub[1], (n,), jnp.float32)
        p[f"{name}_mean"] = 0.1 * jax.random.normal(sub[2], (n,), jnp.float32)
        p[f"{name}_var"] = 1.0 + 0.1 * jax.random.uniform(sub[3], (n,), jnp.float32)
    return p


@jax.jit
def cnn_forward(x_nchw, fp):
    b = x_nchw.shape[0]
    x = jnp.transpose(x_nchw, (0, 2, 3, 1)).astype(jnp.bfloat16)          # NCHW -> NHWC

    # block 1: conv1 -> bn1 -> smish -> maxpool(2) -> dropout(identity), pool fused in-kernel
    y = conv_bn_smish_pool(im2col_pool_parities(x), fp["w1"], fp["t1"])   # (B*196, 32)
    y = y.reshape(b, 14, 14, 32)

    # block 2: conv2 -> bn2 -> smish -> maxpool(2) -> dropout(identity), pool fused in-kernel
    y = conv_bn_smish_pool(im2col_pool_parities(y), fp["w2"], fp["t2"])   # (B*49, 64)
    y = y.reshape(b, 7, 7, 64)

    # block 3: conv3 -> bn3 -> smish -> dropout(identity)
    y = matmul_bn_smish(im2col_3x3(y), fp["w3"], fp["t3"])                # (B*49, 128)

    # flatten: rows are (b, h, w), lanes c -> (B, 7*7*128) in NHWC order; the fc1 weight rows
    # were pre-permuted to the same order, so this matches PyTorch's NCHW .view().
    y = y.reshape(b, 7 * 7 * 128)

    # fc1 -> bn4 -> smish -> dropout(identity) -> fc2 -> log_softmax (single fused kernel)
    return head_fc(y, fp["fc1_w"], fp["t4"], fp["fc2_w"], fp["fc2_b"])


if __name__ == "__main__":
    key = jax.random.PRNGKey(0)
    k_x, k_p = jax.random.split(key)
    # MNIST-style input implied by fc1 = Linear(128*7*7, 256): (B, 1, 28, 28), NCHW.
    x = jax.random.normal(k_x, (2, 1, 28, 28), jnp.float32)
    params = init_params(k_p)
    packed = pack_params(params)        # weight repack + BN fold, outside the jitted forward

    out = cnn_forward(x, packed)
    jax.block_until_ready(out)

    assert out.shape == (2, 10), out.shape
    # log_softmax rows must (log-)sum to ~1.
    row_sums = jnp.sum(jnp.exp(out), axis=1)
    assert bool(jnp.all(jnp.abs(row_sums - 1.0) < 1e-3)), row_sums
    print("KERNEL_OK")
</pallas_src>

<mosaic_0001>
module attributes {stable_mosaic.version = 11 : i64} {
  func.func @_conv_bn_smish_pool_kernel(%arg0: i32, %arg1: memref<4x200x9xbf16, #tpu.memory_space<vmem>>, %arg2: memref<9x32xbf16, #tpu.memory_space<vmem>>, %arg3: memref<1x32xf32, #tpu.memory_space<vmem>>, %arg4: memref<200x32xbf16, #tpu.memory_space<vmem>>) attributes {dimension_semantics = [#tpu.dimension_semantics<parallel>], iteration_bounds = array<i64: 2>, scalar_prefetch = 0 : i64, scratch_operands = 0 : i64, tpu.core_type = #tpu.core_type<tc>, window_params = [{transform_indices = @transform_0, window_bounds = array<i64: 4, 200, 9>}, {pipeline_mode = #tpu.pipeline_mode<synchronous>, transform_indices = @transform_1, window_bounds = array<i64: 9, 32>}, {pipeline_mode = #tpu.pipeline_mode<synchronous>, transform_indices = @transform_2, window_bounds = array<i64: 1, 32>}, {transform_indices = @transform_3, window_bounds = array<i64: 200, 32>}]} {
    %c0 = arith.constant 0 : index
    %c0_0 = arith.constant 0 : index
    %0 = vector.load %arg3[%c0, %c0_0] : memref<1x32xf32, #tpu.memory_space<vmem>>, vector<1x32xf32>
    %c0_1 = arith.constant 0 : index
    %c0_2 = arith.constant 0 : index
    %c0_3 = arith.constant 0 : index
    %1 = vector.load %arg1[%c0_1, %c0_2, %c0_3] : memref<4x200x9xbf16, #tpu.memory_space<vmem>>, vector<1x200x9xbf16>
    %2 = vector.shape_cast %1 : vector<1x200x9xbf16> to vector<200x9xbf16>
    %c0_4 = arith.constant 0 : index
    %c0_5 = arith.constant 0 : index
    %3 = vector.load %arg2[%c0_4, %c0_5] : memref<9x32xbf16, #tpu.memory_space<vmem>>, vector<9x32xbf16>
    %cst = arith.constant dense<0.000000e+00> : vector<200x32xf32>
    %4 = tpu.matmul %2, %3, %cst {dimension_numbers = #tpu.dot_dimension_numbers<[1], [0], [0], [1], [0, 0, 1, 1], [], []>} : vector<200x9xbf16>, vector<9x32xbf16>, vector<200x32xf32> -> vector<200x32xf32>
    %5 = vector.broadcast %0 : vector<1x32xf32> to vector<200x32xf32>
    %6 = arith.addf %4, %5 : vector<200x32xf32>
    %cst_6 = arith.constant 0.000000e+00 : f32
    %7 = vector.broadcast %cst_6 : f32 to vector<200x32xf32>
    %8 = arith.subf %7, %6 : vector<200x32xf32>
    %9 = math.exp %8 : vector<200x32xf32>
    %cst_7 = arith.constant 1.000000e+00 : f32
    %10 = vector.broadcast %cst_7 : f32 to vector<200x32xf32>
    %11 = arith.addf %10, %9 : vector<200x32xf32>
    %12 = tpu.reciprocal %11 {approx = true} : vector<200x32xf32> -> vector<200x32xf32>
    %cst_8 = arith.constant 2.000000e+00 : f32
    %13 = vector.broadcast %cst_8 : f32 to vector<200x32xf32>
    %14 = arith.addf %12, %13 : vector<200x32xf32>
    %15 = arith.mulf %12, %14 : vector<200x32xf32>
    %16 = arith.mulf %6, %15 : vector<200x32xf32>
    %cst_9 = arith.constant 2.000000e+00 : f32
    %17 = vector.broadcast %cst_9 : f32 to vector<200x32xf32>
    %18 = arith.addf %15, %17 : vector<200x32xf32>
    %19 = tpu.reciprocal %18 {approx = true} : vector<200x32xf32> -> vector<200x32xf32>
    %20 = arith.mulf %16, %19 : vector<200x32xf32>
    %c1 = arith.constant 1 : index
    %c0_10 = arith.constant 0 : index
    %c0_11 = arith.constant 0 : index
    %21 = vector.load %arg1[%c1, %c0_10, %c0_11] : memref<4x200x9xbf16, #tpu.memory_space<vmem>>, vector<1x200x9xbf16>
    %22 = vector.shape_cast %21 : vector<1x200x9xbf16> to vector<200x9xbf16>
    %c0_12 = arith.constant 0 : index
    %c0_13 = arith.constant 0 : index
    %23 = vector.load %arg2[%c0_12, %c0_13] : memref<9x32xbf16, #tpu.memory_space<vmem>>, vector<9x32xbf16>
    %cst_14 = arith.constant dense<0.000000e+00> : vector<200x32xf32>
    %24 = tpu.matmul %22, %23, %cst_14 {dimension_numbers = #tpu.dot_dimension_numbers<[1], [0], [0], [1], [0, 0, 1, 1], [], []>} : vector<200x9xbf16>, vector<9x32xbf16>, vector<200x32xf32> -> vector<200x32xf32>
    %25 = vector.broadcast %0 : vector<1x32xf32> to vector<200x32xf32>
    %26 = arith.addf %24, %25 : vector<200x32xf32>
    %cst_15 = arith.constant 0.000000e+00 : f32
    %27 = vector.broadcast %cst_15 : f32 to vector<200x32xf32>
    %28 = arith.subf %27, %26 : vector<200x32xf32>
    %29 = math.exp %28 : vector<200x32xf32>
    %cst_16 = arith.constant 1.000000e+00 : f32
    %30 = vector.broadcast %cst_16 : f32 to vector<200x32xf32>
    %31 = arith.addf %30, %29 : vector<200x32xf32>
    %32 = tpu.reciprocal %31 {approx = true} : vector<200x32xf32> -> vector<200x32xf32>
    %cst_17 = arith.constant 2.000000e+00 : f32
    %33 = vector.broadcast %cst_17 : f32 to vector<200x32xf32>
    %34 = arith.addf %32, %33 : vector<200x32xf32>
    %35 = arith.mulf %32, %34 : vector<200x32xf32>
    %36 = arith.mulf %26, %35 : vector<200x32xf32>
    %cst_18 = arith.constant 2.000000e+00 : f32
    %37 = vector.broadcast %cst_18 : f32 to vector<200x32xf32>
    %38 = arith.addf %35, %37 : vector<200x32xf32>
    %39 = tpu.reciprocal %38 {approx = true} : vector<200x32xf32> -> vector<200x32xf32>
    %40 = arith.mulf %36, %39 : vector<200x32xf32>
    %41 = arith.maximumf %20, %40 : vector<200x32xf32>
    %c2 = arith.constant 2 : index
    %c0_19 = arith.constant 0 : index
    %c0_20 = arith.constant 0 : index
    %42 = vector.load %arg1[%c2, %c0_19, %c0_20] : memref<4x200x9xbf16, #tpu.memory_space<vmem>>, vector<1x200x9xbf16>
    %43 = vector.shape_cast %42 : vector<1x200x9xbf16> to vector<200x9xbf16>
    %c0_21 = arith.constant 0 : index
    %c0_22 = arith.constant 0 : index
    %44 = vector.load %arg2[%c0_21, %c0_22] : memref<9x32xbf16, #tpu.memory_space<vmem>>, vector<9x32xbf16>
    %cst_23 = arith.constant dense<0.000000e+00> : vector<200x32xf32>
    %45 = tpu.matmul %43, %44, %cst_23 {dimension_numbers = #tpu.dot_dimension_numbers<[1], [0], [0], [1], [0, 0, 1, 1], [], []>} : vector<200x9xbf16>, vector<9x32xbf16>, vector<200x32xf32> -> vector<200x32xf32>
    %46 = vector.broadcast %0 : vector<1x32xf32> to vector<200x32xf32>
    %47 = arith.addf %45, %46 : vector<200x32xf32>
    %cst_24 = arith.constant 0.000000e+00 : f32
    %48 = vector.broadcast %cst_24 : f32 to vector<200x32xf32>
    %49 = arith.subf %48, %47 : vector<200x32xf32>
    %50 = math.exp %49 : vector<200x32xf32>
    %cst_25 = arith.constant 1.000000e+00 : f32
    %51 = vector.broadcast %cst_25 : f32 to vector<200x32xf32>
    %52 = arith.addf %51, %50 : vector<200x32xf32>
    %53 = tpu.reciprocal %52 {approx = true} : vector<200x32xf32> -> vector<200x32xf32>
    %cst_26 = arith.constant 2.000000e+00 : f32
    %54 = vector.broadcast %cst_26 : f32 to vector<200x32xf32>
    %55 = arith.addf %53, %54 : vector<200x32xf32>
    %56 = arith.mulf %53, %55 : vector<200x32xf32>
    %57 = arith.mulf %47, %56 : vector<200x32xf32>
    %cst_27 = arith.constant 2.000000e+00 : f32
    %58 = vector.broadcast %cst_27 : f32 to vector<200x32xf32>
    %59 = arith.addf %56, %58 : vector<200x32xf32>
    %60 = tpu.reciprocal %59 {approx = true} : vector<200x32xf32> -> vector<200x32xf32>
    %61 = arith.mulf %57, %60 : vector<200x32xf32>
    %62 = arith.maximumf %41, %61 : vector<200x32xf32>
    %c3 = arith.constant 3 : index
    %c0_28 = arith.constant 0 : index
    %c0_29 = arith.constant 0 : index
    %63 = vector.load %arg1[%c3, %c0_28, %c0_29] : memref<4x200x9xbf16, #tpu.memory_space<vmem>>, vector<1x200x9xbf16>
    %64 = vector.shape_cast %63 : vector<1x200x9xbf16> to vector<200x9xbf16>
    %c0_30 = arith.constant 0 : index
    %c0_31 = arith.constant 0 : index
    %65 = vector.load %arg2[%c0_30, %c0_31] : memref<9x32xbf16, #tpu.memory_space<vmem>>, vector<9x32xbf16>
    %cst_32 = arith.constant dense<0.000000e+00> : vector<200x32xf32>
    %66 = tpu.matmul %64, %65, %cst_32 {dimension_numbers = #tpu.dot_dimension_numbers<[1], [0], [0], [1], [0, 0, 1, 1], [], []>} : vector<200x9xbf16>, vector<9x32xbf16>, vector<200x32xf32> -> vector<200x32xf32>
    %67 = vector.broadcast %0 : vector<1x32xf32> to vector<200x32xf32>
    %68 = arith.addf %66, %67 : vector<200x32xf32>
    %cst_33 = arith.constant 0.000000e+00 : f32
    %69 = vector.broadcast %cst_33 : f32 to vector<200x32xf32>
    %70 = arith.subf %69, %68 : vector<200x32xf32>
    %71 = math.exp %70 : vector<200x32xf32>
    %cst_34 = arith.constant 1.000000e+00 : f32
    %72 = vector.broadcast %cst_34 : f32 to vector<200x32xf32>
    %73 = arith.addf %72, %71 : vector<200x32xf32>
    %74 = tpu.reciprocal %73 {approx = true} : vector<200x32xf32> -> vector<200x32xf32>
    %cst_35 = arith.constant 2.000000e+00 : f32
    %75 = vector.broadcast %cst_35 : f32 to vector<200x32xf32>
    %76 = arith.addf %74, %75 : vector<200x32xf32>
    %77 = arith.mulf %74, %76 : vector<200x32xf32>
    %78 = arith.mulf %68, %77 : vector<200x32xf32>
    %cst_36 = arith.constant 2.000000e+00 : f32
    %79 = vector.broadcast %cst_36 : f32 to vector<200x32xf32>
    %80 = arith.addf %77, %79 : vector<200x32xf32>
    %81 = tpu.reciprocal %80 {approx = true} : vector<200x32xf32> -> vector<200x32xf32>
    %82 = arith.mulf %78, %81 : vector<200x32xf32>
    %83 = arith.maximumf %62, %82 : vector<200x32xf32>
    %84 = arith.truncf %83 : vector<200x32xf32> to vector<200x32xbf16>
    %c0_37 = arith.constant 0 : index
    %c0_38 = arith.constant 0 : index
    %85 = vector.load %arg4[%c0_37, %c0_38] : memref<200x32xbf16, #tpu.memory_space<vmem>>, vector<200x32xbf16>
    tpu.vector_store %arg4[%c0_37, %c0_38], %84 {strides = array<i32>} : memref<200x32xbf16, #tpu.memory_space<vmem>>, vector<200x32xbf16>,
    return
  }
  func.func @transform_0(%arg0: i32) -> (i32, i32, i32) {
    %c0_i32 = arith.constant 0 : i32
    %c0_i32_0 = arith.constant 0 : i32
    %c0_i32_1 = arith.constant 0 : i32
    return %c0_i32, %arg0, %c0_i32_0 : i32, i32, i32
  }
  func.func @transform_1(%arg0: i32) -> (i32, i32) {
    %c0_i32 = arith.constant 0 : i32
    %c0_i32_0 = arith.constant 0 : i32
    %c0_i32_1 = arith.constant 0 : i32
    return %c0_i32, %c0_i32_0 : i32, i32
  }
  func.func @transform_2(%arg0: i32) -> (i32, i32) {
    %c0_i32 = arith.constant 0 : i32
    %c0_i32_0 = arith.constant 0 : i32
    %c0_i32_1 = arith.constant 0 : i32
    return %c0_i32, %c0_i32_0 : i32, i32
  }
  func.func @transform_3(%arg0: i32) -> (i32, i32) {
    %c0_i32 = arith.constant 0 : i32
    %c0_i32_0 = arith.constant 0 : i32
    return %arg0, %c0_i32 : i32, i32
  }
}

module attributes {stable_mosaic.version = 11 : i64} {
  func.func @_conv_bn_smish_pool_kernel(%arg0: i32, %arg1: memref<4x56x288xbf16, #tpu.memory_space<vmem>>, %arg2: memref<288x64xbf16, #tpu.memory_space<vmem>>, %arg3: memref<1x64xf32, #tpu.memory_space<vmem>>, %arg4: memref<56x64xbf16, #tpu.memory_space<vmem>>) attributes {dimension_semantics = [#tpu.dimension_semantics<parallel>], iteration_bounds = array<i64: 2>, scalar_prefetch = 0 : i64, scratch_operands = 0 : i64, tpu.core_type = #tpu.core_type<tc>, window_params = [{transform_indices = @transform_0, window_bounds = array<i64: 4, 56, 288>}, {pipeline_mode = #tpu.pipeline_mode<synchronous>, transform_indices = @transform_1, window_bounds = array<i64: 288, 64>}, {pipeline_mode = #tpu.pipeline_mode<synchronous>, transform_indices = @transform_2, window_bounds = array<i64: 1, 64>}, {transform_indices = @transform_3, window_bounds = array<i64: 56, 64>}]} {
    %c0 = arith.constant 0 : index
    %c0_0 = arith.constant 0 : index
    %0 = vector.load %arg3[%c0, %c0_0] : memref<1x64xf32, #tpu.memory_space<vmem>>, vector<1x64xf32>
    %c0_1 = arith.constant 0 : index
    %c0_2 = arith.constant 0 : index
    %c0_3 = arith.constant 0 : index
    %1 = vector.load %arg1[%c0_1, %c0_2, %c0_3] : memref<4x56x288xbf16, #tpu.memory_space<vmem>>, vector<1x56x288xbf16>
    %2 = vector.shape_cast %1 : vector<1x56x288xbf16> to vector<56x288xbf16>
    %c0_4 = arith.constant 0 : index
    %c0_5 = arith.constant 0 : index
    %3 = vector.load %arg2[%c0_4, %c0_5] : memref<288x64xbf16, #tpu.memory_space<vmem>>, vector<288x64xbf16>
    %cst = arith.constant dense<0.000000e+00> : vector<56x64xf32>
    %4 = tpu.matmul %2, %3, %cst {dimension_numbers = #tpu.dot_dimension_numbers<[1], [0], [0], [1], [0, 0, 1, 1], [], []>} : vector<56x288xbf16>, vector<288x64xbf16>, vector<56x64xf32> -> vector<56x64xf32>
    %5 = vector.broadcast %0 : vector<1x64xf32> to vector<56x64xf32>
    %6 = arith.addf %4, %5 : vector<56x64xf32>
    %cst_6 = arith.constant 0.000000e+00 : f32
    %7 = vector.broadcast %cst_6 : f32 to vector<56x64xf32>
    %8 = arith.subf %7, %6 : vector<56x64xf32>
    %9 = math.exp %8 : vector<56x64xf32>
    %cst_7 = arith.constant 1.000000e+00 : f32
    %10 = vector.broadcast %cst_7 : f32 to vector<56x64xf32>
    %11 = arith.addf %10, %9 : vector<56x64xf32>
    %12 = tpu.reciprocal %11 {approx = true} : vector<56x64xf32> -> vector<56x64xf32>
    %cst_8 = arith.constant 2.000000e+00 : f32
    %13 = vector.broadcast %cst_8 : f32 to vector<56x64xf32>
    %14 = arith.addf %12, %13 : vector<56x64xf32>
    %15 = arith.mulf %12, %14 : vector<56x64xf32>
    %16 = arith.mulf %6, %15 : vector<56x64xf32>
    %cst_9 = arith.constant 2.000000e+00 : f32
    %17 = vector.broadcast %cst_9 : f32 to vector<56x64xf32>
    %18 = arith.addf %15, %17 : vector<56x64xf32>
    %19 = tpu.reciprocal %18 {approx = true} : vector<56x64xf32> -> vector<56x64xf32>
    %20 = arith.mulf %16, %19 : vector<56x64xf32>
    %c1 = arith.constant 1 : index
    %c0_10 = arith.constant 0 : index
    %c0_11 = arith.constant 0 : index
    %21 = vector.load %arg1[%c1, %c0_10, %c0_11] : memref<4x56x288xbf16, #tpu.memory_space<vmem>>, vector<1x56x288xbf16>
    %22 = vector.shape_cast %21 : vector<1x56x288xbf16> to vector<56x288xbf16>
    %c0_12 = arith.constant 0 : index
    %c0_13 = arith.constant 0 : index
    %23 = vector.load %arg2[%c0_12, %c0_13] : memref<288x64xbf16, #tpu.memory_space<vmem>>, vector<288x64xbf16>
    %cst_14 = arith.constant dense<0.000000e+00> : vector<56x64xf32>
    %24 = tpu.matmul %22, %23, %cst_14 {dimension_numbers = #tpu.dot_dimension_numbers<[1], [0], [0], [1], [0, 0, 1, 1], [], []>} : vector<56x288xbf16>, vector<288x64xbf16>, vector<56x64xf32> -> vector<56x64xf32>
    %25 = vector.broadcast %0 : vector<1x64xf32> to vector<56x64xf32>
    %26 = arith.addf %24, %25 : vector<56x64xf32>
    %cst_15 = arith.constant 0.000000e+00 : f32
    %27 = vector.broadcast %cst_15 : f32 to vector<56x64xf32>
    %28 = arith.subf %27, %26 : vector<56x64xf32>
    %29 = math.exp %28 : vector<56x64xf32>
    %cst_16 = arith.constant 1.000000e+00 : f32
    %30 = vector.broadcast %cst_16 : f32 to vector<56x64xf32>
    %31 = arith.addf %30, %29 : vector<56x64xf32>
    %32 = tpu.reciprocal %31 {approx = true} : vector<56x64xf32> -> vector<56x64xf32>
    %cst_17 = arith.constant 2.000000e+00 : f32
    %33 = vector.broadcast %cst_17 : f32 to vector<56x64xf32>
    %34 = arith.addf %32, %33 : vector<56x64xf32>
    %35 = arith.mulf %32, %34 : vector<56x64xf32>
    %36 = arith.mulf %26, %35 : vector<56x64xf32>
    %cst_18 = arith.constant 2.000000e+00 : f32
    %37 = vector.broadcast %cst_18 : f32 to vector<56x64xf32>
    %38 = arith.addf %35, %37 : vector<56x64xf32>
    %39 = tpu.reciprocal %38 {approx = true} : vector<56x64xf32> -> vector<56x64xf32>
    %40 = arith.mulf %36, %39 : vector<56x64xf32>
    %41 = arith.maximumf %20, %40 : vector<56x64xf32>
    %c2 = arith.constant 2 : index
    %c0_19 = arith.constant 0 : index
    %c0_20 = arith.constant 0 : index
    %42 = vector.load %arg1[%c2, %c0_19, %c0_20] : memref<4x56x288xbf16, #tpu.memory_space<vmem>>, vector<1x56x288xbf16>
    %43 = vector.shape_cast %42 : vector<1x56x288xbf16> to vector<56x288xbf16>
    %c0_21 = arith.constant 0 : index
    %c0_22 = arith.constant 0 : index
    %44 = vector.load %arg2[%c0_21, %c0_22] : memref<288x64xbf16, #tpu.memory_space<vmem>>, vector<288x64xbf16>
    %cst_23 = arith.constant dense<0.000000e+00> : vector<56x64xf32>
    %45 = tpu.matmul %43, %44, %cst_23 {dimension_numbers = #tpu.dot_dimension_numbers<[1], [0], [0], [1], [0, 0, 1, 1], [], []>} : vector<56x288xbf16>, vector<288x64xbf16>, vector<56x64xf32> -> vector<56x64xf32>
    %46 = vector.broadcast %0 : vector<1x64xf32> to vector<56x64xf32>
    %47 = arith.addf %45, %46 : vector<56x64xf32>
    %cst_24 = arith.constant 0.000000e+00 : f32
    %48 = vector.broadcast %cst_24 : f32 to vector<56x64xf32>
    %49 = arith.subf %48, %47 : vector<56x64xf32>
    %50 = math.exp %49 : vector<56x64xf32>
    %cst_25 = arith.constant 1.000000e+00 : f32
    %51 = vector.broadcast %cst_25 : f32 to vector<56x64xf32>
    %52 = arith.addf %51, %50 : vector<56x64xf32>
    %53 = tpu.reciprocal %52 {approx = true} : vector<56x64xf32> -> vector<56x64xf32>
    %cst_26 = arith.constant 2.000000e+00 : f32
    %54 = vector.broadcast %cst_26 : f32 to vector<56x64xf32>
    %55 = arith.addf %53, %54 : vector<56x64xf32>
    %56 = arith.mulf %53, %55 : vector<56x64xf32>
    %57 = arith.mulf %47, %56 : vector<56x64xf32>
    %cst_27 = arith.constant 2.000000e+00 : f32
    %58 = vector.broadcast %cst_27 : f32 to vector<56x64xf32>
    %59 = arith.addf %56, %58 : vector<56x64xf32>
    %60 = tpu.reciprocal %59 {approx = true} : vector<56x64xf32> -> vector<56x64xf32>
    %61 = arith.mulf %57, %60 : vector<56x64xf32>
    %62 = arith.maximumf %41, %61 : vector<56x64xf32>
    %c3 = arith.constant 3 : index
    %c0_28 = arith.constant 0 : index
    %c0_29 = arith.constant 0 : index
    %63 = vector.load %arg1[%c3, %c0_28, %c0_29] : memref<4x56x288xbf16, #tpu.memory_space<vmem>>, vector<1x56x288xbf16>
    %64 = vector.shape_cast %63 : vector<1x56x288xbf16> to vector<56x288xbf16>
    %c0_30 = arith.constant 0 : index
    %c0_31 = arith.constant 0 : index
    %65 = vector.load %arg2[%c0_30, %c0_31] : memref<288x64xbf16, #tpu.memory_space<vmem>>, vector<288x64xbf16>
    %cst_32 = arith.constant dense<0.000000e+00> : vector<56x64xf32>
    %66 = tpu.matmul %64, %65, %cst_32 {dimension_numbers = #tpu.dot_dimension_numbers<[1], [0], [0], [1], [0, 0, 1, 1], [], []>} : vector<56x288xbf16>, vector<288x64xbf16>, vector<56x64xf32> -> vector<56x64xf32>
    %67 = vector.broadcast %0 : vector<1x64xf32> to vector<56x64xf32>
    %68 = arith.addf %66, %67 : vector<56x64xf32>
    %cst_33 = arith.constant 0.000000e+00 : f32
    %69 = vector.broadcast %cst_33 : f32 to vector<56x64xf32>
    %70 = arith.subf %69, %68 : vector<56x64xf32>
    %71 = math.exp %70 : vector<56x64xf32>
    %cst_34 = arith.constant 1.000000e+00 : f32
    %72 = vector.broadcast %cst_34 : f32 to vector<56x64xf32>
    %73 = arith.addf %72, %71 : vector<56x64xf32>
    %74 = tpu.reciprocal %73 {approx = true} : vector<56x64xf32> -> vector<56x64xf32>
    %cst_35 = arith.constant 2.000000e+00 : f32
    %75 = vector.broadcast %cst_35 : f32 to vector<56x64xf32>
    %76 = arith.addf %74, %75 : vector<56x64xf32>
    %77 = arith.mulf %74, %76 : vector<56x64xf32>
    %78 = arith.mulf %68, %77 : vector<56x64xf32>
    %cst_36 = arith.constant 2.000000e+00 : f32
    %79 = vector.broadcast %cst_36 : f32 to vector<56x64xf32>
    %80 = arith.addf %77, %79 : vector<56x64xf32>
    %81 = tpu.reciprocal %80 {approx = true} : vector<56x64xf32> -> vector<56x64xf32>
    %82 = arith.mulf %78, %81 : vector<56x64xf32>
    %83 = arith.maximumf %62, %82 : vector<56x64xf32>
    %84 = arith.truncf %83 : vector<56x64xf32> to vector<56x64xbf16>
    %c0_37 = arith.constant 0 : index
    %c0_38 = arith.constant 0 : index
    %85 = vector.load %arg4[%c0_37, %c0_38] : memref<56x64xbf16, #tpu.memory_space<vmem>>, vector<56x64xbf16>
    tpu.vector_store %arg4[%c0_37, %c0_38], %84 {strides = array<i32>} : memref<56x64xbf16, #tpu.memory_space<vmem>>, vector<56x64xbf16>,
    return
  }
  func.func @transform_0(%arg0: i32) -> (i32, i32, i32) {
    %c0_i32 = arith.constant 0 : i32
    %c0_i32_0 = arith.constant 0 : i32
    %c0_i32_1 = arith.constant 0 : i32
    return %c0_i32, %arg0, %c0_i32_0 : i32, i32, i32
  }
  func.func @transform_1(%arg0: i32) -> (i32, i32) {
    %c0_i32 = arith.constant 0 : i32
    %c0_i32_0 = arith.constant 0 : i32
    %c0_i32_1 = arith.constant 0 : i32
    return %c0_i32, %c0_i32_0 : i32, i32
  }
  func.func @transform_2(%arg0: i32) -> (i32, i32) {
    %c0_i32 = arith.constant 0 : i32
    %c0_i32_0 = arith.constant 0 : i32
    %c0_i32_1 = arith.constant 0 : i32
    return %c0_i32, %c0_i32_0 : i32, i32
  }
  func.func @transform_3(%arg0: i32) -> (i32, i32) {
    %c0_i32 = arith.constant 0 : i32
    %c0_i32_0 = arith.constant 0 : i32
    return %arg0, %c0_i32 : i32, i32
  }
}

module attributes {stable_mosaic.version = 11 : i64} {
  func.func @_matmul_bn_smish_kernel(%arg0: i32, %arg1: memref<56x576xbf16, #tpu.memory_space<vmem>>, %arg2: memref<576x128xbf16, #tpu.memory_space<vmem>>, %arg3: memref<1x128xf32, #tpu.memory_space<vmem>>, %arg4: memref<56x128xbf16, #tpu.memory_space<vmem>>) attributes {dimension_semantics = [#tpu.dimension_semantics<parallel>], iteration_bounds = array<i64: 2>, scalar_prefetch = 0 : i64, scratch_operands = 0 : i64, tpu.core_type = #tpu.core_type<tc>, window_params = [{transform_indices = @transform_0, window_bounds = array<i64: 56, 576>}, {pipeline_mode = #tpu.pipeline_mode<synchronous>, transform_indices = @transform_1, window_bounds = array<i64: 576, 128>}, {pipeline_mode = #tpu.pipeline_mode<synchronous>, transform_indices = @transform_2, window_bounds = array<i64: 1, 128>}, {transform_indices = @transform_3, window_bounds = array<i64: 56, 128>}]} {
    %c0 = arith.constant 0 : index
    %c0_0 = arith.constant 0 : index
    %0 = vector.load %arg1[%c0, %c0_0] : memref<56x576xbf16, #tpu.memory_space<vmem>>, vector<56x576xbf16>
    %c0_1 = arith.constant 0 : index
    %c0_2 = arith.constant 0 : index
    %1 = vector.load %arg2[%c0_1, %c0_2] : memref<576x128xbf16, #tpu.memory_space<vmem>>, vector<576x128xbf16>
    %cst = arith.constant dense<0.000000e+00> : vector<56x128xf32>
    %2 = tpu.matmul %0, %1, %cst {dimension_numbers = #tpu.dot_dimension_numbers<[1], [0], [0], [1], [0, 0, 1, 1], [], []>} : vector<56x576xbf16>, vector<576x128xbf16>, vector<56x128xf32> -> vector<56x128xf32>
    %c0_3 = arith.constant 0 : index
    %c0_4 = arith.constant 0 : index
    %3 = vector.load %arg3[%c0_3, %c0_4] : memref<1x128xf32, #tpu.memory_space<vmem>>, vector<1x128xf32>
    %4 = vector.broadcast %3 : vector<1x128xf32> to vector<56x128xf32>
    %5 = arith.addf %2, %4 : vector<56x128xf32>
    %cst_5 = arith.constant 0.000000e+00 : f32
    %6 = vector.broadcast %cst_5 : f32 to vector<56x128xf32>
    %7 = arith.subf %6, %5 : vector<56x128xf32>
    %8 = math.exp %7 : vector<56x128xf32>
    %cst_6 = arith.constant 1.000000e+00 : f32
    %9 = vector.broadcast %cst_6 : f32 to vector<56x128xf32>
    %10 = arith.addf %9, %8 : vector<56x128xf32>
    %11 = tpu.reciprocal %10 {approx = true} : vector<56x128xf32> -> vector<56x128xf32>
    %cst_7 = arith.constant 2.000000e+00 : f32
    %12 = vector.broadcast %cst_7 : f32 to vector<56x128xf32>
    %13 = arith.addf %11, %12 : vector<56x128xf32>
    %14 = arith.mulf %11, %13 : vector<56x128xf32>
    %15 = arith.mulf %5, %14 : vector<56x128xf32>
    %cst_8 = arith.constant 2.000000e+00 : f32
    %16 = vector.broadcast %cst_8 : f32 to vector<56x128xf32>
    %17 = arith.addf %14, %16 : vector<56x128xf32>
    %18 = tpu.reciprocal %17 {approx = true} : vector<56x128xf32> -> vector<56x128xf32>
    %19 = arith.mulf %15, %18 : vector<56x128xf32>
    %20 = arith.truncf %19 : vector<56x128xf32> to vector<56x128xbf16>
    %c0_9 = arith.constant 0 : index
    %c0_10 = arith.constant 0 : index
    %21 = vector.load %arg4[%c0_9, %c0_10] : memref<56x128xbf16, #tpu.memory_space<vmem>>, vector<56x128xbf16>
    tpu.vector_store %arg4[%c0_9, %c0_10], %20 {strides = array<i32>} : memref<56x128xbf16, #tpu.memory_space<vmem>>, vector<56x128xbf16>,
    return
  }
  func.func @transform_0(%arg0: i32) -> (i32, i32) {
    %c0_i32 = arith.constant 0 : i32
    %c0_i32_0 = arith.constant 0 : i32
    return %arg0, %c0_i32 : i32, i32
  }
  func.func @transform_1(%arg0: i32) -> (i32, i32) {
    %c0_i32 = arith.constant 0 : i32
    %c0_i32_0 = arith.constant 0 : i32
    %c0_i32_1 = arith.constant 0 : i32
    return %c0_i32, %c0_i32_0 : i32, i32
  }
  func.func @transform_2(%arg0: i32) -> (i32, i32) {
    %c0_i32 = arith.constant 0 : i32
    %c0_i32_0 = arith.constant 0 : i32
    %c0_i32_1 = arith.constant 0 : i32
    return %c0_i32, %c0_i32_0 : i32, i32
  }
  func.func @transform_3(%arg0: i32) -> (i32, i32) {
    %c0_i32 = arith.constant 0 : i32
    %c0_i32_0 = arith.constant 0 : i32
    return %arg0, %c0_i32 : i32, i32
  }
}

module attributes {stable_mosaic.version = 11 : i64} {
  func.func @_head_kernel(%arg0: i32, %arg1: memref<2x6272xbf16, #tpu.memory_space<vmem>>, %arg2: memref<6272x256xbf16, #tpu.memory_space<vmem>>, %arg3: memref<1x256xf32, #tpu.memory_space<vmem>>, %arg4: memref<256x10xbf16, #tpu.memory_space<vmem>>, %arg5: memref<1x10xf32, #tpu.memory_space<vmem>>, %arg6: memref<2x10xf32, #tpu.memory_space<vmem>>) attributes {dimension_semantics = [#tpu.dimension_semantics<parallel>], iteration_bounds = array<i64: 1>, scalar_prefetch = 0 : i64, scratch_operands = 0 : i64, tpu.core_type = #tpu.core_type<tc>, window_params = [{transform_indices = @transform_0, window_bounds = array<i64: 2, 6272>}, {pipeline_mode = #tpu.pipeline_mode<synchronous>, transform_indices = @transform_1, window_bounds = array<i64: 6272, 256>}, {pipeline_mode = #tpu.pipeline_mode<synchronous>, transform_indices = @transform_2, window_bounds = array<i64: 1, 256>}, {pipeline_mode = #tpu.pipeline_mode<synchronous>, transform_indices = @transform_3, window_bounds = array<i64: 256, 10>}, {pipeline_mode = #tpu.pipeline_mode<synchronous>, transform_indices = @transform_4, window_bounds = array<i64: 1, 10>}, {transform_indices = @transform_5, window_bounds = array<i64: 2, 10>}]} {
    %c0 = arith.constant 0 : index
    %c0_0 = arith.constant 0 : index
    %0 = vector.load %arg1[%c0, %c0_0] : memref<2x6272xbf16, #tpu.memory_space<vmem>>, vector<2x6272xbf16>
    %c0_1 = arith.constant 0 : index
    %c0_2 = arith.constant 0 : index
    %1 = vector.load %arg2[%c0_1, %c0_2] : memref<6272x256xbf16, #tpu.memory_space<vmem>>, vector<6272x256xbf16>
    %cst = arith.constant dense<0.000000e+00> : vector<2x256xf32>
    %2 = tpu.matmul %0, %1, %cst {dimension_numbers = #tpu.dot_dimension_numbers<[1], [0], [0], [1], [0, 0, 1, 1], [], []>} : vector<2x6272xbf16>, vector<6272x256xbf16>, vector<2x256xf32> -> vector<2x256xf32>
    %c0_3 = arith.constant 0 : index
    %c0_4 = arith.constant 0 : index
    %3 = vector.load %arg3[%c0_3, %c0_4] : memref<1x256xf32, #tpu.memory_space<vmem>>, vector<1x256xf32>
    %4 = vector.broadcast %3 : vector<1x256xf32> to vector<2x256xf32>
    %5 = arith.addf %2, %4 : vector<2x256xf32>
    %cst_5 = arith.constant 0.000000e+00 : f32
    %6 = vector.broadcast %cst_5 : f32 to vector<2x256xf32>
    %7 = arith.subf %6, %5 : vector<2x256xf32>
    %8 = math.exp %7 : vector<2x256xf32>
    %cst_6 = arith.constant 1.000000e+00 : f32
    %9 = vector.broadcast %cst_6 : f32 to vector<2x256xf32>
    %10 = arith.addf %9, %8 : vector<2x256xf32>
    %11 = tpu.reciprocal %10 {approx = true} : vector<2x256xf32> -> vector<2x256xf32>
    %cst_7 = arith.constant 2.000000e+00 : f32
    %12 = vector.broadcast %cst_7 : f32 to vector<2x256xf32>
    %13 = arith.addf %11, %12 : vector<2x256xf32>
    %14 = arith.mulf %11, %13 : vector<2x256xf32>
    %15 = arith.mulf %5, %14 : vector<2x256xf32>
    %cst_8 = arith.constant 2.000000e+00 : f32
    %16 = vector.broadcast %cst_8 : f32 to vector<2x256xf32>
    %17 = arith.addf %14, %16 : vector<2x256xf32>
    %18 = tpu.reciprocal %17 {approx = true} : vector<2x256xf32> -> vector<2x256xf32>
    %19 = arith.mulf %15, %18 : vector<2x256xf32>
    %20 = arith.truncf %19 : vector<2x256xf32> to vector<2x256xbf16>
    %c0_9 = arith.constant 0 : index
    %c0_10 = arith.constant 0 : index
    %21 = vector.load %arg4[%c0_9, %c0_10] : memref<256x10xbf16, #tpu.memory_space<vmem>>, vector<256x10xbf16>
    %cst_11 = arith.constant dense<0.000000e+00> : vector<2x10xf32>
    %22 = tpu.matmul %20, %21, %cst_11 {dimension_numbers = #tpu.dot_dimension_numbers<[1], [0], [0], [1], [0, 0, 1, 1], [], []>} : vector<2x256xbf16>, vector<256x10xbf16>, vector<2x10xf32> -> vector<2x10xf32>
    %c0_12 = arith.constant 0 : index
    %c0_13 = arith.constant 0 : index
    %23 = vector.load %arg5[%c0_12, %c0_13] : memref<1x10xf32, #tpu.memory_space<vmem>>, vector<1x10xf32>
    %24 = vector.broadcast %23 : vector<1x10xf32> to vector<2x10xf32>
    %25 = arith.addf %22, %24 : vector<2x10xf32>
    %cst_14 = arith.constant dense<0xFF800000> : vector<2xf32>
    %26 = vector.multi_reduction <maximumf>, %25, %cst_14 [1] : vector<2x10xf32> to vector<2xf32>
    %27 = vector.shape_cast %26 : vector<2xf32> to vector<2x1xf32>
    %28 = vector.broadcast %27 : vector<2x1xf32> to vector<2x10xf32>
    %29 = arith.subf %25, %28 : vector<2x10xf32>
    %30 = math.exp %29 : vector<2x10xf32>
    %cst_15 = arith.constant dense<0.000000e+00> : vector<2xf32>
    %31 = vector.multi_reduction <add>, %30, %cst_15 [1] : vector<2x10xf32> to vector<2xf32>
    %32 = vector.shape_cast %31 : vector<2xf32> to vector<2x1xf32>
    %33 = math.log %32 : vector<2x1xf32>
    %34 = vector.broadcast %33 : vector<2x1xf32> to vector<2x10xf32>
    %35 = arith.subf %29, %34 : vector<2x10xf32>
    %c0_16 = arith.constant 0 : index
    %c0_17 = arith.constant 0 : index
    %36 = vector.load %arg6[%c0_16, %c0_17] : memref<2x10xf32, #tpu.memory_space<vmem>>, vector<2x10xf32>
    tpu.vector_store %arg6[%c0_16, %c0_17], %35 {strides = array<i32>} : memref<2x10xf32, #tpu.memory_space<vmem>>, vector<2x10xf32>,
    return
  }
  func.func @transform_0(%arg0: i32) -> (i32, i32) {
    %c0_i32 = arith.constant 0 : i32
    %c0_i32_0 = arith.constant 0 : i32
    return %arg0, %c0_i32 : i32, i32
  }
  func.func @transform_1(%arg0: i32) -> (i32, i32) {
    %c0_i32 = arith.constant 0 : i32
    %c0_i32_0 = arith.constant 0 : i32
    %c0_i32_1 = arith.constant 0 : i32
    return %c0_i32, %c0_i32_0 : i32, i32
  }
  func.func @transform_2(%arg0: i32) -> (i32, i32) {
    %c0_i32 = arith.constant 0 : i32
    %c0_i32_0 = arith.constant 0 : i32
    %c0_i32_1 = arith.constant 0 : i32
    return %c0_i32, %c0_i32_0 : i32, i32
  }
  func.func @transform_3(%arg0: i32) -> (i32, i32) {
    %c0_i32 = arith.constant 0 : i32
    %c0_i32_0 = arith.constant 0 : i32
    %c0_i32_1 = arith.constant 0 : i32
    return %c0_i32, %c0_i32_0 : i32, i32
  }
  func.func @transform_4(%arg0: i32) -> (i32, i32) {
    %c0_i32 = arith.constant 0 : i32
    %c0_i32_0 = arith.constant 0 : i32
    %c0_i32_1 = arith.constant 0 : i32
    return %c0_i32, %c0_i32_0 : i32, i32
  }
  func.func @transform_5(%arg0: i32) -> (i32, i32) {
    %c0_i32 = arith.constant 0 : i32
    %c0_i32_0 = arith.constant 0 : i32
    return %arg0, %c0_i32 : i32, i32
  }
}

</mosaic_0001>

<bundles_post_ra>
// kernel: cnn_forward.4
= control target key start
LH: loop header
LB: loop body
LE: loop exit
PB: predicated region body
PF: predicated region fallthrough
CT: control target
= control target key end

     0   :  { %8 = vsyncpa [#allocation4], 0  ;;  %s5468_s0 = inlined_call_operand.vmem [shape: bf16[4,392,9], index: 0, kind: input, shape index: {}]   ;;  %s5469_s1 = inlined_call_operand.hbm [shape: bf16[9,32], index: 1, kind: input, shape index: {}]   ;;  %s5470_s2 = inlined_call_operand.hbm [shape: f32[1,32], index: 2, kind: input, shape index: {}]   ;;  %s5471_s3 = inlined_call_operand.vmem [shape: bf16[392,32], index: 3, kind: output, shape index: {}]  }
   0x1   :  { %9 = vsyncpa [#allocation6], 0  ;;  %s4388_s12 = smov 0   ;;  %s4390_s13 = smov 0  }
   0x2   :  { %s4392_s14 = smov 0  }
   0x3 LB: > { %s4404_s15 = sadd.s32 4294967295, %s4297_s14   ;;  %s4407_s16 = sadd.s32 1, %s4297_s14   ;;  %s4297_s14 = sphi %s4392_s14, %s5489_s14   ;;  %s4293_s13 = sphi %s4390_s13, %s5488_s13   ;;  %s4289_s12 = sphi %s4388_s12, %s5487_s12  }
   0x4   : > { %s19_s17 = ssub.s32 %s4297_s14, %s4407_s16  ;;  %s22_s18 = sadd.s32 1, %s4293_s13 }
   0x5   : > { %p20_p0 = scmp.eq.s32.totalorder %s19_s17, 0  ;;  %p29_p1 = scmp.ne.s32.totalorder %s4293_s13, %s4289_s12 }
   0x6   : > { %p30_p2 = scmp.eq.s32.totalorder %s4297_s14, 0  ;;  %p101_p3 = scmp.eq.s32.totalorder %s4404_s15, 1 }
   0x7   : > { %s4417_s19 = scalar_select %p20_p0, %s4293_s13, %s22_s18  }
   0x8   : > { %p4419_p4 = por %p30_p2, %p29_p1  ;;  %p4423_p5 = por %p101_p3, %p29_p1 }
   0x9   : > { %p2945_p6 = scmp.ge.s32.totalorder %s4297_s14, 1  ;;  %p114_p7 = scmp.lt.s32.totalorder %s4297_s14, 3 }
   0xa   : > { %p3371_p8 = scmp.eq.s32.totalorder %s4404_s15, 0  ;;  %s125_s25 = sshll.u32 %s5469_s1, 4  ;;  %s126_s25 = int_to_ptr.hbm [resolvable:$true] %s125_s25 }
   0xb   : > { %p4430_p9 = pnand %p2945_p6, %p114_p7  ;;  %s4363_s26 = smov [#allocation3]  }
   0xc   : > { %s127_s27 = sshll.u32 %s4363_s26, 4  ;;  %s140_s30 = sshll.u32 %s5470_s2, 4  ;;  %s128_s27 = int_to_ptr.vmem [resolvable:$true] %s127_s27  ;;  %s141_s30 = int_to_ptr.hbm [resolvable:$true] %s140_s30 }
   0xd   : > { %p3364_p10 = pneg %p4430_p9  ;;  %s4364_s4 = smov 64  }
   0xe   : > { %s4365_s5 = smov 4   ;;  %s4366_s6 = smov [#allocation5]  }
   0xf   : > { %p3365_p11 = pnand %p3371_p8, %p3364_p10  ;;  %s142_s7 = sshll.u32 %s4366_s6, 4  ;;  %s143_s7 = int_to_ptr.vmem [resolvable:$true] %s142_s7 }
  0x10   : > { %p2948_p12 = scmp.ge.s32.totalorder %s4297_s14, 2 }
  0x11   : > { %3367 = dma.hbm_to_vmem [thread:$0]  (!%p3365_p11), %s126_s25, 128, %s128_s27, [#allocation4], %s4364_s4, %s4364_s4, %s4365_s5  }
  0x12   : > { %3370 = dma.hbm_to_vmem [thread:$0]  (!%p3365_p11), %s141_s30, 16, %s143_s7, [#allocation6]  }
  0x13   : > { %149 = sbr.rel (%p2948_p12) target bundleno = 95 (0x5f), region = 24 }
  0x18   : > { %152 = sbr.rel (!%p4419_p4) target bundleno = 95 (0x5f), region = 28  ;;  %s154_s8 = sand.u32 (%p4419_p4), 1, %s4293_s13  }
  0x19   : > { %s157_s9 = smul.u32 (%p4419_p4), 25, %s4297_s14 }
  0x1a   : > { %s3353_s10 = smul.u32 (%p4419_p4), 400, %s154_s8 }
  0x1b   : > { %s158_s11 = ssub.s32 (%p4419_p4), 49, %s157_s9  ;;  %s3300_s17 = smul.u32 (%p4419_p4), 100, %s4297_s14 }
  0x1c   : > { %p159_p13 = scmp.lt.s32.totalorder (%p4419_p4), %s158_s11, 25  ;;  %s4458_s20 = scalar_lea.vmem (%p4419_p4), [#allocation2], %s3353_s10  }
  0x1d   : > { %s4453_s24 = scalar_lea.vmem %s5468_s0, %s3300_s17  }
  0x1e   : > { %s5491_s11 = smov (!%p159_p13, %s158_s11), 25 }
  0x1f   : > { %s2949_s25 = sshll.u32 %s5491_s11, 4 }
  0x20   : > { %p2952_p0 = scmp.eq.s32.totalorder %s2949_s25, 0 }
  0x21   : > { %s4461_s26 = sshrl.u32 (!%p2952_p0), %s5491_s11, 3 }
  0x22   : > { %167 = sbr.rel (%p2952_p0) target bundleno = 95 (0x5f), region = 32  ;;  %p2953_p1 = scmp.le.s32.totalorder (!%p2952_p0), %s4461_s26, 0 }
  0x27   : > { %2854 = sbr.rel (%p2953_p1) target bundleno = 77 (0x4d), region = 205  ;;  %s5475_s14 = smov (!%p2953_p1), %s4458_s20 }
  0x28   : > { %s5476_s27 = smov (!%p2953_p1), %s4453_s24  ;;  %s4470_s28 = smov (!%p2953_p1), 0  }
  0x29   : > { %s4472_s29 = smov (!%p2953_p1), 0  }
  0x2c LB: >> { %v184_v0 = vld [vmem:[%s4305_s27] sm:$0xf]  ;;  %v186_v1 = vld [vmem:[%s4305_s27 + $0x4] sm:$0xf]  ;;  %v188_v2 = vld [vmem:[%s4305_s27 + $0x8] sm:$0xf]  ;;  %s4313_s29 = sphi %s4472_s29, %s178_s29   ;;  %s4309_s28 = sphi %s4470_s28, %s5479_s28   ;;  %s4305_s27 = sphi %s5476_s27, %s5478_s27   ;;  %s4301_s14 = sphi %s5475_s14, %s5477_s14  }
  0x2d   : >> { %185 = vst [vmem:[%s4301_s14] sm:$0xf] %v184_v0  ;;  %v190_v3 = vld [vmem:[%s4305_s27 + $0xc] sm:$0xf]  ;;  %v192_v4 = vld [vmem:[%s4305_s27 + $0x10] sm:$0xf]  ;;  %s248_s30 = sadd.s32 1, %s4309_s28 }
  0x2e   : >> { %187 = vst [vmem:[%s4301_s14 + $0x4] sm:$0xf] %v186_v1  ;;  %v194_v5 = vld [vmem:[%s4305_s27 + $0x14] sm:$0xf]  ;;  %v196_v6 = vld [vmem:[%s4305_s27 + $0x18] sm:$0xf]  ;;  %p249_p2 = scmp.ge.s32.totalorder %s248_s30, %s4461_s26 }
  0x2f   : >> { %189 = vst [vmem:[%s4301_s14 + $0x8] sm:$0xf] %v188_v2  ;;  %v198_v7 = vld [vmem:[%s4305_s27 + $0x1c] sm:$0xf]  ;;  %v200_v8 = vld [vmem:[%s4305_s27 + $0xc4] sm:$0xf] }
  0x30   : >> { %191 = vst [vmem:[%s4301_s14 + $0xc] sm:$0xf] %v190_v3  ;;  %v202_v9 = vld [vmem:[%s4305_s27 + $0xc8] sm:$0xf]  ;;  %v204_v10 = vld [vmem:[%s4305_s27 + $0xcc] sm:$0xf] }
  0x31   : >> { %193 = vst [vmem:[%s4301_s14 + $0x10] sm:$0xf] %v192_v4  ;;  %v206_v11 = vld [vmem:[%s4305_s27 + $0xd0] sm:$0xf]  ;;  %v208_v12 = vld [vmem:[%s4305_s27 + $0xd4] sm:$0xf] }
  0x32   : >> { %195 = vst [vmem:[%s4301_s14 + $0x14] sm:$0xf] %v194_v5  ;;  %v210_v13 = vld [vmem:[%s4305_s27 + $0xd8] sm:$0xf]  ;;  %v212_v14 = vld [vmem:[%s4305_s27 + $0xdc] sm:$0xf] }
  0x33   : >> { %197 = vst [vmem:[%s4301_s14 + $0x18] sm:$0xf] %v196_v6  ;;  %v214_v15 = vld [vmem:[%s4305_s27 + $0xe0] sm:$0xf]  ;;  %v216_v16 = vld [vmem:[%s4305_s27 + $0x188] sm:$0xf] }
  0x34   : >> { %199 = vst [vmem:[%s4301_s14 + $0x1c] sm:$0xf] %v198_v7  ;;  %v218_v17 = vld [vmem:[%s4305_s27 + $0x18c] sm:$0xf]  ;;  %s5493_s30 = smov (%p249_p2, %s248_s30), 0  ;;  %s178_s29 = sadd.s32 1, %s4313_s29  }
  0x35   : >> { %201 = vst [vmem:[%s4301_s14 + $0x64] sm:$0xf] %v200_v8  ;;  %v220_v18 = vld [vmem:[%s4305_s27 + $0x190] sm:$0xf]  ;;  %v222_v19 = vld [vmem:[%s4305_s27 + $0x194] sm:$0xf]  ;;  %p177_p3 = scmp.ge.s32.totalorder %s178_s29, %s4461_s26  ;;  %s5479_s28 = smov %s5493_s30 }
  0x36   : >> { %203 = vst [vmem:[%s4301_s14 + $0x68] sm:$0xf] %v202_v9  ;;  %s2954_s4 = sshll.u32 %s5493_s30, 5  ;;  %v224_v20 = vld [vmem:[%s4305_s27 + $0x198] sm:$0xf] }
  0x37   : >> { %205 = vst [vmem:[%s4301_s14 + $0x6c] sm:$0xf] %v204_v10  ;;  %s4531_s5 = scalar_lea.vmem %s4453_s24, %s2954_s4   ;;  %s254_s6 = scalar_lea.vmem %s4458_s20, %s2954_s4 [#allocation2]   ;;  %v226_v21 = vld [vmem:[%s4305_s27 + $0x19c] sm:$0xf]  ;;  %v228_v22 = vld [vmem:[%s4305_s27 + $0x1a0] sm:$0xf] }
  0x38   : >> { %207 = vst [vmem:[%s4301_s14 + $0x70] sm:$0xf] %v206_v11  ;;  %v230_v23 = vld [vmem:[%s4305_s27 + $0x1a4] sm:$0xf]  ;;  %v232_v24 = vld [vmem:[%s4305_s27 + $0x24c] sm:$0xf] }
  0x39   : >> { %209 = vst [vmem:[%s4301_s14 + $0x74] sm:$0xf] %v208_v12  ;;  %v234_v25 = vld [vmem:[%s4305_s27 + $0x250] sm:$0xf]  ;;  %v236_v26 = vld [vmem:[%s4305_s27 + $0x254] sm:$0xf] }
  0x3a   : >> { %211 = vst [vmem:[%s4301_s14 + $0x78] sm:$0xf] %v210_v13  ;;  %v238_v27 = vld [vmem:[%s4305_s27 + $0x258] sm:$0xf]  ;;  %v240_v28 = vld [vmem:[%s4305_s27 + $0x25c] sm:$0xf] }
  0x3b   : >> { %213 = vst [vmem:[%s4301_s14 + $0x7c] sm:$0xf] %v212_v14  ;;  %v242_v29 = vld [vmem:[%s4305_s27 + $0x260] sm:$0xf]  ;;  %v244_v30 = vld [vmem:[%s4305_s27 + $0x264] sm:$0xf] }
  0x3c   : >> { %215 = vst [vmem:[%s4301_s14 + $0x80] sm:$0xf] %v214_v15  ;;  %v246_v31 = vld [vmem:[%s4305_s27 + $0x268] sm:$0xf]  ;;  %s5478_s27 = smov %s4531_s5 }
  0x3d   : >> { %217 = vst [vmem:[%s4301_s14 + $0xc8] sm:$0xf] %v216_v16 }
  0x3e   : >> { %219 = vst [vmem:[%s4301_s14 + $0xcc] sm:$0xf] %v218_v17 }
  0x3f   : >> { %221 = vst [vmem:[%s4301_s14 + $0xd0] sm:$0xf] %v220_v18 }
  0x40   : >> { %223 = vst [vmem:[%s4301_s14 + $0xd4] sm:$0xf] %v222_v19 }
  0x41   : >> { %225 = vst [vmem:[%s4301_s14 + $0xd8] sm:$0xf] %v224_v20 }
  0x42   : >> { %227 = vst [vmem:[%s4301_s14 + $0xdc] sm:$0xf] %v226_v21 }
  0x43   : >> { %229 = vst [vmem:[%s4301_s14 + $0xe0] sm:$0xf] %v228_v22 }
  0x44   : >> { %231 = vst [vmem:[%s4301_s14 + $0xe4] sm:$0xf] %v230_v23 }
  0x45   : >> { %233 = vst [vmem:[%s4301_s14 + $0x12c] sm:$0xf] %v232_v24 }
  0x46   : >> { %235 = vst [vmem:[%s4301_s14 + $0x130] sm:$0xf] %v234_v25 }
  0x47   : >> { %237 = vst [vmem:[%s4301_s14 + $0x134] sm:$0xf] %v236_v26 }
  0x48   : >> { %239 = vst [vmem:[%s4301_s14 + $0x138] sm:$0xf] %v238_v27  ;;  %180 = sbr.rel (!%p177_p3) target bundleno = 44 (0x2c), region = 211 }
  0x49   : >> { %241 = vst [vmem:[%s4301_s14 + $0x13c] sm:$0xf] %v240_v28 }
  0x4a   : >> { %243 = vst [vmem:[%s4301_s14 + $0x140] sm:$0xf] %v242_v29 }
  0x4b   : >> { %245 = vst [vmem:[%s4301_s14 + $0x144] sm:$0xf] %v244_v30 }
  0x4c   : >> { %247 = vst [vmem:[%s4301_s14 + $0x148] sm:$0xf] %v246_v31  ;;  %s5477_s14 = smov %s254_s6 }
  0x4d PF: > { %s4572_s7 = sand.u32 7, %s5491_s11   ;;  %s3301_s8 = sshll.u32 %s4461_s26, 5 }
  0x4e   : > { %s4576_s9 = scalar_lea.vmem %s4453_s24, %s3301_s8   ;;  %s4579_s10 = scalar_lea.vmem %s4458_s20, %s3301_s8 [#allocation2]  }
  0x4f   : > { %p2959_p4 = scmp.le.s32.totalorder %s4572_s7, 0 }
  0x50   : > { %s5480_s17 = smov (!%p2959_p4), %s4579_s10  ;;  %s5481_s18 = smov (!%p2959_p4), %s4576_s9 }
  0x51   : > { %2868 = sbr.rel (%p2959_p4) target bundleno = 95 (0x5f), region = 216  ;;  %s4323_s23 = smov (!%p2959_p4), 0  }
  0x52   : > { %s4327_s25 = smov (!%p2959_p4), 0  }
  0x56 LB: >> { %v271_v32 = vld [vmem:[%s4321_s18] sm:$0xf]  ;;  %v273_v33 = vld [vmem:[%s4321_s18 + $0xc4] sm:$0xf]  ;;  %v275_v34 = vld [vmem:[%s4321_s18 + $0x188] sm:$0xf]  ;;  %s4329_s25 = sphi %s4327_s25, %s265_s25   ;;  %s4325_s23 = sphi %s4323_s23, %s4324_s23   ;;  %s4321_s18 = sphi %s5481_s18, %s284_s18   ;;  %s4317_s17 = sphi %s5480_s17, %s285_s17  }
  0x57   : >> { %272 = vst [vmem:[%s4317_s17] sm:$0xf] %v271_v32  ;;  %v277_v35 = vld [vmem:[%s4321_s18 + $0x24c] sm:$0xf]  ;;  %s279_s11 = sadd.s32 1, %s4325_s23  ;;  %s265_s25 = sadd.s32 1, %s4329_s25  }
  0x58   : >> { %274 = vst [vmem:[%s4317_s17 + $0x64] sm:$0xf] %v273_v33  ;;  %p280_p6 = scmp.ge.s32.totalorder %s279_s11, %s4572_s7  ;;  %p264_p7 = scmp.ge.s32.totalorder %s265_s25, %s4572_s7 }
  0x59   : >> { %276 = vst [vmem:[%s4317_s17 + $0xc8] sm:$0xf] %v275_v34 }
  0x5a   : >> { %278 = vst [vmem:[%s4317_s17 + $0x12c] sm:$0xf] %v277_v35  ;;  %s5495_s11 = smov (%p280_p6, %s279_s11), 0  ;;  %267 = sbr.rel (!%p264_p7) target bundleno = 86 (0x56), region = 222 }
  0x5b   : >> { %s2960_s24 = sshll.u32 %s5495_s11, 2  ;;  %s4324_s23 = smov %s5495_s11  }
  0x5c   : >> { %s284_s18 = scalar_lea.vmem %s4576_s9, %s2960_s24   ;;  %s285_s17 = scalar_lea.vmem %s4579_s10, %s2960_s24 [#allocation2]  }
  0x5f PF: > { %448 = sbr.rel (%p4430_p9) target bundleno = 687 (0x2af), region = 90  ;;  %s451_s20 = sand.u32 (!%p4430_p9), 1, %s4289_s12  }
  0x60   : > { %s3354_s26 = smul.u32 (!%p4430_p9), 400, %s451_s20 }
  0x62   : > { %s4603_s14 = scalar_lea.vmem (!%p4430_p9), [#allocation2], %s3354_s26 }
  0x64   : > { %4280 = dma.done.wait (%p3371_p8), [#allocation4], 128  }
  0x65   : > { %4282 = vsyncadd (%p3371_p8), [#allocation4], 4294967168 }
  0x66   : > { %4284 = dma.done.wait (%p3371_p8), [#allocation6], 16  }
  0x67   : > { %4286 = vsyncadd (%p3371_p8), [#allocation6], 4294967280  ;;  %vm633_vm0 = vcmask 1043456   ;;  %vm634_vm1 = vcmask 1044480   ;;  %v4367_v36 = vmov 65535   ;;  %v3303_v43 = vld [vmem:[%s4603_s14] sm:$0xff] }
  0x68   : > { %v635_v37 = vsel %vm633_vm0, 4294967295, %v4367_v36  ;;  %v3015_v38 = vld [vmem:[#allocation3] sm:$0xf]  ;;  %v3315_v39 = vld [vmem:[#allocation3] sm:$0x10]  ;;  %vm593_vm2 = vcmask 72704  }
  0x69   : > { %v636_v40 = vsel %vm634_vm1, %v635_v37, 0  ;;  %v3016_v41 = vor.u32 %v3315_v39, %v3015_v38  ;;  %v3316_v44 = vld [vmem:[%s4603_s14 + $0x64] sm:$0xff]  ;;  %v3340_v46 = vld [vmem:[%s4603_s14 + $0x12c] sm:$0xff]  ;;  %v3341_v50 = vld [vmem:[%s4603_s14 + $0x134] sm:$0xff]  ;;  %vm2516_vm3 = vcmask 257024   ;;  %s4782_s22 = smul.u32 100, %s451_s20 }
  0x6a   : > { %v3328_v45 = vld [vmem:[%s4603_s14 + $0xc8] sm:$0xff]  ;;  %v3329_v49 = vld [vmem:[%s4603_s14 + $0xd0] sm:$0xff]  ;;  %v3330_v53 = vld [vmem:[%s4603_s14 + $0xd8] sm:$0xff]  ;;  %s2549_s27 = smul.u32 (%p4423_p5), 25, %s4404_s15 }
  0x6b   : > { %v638_v42 = vand.u32 %v3016_v41, %v636_v40  ;;  %v3304_v47 = vld [vmem:[%s4603_s14 + $0x8] sm:$0xff]  ;;  %v3305_v51 = vld [vmem:[%s4603_s14 + $0x10] sm:$0xff]  ;;  %v3342_v54 = vld [vmem:[%s4603_s14 + $0x13c] sm:$0xff]  ;;  %s4803_s12 = scalar_lea.vmem [#allocation7], %s4782_s22   ;;  %s3352_s28 = smul.u32 (%p4423_p5), 100, %s4404_s15 }
  0x6c   : > { %v3317_v48 = vld [vmem:[%s4603_s14 + $0x6c] sm:$0xff]  ;;  %v3318_v52 = vld [vmem:[%s4603_s14 + $0x74] sm:$0xff]  ;;  %v3319_v56 = vld [vmem:[%s4603_s14 + $0x7c] sm:$0xff]  ;;  %s2550_s29 = ssub.s32 (%p4423_p5), 49, %s2549_s27 }
  0x6d   : > { %647 = vmatpush.bf16.msra.mxu0 %v638_v42  ;;  %1123 = vmatpush.bf16.msra.mxu1 %v638_v42  ;;  %v3306_v55 = vld [vmem:[%s4603_s14 + $0x18] sm:$0xff]  ;;  %v3331_v57 = vld [vmem:[%s4603_s14 + $0xe0] sm:$0xff]  ;;  %v3332_v61 = vld [vmem:[%s4603_s14 + $0xe8] sm:$0xff]  ;;  %p2551_p8 = scmp.lt.s32.totalorder (%p4423_p5), %s2550_s29, 25  ;;  %s5351_s5 = scalar_lea.vmem (%p4423_p5), %s5471_s3, %s3352_s28  }
  0x6e   : > { %1624 = vmatpush.bf16.msra.mxu2 %v638_v42  ;;  %2125 = vmatpush.bf16.msra.mxu3 %v638_v42  ;;  %v3343_v58 = vld [vmem:[%s4603_s14 + $0x144] sm:$0xff]  ;;  %v3344_v62 = vld [vmem:[%s4603_s14 + $0x14c] sm:$0xff]  ;;  %v3345_v2 = vld [vmem:[%s4603_s14 + $0x154] sm:$0xff] }
  0x6f   : > { %v3307_v59 = vld [vmem:[%s4603_s14 + $0x20] sm:$0xff]  ;;  %v3308_v63 = vld [vmem:[%s4603_s14 + $0x28] sm:$0xff]  ;;  %v3333_v1 = vld [vmem:[%s4603_s14 + $0xf0] sm:$0xff] }
  0x70   : > { %3017 = vmatmul.msk.bf16.vlgmr.msra.gmra.mxu0 %vm593_vm2, %v3303_v43  ;;  %3103 = vmatmul.msk.bf16.vlgmr.msra.gmra.mxu1 %vm593_vm2, %v3316_v44  ;;  %v3320_v60 = vld [vmem:[%s4603_s14 + $0x84] sm:$0xff]  ;;  %v3321_v0 = vld [vmem:[%s4603_s14 + $0x8c] sm:$0xff]  ;;  %v3322_v4 = vld [vmem:[%s4603_s14 + $0x94] sm:$0xff] }
  0x71   : > { %3189 = vmatmul.msk.bf16.vlgmr.msra.gmra.mxu2 %vm593_vm2, %v3328_v45  ;;  %3275 = vmatmul.msk.bf16.vlgmr.msra.gmra.mxu3 %vm593_vm2, %v3340_v46  ;;  %v3309_v3 = vld [vmem:[%s4603_s14 + $0x30] sm:$0xff]  ;;  %v3334_v5 = vld [vmem:[%s4603_s14 + $0xf8] sm:$0xff]  ;;  %v3335_v9 = vld [vmem:[%s4603_s14 + $0x100] sm:$0xff] }
  0x72   : > { %v3346_v6 = vld [vmem:[%s4603_s14 + $0x15c] sm:$0xff]  ;;  %v3347_v10 = vld [vmem:[%s4603_s14 + $0x164] sm:$0xff]  ;;  %v3348_v17 = vld [vmem:[%s4603_s14 + $0x16c] sm:$0xff] }
  0x73   : > { %v3310_v7 = vld [vmem:[%s4603_s14 + $0x38] sm:$0xff]  ;;  %v3311_v12 = vld [vmem:[%s4603_s14 + $0x40] sm:$0xff]  ;;  %v3336_v16 = vld [vmem:[%s4603_s14 + $0x108] sm:$0xff] }
  0x74   : > { %v3323_v8 = vld [vmem:[%s4603_s14 + $0x9c] sm:$0xff]  ;;  %v4677_v11 = vld [vmem:[#allocation5] ss:$0 sm:$0xff] }
  0x75   : > { %v3324_v13 = vld [vmem:[%s4603_s14 + $0xa4] sm:$0xff] }
  0x76   : > { %v3312_v46 = vld [vmem:[%s4603_s14 + $0x48] sm:$0xff] }
  0x80   : > { %3018 = vmatmul.msk.bf16.gmra.mxu0 %vm593_vm2, %v3304_v47  ;;  %3104 = vmatmul.msk.bf16.gmra.mxu1 %vm593_vm2, %v3317_v48  ;;  %v3325_v47 = vld [vmem:[%s4603_s14 + $0xac] sm:$0xff] }
  0x81   : > { %3190 = vmatmul.msk.bf16.gmra.mxu2 %vm593_vm2, %v3329_v49  ;;  %3276 = vmatmul.msk.bf16.gmra.mxu3 %vm593_vm2, %v3341_v50 }
  0x90   : > { %3019 = vmatmul.msk.bf16.gmra.mxu0 %vm593_vm2, %v3305_v51  ;;  %3105 = vmatmul.msk.bf16.gmra.mxu1 %vm593_vm2, %v3318_v52  ;;  %v3337_v52 = vld [vmem:[%s4603_s14 + $0x110] sm:$0xff] }
  0x91   : > { %3191 = vmatmul.msk.bf16.gmra.mxu2 %vm593_vm2, %v3330_v53  ;;  %3277 = vmatmul.msk.bf16.gmra.mxu3 %vm593_vm2, %v3342_v54  ;;  %v3349_v53 = vld [vmem:[%s4603_s14 + $0x174] sm:$0xff] }
  0xa0   : > { %3020 = vmatmul.msk.bf16.gmra.mxu0 %vm593_vm2, %v3306_v55  ;;  %3106 = vmatmul.msk.bf16.gmra.mxu1 %vm593_vm2, %v3319_v56 }
  0xa1   : > { %3192 = vmatmul.msk.bf16.gmra.mxu2 %vm593_vm2, %v3331_v57  ;;  %3278 = vmatmul.msk.bf16.gmra.mxu3 %vm593_vm2, %v3343_v58 }
  0xb0   : > { %3021 = vmatmul.msk.bf16.gmra.mxu0 %vm593_vm2, %v3307_v59  ;;  %3107 = vmatmul.msk.bf16.gmra.mxu1 %vm593_vm2, %v3320_v60 }
  0xb1   : > { %3193 = vmatmul.msk.bf16.gmra.mxu2 %vm593_vm2, %v3332_v61  ;;  %3279 = vmatmul.msk.bf16.gmra.mxu3 %vm593_vm2, %v3344_v62 }
  0xc0   : > { %3022 = vmatmul.msk.bf16.gmra.mxu0 %vm593_vm2, %v3308_v63  ;;  %3108 = vmatmul.msk.bf16.gmra.mxu1 %vm593_vm2, %v3321_v0 }
  0xc1   : > { %3194 = vmatmul.msk.bf16.gmra.mxu2 %vm593_vm2, %v3333_v1  ;;  %3280 = vmatmul.msk.bf16.gmra.mxu3 %vm593_vm2, %v3345_v2 }
  0xd0   : > { %3023 = vmatmul.msk.bf16.gmra.mxu0 %vm593_vm2, %v3309_v3  ;;  %3109 = vmatmul.msk.bf16.gmra.mxu1 %vm593_vm2, %v3322_v4 }
  0xd1   : > { %3195 = vmatmul.msk.bf16.gmra.mxu2 %vm593_vm2, %v3334_v5  ;;  %3281 = vmatmul.msk.bf16.gmra.mxu3 %vm593_vm2, %v3346_v6 }
  0xe0   : > { %3024 = vmatmul.msk.bf16.gmra.mxu0 %vm593_vm2, %v3310_v7  ;;  %3110 = vmatmul.msk.bf16.gmra.mxu1 %vm593_vm2, %v3323_v8 }
  0xe1   : > { %3196 = vmatmul.msk.bf16.gmra.mxu2 %vm593_vm2, %v3335_v9  ;;  %3282 = vmatmul.msk.bf16.gmra.mxu3 %vm593_vm2, %v3347_v10 }
  0xed   : > { %v649_v14 = vpop.f32.mrf.mxu0  ;;  %v1125_v15 = vpop.f32.mrf.mxu1 }
  0xee   : > { %v4684_v18 = vadd.f32 %v4677_v11, %v649_v14  ;;  %v4687_v19 = vadd.f32 %v4677_v11, %v1125_v15 }
  0xf0   : > { %v713_v20 = vsub.f32 0.0, %v4684_v18  ;;  %v1189_v21 = vsub.f32 0.0, %v4687_v19  ;;  %3025 = vmatmul.msk.bf16.gmra.mxu0 %vm593_vm2, %v3311_v12  ;;  %3111 = vmatmul.msk.bf16.gmra.mxu1 %vm593_vm2, %v3324_v13 }
  0xf1   : > { %3197 = vmatmul.msk.bf16.gmra.mxu2 %vm593_vm2, %v3336_v16  ;;  %3283 = vmatmul.msk.bf16.gmra.mxu3 %vm593_vm2, %v3348_v17 }
  0xf2   : > { %v738_v22 = vmul.f32 1.442695, %v713_v20  ;;  %v1214_v23 = vmul.f32 1.442695, %v1189_v21 }
  0xf4   : > { %3534 = vpow2.f32 %v738_v22  ;;  %v1626_v24 = vpop.f32.mrf.mxu2  ;;  %v2127_v25 = vpop.f32.mrf.mxu3 }
  0xf5   : > { %3536 = vpow2.f32 %v1214_v23  ;;  %v4696_v26 = vadd.f32 %v4677_v11, %v1626_v24  ;;  %v4699_v27 = vadd.f32 %v4677_v11, %v2127_v25  ;;  %v651_v28 = vpop.f32.mrf.mxu0  ;;  %v1127_v29 = vpop.f32.mrf.mxu1 }
  0xf6   : > { %v4702_v30 = vadd.f32 %v4677_v11, %v651_v28  ;;  %v4705_v31 = vadd.f32 %v4677_v11, %v1127_v29 }
  0xf7   : > { %v1690_v32 = vsub.f32 0.0, %v4696_v26  ;;  %v2191_v33 = vsub.f32 0.0, %v4699_v27 }
  0xf8   : > { %v714_v34 = vsub.f32 0.0, %v4702_v30  ;;  %v1190_v35 = vsub.f32 0.0, %v4705_v31 }
  0xf9   : > { %v1715_v36 = vmul.f32 1.442695, %v1690_v32  ;;  %v2216_v37 = vmul.f32 1.442695, %v2191_v33 }
  0xfa   : > { %v3535_v38 = vpop.eup %3534  ;;  %v740_v41 = vmul.f32 1.442695, %v714_v34  ;;  %v1216_v43 = vmul.f32 1.442695, %v1190_v35 }
  0xfb   : > { %v3537_v39 = vpop.eup %3536  ;;  %v788_v40 = vadd.f32 1.0, %v3535_v38  ;;  %3538 = vpow2.f32 %v1715_v36 }
  0xfc   : > { %v1264_v42 = vadd.f32 1.0, %v3537_v39  ;;  %3540 = vpow2.f32 %v2216_v37  ;;  %v1628_v44 = vpop.f32.mrf.mxu2  ;;  %v2129_v45 = vpop.f32.mrf.mxu3 }
  0xfd   : > { %3542 = vrcp.f32 %v788_v40  ;;  %v4714_v48 = vadd.f32 %v4677_v11, %v1628_v44  ;;  %v4717_v49 = vadd.f32 %v4677_v11, %v2129_v45  ;;  %v654_v50 = vpop.f32.mrf.mxu0  ;;  %v1130_v51 = vpop.f32.mrf.mxu1  ;;  %v3313_v44 = vld [vmem:[%s4603_s14 + $0x50] sm:$0xff] }
  0xfe   : > { %3544 = vrcp.f32 %v1264_v42  ;;  %v4722_v54 = vadd.f32 %v4677_v11, %v654_v50  ;;  %v4728_v58 = vadd.f32 %v4677_v11, %v1130_v51  ;;  %v3326_v45 = vld [vmem:[%s4603_s14 + $0xb4] sm:$0xff] }
  0xff   : > { %3546 = vpow2.f32 %v740_v41  ;;  %v1691_v55 = vsub.f32 0.0, %v4714_v48  ;;  %v2192_v56 = vsub.f32 0.0, %v4717_v49 }
 0x100   : > { %3548 = vpow2.f32 %v1216_v43  ;;  %v715_v57 = vsub.f32 0.0, %v4722_v54  ;;  %3026 = vmatmul.msk.bf16.gmra.mxu0 %vm593_vm2, %v3312_v46  ;;  %3112 = vmatmul.msk.bf16.gmra.mxu1 %vm593_vm2, %v3325_v47  ;;  %v1191_v5 = vsub.f32 0.0, %v4728_v58 }
 0x101   : > { %v3539_v59 = vpop.eup %3538  ;;  %v1717_v60 = vmul.f32 1.442695, %v1691_v55  ;;  %3198 = vmatmul.msk.bf16.gmra.mxu2 %vm593_vm2, %v3337_v52  ;;  %3284 = vmatmul.msk.bf16.gmra.mxu3 %vm593_vm2, %v3349_v53  ;;  %v2218_v63 = vmul.f32 1.442695, %v2192_v56  ;;  %v3338_v53 = vld [vmem:[%s4603_s14 + $0x118] sm:$0xff] }
 0x102   : > { %v3541_v61 = vpop.eup %3540  ;;  %v1765_v62 = vadd.f32 1.0, %v3539_v59  ;;  %v742_v2 = vmul.f32 1.442695, %v715_v57  ;;  %v1218_v29 = vmul.f32 1.442695, %v1191_v5  ;;  %v3350_v55 = vld [vmem:[%s4603_s14 + $0x17c] sm:$0xff] }
 0x103   : > { %v3543_v0 = vpop.eup %3542  ;;  %v2266_v1 = vadd.f32 1.0, %v3541_v61  ;;  %3550 = vpow2.f32 %v1717_v60 }
 0x104   : > { %v3545_v3 = vpop.eup %3544  ;;  %v838_v4 = vadd.f32 2.0, %v3543_v0  ;;  %3552 = vrcp.f32 %v1765_v62  ;;  %v1631_v6 = vpop.f32.mrf.mxu2 }
 0x105   : > { %v2132_v7 = vpop.f32.mrf.mxu3  ;;  %v3547_v8 = vpop.eup %3546  ;;  %v1314_v9 = vadd.f32 2.0, %v3545_v3  ;;  %3554 = vrcp.f32 %v2266_v1  ;;  %v4736_v10 = vadd.f32 %v4677_v11, %v1631_v6 }
 0x106   : > { %v4739_v12 = vadd.f32 %v4677_v11, %v2132_v7  ;;  %v656_v13 = vpop.f32.mrf.mxu0  ;;  %v3549_v14 = vpop.eup %3548  ;;  %v863_v15 = vmul.f32 %v3543_v0, %v838_v4  ;;  %v789_v16 = vadd.f32 1.0, %v3547_v8  ;;  %3556 = vpow2.f32 %v2218_v63 }
 0x107   : > { %v4742_v17 = vadd.f32 %v4677_v11, %v656_v13  ;;  %v1339_v20 = vmul.f32 %v3545_v3, %v1314_v9  ;;  %v1265_v21 = vadd.f32 1.0, %v3549_v14  ;;  %3558 = vpow2.f32 %v742_v2  ;;  %v1132_v24 = vpop.f32.mrf.mxu1 }
 0x108   : > { %v1692_v22 = vsub.f32 0.0, %v4736_v10  ;;  %v913_v23 = vadd.f32 2.0, %v863_v15  ;;  %3560 = vrcp.f32 %v789_v16  ;;  %v2193_v32 = vsub.f32 0.0, %v4739_v12 }
 0x109   : > { %v3551_v25 = vpop.eup %3550  ;;  %v1389_v28 = vadd.f32 2.0, %v1339_v20  ;;  %3562 = vrcp.f32 %v1265_v21  ;;  %v716_v36 = vsub.f32 0.0, %v4742_v17  ;;  %v4748_v39 = vadd.f32 %v4677_v11, %v1132_v24 }
 0x10a   : > { %v3553_v33 = vpop.eup %3552  ;;  %3564 = vrcp.f32 %v913_v23  ;;  %v1766_v34 = vadd.f32 1.0, %v3551_v25  ;;  %v1719_v35 = vmul.f32 1.442695, %v1692_v22  ;;  %v888_v41 = vmul.f32 %v863_v15, %v4684_v18 }
 0x10b   : > { %v3555_v37 = vpop.eup %3554  ;;  %3566 = vrcp.f32 %v1389_v28  ;;  %v1815_v38 = vadd.f32 2.0, %v3553_v33  ;;  %v1364_v42 = vmul.f32 %v1339_v20, %v4687_v19  ;;  %v2220_v51 = vmul.f32 1.442695, %v2193_v32 }
 0x10c   : > { %v3557_v40 = vpop.eup %3556  ;;  %v2316_v43 = vadd.f32 2.0, %v3555_v37  ;;  %3568 = vrcp.f32 %v1766_v34  ;;  %v1633_v52 = vpop.f32.mrf.mxu2  ;;  %v4756_v60 = vmul.f32 1.442695, %v716_v36  ;;  %v1192_v62 = vsub.f32 0.0, %v4748_v39 }
 0x10d   : > { %v3559_v46 = vpop.eup %3558  ;;  %v1840_v47 = vmul.f32 %v3553_v33, %v1815_v38  ;;  %v2267_v50 = vadd.f32 1.0, %v3557_v40  ;;  %3570 = vpow2.f32 %v1218_v29  ;;  %v4760_v2 = vadd.f32 %v4677_v11, %v1633_v52  ;;  %v2134_v7 = vpop.f32.mrf.mxu3 }
 0x10e   : > { %v3561_v56 = vpop.eup %3560  ;;  %v2341_v57 = vmul.f32 %v3555_v37, %v2316_v43  ;;  %v790_v59 = vadd.f32 1.0, %v3559_v46  ;;  %3572 = vpow2.f32 %v1719_v35  ;;  %v4768_v21 = vmul.f32 1.442695, %v1192_v62 }
 0x10f   : > { %v3563_v18 = vpop.eup %3562  ;;  %v1890_v19 = vadd.f32 2.0, %v1840_v47  ;;  %v839_v61 = vadd.f32 2.0, %v3561_v56  ;;  %3574 = vrcp.f32 %v2267_v50  ;;  %v1865_v5 = vmul.f32 %v1840_v47, %v4696_v26  ;;  %v659_v26 = vpop.f32.mrf.mxu0 }
 0x110   : > { %v3565_v63 = vpop.eup %3564  ;;  %v2391_v0 = vadd.f32 2.0, %v2341_v57  ;;  %v1315_v1 = vadd.f32 2.0, %v3563_v18  ;;  %3576 = vrcp.f32 %v790_v59  ;;  %3027 = vmatmul.msk.bf16.gmra.mxu0 %vm593_vm2, %v3313_v44  ;;  %3113 = vmatmul.msk.bf16.gmra.mxu1 %vm593_vm2, %v3326_v45  ;;  %v2366_v13 = vmul.f32 %v2341_v57, %v4699_v27  ;;  %v1135_v52 = vpop.f32.mrf.mxu1 }
 0x111   : > { %v3567_v3 = vpop.eup %3566  ;;  %v963_v4 = vmul.f32 %v3565_v63, %v888_v41  ;;  %3578 = vrcp.f32 %v1890_v19  ;;  %v864_v6 = vmul.f32 %v3561_v56, %v839_v61  ;;  %3199 = vmatmul.msk.bf16.gmra.mxu2 %vm593_vm2, %v3338_v53  ;;  %3285 = vmatmul.msk.bf16.gmra.mxu3 %vm593_vm2, %v3350_v55  ;;  %v1693_v28 = vsub.f32 0.0, %v4760_v2 }
 0x112   : > { %v3569_v8 = vpop.eup %3568  ;;  %v1439_v9 = vmul.f32 %v3567_v3, %v1364_v42  ;;  %3580 = vrcp.f32 %v2391_v0  ;;  %v1340_v14 = vmul.f32 %v3563_v18, %v1315_v1  ;;  %v4773_v36 = vadd.f32 %v4677_v11, %v2134_v7 }
 0x113   : > { %v3571_v15 = vpop.eup %3570  ;;  %v914_v16 = vadd.f32 2.0, %v864_v6  ;;  %v1816_v20 = vadd.f32 2.0, %v3569_v8  ;;  %3582 = vpow2.f32 %v2220_v51  ;;  %v889_v23 = vmul.f32 %v864_v6, %v4702_v30 }
 0x114   : > { %v3573_v22 = vpop.eup %3572  ;;  %v1390_v24 = vadd.f32 2.0, %v1340_v14  ;;  %v1266_v25 = vadd.f32 1.0, %v3571_v15  ;;  %v1464_v32 = vmax.f32 %v963_v4, %v1439_v9  ;;  %v4776_v37 = vadd.f32 %v4677_v11, %v659_v26  ;;  %v1636_v57 = vpop.f32.mrf.mxu2  ;;  %v3339_v15 = vld [vmem:[%s4603_s14 + $0x120] sm:$0xff] }
 0x115   : > { %v3575_v29 = vpop.eup %3574  ;;  %3584 = vrcp.f32 %v914_v16  ;;  %v1841_v27 = vmul.f32 %v3569_v8, %v1816_v20  ;;  %v1767_v33 = vadd.f32 1.0, %v3573_v22  ;;  %v1365_v38 = vmul.f32 %v1340_v14, %v4705_v31  ;;  %v2137_v62 = vpop.f32.mrf.mxu3  ;;  %v3327_v14 = vld [vmem:[%s4603_s14 + $0xbc] sm:$0xff] }
 0x116   : > { %v3577_v34 = vpop.eup %3576  ;;  %3586 = vrcp.f32 %v1390_v24  ;;  %v2317_v35 = vadd.f32 2.0, %v3575_v29  ;;  %v2194_v45 = vsub.f32 0.0, %v4773_v36  ;;  %v1721_v50 = vmul.f32 1.442695, %v1693_v28 }
 0x117   : > { %v3579_v30 = vpop.eup %3578  ;;  %v1891_v40 = vadd.f32 2.0, %v1841_v27  ;;  %v840_v41 = vadd.f32 2.0, %v3577_v34  ;;  %3588 = vrcp.f32 %v1266_v25  ;;  %v717_v51 = vsub.f32 0.0, %v4776_v37 }
 0x118   : > { %v3581_v42 = vpop.eup %3580  ;;  %v1940_v43 = vmul.f32 %v3579_v30, %v1865_v5  ;;  %v2342_v44 = vmul.f32 %v3575_v29, %v2317_v35  ;;  %3590 = vrcp.f32 %v1767_v33  ;;  %v1866_v18 = vmul.f32 %v1841_v27, %v4714_v48  ;;  %v661_v30 = vpop.f32.mrf.mxu0 }
 0x119   : > { %v3583_v46 = vpop.eup %3582  ;;  %3592 = vrcp.f32 %v1891_v40  ;;  %v865_v47 = vmul.f32 %v3577_v34, %v840_v41  ;;  %v2441_v53 = vmul.f32 %v3581_v42, %v2366_v13  ;;  %v2222_v61 = vmul.f32 1.442695, %v2194_v45  ;;  %v3314_v13 = vld [vmem:[%s4603_s14 + $0x58] sm:$0xff] }
 0x11a   : > { %v1965_v31 = vmax.f32 %v1464_v32, %v1940_v43  ;;  %v2392_v55 = vadd.f32 2.0, %v2342_v44  ;;  %v2268_v56 = vadd.f32 1.0, %v3583_v46  ;;  %3594 = vpow2.f32 %v4756_v60  ;;  %v1137_v43 = vpop.f32.mrf.mxu1 }
 0x11b   : > { %v3585_v59 = vpop.eup %3584  ;;  %v915_v19 = vadd.f32 2.0, %v865_v47  ;;  %v746_v3 = vmul.f32 1.442695, %v717_v51  ;;  %v4788_v6 = vadd.f32 %v4677_v11, %v1135_v52  ;;  %v4791_v48 = vadd.f32 %v4677_v11, %v1636_v57 }
 0x11c   : > { %v3587_v63 = vpop.eup %3586  ;;  %v2466_v0 = vmax.f32 %v1965_v31, %v2441_v53  ;;  %v964_v1 = vmul.f32 %v3585_v59, %v889_v23  ;;  %3596 = vrcp.f32 %v2392_v55  ;;  %v4794_v9 = vadd.f32 %v4677_v11, %v2137_v62  ;;  %v3351_v23 = vld [vmem:[%s4603_s14 + $0x184] sm:$0xff]  ;;  %v1638_v55 = vpop.f32.mrf.mxu2 }
 0x11d   : > { %v3589_v4 = vpop.eup %3588  ;;  %v1440_v5 = vmul.f32 %v3587_v63, %v1365_v38  ;;  %3598 = vrcp.f32 %v915_v19  ;;  %v1193_v22 = vsub.f32 0.0, %v4788_v6  ;;  %v2367_v29 = vmul.f32 %v2342_v44, %v4717_v49 }
 0x11e   : > { %v3591_v60 = vpop.eup %3590  ;;  %v2491_v7 = vpack.c.bf16 %v2466_v0, %v2466_v0  ;;  %v1316_v8 = vadd.f32 2.0, %v3589_v4  ;;  %3600 = vrcp.f32 %v2268_v56  ;;  %v890_v33 = vmul.f32 %v865_v47, %v4722_v54 }
 0x11f   : > { %v3593_v16 = vpop.eup %3592  ;;  %v1465_v20 = vmax.f32 %v964_v1, %v1440_v5  ;;  %v1817_v26 = vadd.f32 2.0, %v3591_v60  ;;  %3602 = vpow2.f32 %v4768_v21  ;;  %v1222_v42 = vmul.f32 1.442695, %v1193_v22 }
 0x120   : > { %2517 = vst.msk [vmem:[%s4803_s12] sm:$0xf] %vm2516_vm3, %v2491_v7  ;;  %v1941_v24 = vmul.f32 %v3593_v16, %v1866_v18  ;;  %v1341_v25 = vmul.f32 %v3589_v4, %v1316_v8  ;;  %3604 = vpow2.f32 %v1721_v50  ;;  %3028 = vmatmul.msk.bf16.gmra.mxu0 %vm593_vm2, %v3314_v13  ;;  %3114 = vmatmul.msk.bf16.gmra.mxu1 %vm593_vm2, %v3327_v14  ;;  %v3595_v28 = vpop.eup %3594  ;;  %v1694_v45 = vsub.f32 0.0, %v4791_v48  ;;  %v2139_v7 = vpop.f32.mrf.mxu3 }
 0x121   : > { %v1842_v32 = vmul.f32 %v3591_v60, %v1817_v26  ;;  %3606 = vpow2.f32 %v2222_v61  ;;  %3200 = vmatmul.msk.bf16.gmra.mxu2 %vm593_vm2, %v3339_v15  ;;  %3286 = vmatmul.msk.bf16.gmra.mxu3 %vm593_vm2, %v3351_v23  ;;  %v791_v35 = vadd.f32 1.0, %v3595_v28  ;;  %v2195_v46 = vsub.f32 0.0, %v4794_v9  ;;  %v664_v26 = vpop.f32.mrf.mxu0 }
 0x122   : > { %v3597_v21 = vpop.eup %3596  ;;  %v1966_v27 = vmax.f32 %v1465_v20, %v1941_v24  ;;  %v1391_v34 = vadd.f32 2.0, %v1341_v25  ;;  %3608 = vpow2.f32 %v746_v3  ;;  %v1366_v44 = vmul.f32 %v1341_v25, %v4728_v58  ;;  %v1140_v28 = vpop.f32.mrf.mxu1 }
 0x123   : > { %v3599_v38 = vpop.eup %3598  ;;  %v2442_v40 = vmul.f32 %v3597_v21, %v2367_v29  ;;  %v1892_v41 = vadd.f32 2.0, %v1842_v32  ;;  %v4817_v47 = vadd.f32 %v4677_v11, %v661_v30  ;;  %v1867_v31 = vmul.f32 %v1842_v32, %v4736_v10 }
 0x124   : > { %v3601_v49 = vpop.eup %3600  ;;  %3610 = vrcp.f32 %v1391_v34  ;;  %v4821_v58 = vadd.f32 %v4677_v11, %v1137_v43  ;;  %v965_v19 = vmul.f32 %v3599_v38, %v890_v33  ;;  %v1723_v0 = vmul.f32 1.442695, %v1694_v45 }
 0x125   : > { %v3603_v50 = vpop.eup %3602  ;;  %v2467_v51 = vmax.f32 %v1966_v27, %v2442_v40  ;;  %3612 = vrcp.f32 %v1892_v41  ;;  %v2318_v54 = vadd.f32 2.0, %v3601_v49  ;;  %v718_v62 = vsub.f32 0.0, %v4817_v47 }
 0x126   : > { %v3605_v52 = vpop.eup %3604  ;;  %3614 = vrcp.f32 %v791_v35  ;;  %v1267_v53 = vadd.f32 1.0, %v3603_v50  ;;  %v4827_v1 = vadd.f32 %v4677_v11, %v1638_v55  ;;  %v2224_v5 = vmul.f32 1.442695, %v2195_v46 }
 0x127   : > { %v3607_v56 = vpop.eup %3606  ;;  %v2492_v57 = vpack.c.bf16 %v2467_v51, %v2467_v51  ;;  %v2343_v59 = vmul.f32 %v3601_v49, %v2318_v54  ;;  %v1768_v18 = vadd.f32 1.0, %v3605_v52  ;;  %3616 = vpow2.f32 %v1222_v42 }
 0x128   : > { %3618 = vrcp.f32 %v1267_v53  ;;  %v2269_v61 = vadd.f32 1.0, %v3607_v56  ;;  %v3609_v63 = vpop.eup %3608  ;;  %v1194_v60 = vsub.f32 0.0, %v4821_v58  ;;  %v748_v14 = vmul.f32 1.442695, %v718_v62 }
 0x129   : > { %2518 = vst.msk [vmem:[%s4803_s12 + $0x4] sm:$0xf] %vm2516_vm3, %v2492_v57  ;;  %v2393_v10 = vadd.f32 2.0, %v2343_v59  ;;  %3620 = vrcp.f32 %v1768_v18  ;;  %v792_v4 = vadd.f32 1.0, %v3609_v63  ;;  %v2368_v20 = vmul.f32 %v2343_v59, %v4739_v12 }
 0x12a   : > { %v3611_v3 = vpop.eup %3610  ;;  %3622 = vrcp.f32 %v2269_v61  ;;  %v1695_v24 = vsub.f32 0.0, %v4827_v1  ;;  %v4833_v25 = vadd.f32 %v4677_v11, %v2139_v7  ;;  %v1224_v27 = vmul.f32 1.442695, %v1194_v60  ;;  %v1641_v61 = vpop.f32.mrf.mxu2 }
 0x12b   : > { %v3613_v8 = vpop.eup %3612  ;;  %v1441_v13 = vmul.f32 %v3611_v3, %v1366_v44  ;;  %3624 = vrcp.f32 %v2393_v10  ;;  %v4836_v12 = vadd.f32 %v4677_v11, %v664_v26  ;;  %v4839_v41 = vadd.f32 %v4677_v11, %v1140_v28  ;;  %v2142_v3 = vpop.f32.mrf.mxu3 }
 0x12c   : > { %v3615_v15 = vpop.eup %3614  ;;  %v1942_v16 = vmul.f32 %v3613_v8, %v1867_v31  ;;  %3626 = vrcp.f32 %v792_v4  ;;  %v2196_v45 = vsub.f32 0.0, %v4833_v25  ;;  %v1725_v54 = vmul.f32 1.442695, %v1695_v24 }
 0x12d   : > { %v3617_v22 = vpop.eup %3616  ;;  %v841_v23 = vadd.f32 2.0, %v3615_v15  ;;  %3628 = vpow2.f32 %v1723_v0  ;;  %v1466_v32 = vmax.f32 %v965_v19, %v1441_v13  ;;  %v719_v55 = vsub.f32 0.0, %v4836_v12 }
 0x12e   : > { %v3619_v29 = vpop.eup %3618  ;;  %v1268_v21 = vadd.f32 1.0, %v3617_v22  ;;  %3630 = vpow2.f32 %v2224_v5  ;;  %v1195_v19 = vsub.f32 0.0, %v4839_v41  ;;  %v2226_v0 = vmul.f32 1.442695, %v2196_v45 }
 0x12f   : > { %v3621_v33 = vpop.eup %3620  ;;  %v866_v34 = vmul.f32 %v3615_v15, %v841_v23  ;;  %v1317_v35 = vadd.f32 2.0, %v3619_v29  ;;  %3632 = vpow2.f32 %v748_v14  ;;  %v1967_v38 = vmax.f32 %v1466_v32, %v1942_v16 }
 0x130   : > { %v3623_v30 = vpop.eup %3622  ;;  %v1818_v40 = vadd.f32 2.0, %v3621_v33  ;;  %3634 = vrcp.f32 %v1268_v21  ;;  %v4845_v14 = vadd.f32 %v4677_v11, %v1641_v61  ;;  %v4851_v26 = vadd.f32 %v4677_v11, %v2142_v3 }
 0x131   : > { %v3625_v42 = vpop.eup %3624  ;;  %v916_v43 = vadd.f32 2.0, %v866_v34  ;;  %v1342_v49 = vmul.f32 %v3619_v29, %v1317_v35  ;;  %v2319_v44 = vadd.f32 2.0, %v3623_v30  ;;  %3636 = vpow2.f32 %v1224_v27  ;;  %v666_v27 = vpop.f32.mrf.mxu0 }
 0x132   : > { %v3627_v46 = vpop.eup %3626  ;;  %v2443_v50 = vmul.f32 %v3625_v42, %v2368_v20  ;;  %v1843_v51 = vmul.f32 %v3621_v33, %v1818_v40  ;;  %v891_v16 = vmul.f32 %v866_v34, %v4742_v17  ;;  %v750_v28 = vmul.f32 1.442695, %v719_v55 }
 0x133   : > { %v3629_v52 = vpop.eup %3628  ;;  %3638 = vrcp.f32 %v916_v43  ;;  %v1392_v31 = vadd.f32 2.0, %v1342_v49  ;;  %v2344_v53 = vmul.f32 %v3623_v30, %v2319_v44  ;;  %v842_v18 = vadd.f32 2.0, %v3627_v46  ;;  %v1142_v43 = vpop.f32.mrf.mxu1 }
 0x134   : > { %v3631_v56 = vpop.eup %3630  ;;  %v2468_v57 = vmax.f32 %v1967_v38, %v2443_v50  ;;  %v1893_v59 = vadd.f32 2.0, %v1843_v51  ;;  %v1769_v10 = vadd.f32 1.0, %v3629_v52  ;;  %v1367_v32 = vmul.f32 %v1342_v49, %v4748_v39  ;;  %v1643_v52 = vpop.f32.mrf.mxu2 }
 0x135   : > { %v3633_v62 = vpop.eup %3632  ;;  %3640 = vrcp.f32 %v1392_v31  ;;  %v2394_v63 = vadd.f32 2.0, %v2344_v53  ;;  %v867_v60 = vmul.f32 %v3627_v46, %v842_v18  ;;  %v2270_v7 = vadd.f32 1.0, %v3631_v56 }
 0x136   : > { %v3635_v4 = vpop.eup %3634  ;;  %v2493_v5 = vpack.c.bf16 %v2468_v57, %v2468_v57  ;;  %3642 = vrcp.f32 %v1893_v59  ;;  %v793_v13 = vadd.f32 1.0, %v3633_v62  ;;  %v1696_v21 = vsub.f32 0.0, %v4845_v14 }
 0x137   : > { %3644 = vrcp.f32 %v2394_v63  ;;  %v1318_v8 = vadd.f32 2.0, %v3635_v4  ;;  %v3637_v15 = vpop.eup %3636  ;;  %v917_v20 = vadd.f32 2.0, %v867_v60  ;;  %v1868_v17 = vmul.f32 %v1843_v51, %v4760_v2 }
 0x138   : > { %2519 = vst.msk [vmem:[%s4803_s12 + $0x8] sm:$0xf] %vm2516_vm3, %v2493_v5  ;;  %3646 = vrcp.f32 %v1769_v10  ;;  %v1269_v24 = vadd.f32 1.0, %v3637_v15  ;;  %v2197_v35 = vsub.f32 0.0, %v4851_v26  ;;  %v2369_v40 = vmul.f32 %v2344_v53, %v4773_v36 }
 0x139   : > { %v3639_v22 = vpop.eup %3638  ;;  %v1343_v23 = vmul.f32 %v3635_v4, %v1318_v8  ;;  %3648 = vrcp.f32 %v2270_v7  ;;  %v1226_v42 = vmul.f32 1.442695, %v1195_v19  ;;  %v892_v49 = vmul.f32 %v867_v60, %v4776_v37 }
 0x13a   : > { %v966_v29 = vmul.f32 %v3639_v22, %v891_v16  ;;  %3650 = vrcp.f32 %v917_v20  ;;  %v4860_v45 = vadd.f32 %v4677_v11, %v666_v27  ;;  %v1727_v51 = vmul.f32 1.442695, %v1696_v21  ;;  %v2144_v16 = vpop.f32.mrf.mxu3 }
 0x13b   : > { %v3641_v33 = vpop.eup %3640  ;;  %v1393_v34 = vadd.f32 2.0, %v1343_v23  ;;  %3652 = vrcp.f32 %v793_v13  ;;  %v1368_v50 = vmul.f32 %v1343_v23, %v4788_v6  ;;  %v2228_v53 = vmul.f32 1.442695, %v2197_v35  ;;  %v519_v35 = vld [vmem:[%s4603_s14 + $0x60] sm:$0xf] }
 0x13c   : > { %v3643_v30 = vpop.eup %3642  ;;  %v1442_v38 = vmul.f32 %v3641_v33, %v1367_v32  ;;  %3654 = vrcp.f32 %v1269_v24  ;;  %v4864_v55 = vadd.f32 %v4677_v11, %v1142_v43  ;;  %v720_v6 = vsub.f32 0.0, %v4860_v45  ;;  %v3054_v43 = vld [vmem:[%s4603_s14 + $0xc4] sm:$0xf] }
 0x13d   : > { %v3645_v44 = vpop.eup %3644  ;;  %v1943_v39 = vmul.f32 %v3643_v30, %v1868_v17  ;;  %3656 = vrcp.f32 %v1393_v34  ;;  %v4875_v34 = vadd.f32 %v4677_v11, %v2144_v16 }
 0x13e   : > { %v3647_v2 = vpop.eup %3646  ;;  %v1467_v46 = vmax.f32 %v966_v29, %v1442_v38  ;;  %3658 = vpow2.f32 %v1725_v54  ;;  %v2444_v57 = vmul.f32 %v3645_v44, %v2369_v40  ;;  %v4868_v54 = vadd.f32 %v4677_v11, %v1643_v52  ;;  %v669_v52 = vpop.f32.mrf.mxu0 }
 0x13f   : > { %v3649_v31 = vpop.eup %3648  ;;  %v1819_v36 = vadd.f32 2.0, %v3647_v2  ;;  %3660 = vpow2.f32 %v2226_v0  ;;  %v1196_v5 = vsub.f32 0.0, %v4864_v55  ;;  %v752_v29 = vmul.f32 1.442695, %v720_v6 }
 0x140   : > { %v3651_v56 = vpop.eup %3650  ;;  %v1968_v37 = vmax.f32 %v1467_v46, %v1943_v39  ;;  %v2320_v59 = vadd.f32 2.0, %v3649_v31  ;;  %3662 = vpow2.f32 %v750_v28  ;;  %v1697_v32 = vsub.f32 0.0, %v4868_v54  ;;  %v3140_v46 = vld [vmem:[%s4603_s14 + $0x128] sm:$0xf] }
 0x141   : > { %v3653_v18 = vpop.eup %3652  ;;  %v1844_v19 = vmul.f32 %v3647_v2, %v1819_v36  ;;  %3664 = vpow2.f32 %v1226_v42  ;;  %v967_v8 = vmul.f32 %v3651_v56, %v892_v49  ;;  %v1228_v42 = vmul.f32 1.442695, %v1196_v5 }
 0x142   : > { %v3655_v61 = vpop.eup %3654  ;;  %v2469_v62 = vmax.f32 %v1968_v37, %v2444_v57  ;;  %v2345_v63 = vmul.f32 %v3649_v31, %v2320_v59  ;;  %v843_v10 = vadd.f32 2.0, %v3653_v18  ;;  %3666 = vpow2.f32 %v1727_v51  ;;  %v1145_v31 = vpop.f32.mrf.mxu1 }
 0x143   : > { %v3657_v0 = vpop.eup %3656  ;;  %v1894_v3 = vadd.f32 2.0, %v1844_v19  ;;  %v1319_v4 = vadd.f32 2.0, %v3655_v61  ;;  %3668 = vpow2.f32 %v2228_v53  ;;  %v1869_v38 = vmul.f32 %v1844_v19, %v4791_v48  ;;  %v3226_v19 = vld [vmem:[%s4603_s14 + $0x18c] sm:$0xf] }
 0x144   : > { %v3659_v60 = vpop.eup %3658  ;;  %v2494_v7 = vpack.c.bf16 %v2469_v62, %v2469_v62  ;;  %v1443_v13 = vmul.f32 %v3657_v0, %v1368_v50  ;;  %v2395_v15 = vadd.f32 2.0, %v2345_v63  ;;  %v868_v22 = vmul.f32 %v3653_v18, %v843_v10 }
 0x145   : > { %v3661_v20 = vpop.eup %3660  ;;  %3670 = vrcp.f32 %v1894_v3  ;;  %v1344_v23 = vmul.f32 %v3655_v61, %v1319_v4  ;;  %v1770_v24 = vadd.f32 1.0, %v3659_v60  ;;  %v2370_v49 = vmul.f32 %v2345_v63, %v4794_v9 }
 0x146   : > { %v3663_v28 = vpop.eup %3662  ;;  %2520 = vst.msk [vmem:[%s4803_s12 + $0xc] sm:$0xf] %vm2516_vm3, %v2494_v7  ;;  %3672 = vrcp.f32 %v2395_v15  ;;  %v918_v27 = vadd.f32 2.0, %v868_v22  ;;  %v2271_v17 = vadd.f32 1.0, %v3661_v20  ;;  %v1468_v39 = vmax.f32 %v967_v8, %v1443_v13  ;;  %v1646_v8 = vpop.f32.mrf.mxu2 }
 0x147   : > { %v3665_v21 = vpop.eup %3664  ;;  %v1394_v33 = vadd.f32 2.0, %v1344_v23  ;;  %3674 = vrcp.f32 %v1770_v24  ;;  %v794_v40 = vadd.f32 1.0, %v3663_v28  ;;  %v1729_v51 = vmul.f32 1.442695, %v1697_v32 }
 0x148   : > { %v3667_v30 = vpop.eup %3666  ;;  %3676 = vrcp.f32 %v918_v27  ;;  %v1270_v2 = vadd.f32 1.0, %v3665_v21  ;;  %v574_v36 = vunpack.c.l.b16 %v519_v35  ;;  %v2198_v56 = vsub.f32 0.0, %v4875_v34 }
 0x149   : > { %v3669_v44 = vpop.eup %3668  ;;  %3678 = vrcp.f32 %v1394_v33  ;;  %v1771_v50 = vadd.f32 1.0, %v3667_v30  ;;  %v1063_v37 = vunpack.c.l.b16 %v3054_v43  ;;  %v1564_v18 = vunpack.c.l.b16 %v3140_v46  ;;  %v2147_v30 = vpop.f32.mrf.mxu3 }
 0x14a   : > { %3680 = vrcp.f32 %v2271_v17  ;;  %v2272_v48 = vadd.f32 1.0, %v3669_v44  ;;  %v587_v9 = vpack.c.b16 %v574_v36, %v574_v36  ;;  %v4885_v61 = vadd.f32 %v4677_v11, %v669_v52 }
 0x14b   : > { %v3671_v53 = vpop.eup %3670  ;;  %3682 = vrcp.f32 %v794_v40  ;;  %v4888_v62 = vadd.f32 %v4677_v11, %v1145_v31  ;;  %v1076_v0 = vpack.c.b16 %v1063_v37, %v1063_v37  ;;  %v1577_v3 = vpack.c.b16 %v1564_v18, %v1564_v18  ;;  %v4903_v31 = vld [vmem:[#allocation5] ss:$0 sm:$0xff] }
 0x14c   : > { %v3673_v57 = vpop.eup %3672  ;;  %v1944_v59 = vmul.f32 %v3671_v53, %v1869_v38  ;;  %3684 = vrcp.f32 %v1270_v2  ;;  %3029 = vmatmul.msk.bf16.gmra.mxu0 %vm593_vm2, %v587_v9  ;;  %v893_v5 = vmul.f32 %v868_v22, %v4817_v47  ;;  %v2065_v7 = vunpack.c.l.b16 %v3226_v19  ;;  %v671_v19 = vpop.f32.mrf.mxu0 }
 0x14d   : > { %v2445_v6 = vmul.f32 %v3673_v57, %v2370_v49  ;;  %v3675_v63 = vpop.eup %3674  ;;  %3686 = vrcp.f32 %v1771_v50  ;;  %v1369_v16 = vmul.f32 %v1344_v23, %v4821_v58  ;;  %v2230_v20 = vmul.f32 1.442695, %v2198_v56  ;;  %3115 = vmatmul.msk.bf16.gmra.mxu1 %vm593_vm2, %v1076_v0  ;;  %3201 = vmatmul.msk.bf16.gmra.mxu2 %vm593_vm2, %v1577_v3  ;;  %v1147_v0 = vpop.f32.mrf.mxu1 }
 0x14e   : > { %v1969_v10 = vmax.f32 %v1468_v39, %v1944_v59  ;;  %v3677_v4 = vpop.eup %3676  ;;  %v1820_v60 = vadd.f32 2.0, %v3675_v63  ;;  %3688 = vrcp.f32 %v2272_v48  ;;  %v721_v47 = vsub.f32 0.0, %v4885_v61  ;;  %v1648_v3 = vpop.f32.mrf.mxu2 }
 0x14f   : > { %v3679_v13 = vpop.eup %3678  ;;  %3690 = vpow2.f32 %v752_v29  ;;  %v2078_v22 = vpack.c.b16 %v2065_v7, %v2065_v7  ;;  %v1197_v33 = vsub.f32 0.0, %v4888_v62  ;;  %v968_v23 = vmul.f32 %v3677_v4, %v893_v5 }
 0x150   : > { %v2470_v15 = vmax.f32 %v1969_v10, %v2445_v6  ;;  %v3681_v24 = vpop.eup %3680  ;;  %v1845_v28 = vmul.f32 %v3675_v63, %v1820_v60  ;;  %3692 = vpow2.f32 %v1228_v42  ;;  %v4899_v35 = vadd.f32 %v4677_v11, %v1646_v8 }
 0x151   : > { %v3683_v32 = vpop.eup %3682  ;;  %v2321_v27 = vadd.f32 2.0, %v3681_v24  ;;  %3694 = vpow2.f32 %v1729_v51  ;;  %3287 = vmatmul.msk.bf16.gmra.mxu3 %vm593_vm2, %v2078_v22  ;;  %v1444_v40 = vmul.f32 %v3679_v13, %v1369_v16  ;;  %v754_v2 = vmul.f32 1.442695, %v721_v47 }
 0x152   : > { %v2495_v21 = vpack.c.bf16 %v2470_v15, %v2470_v15  ;;  %v3685_v58 = vpop.eup %3684  ;;  %v1895_v29 = vadd.f32 2.0, %v1845_v28  ;;  %v844_v17 = vadd.f32 2.0, %v3683_v32  ;;  %3696 = vpow2.f32 %v2230_v20 }
 0x153   : > { %v3687_v38 = vpop.eup %3686  ;;  %v2346_v42 = vmul.f32 %v3681_v24, %v2321_v27  ;;  %v1320_v43 = vadd.f32 2.0, %v3685_v58  ;;  %v4906_v11 = vadd.f32 %v4903_v31, %v2147_v30  ;;  %v1230_v56 = vmul.f32 1.442695, %v1197_v33 }
 0x154   : > { %2521 = vst.msk [vmem:[%s4803_s12 + $0x10] sm:$0xf] %vm2516_vm3, %v2495_v21  ;;  %v3689_v44 = vpop.eup %3688  ;;  %3698 = vrcp.f32 %v1895_v29  ;;  %v869_v39 = vmul.f32 %v3683_v32, %v844_v17  ;;  %v1821_v49 = vadd.f32 2.0, %v3687_v38  ;;  %v1698_v37 = vsub.f32 0.0, %v4899_v35 }
 0x155   : > { %v3691_v46 = vpop.eup %3690  ;;  %v2396_v50 = vadd.f32 2.0, %v2346_v42  ;;  %v1345_v51 = vmul.f32 %v3685_v58, %v1320_v43  ;;  %v2322_v52 = vadd.f32 2.0, %v3689_v44  ;;  %v1469_v59 = vmax.f32 %v968_v23, %v1444_v40 }
 0x156   : > { %v3693_v36 = vpop.eup %3692  ;;  %v919_v53 = vadd.f32 2.0, %v869_v39  ;;  %v1846_v48 = vmul.f32 %v3687_v38, %v1821_v49  ;;  %v1870_v6 = vmul.f32 %v1845_v28, %v4827_v1  ;;  %v795_v10 = vadd.f32 1.0, %v3691_v46 }
 0x157   : > { %v3695_v57 = vpop.eup %3694  ;;  %3700 = vrcp.f32 %v2396_v50  ;;  %v1395_v9 = vadd.f32 2.0, %v1345_v51  ;;  %v2347_v18 = vmul.f32 %v3689_v44, %v2322_v52  ;;  %v1271_v60 = vadd.f32 1.0, %v3693_v36 }
 0x158   : > { %3702 = vrcp.f32 %v919_v53  ;;  %v1896_v63 = vadd.f32 2.0, %v1846_v48  ;;  %v3697_v4 = vpop.eup %3696  ;;  %v2199_v7 = vsub.f32 0.0, %v4906_v11  ;;  %v1772_v13 = vadd.f32 1.0, %v3695_v57 }
 0x159   : > { %3704 = vrcp.f32 %v1395_v9  ;;  %v2397_v5 = vadd.f32 2.0, %v2347_v18  ;;  %v2273_v15 = vadd.f32 1.0, %v3697_v4  ;;  %v4912_v16 = vadd.f32 %v4903_v31, %v671_v19 }
 0x15a   : > { %v3699_v8 = vpop.eup %3698  ;;  %3706 = vrcp.f32 %v1896_v63  ;;  %v4915_v1 = vadd.f32 %v4903_v31, %v1147_v0  ;;  %v4918_v24 = vadd.f32 %v4903_v31, %v1648_v3  ;;  %v2371_v28 = vmul.f32 %v2346_v42, %v4833_v25 }
 0x15b   : > { %v1945_v20 = vmul.f32 %v3699_v8, %v1870_v6  ;;  %3708 = vrcp.f32 %v2397_v5  ;;  %v1731_v47 = vmul.f32 1.442695, %v1698_v37  ;;  %v722_v22 = vsub.f32 0.0, %v4912_v16  ;;  %v1150_v5 = vpop.f32.mrf.mxu1 }
 0x15c   : > { %3710 = vrcp.f32 %v795_v10  ;;  %v894_v27 = vmul.f32 %v869_v39, %v4836_v12  ;;  %v1198_v33 = vsub.f32 0.0, %v4915_v1  ;;  %v1370_v29 = vmul.f32 %v1345_v51, %v4839_v41  ;;  %v674_v10 = vpop.f32.mrf.mxu0 }
 0x15d   : > { %v3701_v32 = vpop.eup %3700  ;;  %v1970_v21 = vmax.f32 %v1469_v59, %v1945_v20  ;;  %3712 = vrcp.f32 %v1271_v60  ;;  %v1699_v17 = vsub.f32 0.0, %v4918_v24  ;;  %v1871_v38 = vmul.f32 %v1846_v48, %v4845_v14  ;;  %v1651_v20 = vpop.f32.mrf.mxu2 }
 0x15e   : > { %v3703_v58 = vpop.eup %3702  ;;  %v2446_v23 = vmul.f32 %v3701_v32, %v2371_v28  ;;  %3714 = vrcp.f32 %v1772_v13  ;;  %v2232_v40 = vmul.f32 1.442695, %v2199_v7  ;;  %v756_v12 = vmul.f32 1.442695, %v722_v22 }
 0x15f   : > { %v3705_v30 = vpop.eup %3704  ;;  %v969_v25 = vmul.f32 %v3703_v58, %v894_v27  ;;  %3716 = vrcp.f32 %v2273_v15  ;;  %v2372_v46 = vmul.f32 %v2347_v18, %v4851_v26  ;;  %v1232_v41 = vmul.f32 1.442695, %v1198_v33 }
 0x160   : > { %v3707_v42 = vpop.eup %3706  ;;  %v2471_v43 = vmax.f32 %v1970_v21, %v2446_v23  ;;  %v1445_v44 = vmul.f32 %v3705_v30, %v1370_v29  ;;  %3718 = vpow2.f32 %v754_v2  ;;  %v1733_v36 = vmul.f32 1.442695, %v1699_v17 }
 0x161   : > { %v3709_v39 = vpop.eup %3708  ;;  %v1946_v49 = vmul.f32 %v3707_v42, %v1871_v38  ;;  %3720 = vpow2.f32 %v1230_v56  ;;  %v2149_v56 = vpop.f32.mrf.mxu3  ;;  %v4934_v32 = vadd.f32 %v4903_v31, %v674_v10  ;;  %v4939_v58 = vadd.f32 %v4903_v31, %v1150_v5 }
 0x162   : > { %v3711_v50 = vpop.eup %3710  ;;  %v2496_v51 = vpack.c.bf16 %v2471_v43, %v2471_v43  ;;  %v1470_v52 = vmax.f32 %v969_v25, %v1445_v44  ;;  %3722 = vpow2.f32 %v1731_v47  ;;  %v2447_v37 = vmul.f32 %v3709_v39, %v2372_v46 }
 0x163   : > { %v3713_v14 = vpop.eup %3712  ;;  %v845_v53 = vadd.f32 2.0, %v3711_v50  ;;  %3724 = vpow2.f32 %v2232_v40  ;;  %v4931_v15 = vadd.f32 %v4903_v31, %v2149_v56  ;;  %v4942_v17 = vadd.f32 %v4903_v31, %v1651_v20 }
 0x164   : > { %v3715_v48 = vpop.eup %3714  ;;  %2522 = vst.msk [vmem:[%s4803_s12 + $0x14] sm:$0xf] %vm2516_vm3, %v2496_v51  ;;  %v1971_v2 = vmax.f32 %v1470_v52, %v1946_v49  ;;  %v1321_v57 = vadd.f32 2.0, %v3713_v14  ;;  %3726 = vpow2.f32 %v756_v12  ;;  %v723_v42 = vsub.f32 0.0, %v4934_v32 }
 0x165   : > { %v3717_v59 = vpop.eup %3716  ;;  %v870_v9 = vmul.f32 %v3711_v50, %v845_v53  ;;  %v1822_v26 = vadd.f32 2.0, %v3715_v48  ;;  %3728 = vpow2.f32 %v1232_v41  ;;  %v2200_v38 = vsub.f32 0.0, %v4931_v15 }
 0x166   : > { %v3719_v18 = vpop.eup %3718  ;;  %v2472_v19 = vmax.f32 %v1971_v2, %v2447_v37  ;;  %v1346_v6 = vmul.f32 %v3713_v14, %v1321_v57  ;;  %v2323_v63 = vadd.f32 2.0, %v3717_v59  ;;  %3730 = vpow2.f32 %v1733_v36  ;;  %v676_v2 = vpop.f32.mrf.mxu0 }
 0x167   : > { %v3721_v0 = vpop.eup %3720  ;;  %v920_v3 = vadd.f32 2.0, %v870_v9  ;;  %v1847_v4 = vmul.f32 %v3715_v48, %v1822_v26  ;;  %v796_v22 = vadd.f32 1.0, %v3719_v18  ;;  %v895_v43 = vmul.f32 %v870_v9, %v4860_v45  ;;  %v1152_v18 = vpop.f32.mrf.mxu1 }
 0x168   : > { %v3723_v60 = vpop.eup %3722  ;;  %v2497_v7 = vpack.c.bf16 %v2472_v19, %v2472_v19  ;;  %v1396_v8 = vadd.f32 2.0, %v1346_v6  ;;  %v2348_v13 = vmul.f32 %v3717_v59, %v2323_v63  ;;  %v1272_v33 = vadd.f32 1.0, %v3721_v0 }
 0x169   : > { %v3725_v28 = vpop.eup %3724  ;;  %3732 = vrcp.f32 %v920_v3  ;;  %v1897_v47 = vadd.f32 2.0, %v1847_v4  ;;  %v1773_v29 = vadd.f32 1.0, %v3723_v60  ;;  %v1199_v12 = vsub.f32 0.0, %v4939_v58  ;;  %v2152_v50 = vpop.f32.mrf.mxu3 }
 0x16a   : > { %v3727_v21 = vpop.eup %3726  ;;  %2523 = vst.msk [vmem:[%s4803_s12 + $0x18] sm:$0xf] %vm2516_vm3, %v2497_v7  ;;  %3734 = vrcp.f32 %v1396_v8  ;;  %v2398_v27 = vadd.f32 2.0, %v2348_v13  ;;  %v2274_v25 = vadd.f32 1.0, %v3725_v28  ;;  %v1371_v49 = vmul.f32 %v1346_v6, %v4864_v55 }
 0x16b   : > { %v3729_v23 = vpop.eup %3728  ;;  %3736 = vrcp.f32 %v1897_v47  ;;  %v797_v40 = vadd.f32 1.0, %v3727_v21  ;;  %v1700_v41 = vsub.f32 0.0, %v4942_v17  ;;  %v1872_v36 = vmul.f32 %v1847_v4, %v4868_v54  ;;  %v1653_v47 = vpop.f32.mrf.mxu2 }
 0x16c   : > { %v3731_v30 = vpop.eup %3730  ;;  %3738 = vrcp.f32 %v2398_v27  ;;  %v1273_v44 = vadd.f32 1.0, %v3729_v23  ;;  %v2234_v14 = vmul.f32 1.442695, %v2200_v38  ;;  %v758_v48 = vmul.f32 1.442695, %v723_v42 }
 0x16d   : > { %3740 = vrcp.f32 %v796_v22  ;;  %v1774_v46 = vadd.f32 1.0, %v3731_v30  ;;  %v1234_v55 = vmul.f32 1.442695, %v1199_v12  ;;  %v2373_v26 = vmul.f32 %v2348_v13, %v4875_v34 }
 0x16e   : > { %3742 = vrcp.f32 %v1272_v33  ;;  %v1735_v56 = vmul.f32 1.442695, %v1700_v41  ;;  %v4953_v6 = vadd.f32 %v4903_v31, %v2152_v50  ;;  %v4956_v63 = vadd.f32 %v4903_v31, %v676_v2 }
 0x16f   : > { %v3733_v39 = vpop.eup %3732  ;;  %3744 = vrcp.f32 %v1773_v29  ;;  %v4959_v7 = vadd.f32 %v4903_v31, %v1152_v18 }
 0x170   : > { %v3735_v51 = vpop.eup %3734  ;;  %v970_v52 = vmul.f32 %v3733_v39, %v895_v43  ;;  %3746 = vrcp.f32 %v2274_v25  ;;  %v2201_v23 = vsub.f32 0.0, %v4953_v6  ;;  %v4964_v39 = vadd.f32 %v4903_v31, %v1653_v47 }
 0x171   : > { %v3737_v53 = vpop.eup %3736  ;;  %v1446_v45 = vmul.f32 %v3735_v51, %v1371_v49  ;;  %3748 = vrcp.f32 %v797_v40  ;;  %v724_v40 = vsub.f32 0.0, %v4956_v63  ;;  %v2154_v42 = vpop.f32.mrf.mxu3  ;;  %v1200_v50 = vsub.f32 0.0, %v4959_v7 }
 0x172   : > { %v3739_v37 = vpop.eup %3738  ;;  %v1947_v57 = vmul.f32 %v3737_v53, %v1872_v36  ;;  %3750 = vrcp.f32 %v1273_v44 }
 0x173   : > { %v3741_v59 = vpop.eup %3740  ;;  %v1471_v9 = vmax.f32 %v970_v52, %v1446_v45  ;;  %3752 = vrcp.f32 %v1774_v46  ;;  %v2448_v3 = vmul.f32 %v3739_v37, %v2373_v26 }
 0x174   : > { %v3743_v19 = vpop.eup %3742  ;;  %v846_v54 = vadd.f32 2.0, %v3741_v59  ;;  %3754 = vpow2.f32 %v2234_v14  ;;  %v4970_v14 = vadd.f32 %v4903_v31, %v2154_v42 }
 0x175   : > { %v3745_v10 = vpop.eup %3744  ;;  %v1972_v0 = vmax.f32 %v1471_v9, %v1947_v57  ;;  %v1322_v4 = vadd.f32 2.0, %v3743_v19  ;;  %3756 = vpow2.f32 %v758_v48  ;;  %v2236_v57 = vmul.f32 1.442695, %v2201_v23 }
 0x176   : > { %v3747_v5 = vpop.eup %3746  ;;  %v871_v60 = vmul.f32 %v3741_v59, %v846_v54  ;;  %v1823_v34 = vadd.f32 2.0, %v3745_v10  ;;  %3758 = vpow2.f32 %v1234_v55  ;;  %v1701_v55 = vsub.f32 0.0, %v4964_v39 }
 0x177   : > { %v3749_v8 = vpop.eup %3748  ;;  %v2473_v13 = vmax.f32 %v1972_v0, %v2448_v3  ;;  %v1347_v20 = vmul.f32 %v3743_v19, %v1322_v4  ;;  %v2324_v28 = vadd.f32 2.0, %v3747_v5  ;;  %3760 = vpow2.f32 %v1735_v56 }
 0x178   : > { %v3751_v22 = vpop.eup %3750  ;;  %v921_v21 = vadd.f32 2.0, %v871_v60  ;;  %v1848_v27 = vmul.f32 %v3745_v10, %v1823_v34  ;;  %v847_v33 = vadd.f32 2.0, %v3749_v8  ;;  %v896_v59 = vmul.f32 %v871_v60, %v4885_v61 }
 0x179   : > { %v3753_v29 = vpop.eup %3752  ;;  %v2498_v30 = vpack.c.bf16 %v2473_v13, %v2473_v13  ;;  %v1397_v25 = vadd.f32 2.0, %v1347_v20  ;;  %v2349_v38 = vmul.f32 %v3747_v5, %v2324_v28  ;;  %v1323_v41 = vadd.f32 2.0, %v3751_v22  ;;  %v679_v5 = vpop.f32.mrf.mxu0 }
 0x17a   : > { %v3755_v43 = vpop.eup %3754  ;;  %3762 = vrcp.f32 %v921_v21  ;;  %v1898_v44 = vadd.f32 2.0, %v1848_v27  ;;  %v872_v12 = vmul.f32 %v3749_v8, %v847_v33  ;;  %v1824_v36 = vadd.f32 2.0, %v3753_v29  ;;  %v1155_v33 = vpop.f32.mrf.mxu1 }
 0x17b   : > { %v3757_v49 = vpop.eup %3756  ;;  %2524 = vst.msk [vmem:[%s4803_s12 + $0x1c] sm:$0xf] %vm2516_vm3, %v2498_v30  ;;  %3764 = vrcp.f32 %v1397_v25  ;;  %v2399_v46 = vadd.f32 2.0, %v2349_v38  ;;  %v1348_v45 = vmul.f32 %v3751_v22, %v1323_v41  ;;  %v2275_v48 = vadd.f32 1.0, %v3755_v43 }
 0x17c   : > { %v3759_v51 = vpop.eup %3758  ;;  %3766 = vrcp.f32 %v1898_v44  ;;  %v922_v52 = vadd.f32 2.0, %v872_v12  ;;  %v798_v2 = vadd.f32 1.0, %v3757_v49  ;;  %v4972_v37 = vmul.f32 %v3753_v29, %v1824_v36 }
 0x17d   : > { %v3761_v53 = vpop.eup %3760  ;;  %3768 = vrcp.f32 %v2399_v46  ;;  %v1398_v9 = vadd.f32 2.0, %v1348_v45  ;;  %v1274_v26 = vadd.f32 1.0, %v3759_v51  ;;  %v1372_v18 = vmul.f32 %v1347_v20, %v4888_v62 }
 0x17e   : > { %3770 = vrcp.f32 %v922_v52  ;;  %v1899_v19 = vadd.f32 2.0, %v4972_v37  ;;  %v1775_v54 = vadd.f32 1.0, %v3761_v53  ;;  %v1873_v3 = vmul.f32 %v1848_v27, %v4899_v35 }
 0x17f   : > { %3772 = vrcp.f32 %v2275_v48  ;;  %v2202_v4 = vsub.f32 0.0, %v4970_v14  ;;  %v760_v60 = vmul.f32 1.442695, %v724_v40  ;;  %v1236_v62 = vmul.f32 1.442695, %v1200_v50 }
 0x180   : > { %v3763_v56 = vpop.eup %3762  ;;  %3774 = vrcp.f32 %v798_v2  ;;  %v2374_v47 = vmul.f32 %v2349_v38, %v4906_v11  ;;  %v1737_v22 = vmul.f32 1.442695, %v1701_v55  ;;  %v4982_v27 = vadd.f32 %v4903_v31, %v679_v5  ;;  %v1656_v11 = vpop.f32.mrf.mxu2 }
 0x181   : > { %v3765_v10 = vpop.eup %3764  ;;  %v971_v0 = vmul.f32 %v3763_v56, %v896_v59  ;;  %3776 = vrcp.f32 %v1398_v9  ;;  %v2238_v35 = vmul.f32 1.442695, %v2202_v4  ;;  %v897_v42 = vmul.f32 %v872_v12, %v4912_v16  ;;  %v2157_v16 = vpop.f32.mrf.mxu3 }
 0x182   : > { %v3767_v34 = vpop.eup %3766  ;;  %v1447_v61 = vmul.f32 %v3765_v10, %v1372_v18  ;;  %3778 = vrcp.f32 %v1899_v19  ;;  %v1373_v49 = vmul.f32 %v1348_v45, %v4915_v1  ;;  %v725_v51 = vsub.f32 0.0, %v4982_v27  ;;  %v681_v9 = vpop.f32.mrf.mxu0 }
 0x183   : > { %v3769_v8 = vpop.eup %3768  ;;  %v1948_v13 = vmul.f32 %v3767_v34, %v1873_v3  ;;  %3780 = vrcp.f32 %v1274_v26  ;;  %v4990_v52 = vadd.f32 %v4903_v31, %v1155_v33  ;;  %v1874_v1 = vmul.f32 %v4972_v37, %v4918_v24 }
 0x184   : > { %v3771_v20 = vpop.eup %3770  ;;  %v1472_v28 = vmax.f32 %v971_v0, %v1447_v61  ;;  %3782 = vrcp.f32 %v1775_v54  ;;  %v2449_v30 = vmul.f32 %v3769_v8, %v2374_v47  ;;  %v4998_v18 = vadd.f32 %v4903_v31, %v1656_v11 }
 0x185   : > { %v3773_v21 = vpop.eup %3772  ;;  %3784 = vpow2.f32 %v2236_v57  ;;  %v972_v53 = vmul.f32 %v3771_v20, %v897_v42  ;;  %v5001_v19 = vadd.f32 %v4903_v31, %v2157_v16  ;;  %v1201_v5 = vsub.f32 0.0, %v4990_v52 }
 0x186   : > { %v3775_v23 = vpop.eup %3774  ;;  %v1973_v29 = vmax.f32 %v1472_v28, %v1948_v13  ;;  %v2325_v25 = vadd.f32 2.0, %v3773_v21  ;;  %3786 = vpow2.f32 %v760_v60  ;;  %v5005_v34 = vadd.f32 %v4903_v31, %v681_v9 }
 0x187   : > { %v3777_v40 = vpop.eup %3776  ;;  %v848_v43 = vadd.f32 2.0, %v3775_v23  ;;  %3788 = vpow2.f32 %v1236_v62  ;;  %v1157_v62 = vpop.f32.mrf.mxu1  ;;  %v1702_v28 = vsub.f32 0.0, %v4998_v18  ;;  %v2203_v47 = vsub.f32 0.0, %v5001_v19 }
 0x188   : > { %v3779_v38 = vpop.eup %3778  ;;  %v2474_v44 = vmax.f32 %v1973_v29, %v2449_v30  ;;  %v2350_v46 = vmul.f32 %v3773_v21, %v2325_v25  ;;  %3790 = vpow2.f32 %v1737_v22  ;;  %v1448_v48 = vmul.f32 %v3777_v40, %v1373_v49  ;;  %v1658_v33 = vpop.f32.mrf.mxu2 }
 0x189   : > { %v3781_v41 = vpop.eup %3780  ;;  %v4986_v50 = vmul.f32 %v3775_v23, %v848_v43  ;;  %3792 = vpow2.f32 %v2238_v35  ;;  %v1949_v10 = vmul.f32 %v3779_v38, %v1874_v1  ;;  %v762_v29 = vmul.f32 1.442695, %v725_v51  ;;  %v2159_v43 = vpop.f32.mrf.mxu3 }
 0x18a   : > { %v3783_v12 = vpop.eup %3782  ;;  %v2499_v36 = vpack.c.bf16 %v2474_v44, %v2474_v44  ;;  %v2400_v2 = vadd.f32 2.0, %v2350_v46  ;;  %v1324_v55 = vadd.f32 2.0, %v3781_v41  ;;  %v1473_v4 = vmax.f32 %v972_v53, %v1448_v48  ;;  %v684_v53 = vpop.f32.mrf.mxu0 }
 0x18b   : > { %v3785_v57 = vpop.eup %3784  ;;  %v923_v45 = vadd.f32 2.0, %v4986_v50  ;;  %v1825_v59 = vadd.f32 2.0, %v3783_v12  ;;  %v2375_v21 = vmul.f32 %v2350_v46, %v4931_v15  ;;  %v726_v30 = vsub.f32 0.0, %v5005_v34 }
 0x18c   : > { %v3787_v26 = vpop.eup %3786  ;;  %2525 = vst.msk [vmem:[%s4803_s12 + $0x20] sm:$0xf] %vm2516_vm3, %v2499_v36  ;;  %3794 = vrcp.f32 %v2400_v2  ;;  %v2276_v56 = vadd.f32 1.0, %v3785_v57  ;;  %v1349_v0 = vmul.f32 %v3781_v41, %v1324_v55  ;;  %v1974_v22 = vmax.f32 %v1473_v4, %v1949_v10 }
 0x18d   : > { %v3789_v54 = vpop.eup %3788  ;;  %v1850_v24 = vmul.f32 %v3783_v12, %v1825_v59  ;;  %v799_v37 = vadd.f32 1.0, %v3787_v26  ;;  %v5012_v25 = vadd.f32 %v4903_v31, %v1157_v62  ;;  %v1238_v42 = vmul.f32 1.442695, %v1201_v5 }
 0x18e   : > { %v3791_v3 = vpop.eup %3790  ;;  %3796 = vrcp.f32 %v2276_v56  ;;  %v1399_v60 = vadd.f32 2.0, %v1349_v0  ;;  %v1275_v13 = vadd.f32 1.0, %v3789_v54  ;;  %v1739_v38 = vmul.f32 1.442695, %v1702_v28 }
 0x18f   : > { %v3793_v61 = vpop.eup %3792  ;;  %3798 = vrcp.f32 %v923_v45  ;;  %v1900_v8 = vadd.f32 2.0, %v1850_v24  ;;  %v1776_v20 = vadd.f32 1.0, %v3791_v3  ;;  %v5015_v15 = vadd.f32 %v4903_v31, %v1658_v33 }
 0x190   : > { %3800 = vrcp.f32 %v799_v37  ;;  %v2277_v35 = vadd.f32 1.0, %v3793_v61  ;;  %v2240_v41 = vmul.f32 1.442695, %v2203_v47  ;;  %v764_v16 = vmul.f32 1.442695, %v726_v30 }
 0x191   : > { %3802 = vrcp.f32 %v1399_v60  ;;  %v1202_v12 = vsub.f32 0.0, %v5012_v25  ;;  %v5019_v36 = vadd.f32 %v4903_v31, %v2159_v43  ;;  %v898_v55 = vmul.f32 %v4986_v50, %v4934_v32  ;;  %v1160_v32 = vpop.f32.mrf.mxu1 }
 0x192   : > { %v3795_v23 = vpop.eup %3794  ;;  %3804 = vrcp.f32 %v1900_v8  ;;  %v1374_v59 = vmul.f32 %v1349_v0, %v4939_v58  ;;  %v1703_v9 = vsub.f32 0.0, %v5015_v15  ;;  %v1875_v56 = vmul.f32 %v1850_v24, %v4942_v17 }
 0x193   : > { %v2450_v40 = vmul.f32 %v3795_v23, %v2375_v21  ;;  %3806 = vrcp.f32 %v1275_v13  ;;  %v5029_v37 = vadd.f32 %v4903_v31, %v684_v53  ;;  %v2204_v60 = vsub.f32 0.0, %v5019_v36 }
 0x194   : > { %v3797_v11 = vpop.eup %3796  ;;  %3808 = vrcp.f32 %v1776_v20  ;;  %v5033_v47 = vadd.f32 %v4903_v31, %v1160_v32  ;;  %v1240_v53 = vmul.f32 1.442695, %v1202_v12 }
 0x195   : > { %v3799_v44 = vpop.eup %3798  ;;  %v2475_v49 = vmax.f32 %v1974_v22, %v2450_v40  ;;  %v2326_v46 = vadd.f32 2.0, %v3797_v11  ;;  %3810 = vrcp.f32 %v2277_v35  ;;  %v727_v23 = vsub.f32 0.0, %v5029_v37 }
 0x196   : > { %v3801_v51 = vpop.eup %3800  ;;  %3812 = vpow2.f32 %v762_v29  ;;  %v973_v4 = vmul.f32 %v3799_v44, %v898_v55  ;;  %v1661_v29 = vpop.f32.mrf.mxu2  ;;  %v2242_v55 = vmul.f32 1.442695, %v2204_v60 }
 0x197   : > { %v3803_v48 = vpop.eup %3802  ;;  %v2500_v2 = vpack.c.bf16 %v2475_v49, %v2475_v49  ;;  %v2351_v57 = vmul.f32 %v3797_v11, %v2326_v46  ;;  %v849_v1 = vadd.f32 2.0, %v3801_v51  ;;  %3814 = vpow2.f32 %v1238_v42 }
 0x198   : > { %v3805_v45 = vpop.eup %3804  ;;  %3816 = vpow2.f32 %v1739_v38  ;;  %v1449_v5 = vmul.f32 %v3803_v48, %v1374_v59  ;;  %v1741_v48 = vmul.f32 1.442695, %v1703_v9  ;;  %v766_v59 = vmul.f32 1.442695, %v727_v23  ;;  %v2162_v9 = vpop.f32.mrf.mxu3 }
 0x199   : > { %v3807_v26 = vpop.eup %3806  ;;  %2526 = vst.msk [vmem:[%s4803_s12 + $0x24] sm:$0xf] %vm2516_vm3, %v2500_v2  ;;  %v2401_v54 = vadd.f32 2.0, %v2351_v57  ;;  %v874_v10 = vmul.f32 %v3801_v51, %v849_v1  ;;  %3818 = vpow2.f32 %v2240_v41  ;;  %v1950_v13 = vmul.f32 %v3805_v45, %v1875_v56 }
 0x19a   : > { %v3809_v3 = vpop.eup %3808  ;;  %v1325_v61 = vadd.f32 2.0, %v3807_v26  ;;  %v1474_v21 = vmax.f32 %v973_v4, %v1449_v5  ;;  %v2376_v30 = vmul.f32 %v2351_v57, %v4953_v6  ;;  %v5038_v41 = vadd.f32 %v4903_v31, %v1661_v29 }
 0x19b   : > { %v3811_v58 = vpop.eup %3810  ;;  %3820 = vrcp.f32 %v2401_v54  ;;  %v924_v50 = vadd.f32 2.0, %v874_v10  ;;  %v1826_v0 = vadd.f32 2.0, %v3809_v3  ;;  %v899_v2 = vmul.f32 %v874_v10, %v4956_v63 }
 0x19c   : > { %v3813_v8 = vpop.eup %3812  ;;  %v1350_v17 = vmul.f32 %v3807_v26, %v1325_v61  ;;  %v2327_v24 = vadd.f32 2.0, %v3811_v58  ;;  %3822 = vpow2.f32 %v764_v16  ;;  %v1975_v11 = vmax.f32 %v1474_v21, %v1950_v13  ;;  %v686_v21 = vpop.f32.mrf.mxu0 }
 0x19d   : > { %v3815_v62 = vpop.eup %3814  ;;  %3824 = vrcp.f32 %v924_v50  ;;  %v1851_v20 = vmul.f32 %v3809_v3, %v1826_v0  ;;  %v800_v28 = vadd.f32 1.0, %v3813_v8  ;;  %v1203_v1 = vsub.f32 0.0, %v5033_v47 }
 0x19e   : > { %v3817_v22 = vpop.eup %3816  ;;  %v1400_v35 = vadd.f32 2.0, %v1350_v17  ;;  %v2352_v33 = vmul.f32 %v3811_v58, %v2327_v24  ;;  %v1276_v42 = vadd.f32 1.0, %v3815_v62  ;;  %v1375_v54 = vmul.f32 %v1350_v17, %v4959_v7 }
 0x19f   : > { %v1901_v40 = vadd.f32 2.0, %v1851_v20  ;;  %3826 = vrcp.f32 %v800_v28  ;;  %v3819_v43 = vpop.eup %3818  ;;  %v1777_v44 = vadd.f32 1.0, %v3817_v22  ;;  %v1704_v12 = vsub.f32 0.0, %v5038_v41 }
 0x1a0   : > { %3828 = vrcp.f32 %v1400_v35  ;;  %v2402_v38 = vadd.f32 2.0, %v2352_v33  ;;  %v2278_v46 = vadd.f32 1.0, %v3819_v43  ;;  %v1876_v63 = vmul.f32 %v1851_v20, %v4964_v39  ;;  %v1663_v43 = vpop.f32.mrf.mxu2 }
 0x1a1   : > { %v3821_v49 = vpop.eup %3820  ;;  %3830 = vrcp.f32 %v1901_v40  ;;  %v1242_v32 = vmul.f32 1.442695, %v1203_v1  ;;  %v2377_v8 = vmul.f32 %v2352_v33, %v4970_v14  ;;  %v1743_v13 = vmul.f32 1.442695, %v1704_v12 }
 0x1a2   : > { %v3823_v51 = vpop.eup %3822  ;;  %v2451_v16 = vmul.f32 %v3821_v49, %v2376_v30  ;;  %3832 = vrcp.f32 %v2402_v38  ;;  %v1162_v30 = vpop.f32.mrf.mxu1  ;;  %v5049_v49 = vadd.f32 %v4903_v31, %v2162_v9 }
 0x1a3   : > { %v3825_v6 = vpop.eup %3824  ;;  %3834 = vrcp.f32 %v1276_v42  ;;  %v801_v57 = vadd.f32 1.0, %v3823_v51 }
 0x1a4   : > { %v2476_v45 = vmax.f32 %v1975_v11, %v2451_v16  ;;  %3836 = vrcp.f32 %v1777_v44  ;;  %v974_v56 = vmul.f32 %v3825_v6, %v899_v2  ;;  %v5057_v6 = vadd.f32 %v4903_v31, %v1162_v30  ;;  %v2164_v2 = vpop.f32.mrf.mxu3 }
 0x1a5   : > { %v3827_v26 = vpop.eup %3826  ;;  %3838 = vrcp.f32 %v2278_v46  ;;  %v5052_v46 = vadd.f32 %v4903_v31, %v686_v21  ;;  %v2205_v9 = vsub.f32 0.0, %v5049_v49 }
 0x1a6   : > { %v3829_v3 = vpop.eup %3828  ;;  %v2501_v4 = vpack.c.bf16 %v2476_v45, %v2476_v45  ;;  %v850_v10 = vadd.f32 2.0, %v3827_v26  ;;  %3840 = vrcp.f32 %v801_v57 }
 0x1a7   : > { %v3831_v5 = vpop.eup %3830  ;;  %v1450_v61 = vmul.f32 %v3829_v3, %v1375_v54  ;;  %3842 = vpow2.f32 %v1240_v53  ;;  %v5067_v3 = vadd.f32 %v4903_v31, %v2164_v2 }
 0x1a8   : > { %v3833_v58 = vpop.eup %3832  ;;  %2527 = vst.msk [vmem:[%s4803_s12 + $0x28] sm:$0xf] %vm2516_vm3, %v2501_v4  ;;  %v1951_v50 = vmul.f32 %v3831_v5, %v1876_v63  ;;  %v875_v0 = vmul.f32 %v3827_v26, %v850_v10  ;;  %3844 = vpow2.f32 %v1741_v48  ;;  %v728_v5 = vsub.f32 0.0, %v5052_v46 }
 0x1a9   : > { %v3835_v7 = vpop.eup %3834  ;;  %v1475_v60 = vmax.f32 %v974_v56, %v1450_v61  ;;  %3846 = vpow2.f32 %v2242_v55  ;;  %v2452_v28 = vmul.f32 %v3833_v58, %v2377_v8  ;;  %v5060_v55 = vadd.f32 %v4903_v31, %v1663_v43 }
 0x1aa   : > { %v3837_v17 = vpop.eup %3836  ;;  %v925_v39 = vadd.f32 2.0, %v875_v0  ;;  %v1326_v24 = vadd.f32 2.0, %v3835_v7  ;;  %3848 = vpow2.f32 %v766_v59  ;;  %v900_v63 = vmul.f32 %v875_v0, %v4982_v27  ;;  %v1165_v43 = vpop.f32.mrf.mxu1 }
 0x1ab   : > { %v3839_v62 = vpop.eup %3838  ;;  %v1976_v20 = vmax.f32 %v1475_v60, %v1951_v50  ;;  %v1827_v22 = vadd.f32 2.0, %v3837_v17  ;;  %3850 = vpow2.f32 %v1242_v32  ;;  %v1204_v32 = vsub.f32 0.0, %v5057_v6 }
 0x1ac   : > { %v3841_v35 = vpop.eup %3840  ;;  %3852 = vrcp.f32 %v925_v39  ;;  %v1351_v23 = vmul.f32 %v3835_v7, %v1326_v24  ;;  %v2328_v29 = vadd.f32 2.0, %v3839_v62  ;;  %v1705_v58 = vsub.f32 0.0, %v5060_v55 }
 0x1ad   : > { %v3843_v40 = vpop.eup %3842  ;;  %v2477_v42 = vmax.f32 %v1976_v20, %v2452_v28  ;;  %v1852_v14 = vmul.f32 %v3837_v17, %v1827_v22  ;;  %v851_v33 = vadd.f32 2.0, %v3841_v35  ;;  %3854 = vpow2.f32 %v1743_v13 }
 0x1ae   : > { %v3845_v11 = vpop.eup %3844  ;;  %v1401_v38 = vadd.f32 2.0, %v1351_v23  ;;  %v2353_v44 = vmul.f32 %v3839_v62, %v2328_v29  ;;  %v1277_v45 = vadd.f32 1.0, %v3843_v40  ;;  %v1376_v7 = vmul.f32 %v1351_v23, %v4990_v52  ;;  %v689_v62 = vpop.f32.mrf.mxu0 }
 0x1af   : > { %v3847_v51 = vpop.eup %3846  ;;  %v2502_v16 = vpack.c.bf16 %v2477_v42, %v2477_v42  ;;  %v1902_v53 = vadd.f32 2.0, %v1852_v14  ;;  %v5054_v48 = vmul.f32 %v3841_v35, %v851_v33  ;;  %v1778_v56 = vadd.f32 1.0, %v3845_v11 }
 0x1b0   : > { %v3849_v57 = vpop.eup %3848  ;;  %3856 = vrcp.f32 %v1401_v38  ;;  %v2403_v1 = vadd.f32 2.0, %v2353_v44  ;;  %v2279_v12 = vadd.f32 1.0, %v3847_v51  ;;  %v1877_v13 = vmul.f32 %v1852_v14, %v4998_v18 }
 0x1b1   : > { %v3851_v59 = vpop.eup %3850  ;;  %2528 = vst.msk [vmem:[%s4803_s12 + $0x2c] sm:$0xf] %vm2516_vm3, %v2502_v16  ;;  %3858 = vrcp.f32 %v1902_v53  ;;  %v926_v26 = vadd.f32 2.0, %v5054_v48  ;;  %v802_v10 = vadd.f32 1.0, %v3849_v57  ;;  %v2244_v27 = vmul.f32 1.442695, %v2205_v9 }
 0x1b2   : > { %v3853_v54 = vpop.eup %3852  ;;  %3860 = vrcp.f32 %v2403_v1  ;;  %v1278_v61 = vadd.f32 1.0, %v3851_v59  ;;  %v2206_v0 = vsub.f32 0.0, %v5067_v3  ;;  %v768_v24 = vmul.f32 1.442695, %v728_v5 }
 0x1b3   : > { %v3855_v4 = vpop.eup %3854  ;;  %3862 = vrcp.f32 %v926_v26  ;;  %v975_v50 = vmul.f32 %v3853_v54, %v900_v63  ;;  %v1244_v22 = vmul.f32 1.442695, %v1204_v32  ;;  %v2378_v35 = vmul.f32 %v2353_v44, %v5001_v19 }
 0x1b4   : > { %3864 = vrcp.f32 %v1277_v45  ;;  %v1779_v60 = vadd.f32 1.0, %v3855_v4  ;;  %v1745_v18 = vmul.f32 1.442695, %v1705_v58  ;;  %v2246_v29 = vmul.f32 1.442695, %v2206_v0  ;;  %v1666_v45 = vpop.f32.mrf.mxu2 }
 0x1b5   : > { %3866 = vrcp.f32 %v1778_v56  ;;  %v5080_v30 = vadd.f32 %v4903_v31, %v689_v62  ;;  %v5082_v31 = vld [vmem:[#allocation5] ss:$0 sm:$0xff]  ;;  %v901_v4 = vmul.f32 %v5054_v48, %v5005_v34 }
 0x1b6   : > { %v3857_v8 = vpop.eup %3856  ;;  %3868 = vrcp.f32 %v2279_v12  ;;  %v5085_v1 = vadd.f32 %v5082_v31, %v1165_v43 }
 0x1b7   : > { %v3859_v17 = vpop.eup %3858  ;;  %v1451_v39 = vmul.f32 %v3857_v8, %v1376_v7  ;;  %3870 = vrcp.f32 %v802_v10  ;;  %v729_v12 = vsub.f32 0.0, %v5080_v30  ;;  %v5095_v7 = vadd.f32 %v5082_v31, %v1666_v45 }
 0x1b8   : > { %v3861_v20 = vpop.eup %3860  ;;  %v1952_v28 = vmul.f32 %v3859_v17, %v1877_v13  ;;  %3872 = vrcp.f32 %v1278_v61  ;;  %v2167_v61 = vpop.f32.mrf.mxu3  ;;  %v1205_v48 = vsub.f32 0.0, %v5085_v1 }
 0x1b9   : > { %v5076_v21 = vpop.eup %3862  ;;  %v1476_v52 = vmax.f32 %v975_v50, %v1451_v39  ;;  %3874 = vrcp.f32 %v1779_v60  ;;  %v2453_v14 = vmul.f32 %v3861_v20, %v2378_v35  ;;  %v691_v60 = vpop.f32.mrf.mxu0  ;;  %v5100_v39 = vadd.f32 %v5082_v31, %v2167_v61 }
 0x1ba   : > { %v3865_v23 = vpop.eup %3864  ;;  %3876 = vpow2.f32 %v2244_v27  ;;  %v1706_v35 = vsub.f32 0.0, %v5095_v7 }
 0x1bb   : > { %v3867_v40 = vpop.eup %3866  ;;  %v1977_v42 = vmax.f32 %v1476_v52, %v1952_v28  ;;  %v1327_v33 = vadd.f32 2.0, %v3865_v23  ;;  %3878 = vpow2.f32 %v768_v24  ;;  %v5103_v28 = vadd.f32 %v5082_v31, %v691_v60 }
 0x1bc   : > { %v3869_v11 = vpop.eup %3868  ;;  %v1828_v38 = vadd.f32 2.0, %v3867_v40  ;;  %3880 = vpow2.f32 %v1244_v22  ;;  %v2207_v43 = vsub.f32 0.0, %v5100_v39  ;;  %v1747_v45 = vmul.f32 1.442695, %v1706_v35 }
 0x1bd   : > { %v3871_v51 = vpop.eup %3870  ;;  %v2478_v16 = vmax.f32 %v1977_v42, %v2453_v14  ;;  %v1352_v19 = vmul.f32 %v3865_v23, %v1327_v33  ;;  %v2329_v44 = vadd.f32 2.0, %v3869_v11  ;;  %3882 = vpow2.f32 %v1745_v18 }
 0x1be   : > { %v3873_v53 = vpop.eup %3872  ;;  %v1853_v2 = vmul.f32 %v3867_v40, %v1828_v38  ;;  %v852_v57 = vadd.f32 2.0, %v3871_v51  ;;  %3884 = vpow2.f32 %v2246_v29  ;;  %v976_v18 = vmul.f32 %v5076_v21, %v901_v4  ;;  %v1167_v40 = vpop.f32.mrf.mxu1 }
 0x1bf   : > { %v3875_v59 = vpop.eup %3874  ;;  %v2503_v26 = vpack.c.bf16 %v2478_v16, %v2478_v16  ;;  %v1402_v56 = vadd.f32 2.0, %v1352_v19  ;;  %v2354_v54 = vmul.f32 %v3869_v11, %v2329_v44  ;;  %v1328_v5 = vadd.f32 2.0, %v3873_v53 }
 0x1c0   : > { %v3877_v9 = vpop.eup %3876  ;;  %v1903_v63 = vadd.f32 2.0, %v1853_v2  ;;  %v5090_v10 = vmul.f32 %v3871_v51, %v852_v57  ;;  %v1829_v50 = vadd.f32 2.0, %v3875_v59  ;;  %v1377_v23 = vmul.f32 %v1352_v19, %v5012_v25  ;;  %v1668_v19 = vpop.f32.mrf.mxu2 }
 0x1c1   : > { %v3879_v32 = vpop.eup %3878  ;;  %2529 = vst.msk [vmem:[%s4803_s12 + $0x30] sm:$0xf] %vm2516_vm3, %v2503_v26  ;;  %3886 = vrcp.f32 %v1402_v56  ;;  %v2404_v58 = vadd.f32 2.0, %v2354_v54  ;;  %v1353_v34 = vmul.f32 %v3873_v53, %v1328_v5  ;;  %v2280_v17 = vadd.f32 1.0, %v3877_v9 }
 0x1c2   : > { %v3881_v8 = vpop.eup %3880  ;;  %3888 = vrcp.f32 %v1903_v63  ;;  %v927_v13 = vadd.f32 2.0, %v5090_v10  ;;  %v1854_v0 = vmul.f32 %v3875_v59, %v1829_v50  ;;  %v803_v20 = vadd.f32 1.0, %v3879_v32 }
 0x1c3   : > { %v3883_v27 = vpop.eup %3882  ;;  %3890 = vrcp.f32 %v2404_v58  ;;  %v1403_v62 = vadd.f32 2.0, %v1353_v34  ;;  %v1279_v52 = vadd.f32 1.0, %v3881_v8  ;;  %v1878_v14 = vmul.f32 %v1853_v2, %v5015_v15 }
 0x1c4   : > { %v3885_v24 = vpop.eup %3884  ;;  %3892 = vrcp.f32 %v927_v13  ;;  %v1904_v22 = vadd.f32 2.0, %v1854_v0  ;;  %v1780_v29 = vadd.f32 1.0, %v3883_v27  ;;  %v770_v51 = vmul.f32 1.442695, %v729_v12 }
 0x1c5   : > { %3894 = vrcp.f32 %v2280_v17  ;;  %v2281_v33 = vadd.f32 1.0, %v3885_v24  ;;  %v1246_v16 = vmul.f32 1.442695, %v1205_v48  ;;  %v730_v25 = vsub.f32 0.0, %v5103_v28 }
 0x1c6   : > { %3896 = vrcp.f32 %v1403_v62  ;;  %v5112_v21 = vadd.f32 %v5082_v31, %v1167_v40  ;;  %v2379_v2 = vmul.f32 %v2354_v54, %v5019_v36  ;;  %v2248_v26 = vmul.f32 1.442695, %v2207_v43  ;;  %v1170_v35 = vpop.f32.mrf.mxu1 }
 0x1c7   : > { %v3887_v42 = vpop.eup %3886  ;;  %3898 = vrcp.f32 %v1904_v22  ;;  %v902_v5 = vmul.f32 %v5090_v10, %v5029_v37  ;;  %v772_v61 = vmul.f32 1.442695, %v730_v25  ;;  %v1378_v54 = vmul.f32 %v1353_v34, %v5033_v47  ;;  %v2169_v37 = vpop.f32.mrf.mxu3 }
 0x1c8   : > { %v3889_v11 = vpop.eup %3888  ;;  %v1452_v38 = vmul.f32 %v3887_v42, %v1377_v23  ;;  %3900 = vrcp.f32 %v803_v20  ;;  %v1206_v32 = vsub.f32 0.0, %v5112_v21  ;;  %v1879_v8 = vmul.f32 %v1854_v0, %v5038_v41  ;;  %v694_v20 = vpop.f32.mrf.mxu0 }
 0x1c9   : > { %v3891_v44 = vpop.eup %3890  ;;  %v1953_v53 = vmul.f32 %v3889_v11, %v1878_v14  ;;  %3902 = vrcp.f32 %v1279_v52  ;;  %v5121_v48 = vadd.f32 %v5082_v31, %v1668_v19  ;;  %v5126_v23 = vadd.f32 %v5082_v31, %v2169_v37  ;;  %v1671_v43 = vpop.f32.mrf.mxu2 }
 0x1ca   : > { %v3893_v57 = vpop.eup %3892  ;;  %v1477_v15 = vmax.f32 %v976_v18, %v1452_v38  ;;  %3904 = vrcp.f32 %v1780_v29  ;;  %v2454_v9 = vmul.f32 %v3891_v44, %v2379_v2  ;;  %v5133_v44 = vadd.f32 %v5082_v31, %v1170_v35 }
 0x1cb   : > { %v3895_v59 = vpop.eup %3894  ;;  %3906 = vrcp.f32 %v2281_v33  ;;  %v977_v17 = vmul.f32 %v3893_v57, %v902_v5  ;;  %v5129_v33 = vadd.f32 %v5082_v31, %v694_v20  ;;  %v2208_v5 = vsub.f32 0.0, %v5126_v23 }
 0x1cc   : > { %v3897_v56 = vpop.eup %3896  ;;  %v1978_v12 = vmax.f32 %v1477_v15, %v1953_v53  ;;  %v2330_v4 = vadd.f32 2.0, %v3895_v59  ;;  %3908 = vpow2.f32 %v770_v51 }
 0x1cd   : > { %v3899_v63 = vpop.eup %3898  ;;  %3910 = vpow2.f32 %v1246_v16  ;;  %v1453_v47 = vmul.f32 %v3897_v56, %v1378_v54  ;;  %v1707_v16 = vsub.f32 0.0, %v5121_v48 }
 0x1ce   : > { %v3901_v58 = vpop.eup %3900  ;;  %v2479_v36 = vmax.f32 %v1978_v12, %v2454_v9  ;;  %v2355_v50 = vmul.f32 %v3895_v59, %v2330_v4  ;;  %3912 = vpow2.f32 %v1747_v45  ;;  %v1954_v40 = vmul.f32 %v3899_v63, %v1879_v8 }
 0x1cf   : > { %v3903_v60 = vpop.eup %3902  ;;  %v853_v13 = vadd.f32 2.0, %v3901_v58  ;;  %3914 = vpow2.f32 %v2248_v26  ;;  %v1478_v25 = vmax.f32 %v977_v17, %v1453_v47  ;;  %v5136_v45 = vadd.f32 %v5082_v31, %v1671_v43 }
 0x1d0   : > { %v3905_v10 = vpop.eup %3904  ;;  %v2504_v27 = vpack.c.bf16 %v2479_v36, %v2479_v36  ;;  %v2405_v24 = vadd.f32 2.0, %v2355_v50  ;;  %v1329_v62 = vadd.f32 2.0, %v3903_v60  ;;  %3916 = vpow2.f32 %v772_v61  ;;  %v696_v47 = vpop.f32.mrf.mxu0 }
 0x1d1   : > { %v3907_v22 = vpop.eup %3906  ;;  %v878_v34 = vmul.f32 %v3901_v58, %v853_v13  ;;  %v1830_v52 = vadd.f32 2.0, %v3905_v10  ;;  %v1979_v26 = vmax.f32 %v1478_v25, %v1954_v40  ;;  %v2380_v56 = vmul.f32 %v2355_v50, %v5049_v49 }
 0x1d2   : > { %v3909_v41 = vpop.eup %3908  ;;  %2530 = vst.msk [vmem:[%s4803_s12 + $0x34] sm:$0xf] %vm2516_vm3, %v2504_v27  ;;  %3918 = vrcp.f32 %v2405_v24  ;;  %v1354_v0 = vmul.f32 %v3903_v60, %v1329_v62  ;;  %v2331_v18 = vadd.f32 2.0, %v3907_v22  ;;  %v1248_v63 = vmul.f32 1.442695, %v1206_v32  ;;  %v2172_v24 = vpop.f32.mrf.mxu3 }
 0x1d3   : > { %v3911_v29 = vpop.eup %3910  ;;  %v928_v42 = vadd.f32 2.0, %v878_v34  ;;  %v1855_v14 = vmul.f32 %v3905_v10, %v1830_v52  ;;  %v804_v57 = vadd.f32 1.0, %v3909_v41  ;;  %v731_v36 = vsub.f32 0.0, %v5129_v33 }
 0x1d4   : > { %v3913_v11 = vpop.eup %3912  ;;  %v1404_v38 = vadd.f32 2.0, %v1354_v0  ;;  %v2356_v51 = vmul.f32 %v3907_v22, %v2331_v18  ;;  %v1280_v2 = vadd.f32 1.0, %v3911_v29  ;;  %v903_v54 = vmul.f32 %v878_v34, %v5052_v46 }
 0x1d5   : > { %v3915_v53 = vpop.eup %3914  ;;  %3920 = vrcp.f32 %v928_v42  ;;  %v1905_v19 = vadd.f32 2.0, %v1855_v14  ;;  %v1781_v12 = vadd.f32 1.0, %v3913_v11  ;;  %v1749_v60 = vmul.f32 1.442695, %v1707_v16 }
 0x1d6   : > { %3922 = vrcp.f32 %v1404_v38  ;;  %v2406_v15 = vadd.f32 2.0, %v2356_v51  ;;  %v3917_v59 = vpop.eup %3916  ;;  %v2282_v4 = vadd.f32 1.0, %v3915_v53  ;;  %v1207_v8 = vsub.f32 0.0, %v5133_v44 }
 0x1d7   : > { %3924 = vrcp.f32 %v1905_v19  ;;  %v805_v58 = vadd.f32 1.0, %v3917_v59  ;;  %v1379_v13 = vmul.f32 %v1354_v0, %v5057_v6  ;;  %v1708_v32 = vsub.f32 0.0, %v5136_v45 }
 0x1d8   : > { %v3919_v9 = vpop.eup %3918  ;;  %3926 = vrcp.f32 %v2406_v15  ;;  %v1880_v27 = vmul.f32 %v1855_v14, %v5060_v55  ;;  %v2250_v17 = vmul.f32 1.442695, %v2208_v5  ;;  %v774_v22 = vmul.f32 1.442695, %v731_v36  ;;  %v1673_v5 = vpop.f32.mrf.mxu2 }
 0x1d9   : > { %v2455_v61 = vmul.f32 %v3919_v9, %v2380_v56  ;;  %3928 = vrcp.f32 %v804_v57  ;;  %v1250_v6 = vmul.f32 1.442695, %v1207_v8  ;;  %v2381_v0 = vmul.f32 %v2356_v51, %v5067_v3 }
 0x1da   : > { %3930 = vrcp.f32 %v1280_v2  ;;  %v1751_v55 = vmul.f32 1.442695, %v1708_v32  ;;  %v5150_v40 = vadd.f32 %v5082_v31, %v2172_v24  ;;  %v699_v32 = vpop.f32.mrf.mxu0 }
 0x1db   : > { %v3921_v49 = vpop.eup %3920  ;;  %v2480_v50 = vmax.f32 %v1979_v26, %v2455_v61  ;;  %3932 = vrcp.f32 %v1781_v12  ;;  %v1172_v26 = vpop.f32.mrf.mxu1 }
 0x1dc   : > { %v3923_v37 = vpop.eup %3922  ;;  %v978_v10 = vmul.f32 %v3921_v49, %v903_v54  ;;  %3934 = vrcp.f32 %v2282_v4  ;;  %v5156_v54 = vadd.f32 %v5082_v31, %v696_v47 }
 0x1dd   : > { %v3925_v46 = vpop.eup %3924  ;;  %v2505_v62 = vpack.c.bf16 %v2480_v50, %v2480_v50  ;;  %v1454_v20 = vmul.f32 %v3923_v37, %v1379_v13  ;;  %3936 = vrcp.f32 %v805_v58  ;;  %v5161_v13 = vadd.f32 %v5082_v31, %v1172_v26 }
 0x1de   : > { %v3927_v34 = vpop.eup %3926  ;;  %v1955_v52 = vmul.f32 %v3925_v46, %v1880_v27  ;;  %3938 = vpow2.f32 %v1248_v63  ;;  %v2209_v63 = vsub.f32 0.0, %v5150_v40  ;;  %v732_v47 = vsub.f32 0.0, %v5156_v54 }
 0x1df   : > { %v3929_v35 = vpop.eup %3928  ;;  %2531 = vst.msk [vmem:[%s4803_s12 + $0x38] sm:$0xf] %vm2516_vm3, %v2505_v62  ;;  %v1479_v41 = vmax.f32 %v978_v10, %v1454_v20  ;;  %3940 = vpow2.f32 %v1749_v60  ;;  %v2456_v43 = vmul.f32 %v3927_v34, %v2381_v0  ;;  %v2174_v60 = vpop.f32.mrf.mxu3 }
 0x1e0   : > { %v3931_v18 = vpop.eup %3930  ;;  %v854_v29 = vadd.f32 2.0, %v3929_v35  ;;  %3942 = vpow2.f32 %v2250_v17  ;;  %v5165_v17 = vadd.f32 %v5082_v31, %v1673_v5  ;;  %v5168_v62 = vadd.f32 %v5082_v31, %v2174_v60 }
 0x1e1   : > { %v3933_v42 = vpop.eup %3932  ;;  %v1980_v14 = vmax.f32 %v1479_v41, %v1955_v52  ;;  %v1330_v11 = vadd.f32 2.0, %v3931_v18  ;;  %3944 = vpow2.f32 %v774_v22  ;;  %v2252_v22 = vmul.f32 1.442695, %v2209_v63 }
 0x1e2   : > { %v3935_v38 = vpop.eup %3934  ;;  %v879_v16 = vmul.f32 %v3929_v35, %v854_v29  ;;  %v1831_v53 = vadd.f32 2.0, %v3933_v42  ;;  %3946 = vpow2.f32 %v1250_v6  ;;  %v1208_v6 = vsub.f32 0.0, %v5161_v13 }
 0x1e3   : > { %v3937_v25 = vpop.eup %3936  ;;  %v2481_v19 = vmax.f32 %v1980_v14, %v2456_v43  ;;  %v1355_v3 = vmul.f32 %v3931_v18, %v1330_v11  ;;  %v2332_v51 = vadd.f32 2.0, %v3935_v38  ;;  %3948 = vpow2.f32 %v1751_v55 }
 0x1e4   : > { %v3939_v57 = vpop.eup %3938  ;;  %v929_v15 = vadd.f32 2.0, %v879_v16  ;;  %v1856_v2 = vmul.f32 %v3933_v42, %v1831_v53  ;;  %v855_v59 = vadd.f32 2.0, %v3937_v25  ;;  %v904_v34 = vmul.f32 %v879_v16, %v5080_v30 }
 0x1e5   : > { %v3941_v56 = vpop.eup %3940  ;;  %v2506_v12 = vpack.c.bf16 %v2481_v19, %v2481_v19  ;;  %v1405_v9 = vadd.f32 2.0, %v1355_v3  ;;  %v2357_v4 = vmul.f32 %v3935_v38, %v2332_v51  ;;  %v1281_v50 = vadd.f32 1.0, %v3939_v57 }
 0x1e6   : > { %v3943_v61 = vpop.eup %3942  ;;  %3950 = vrcp.f32 %v929_v15  ;;  %v1906_v58 = vadd.f32 2.0, %v1856_v2  ;;  %v5153_v36 = vmul.f32 %v3937_v25, %v855_v59  ;;  %v1782_v27 = vadd.f32 1.0, %v3941_v56 }
 0x1e7   : > { %v3945_v8 = vpop.eup %3944  ;;  %2532 = vst.msk [vmem:[%s4803_s12 + $0x3c] sm:$0xf] %vm2516_vm3, %v2506_v12  ;;  %3952 = vrcp.f32 %v1405_v9  ;;  %v2407_v49 = vadd.f32 2.0, %v2357_v4  ;;  %v2283_v46 = vadd.f32 1.0, %v3943_v61  ;;  %v1380_v41 = vmul.f32 %v1355_v3, %v5085_v1  ;;  %v1175_v1 = vpop.f32.mrf.mxu1 }
 0x1e8   : > { %v3947_v37 = vpop.eup %3946  ;;  %3954 = vrcp.f32 %v1906_v58  ;;  %v930_v10 = vadd.f32 2.0, %v5153_v36  ;;  %v806_v20 = vadd.f32 1.0, %v3945_v8  ;;  %v1709_v55 = vsub.f32 0.0, %v5165_v17 }
 0x1e9   : > { %v3949_v24 = vpop.eup %3948  ;;  %3956 = vrcp.f32 %v2407_v49  ;;  %v1282_v52 = vadd.f32 1.0, %v3947_v37  ;;  %v1881_v42 = vmul.f32 %v1856_v2, %v5095_v7  ;;  %v2210_v14 = vsub.f32 0.0, %v5168_v62  ;;  %v701_v2 = vpop.f32.mrf.mxu0 }
 0x1ea   : > { %3958 = vrcp.f32 %v930_v10  ;;  %v1783_v0 = vadd.f32 1.0, %v3949_v24  ;;  %v776_v11 = vmul.f32 1.442695, %v732_v47  ;;  %v1252_v53 = vmul.f32 1.442695, %v1208_v6 }
 0x1eb   : > { %3960 = vrcp.f32 %v1281_v50  ;;  %v2382_v3 = vmul.f32 %v2357_v4, %v5100_v39  ;;  %v1753_v51 = vmul.f32 1.442695, %v1709_v55  ;;  %v2254_v57 = vmul.f32 1.442695, %v2210_v14  ;;  %v1676_v50 = vpop.f32.mrf.mxu2 }
 0x1ec   : > { %v3951_v35 = vpop.eup %3950  ;;  %3962 = vrcp.f32 %v1782_v27  ;;  %v5181_v15 = vadd.f32 %v5082_v31, %v699_v32  ;;  %v5184_v49 = vadd.f32 %v5082_v31, %v1175_v1 }
 0x1ed   : > { %v3953_v18 = vpop.eup %3952  ;;  %v979_v29 = vmul.f32 %v3951_v35, %v904_v34  ;;  %3964 = vrcp.f32 %v2283_v46  ;;  %v2177_v46 = vpop.f32.mrf.mxu3 }
 0x1ee   : > { %v3955_v43 = vpop.eup %3954  ;;  %v1455_v30 = vmul.f32 %v3953_v18, %v1380_v41  ;;  %3966 = vrcp.f32 %v806_v20  ;;  %v733_v24 = vsub.f32 0.0, %v5181_v15 }
 0x1ef   : > { %v3957_v38 = vpop.eup %3956  ;;  %v1956_v16 = vmul.f32 %v3955_v43, %v1881_v42  ;;  %3968 = vrcp.f32 %v1282_v52 }
 0x1f0   : > { %v5177_v25 = vpop.eup %3958  ;;  %v1480_v19 = vmax.f32 %v979_v29, %v1455_v30  ;;  %3970 = vrcp.f32 %v1783_v0  ;;  %v2457_v56 = vmul.f32 %v3957_v38, %v2382_v3  ;;  %v5194_v0 = vadd.f32 %v5082_v31, %v1676_v50 }
 0x1f1   : > { %v3961_v7 = vpop.eup %3960  ;;  %3972 = vpow2.f32 %v2252_v22  ;;  %v905_v22 = vmul.f32 %v5153_v36, %v5103_v28  ;;  %v1209_v28 = vsub.f32 0.0, %v5184_v49  ;;  %v1177_v36 = vpop.f32.mrf.mxu1  ;;  %v5199_v30 = vadd.f32 %v5082_v31, %v2177_v46 }
 0x1f2   : > { %v3963_v59 = vpop.eup %3962  ;;  %v1981_v26 = vmax.f32 %v1480_v19, %v1956_v16  ;;  %v1331_v12 = vadd.f32 2.0, %v3961_v7  ;;  %3974 = vpow2.f32 %v776_v11  ;;  %v5204_v1 = vpop.f32.mrf.mxu0 }
 0x1f3   : > { %v3965_v9 = vpop.eup %3964  ;;  %v1832_v63 = vadd.f32 2.0, %v3963_v59  ;;  %3976 = vpow2.f32 %v1252_v53  ;;  %v5202_v53 = vadd.f32 %v5082_v31, %v701_v2  ;;  %v2211_v2 = vsub.f32 0.0, %v5199_v30 }
 0x1f4   : > { %v3967_v5 = vpop.eup %3966  ;;  %v2482_v61 = vmax.f32 %v1981_v26, %v2457_v56  ;;  %v1356_v39 = vmul.f32 %v3961_v7, %v1331_v12  ;;  %v2333_v4 = vadd.f32 2.0, %v3965_v9  ;;  %3978 = vpow2.f32 %v1753_v51 }
 0x1f5   : > { %v3969_v58 = vpop.eup %3968  ;;  %v1857_v60 = vmul.f32 %v3963_v59, %v1832_v63  ;;  %v856_v8 = vadd.f32 2.0, %v3967_v5  ;;  %3980 = vpow2.f32 %v2254_v57  ;;  %v1710_v51 = vsub.f32 0.0, %v5194_v0 }
 0x1f6   : > { %v3971_v32 = vpop.eup %3970  ;;  %v2507_v37 = vpack.c.bf16 %v2482_v61, %v2482_v61  ;;  %v1406_v10 = vadd.f32 2.0, %v1356_v39  ;;  %v2358_v27 = vmul.f32 %v3965_v9, %v2333_v4  ;;  %v1332_v52 = vadd.f32 2.0, %v3969_v58 }
 0x1f7   : > { %v3973_v20 = vpop.eup %3972  ;;  %v1907_v47 = vadd.f32 2.0, %v1857_v60  ;;  %v5189_v34 = vmul.f32 %v3967_v5, %v856_v8  ;;  %v1833_v41 = vadd.f32 2.0, %v3971_v32  ;;  %v980_v7 = vmul.f32 %v5177_v25, %v905_v22  ;;  %v2179_v8 = vpop.f32.mrf.mxu3 }
 0x1f8   : > { %v3975_v6 = vpop.eup %3974  ;;  %2533 = vst.msk [vmem:[%s4803_s12 + $0x40] sm:$0xf] %vm2516_vm3, %v2507_v37  ;;  %3982 = vrcp.f32 %v1406_v10  ;;  %v2408_v35 = vadd.f32 2.0, %v2358_v27  ;;  %v1357_v29 = vmul.f32 %v3969_v58, %v1332_v52  ;;  %v2284_v43 = vadd.f32 1.0, %v3973_v20  ;;  %v1678_v58 = vpop.f32.mrf.mxu2 }
 0x1f9   : > { %v3977_v55 = vpop.eup %3976  ;;  %3984 = vrcp.f32 %v1907_v47  ;;  %v931_v18 = vadd.f32 2.0, %v5189_v34  ;;  %v1858_v14 = vmul.f32 %v3971_v32, %v1833_v41  ;;  %v807_v16 = vadd.f32 1.0, %v3975_v6  ;;  %v1180_v47 = vpop.f32.mrf.mxu1 }
 0x1fa   : > { %v3979_v42 = vpop.eup %3978  ;;  %3986 = vrcp.f32 %v2408_v35  ;;  %v1407_v38 = vadd.f32 2.0, %v1357_v29  ;;  %v1283_v3 = vadd.f32 1.0, %v3977_v55  ;;  %v1381_v57 = vmul.f32 %v1356_v39, %v5112_v21 }
 0x1fb   : > { %v3981_v11 = vpop.eup %3980  ;;  %3988 = vrcp.f32 %v931_v18  ;;  %v1908_v19 = vadd.f32 2.0, %v1858_v14  ;;  %v1784_v59 = vadd.f32 1.0, %v3979_v42  ;;  %v1882_v56 = vmul.f32 %v1857_v60, %v5121_v48 }
 0x1fc   : > { %3990 = vrcp.f32 %v2284_v43  ;;  %v2285_v12 = vadd.f32 1.0, %v3981_v11  ;;  %v778_v5 = vmul.f32 1.442695, %v733_v24  ;;  %v5212_v61 = vadd.f32 %v5082_v31, %v1177_v36 }
 0x1fd   : > { %3992 = vrcp.f32 %v1407_v38  ;;  %v1254_v21 = vmul.f32 1.442695, %v1209_v28  ;;  %v734_v39 = vsub.f32 0.0, %v5202_v53  ;;  %v2383_v50 = vmul.f32 %v2358_v27, %v5126_v23  ;;  %v5220_v28 = vpop.f32.mrf.mxu0 }
 0x1fe   : > { %v3983_v26 = vpop.eup %3982  ;;  %3994 = vrcp.f32 %v1908_v19  ;;  %v1755_v32 = vmul.f32 1.442695, %v1710_v51  ;;  %v2256_v10 = vmul.f32 1.442695, %v2211_v2  ;;  %v906_v6 = vmul.f32 %v5189_v34, %v5129_v33 }
 0x1ff   : > { %v3985_v9 = vpop.eup %3984  ;;  %v1456_v63 = vmul.f32 %v3983_v26, %v1381_v57  ;;  %3996 = vrcp.f32 %v807_v16  ;;  %v780_v35 = vmul.f32 1.442695, %v734_v39  ;;  %v1210_v41 = vsub.f32 0.0, %v5212_v61 }
 0x200   : > { %v3987_v4 = vpop.eup %3986  ;;  %v1957_v25 = vmul.f32 %v3985_v9, %v1882_v56  ;;  %3998 = vrcp.f32 %v1283_v3  ;;  %v1382_v55 = vmul.f32 %v1357_v29, %v5133_v44  ;;  %v1883_v42 = vmul.f32 %v1858_v14, %v5136_v45  ;;  %v1681_v9 = vpop.f32.mrf.mxu2 }
 0x201   : > { %v3989_v48 = vpop.eup %3988  ;;  %v1481_v60 = vmax.f32 %v980_v7, %v1456_v63  ;;  %4000 = vrcp.f32 %v1784_v59  ;;  %v2458_v20 = vmul.f32 %v3987_v4, %v2383_v50  ;;  %v5224_v33 = vadd.f32 %v5082_v31, %v1678_v58  ;;  %v5235_v63 = vpop.f32.mrf.mxu3 }
 0x202   : > { %v3991_v37 = vpop.eup %3990  ;;  %4002 = vrcp.f32 %v2285_v12  ;;  %v981_v38 = vmul.f32 %v3989_v48, %v906_v6  ;;  %v5229_v57 = vadd.f32 %v5082_v31, %v2179_v8  ;;  %v5233_v2 = vadd.f32 %v5082_v31, %v5204_v1 }
 0x203   : > { %v3993_v24 = vpop.eup %3992  ;;  %v1982_v46 = vmax.f32 %v1481_v60, %v1957_v25  ;;  %v2334_v22 = vadd.f32 2.0, %v3991_v37  ;;  %4004 = vpow2.f32 %v778_v5  ;;  %v5239_v39 = vadd.f32 %v5082_v31, %v1180_v47 }
 0x204   : > { %v3995_v52 = vpop.eup %3994  ;;  %4006 = vpow2.f32 %v1254_v21  ;;  %v1457_v44 = vmul.f32 %v3993_v24, %v1382_v55  ;;  %v1711_v21 = vsub.f32 0.0, %v5224_v33  ;;  %v2212_v6 = vsub.f32 0.0, %v5229_v57 }
 0x205   : > { %v3997_v23 = vpop.eup %3996  ;;  %v2483_v27 = vmax.f32 %v1982_v46, %v2458_v20  ;;  %v2359_v18 = vmul.f32 %v3991_v37, %v2334_v22  ;;  %4008 = vpow2.f32 %v1755_v32  ;;  %v1958_v26 = vmul.f32 %v3995_v52, %v1883_v42  ;;  %v5244_v37 = vpop.f32.mrf.mxu1 }
 0x206   : > { %v3999_v36 = vpop.eup %3998  ;;  %v857_v43 = vadd.f32 2.0, %v3997_v23  ;;  %4010 = vpow2.f32 %v2256_v10  ;;  %v1482_v8 = vmax.f32 %v981_v38, %v1457_v44  ;;  %v5242_v32 = vadd.f32 %v5082_v31, %v1681_v9 }
 0x207   : > { %v4001_v34 = vpop.eup %4000  ;;  %v2508_v11 = vpack.c.bf16 %v2483_v27, %v2483_v27  ;;  %v2409_v16 = vadd.f32 2.0, %v2359_v18  ;;  %v1333_v19 = vadd.f32 2.0, %v3999_v36  ;;  %4012 = vpow2.f32 %v780_v35  ;;  %v5248_v35 = vpop.f32.mrf.mxu0 }
 0x208   : > { %v4003_v3 = vpop.eup %4002  ;;  %v882_v29 = vmul.f32 %v3997_v23, %v857_v43  ;;  %v1834_v51 = vadd.f32 2.0, %v4001_v34  ;;  %v1983_v24 = vmax.f32 %v1482_v8, %v1958_v26  ;;  %v2384_v46 = vmul.f32 %v2359_v18, %v5150_v40 }
 0x209   : > { %v4005_v7 = vpop.eup %4004  ;;  %2534 = vst.msk [vmem:[%s4803_s12 + $0x44] sm:$0xf] %vm2516_vm3, %v2508_v11  ;;  %4014 = vrcp.f32 %v2409_v16  ;;  %v1358_v45 = vmul.f32 %v3999_v36, %v1333_v19  ;;  %v2335_v14 = vadd.f32 2.0, %v4003_v3  ;;  %v1256_v52 = vmul.f32 1.442695, %v1210_v41 }
 0x20a   : > { %v4007_v59 = vpop.eup %4006  ;;  %v932_v56 = vadd.f32 2.0, %v882_v29  ;;  %v1859_v12 = vmul.f32 %v4001_v34, %v1834_v51  ;;  %v808_v60 = vadd.f32 1.0, %v4005_v7  ;;  %v735_v55 = vsub.f32 0.0, %v5233_v2  ;;  %v1683_v51 = vpop.f32.mrf.mxu2 }
 0x20b   : > { %v4009_v5 = vpop.eup %4008  ;;  %v1408_v4 = vadd.f32 2.0, %v1358_v45  ;;  %v2360_v25 = vmul.f32 %v4003_v3, %v2335_v14  ;;  %v1284_v1 = vadd.f32 1.0, %v4007_v59  ;;  %v907_v36 = vmul.f32 %v882_v29, %v5156_v54  ;;  %v2184_v7 = vpop.f32.mrf.mxu3 }
 0x20c   : > { %v4011_v58 = vpop.eup %4010  ;;  %4016 = vrcp.f32 %v932_v56  ;;  %v1909_v48 = vadd.f32 2.0, %v1859_v12  ;;  %v1785_v20 = vadd.f32 1.0, %v4009_v5  ;;  %v1757_v42 = vmul.f32 1.442695, %v1711_v21 }
 0x20d   : > { %4018 = vrcp.f32 %v1408_v4  ;;  %v2410_v50 = vadd.f32 2.0, %v2360_v25  ;;  %v4013_v10 = vpop.eup %4012  ;;  %v2286_v47 = vadd.f32 1.0, %v4011_v58  ;;  %v1211_v40 = vsub.f32 0.0, %v5239_v39  ;;  %v5263_v4 = vpop.f32.mrf.mxu1 }
 0x20e   : > { %4020 = vrcp.f32 %v1909_v48  ;;  %v809_v27 = vadd.f32 1.0, %v4013_v10  ;;  %v1383_v34 = vmul.f32 %v1358_v45, %v5161_v13  ;;  %v1712_v41 = vsub.f32 0.0, %v5242_v32 }
 0x20f   : > { %v4015_v22 = vpop.eup %4014  ;;  %4022 = vrcp.f32 %v2410_v50  ;;  %v1884_v16 = vmul.f32 %v1859_v12, %v5165_v17  ;;  %v2258_v19 = vmul.f32 1.442695, %v2212_v6  ;;  %v782_v29 = vmul.f32 1.442695, %v735_v55  ;;  %v711_v21 = vpop.f32.mrf.mxu0 }
 0x210   : > { %v2459_v23 = vmul.f32 %v4015_v22, %v2384_v46  ;;  %4024 = vrcp.f32 %v808_v60  ;;  %v1258_v13 = vmul.f32 1.442695, %v1211_v40  ;;  %v2385_v56 = vmul.f32 %v2360_v25, %v5168_v62 }
 0x211   : > { %4026 = vrcp.f32 %v1284_v1  ;;  %v1759_v17 = vmul.f32 1.442695, %v1712_v41  ;;  %v5261_v5 = vadd.f32 %v5082_v31, %v5235_v63 }
 0x212   : > { %v4017_v18 = vpop.eup %4016  ;;  %v2484_v43 = vmax.f32 %v1983_v24, %v2459_v23  ;;  %4028 = vrcp.f32 %v1785_v20 }
 0x213   : > { %v4019_v11 = vpop.eup %4018  ;;  %v982_v38 = vmul.f32 %v4017_v18, %v907_v36  ;;  %4030 = vrcp.f32 %v2286_v47  ;;  %v2213_v55 = vsub.f32 0.0, %v5261_v5  ;;  %v5270_v18 = vadd.f32 %v5082_v31, %v5220_v28 }
 0x214   : > { %v4021_v3 = vpop.eup %4020  ;;  %v2509_v54 = vpack.c.bf16 %v2484_v43, %v2484_v43  ;;  %v1458_v44 = vmul.f32 %v4019_v11, %v1383_v34  ;;  %4032 = vrcp.f32 %v809_v27  ;;  %v5276_v11 = vadd.f32 %v5082_v31, %v5244_v37 }
 0x215   : > { %v4023_v14 = vpop.eup %4022  ;;  %v1959_v59 = vmul.f32 %v4021_v3, %v1884_v16  ;;  %4034 = vpow2.f32 %v1256_v52  ;;  %v5280_v16 = vpop.f32.mrf.mxu3 }
 0x216   : > { %v4025_v45 = vpop.eup %4024  ;;  %2535 = vst.msk [vmem:[%s4803_s12 + $0x48] sm:$0xf] %vm2516_vm3, %v2509_v54  ;;  %v1483_v26 = vmax.f32 %v982_v38, %v1458_v44  ;;  %4036 = vpow2.f32 %v1757_v42  ;;  %v2460_v48 = vmul.f32 %v4023_v14, %v2385_v56  ;;  %v5278_v38 = vpop.f32.mrf.mxu2  ;;  %v5284_v54 = vadd.f32 %v5082_v31, %v1683_v51 }
 0x217   : > { %v4027_v12 = vpop.eup %4026  ;;  %v858_v9 = vadd.f32 2.0, %v4025_v45  ;;  %4038 = vpow2.f32 %v2258_v19  ;;  %v1187_v44 = vpop.f32.mrf.mxu1 }
 0x218   : > { %v4029_v58 = vpop.eup %4028  ;;  %v1984_v8 = vmax.f32 %v1483_v26, %v1959_v59  ;;  %v1334_v60 = vadd.f32 2.0, %v4027_v12  ;;  %4040 = vpow2.f32 %v782_v29  ;;  %v5287_v59 = vadd.f32 %v5082_v31, %v2184_v7 }
 0x219   : > { %v4031_v50 = vpop.eup %4030  ;;  %v883_v1 = vmul.f32 %v4025_v45, %v858_v9  ;;  %v1835_v62 = vadd.f32 2.0, %v4029_v58  ;;  %4042 = vpow2.f32 %v1258_v13  ;;  %v2260_v13 = vmul.f32 1.442695, %v2213_v55 }
 0x21a   : > { %v4033_v25 = vpop.eup %4032  ;;  %v2485_v10 = vmax.f32 %v1984_v8, %v2460_v48  ;;  %v1359_v24 = vmul.f32 %v4027_v12, %v1334_v60  ;;  %v2336_v46 = vadd.f32 2.0, %v4031_v50  ;;  %4044 = vpow2.f32 %v1759_v17 }
 0x21b   : > { %v4035_v63 = vpop.eup %4034  ;;  %v933_v20 = vadd.f32 2.0, %v883_v1  ;;  %v1860_v22 = vmul.f32 %v4029_v58, %v1835_v62  ;;  %v859_v47 = vadd.f32 2.0, %v4033_v25  ;;  %v736_v45 = vsub.f32 0.0, %v5270_v18 }
 0x21c   : > { %v4037_v52 = vpop.eup %4036  ;;  %v2510_v6 = vpack.c.bf16 %v2485_v10, %v2485_v10  ;;  %v1409_v23 = vadd.f32 2.0, %v1359_v24  ;;  %v2361_v27 = vmul.f32 %v4031_v50, %v2336_v46  ;;  %v1285_v41 = vadd.f32 1.0, %v4035_v63 }
 0x21d   : > { %v4039_v36 = vpop.eup %4038  ;;  %4046 = vrcp.f32 %v933_v20  ;;  %v1910_v42 = vadd.f32 2.0, %v1860_v22  ;;  %v5266_v40 = vmul.f32 %v4033_v25, %v859_v47  ;;  %v1786_v28 = vadd.f32 1.0, %v4037_v52  ;;  %v2189_v25 = vpop.f32.mrf.mxu3 }
 0x21e   : > { %v4041_v43 = vpop.eup %4040  ;;  %2536 = vst.msk [vmem:[%s4803_s12 + $0x4c] sm:$0xf] %vm2516_vm3, %v2510_v6  ;;  %4048 = vrcp.f32 %v1409_v23  ;;  %v2411_v34 = vadd.f32 2.0, %v2361_v27  ;;  %v2287_v14 = vadd.f32 1.0, %v4039_v36  ;;  %v908_v26 = vmul.f32 %v883_v1, %v5181_v15 }
 0x21f   : > { %v4043_v19 = vpop.eup %4042  ;;  %4050 = vrcp.f32 %v1910_v42  ;;  %v934_v3 = vadd.f32 2.0, %v5266_v40  ;;  %v810_v37 = vadd.f32 1.0, %v4041_v43  ;;  %v1212_v17 = vsub.f32 0.0, %v5276_v11 }
 0x220   : > { %v4045_v29 = vpop.eup %4044  ;;  %4052 = vrcp.f32 %v2411_v34  ;;  %v1286_v56 = vadd.f32 1.0, %v4043_v19  ;;  %v1384_v12 = vmul.f32 %v1359_v24, %v5184_v49  ;;  %v1713_v21 = vsub.f32 0.0, %v5284_v54  ;;  %v1688_v49 = vpop.f32.mrf.mxu2 }
 0x221   : > { %4054 = vrcp.f32 %v934_v3  ;;  %v1787_v9 = vadd.f32 1.0, %v4045_v29  ;;  %v1885_v58 = vmul.f32 %v1860_v22, %v5194_v0  ;;  %v2214_v8 = vsub.f32 0.0, %v5287_v59  ;;  %v4136_v22 = vld [vmem:[#allocation5] ss:$0 sm:$0xff] }
 0x222   : > { %4056 = vrcp.f32 %v1285_v41  ;;  %v784_v60 = vmul.f32 1.442695, %v736_v45  ;;  %v1260_v62 = vmul.f32 1.442695, %v1212_v17  ;;  %v2386_v46 = vmul.f32 %v2361_v27, %v5199_v30 }
 0x223   : > { %v4047_v51 = vpop.eup %4046  ;;  %4058 = vrcp.f32 %v1786_v28  ;;  %v1761_v63 = vmul.f32 1.442695, %v1713_v21  ;;  %v2262_v20 = vmul.f32 1.442695, %v2214_v8  ;;  %v5298_v47 = vadd.f32 %v4136_v22, %v5248_v35 }
 0x224   : > { %v4049_v31 = vpop.eup %4048  ;;  %v983_v7 = vmul.f32 %v4047_v51, %v908_v26  ;;  %4060 = vrcp.f32 %v2287_v14 }
 0x225   : > { %v4051_v48 = vpop.eup %4050  ;;  %v1459_v15 = vmul.f32 %v4049_v31, %v1384_v12  ;;  %4062 = vrcp.f32 %v810_v37  ;;  %v737_v14 = vsub.f32 0.0, %v5298_v47  ;;  %v909_v31 = vmul.f32 %v5266_v40, %v5202_v53 }
 0x226   : > { %v4053_v50 = vpop.eup %4052  ;;  %v1960_v1 = vmul.f32 %v4051_v48, %v1885_v58  ;;  %4064 = vrcp.f32 %v1286_v56  ;;  %v5304_v56 = vadd.f32 %v4136_v22, %v5263_v4 }
 0x227   : > { %v4055_v10 = vpop.eup %4054  ;;  %v1484_v24 = vmax.f32 %v983_v7, %v1459_v15  ;;  %4066 = vrcp.f32 %v1787_v9  ;;  %v2461_v23 = vmul.f32 %v4053_v50, %v2386_v46  ;;  %v5309_v9 = vadd.f32 %v4136_v22, %v5278_v38 }
 0x228   : > { %v4057_v0 = vpop.eup %4056  ;;  %4068 = vpow2.f32 %v2260_v13  ;;  %v5315_v15 = vadd.f32 %v4136_v22, %v5280_v16  ;;  %v984_v49 = vmul.f32 %v4055_v10, %v909_v31 }
 0x229   : > { %v4059_v52 = vpop.eup %4058  ;;  %v1985_v6 = vmax.f32 %v1484_v24, %v1960_v1  ;;  %v1335_v55 = vadd.f32 2.0, %v4057_v0  ;;  %4070 = vpow2.f32 %v784_v60  ;;  %v1213_v1 = vsub.f32 0.0, %v5304_v56 }
 0x22a   : > { %v4061_v36 = vpop.eup %4060  ;;  %v1836_v42 = vadd.f32 2.0, %v4059_v52  ;;  %4072 = vpow2.f32 %v1260_v62  ;;  %v1714_v40 = vsub.f32 0.0, %v5309_v9 }
 0x22b   : > { %v4063_v43 = vpop.eup %4062  ;;  %v2486_v34 = vmax.f32 %v1985_v6, %v2461_v23  ;;  %v1360_v30 = vmul.f32 %v4057_v0, %v1335_v55  ;;  %v2337_v27 = vadd.f32 2.0, %v4061_v36  ;;  %4074 = vpow2.f32 %v1761_v63 }
 0x22c   : > { %v4065_v41 = vpop.eup %4064  ;;  %v1861_v19 = vmul.f32 %v4059_v52, %v1836_v42  ;;  %v860_v3 = vadd.f32 2.0, %v4063_v43  ;;  %4076 = vpow2.f32 %v2262_v20  ;;  %v2215_v0 = vsub.f32 0.0, %v5315_v15 }
 0x22d   : > { %v4067_v35 = vpop.eup %4066  ;;  %v2511_v28 = vpack.c.bf16 %v2486_v34, %v2486_v34  ;;  %v1410_v44 = vadd.f32 2.0, %v1360_v30  ;;  %v2362_v29 = vmul.f32 %v4061_v36, %v2337_v27  ;;  %v1336_v26 = vadd.f32 2.0, %v4065_v41 }
 0x22e   : > { %v4069_v37 = vpop.eup %4068  ;;  %v1911_v13 = vadd.f32 2.0, %v1861_v19  ;;  %v5301_v45 = vmul.f32 %v4063_v43, %v860_v3  ;;  %v1837_v12 = vadd.f32 2.0, %v4067_v35  ;;  %v1385_v25 = vmul.f32 %v1360_v30, %v5212_v61 }
 0x22f   : > { %v4071_v17 = vpop.eup %4070  ;;  %2537 = vst.msk [vmem:[%s4803_s12 + $0x50] sm:$0xf] %vm2516_vm3, %v2511_v28  ;;  %4078 = vrcp.f32 %v1410_v44  ;;  %v2412_v51 = vadd.f32 2.0, %v2362_v29  ;;  %v1361_v58 = vmul.f32 %v4065_v41, %v1336_v26  ;;  %v2288_v48 = vadd.f32 1.0, %v4069_v37 }
 0x230   : > { %v4073_v21 = vpop.eup %4072  ;;  %4080 = vrcp.f32 %v1911_v13  ;;  %v935_v7 = vadd.f32 2.0, %v5301_v45  ;;  %v1862_v4 = vmul.f32 %v4067_v35, %v1837_v12  ;;  %v811_v38 = vadd.f32 1.0, %v4071_v17 }
 0x231   : > { %v4075_v8 = vpop.eup %4074  ;;  %4082 = vrcp.f32 %v2412_v51  ;;  %v1411_v50 = vadd.f32 2.0, %v1361_v58  ;;  %v1287_v53 = vadd.f32 1.0, %v4073_v21  ;;  %v1886_v16 = vmul.f32 %v1861_v19, %v5224_v33 }
 0x232   : > { %v4077_v60 = vpop.eup %4076  ;;  %4084 = vrcp.f32 %v935_v7  ;;  %v1912_v62 = vadd.f32 2.0, %v1862_v4  ;;  %v1788_v24 = vadd.f32 1.0, %v4075_v8  ;;  %v786_v52 = vmul.f32 1.442695, %v737_v14 }
 0x233   : > { %4086 = vrcp.f32 %v2288_v48  ;;  %v2289_v63 = vadd.f32 1.0, %v4077_v60  ;;  %v1262_v55 = vmul.f32 1.442695, %v1213_v1  ;;  %v2387_v61 = vmul.f32 %v2362_v29, %v5229_v57 }
 0x234   : > { %4088 = vrcp.f32 %v1411_v50  ;;  %v1763_v42 = vmul.f32 1.442695, %v1714_v40  ;;  %v2264_v33 = vmul.f32 1.442695, %v2215_v0  ;;  %v910_v57 = vmul.f32 %v5301_v45, %v5233_v2 }
 0x235   : > { %v4079_v46 = vpop.eup %4078  ;;  %4090 = vrcp.f32 %v1912_v62  ;;  %v1386_v29 = vmul.f32 %v1361_v58, %v5239_v39  ;;  %v1887_v26 = vmul.f32 %v1862_v4, %v5242_v32 }
 0x236   : > { %v4081_v20 = vpop.eup %4080  ;;  %v1460_v22 = vmul.f32 %v4079_v46, %v1385_v25  ;;  %4092 = vrcp.f32 %v811_v38 }
 0x237   : > { %v4083_v6 = vpop.eup %4082  ;;  %v1961_v23 = vmul.f32 %v4081_v20, %v1886_v16  ;;  %4094 = vrcp.f32 %v1287_v53 }
 0x238   : > { %v4085_v10 = vpop.eup %4084  ;;  %v1485_v36 = vmax.f32 %v984_v49, %v1460_v22  ;;  %4096 = vrcp.f32 %v1788_v24  ;;  %v2462_v27 = vmul.f32 %v4083_v6, %v2387_v61 }
 0x239   : > { %v4087_v43 = vpop.eup %4086  ;;  %4098 = vrcp.f32 %v2289_v63  ;;  %v985_v21 = vmul.f32 %v4085_v10, %v910_v57 }
 0x23a   : > { %v4089_v34 = vpop.eup %4088  ;;  %v1986_v30 = vmax.f32 %v1485_v36, %v1961_v23  ;;  %v2338_v41 = vadd.f32 2.0, %v4087_v43  ;;  %4100 = vpow2.f32 %v786_v52 }
 0x23b   : > { %v4091_v19 = vpop.eup %4090  ;;  %4102 = vpow2.f32 %v1262_v55  ;;  %v1461_v31 = vmul.f32 %v4089_v34, %v1386_v29 }
 0x23c   : > { %v4093_v3 = vpop.eup %4092  ;;  %v2487_v35 = vmax.f32 %v1986_v30, %v2462_v27  ;;  %v2363_v28 = vmul.f32 %v4087_v43, %v2338_v41  ;;  %4104 = vpow2.f32 %v1763_v42  ;;  %v1962_v58 = vmul.f32 %v4091_v19, %v1887_v26 }
 0x23d   : > { %v4095_v44 = vpop.eup %4094  ;;  %v861_v14 = vadd.f32 2.0, %v4093_v3  ;;  %4106 = vpow2.f32 %v2264_v33  ;;  %v1486_v62 = vmax.f32 %v985_v21, %v1461_v31 }
 0x23e   : > { %v4097_v37 = vpop.eup %4096  ;;  %v2512_v13 = vpack.c.bf16 %v2487_v35, %v2487_v35  ;;  %v2413_v17 = vadd.f32 2.0, %v2363_v28  ;;  %v1337_v51 = vadd.f32 2.0, %v4095_v44  ;;  %v2388_v46 = vmul.f32 %v2363_v28, %v5261_v5 }
 0x23f   : > { %v4099_v12 = vpop.eup %4098  ;;  %v886_v7 = vmul.f32 %v4093_v3, %v861_v14  ;;  %v1838_v8 = vadd.f32 2.0, %v4097_v37  ;;  %v1987_v24 = vmax.f32 %v1486_v62, %v1962_v58 }
 0x240   : > { %v4101_v48 = vpop.eup %4100  ;;  %2538 = vst.msk [vmem:[%s4803_s12 + $0x54] sm:$0xf] %vm2516_vm3, %v2512_v13  ;;  %4108 = vrcp.f32 %v2413_v17  ;;  %v1362_v2 = vmul.f32 %v4095_v44, %v1337_v51  ;;  %v2339_v45 = vadd.f32 2.0, %v4099_v12 }
 0x241   : > { %v4103_v39 = vpop.eup %4102  ;;  %v936_v60 = vadd.f32 2.0, %v886_v7  ;;  %v1863_v50 = vmul.f32 %v4097_v37, %v1838_v8  ;;  %v812_v40 = vadd.f32 1.0, %v4101_v48  ;;  %v911_v22 = vmul.f32 %v886_v7, %v5270_v18 }
 0x242   : > { %v4105_v38 = vpop.eup %4104  ;;  %v1412_v1 = vadd.f32 2.0, %v1362_v2  ;;  %v2364_v32 = vmul.f32 %v4099_v12, %v2339_v45  ;;  %v1288_v25 = vadd.f32 1.0, %v4103_v39  ;;  %v1387_v23 = vmul.f32 %v1362_v2, %v5276_v11 }
 0x243   : > { %v4107_v4 = vpop.eup %4106  ;;  %4110 = vrcp.f32 %v936_v60  ;;  %v1913_v53 = vadd.f32 2.0, %v1863_v50  ;;  %v1789_v16 = vadd.f32 1.0, %v4105_v38  ;;  %v1888_v5 = vmul.f32 %v1863_v50, %v5284_v54 }
 0x244   : > { %4112 = vrcp.f32 %v1412_v1  ;;  %v2414_v49 = vadd.f32 2.0, %v2364_v32  ;;  %v2290_v0 = vadd.f32 1.0, %v4107_v4  ;;  %v2389_v30 = vmul.f32 %v2364_v32, %v5287_v59 }
 0x245   : > { %4114 = vrcp.f32 %v1913_v53 }
 0x246   : > { %v4109_v63 = vpop.eup %4108  ;;  %4116 = vrcp.f32 %v2414_v49 }
 0x247   : > { %v2463_v20 = vmul.f32 %v4109_v63, %v2388_v46  ;;  %4118 = vrcp.f32 %v812_v40 }
 0x248   : > { %4120 = vrcp.f32 %v1288_v25 }
 0x249   : > { %v4111_v52 = vpop.eup %4110  ;;  %v2488_v6 = vmax.f32 %v1987_v24, %v2463_v20  ;;  %4122 = vrcp.f32 %v1789_v16 }
 0x24a   : > { %v4113_v55 = vpop.eup %4112  ;;  %v986_v10 = vmul.f32 %v4111_v52, %v911_v22  ;;  %4124 = vrcp.f32 %v2290_v0 }
 0x24b   : > { %v4115_v36 = vpop.eup %4114  ;;  %v2513_v61 = vpack.c.bf16 %v2488_v6, %v2488_v6  ;;  %v1462_v42 = vmul.f32 %v4113_v55, %v1387_v23 }
 0x24c   : > { %v4117_v43 = vpop.eup %4116  ;;  %v1963_v33 = vmul.f32 %v4115_v36, %v1888_v5 }
 0x24d   : > { %v4119_v34 = vpop.eup %4118  ;;  %2539 = vst.msk [vmem:[%s4803_s12 + $0x58] sm:$0xf] %vm2516_vm3, %v2513_v61  ;;  %v1487_v18 = vmax.f32 %v986_v10, %v1462_v42  ;;  %v2464_v3 = vmul.f32 %v4117_v43, %v2389_v30 }
 0x24e   : > { %v4121_v27 = vpop.eup %4120  ;;  %v862_v41 = vadd.f32 2.0, %v4119_v34 }
 0x24f   : > { %v4123_v11 = vpop.eup %4122  ;;  %v1988_v19 = vmax.f32 %v1487_v18, %v1963_v33  ;;  %v1338_v35 = vadd.f32 2.0, %v4121_v27 }
 0x250   : > { %v4125_v54 = vpop.eup %4124  ;;  %v887_v28 = vmul.f32 %v4119_v34, %v862_v41  ;;  %v1839_v44 = vadd.f32 2.0, %v4123_v11 }
 0x251   : > { %v2489_v57 = vmax.f32 %v1988_v19, %v2464_v3  ;;  %v1363_v29 = vmul.f32 %v4121_v27, %v1338_v35  ;;  %v2340_v14 = vadd.f32 2.0, %v4125_v54 }
 0x252   : > { %v937_v37 = vadd.f32 2.0, %v887_v28  ;;  %v1864_v13 = vmul.f32 %v4123_v11, %v1839_v44  ;;  %v912_v21 = vmul.f32 %v887_v28, %v5298_v47 }
 0x253   : > { %v2514_v26 = vpack.c.bf16 %v2489_v57, %v2489_v57  ;;  %v1413_v17 = vadd.f32 2.0, %v1363_v29  ;;  %v2365_v51 = vmul.f32 %v4125_v54, %v2340_v14  ;;  %v1388_v7 = vmul.f32 %v1363_v29, %v5304_v56 }
 0x254   : > { %4126 = vrcp.f32 %v937_v37  ;;  %v1914_v59 = vadd.f32 2.0, %v1864_v13  ;;  %v1889_v2 = vmul.f32 %v1864_v13, %v5309_v9 }
 0x255   : > { %2540 = vst.msk [vmem:[%s4803_s12 + $0x5c] sm:$0xf] %vm2516_vm3, %v2514_v26  ;;  %4128 = vrcp.f32 %v1413_v17  ;;  %v2415_v12 = vadd.f32 2.0, %v2365_v51  ;;  %v2390_v38 = vmul.f32 %v2365_v51, %v5315_v15 }
 0x256   : > { %4130 = vrcp.f32 %v1914_v59 }
 0x257   : > { %4132 = vrcp.f32 %v2415_v12 }
 0x25a   : > { %v4127_v31 = vpop.eup %4126 }
 0x25b   : > { %v4129_v8 = vpop.eup %4128  ;;  %v987_v48 = vmul.f32 %v4127_v31, %v912_v21 }
 0x25c   : > { %v4131_v45 = vpop.eup %4130  ;;  %v1463_v39 = vmul.f32 %v4129_v8, %v1388_v7 }
 0x25d   : > { %v4133_v58 = vpop.eup %4132  ;;  %v1964_v60 = vmul.f32 %v4131_v45, %v1889_v2 }
 0x25e   : > { %v1488_v50 = vmax.f32 %v987_v48, %v1463_v39  ;;  %v2465_v32 = vmul.f32 %v4133_v58, %v2390_v38 }
 0x260   : > { %v1989_v1 = vmax.f32 %v1488_v50, %v1964_v60 }
 0x262   : > { %v2490_v4 = vmax.f32 %v1989_v1, %v2465_v32  ;;  %2548 = sbr.rel (!%p4423_p5) target bundleno = 687 (0x2af), region = 106 }
 0x264   : > { %v2515_v62 = vpack.c.bf16 %v2490_v4, %v2490_v4 }
 0x266   : > { %2541 = vst.msk [vmem:[%s4803_s12 + $0x60] sm:$0xf] %vm2516_vm3, %v2515_v62 }
 0x267   : > { %s5497_s29 = smov (!%p2551_p8, %s2550_s29), 25 }
 0x268   : > { %s3288_s6 = sshll.u32 %s5497_s29, 2 }
 0x269   : > { %p3291_p9 = scmp.eq.s32.totalorder %s3288_s6, 0 }
 0x26a   : > { %4137 = sdivrem.u32 (!%p3291_p9), %s5497_s29, 25 }
 0x26b   : > { %2559 = sbr.rel (%p3291_p9) target bundleno = 687 (0x2af), region = 110 }
 0x273   : > { %s5357_s21 = spop.drf %4137 }
 0x274   : > { %s4139_s7 = spop.drf %4137  ;;  %p3292_p5 = scmp.le.s32.totalorder %s5357_s21, 0 }
 0x275   : > { %s5482_s15 = smov (!%p3292_p5), %s5351_s5  ;;  %s5483_s8 = smov (!%p3292_p5), %s4803_s12 }
 0x276   : > { %2882 = sbr.rel (%p3292_p5) target bundleno = 661 (0x295), region = 227  ;;  %s5366_s9 = smov (!%p3292_p5), 0  }
 0x277   : > { %s5368_s10 = smov (!%p3292_p5), 0  }
 0x27b LB: >> { %v2577_v47 = vld [vmem:[%s4337_s8] sm:$0xf]  ;;  %v2579_v56 = vld [vmem:[%s4337_s8 + $0x4] sm:$0xf]  ;;  %v2581_v9 = vld [vmem:[%s4337_s8 + $0x8] sm:$0xf]  ;;  %s4345_s10 = sphi %s5368_s10, %s2571_s10   ;;  %s4341_s9 = sphi %s5366_s9, %s5486_s9   ;;  %s4337_s8 = sphi %s5483_s8, %s5485_s8   ;;  %s4333_s15 = sphi %s5482_s15, %s5484_s15  }
 0x27c   : >> { %2578 = vst [vmem:[%s4333_s15] sm:$0xf] %v2577_v47  ;;  %v2583_v15 = vld [vmem:[%s4337_s8 + $0xc] sm:$0xf]  ;;  %v2585_v53 = vld [vmem:[%s4337_s8 + $0x10] sm:$0xf]  ;;  %s2627_s17 = sadd.s32 1, %s4341_s9 }
 0x27d   : >> { %2580 = vst [vmem:[%s4333_s15 + $0x4] sm:$0xf] %v2579_v56  ;;  %v2587_v40 = vld [vmem:[%s4337_s8 + $0x14] sm:$0xf]  ;;  %v2589_v49 = vld [vmem:[%s4337_s8 + $0x18] sm:$0xf]  ;;  %p2628_p10 = scmp.ge.s32.totalorder %s2627_s17, %s5357_s21 }
 0x27e   : >> { %2582 = vst [vmem:[%s4333_s15 + $0x8] sm:$0xf] %v2581_v9  ;;  %v2591_v25 = vld [vmem:[%s4337_s8 + $0x1c] sm:$0xf]  ;;  %v2593_v24 = vld [vmem:[%s4337_s8 + $0x20] sm:$0xf] }
 0x27f   : >> { %2584 = vst [vmem:[%s4333_s15 + $0xc] sm:$0xf] %v2583_v15  ;;  %v2595_v46 = vld [vmem:[%s4337_s8 + $0x24] sm:$0xf]  ;;  %v2597_v16 = vld [vmem:[%s4337_s8 + $0x28] sm:$0xf] }
 0x280   : >> { %2586 = vst [vmem:[%s4333_s15 + $0x10] sm:$0xf] %v2585_v53  ;;  %v2599_v63 = vld [vmem:[%s4337_s8 + $0x2c] sm:$0xf]  ;;  %v2601_v0 = vld [vmem:[%s4337_s8 + $0x30] sm:$0xf] }
 0x281   : >> { %2588 = vst [vmem:[%s4333_s15 + $0x14] sm:$0xf] %v2587_v40  ;;  %v2603_v20 = vld [vmem:[%s4337_s8 + $0x34] sm:$0xf]  ;;  %v2605_v22 = vld [vmem:[%s4337_s8 + $0x38] sm:$0xf] }
 0x282   : >> { %2590 = vst [vmem:[%s4333_s15 + $0x18] sm:$0xf] %v2589_v49  ;;  %s5499_s17 = smov (%p2628_p10, %s2627_s17), 0  ;;  %v2607_v52 = vld [vmem:[%s4337_s8 + $0x3c] sm:$0xf]  ;;  %s2571_s10 = sadd.s32 1, %s4345_s10  }
 0x283   : >> { %2592 = vst [vmem:[%s4333_s15 + $0x1c] sm:$0xf] %v2591_v25  ;;  %v2609_v6 = vld [vmem:[%s4337_s8 + $0x40] sm:$0xf]  ;;  %s2630_s18 = smul.u32 100, %s5499_s17  ;;  %p2570_p11 = scmp.ge.s32.totalorder %s2571_s10, %s5357_s21 }
 0x284   : >> { %2594 = vst [vmem:[%s4333_s15 + $0x20] sm:$0xf] %v2593_v24  ;;  %v2611_v23 = vld [vmem:[%s4337_s8 + $0x44] sm:$0xf]  ;;  %v2613_v55 = vld [vmem:[%s4337_s8 + $0x48] sm:$0xf]  ;;  %s5486_s9 = smov %s5499_s17 }
 0x285   : >> { %2596 = vst [vmem:[%s4333_s15 + $0x24] sm:$0xf] %v2595_v46  ;;  %s2632_s23 = scalar_lea.vmem %s4803_s12, %s2630_s18 [#allocation7]   ;;  %s2633_s25 = scalar_lea.vmem %s5351_s5, %s2630_s18   ;;  %v2615_v10 = vld [vmem:[%s4337_s8 + $0x4c] sm:$0xf]  ;;  %v2617_v5 = vld [vmem:[%s4337_s8 + $0x50] sm:$0xf] }
 0x286   : >> { %2598 = vst [vmem:[%s4333_s15 + $0x28] sm:$0xf] %v2597_v16  ;;  %v2619_v36 = vld [vmem:[%s4337_s8 + $0x54] sm:$0xf]  ;;  %v2621_v61 = vld [vmem:[%s4337_s8 + $0x58] sm:$0xf] }
 0x287   : >> { %2600 = vst [vmem:[%s4333_s15 + $0x2c] sm:$0xf] %v2599_v63  ;;  %v2623_v42 = vld [vmem:[%s4337_s8 + $0x5c] sm:$0xf]  ;;  %v2625_v43 = vld [vmem:[%s4337_s8 + $0x60] sm:$0xf]  ;;  %s5485_s8 = smov %s2632_s23 }
 0x288   : >> { %2602 = vst [vmem:[%s4333_s15 + $0x30] sm:$0xf] %v2601_v0 }
 0x289   : >> { %2604 = vst [vmem:[%s4333_s15 + $0x34] sm:$0xf] %v2603_v20 }
 0x28a   : >> { %2606 = vst [vmem:[%s4333_s15 + $0x38] sm:$0xf] %v2605_v22 }
 0x28b   : >> { %2608 = vst [vmem:[%s4333_s15 + $0x3c] sm:$0xf] %v2607_v52 }
 0x28c   : >> { %2610 = vst [vmem:[%s4333_s15 + $0x40] sm:$0xf] %v2609_v6 }
 0x28d   : >> { %2612 = vst [vmem:[%s4333_s15 + $0x44] sm:$0xf] %v2611_v23 }
 0x28e   : >> { %2614 = vst [vmem:[%s4333_s15 + $0x48] sm:$0xf] %v2613_v55 }
 0x28f   : >> { %2616 = vst [vmem:[%s4333_s15 + $0x4c] sm:$0xf] %v2615_v10 }
 0x290   : >> { %2618 = vst [vmem:[%s4333_s15 + $0x50] sm:$0xf] %v2617_v5  ;;  %2573 = sbr.rel (!%p2570_p11) target bundleno = 635 (0x27b), region = 233 }
 0x291   : >> { %2620 = vst [vmem:[%s4333_s15 + $0x54] sm:$0xf] %v2619_v36 }
 0x292   : >> { %2622 = vst [vmem:[%s4333_s15 + $0x58] sm:$0xf] %v2621_v61 }
 0x293   : >> { %2624 = vst [vmem:[%s4333_s15 + $0x5c] sm:$0xf] %v2623_v42 }
 0x294   : >> { %2626 = vst [vmem:[%s4333_s15 + $0x60] sm:$0xf] %v2625_v43  ;;  %s5484_s15 = smov %s2633_s25 }
 0x295 PF: > { %4140 = sdivrem.u32 %s5497_s29, 25 }
 0x296   : > { %s3293_s11 = smul.u32 100, %s5357_s21 }
 0x298   : > { %s5453_s24 = scalar_lea.vmem %s4803_s12, %s3293_s11 [#allocation7]   ;;  %s2640_s20 = scalar_lea.vmem %s5351_s5, %s3293_s11  }
 0x29e   : > { %s4141_s26 = spop.drf %4140 }
 0x29f   : > { %s4142_s14 = spop.drf %4140 }
 0x2a0   : > { %p3295_p12 = scmp.le.s32.totalorder %s4142_s14, 0 }
 0x2a1   : > { %s4347_s22 = smov (!%p3295_p12), %s2640_s20   ;;  %s4351_s27 = smov (!%p3295_p12), %s5453_s24  }
 0x2a2   : > { %2896 = sbr.rel (%p3295_p12) target bundleno = 687 (0x2af), region = 238  ;;  %s4355_s28 = smov (!%p3295_p12), 0  }
 0x2a3   : > { %s4359_s30 = smov (!%p3295_p12), 0  }
 0x2a7 LB: >> { %v2650_v33 = vld [vmem:[%s4353_s27] sm:$0xf]  ;;  %s2652_s12 = sadd.s32 1, %s4357_s28  ;;  %s2644_s30 = sadd.s32 1, %s4361_s30   ;;  %s4361_s30 = sphi %s4359_s30, %s2644_s30   ;;  %s4357_s28 = sphi %s4355_s28, %s4356_s28   ;;  %s4353_s27 = sphi %s4351_s27, %s2657_s27   ;;  %s4349_s22 = sphi %s4347_s22, %s2658_s22  }
 0x2a8   : >> { %2651 = vst [vmem:[%s4349_s22] sm:$0xf] %v2650_v33  ;;  %p2653_p13 = scmp.ge.s32.totalorder %s2652_s12, %s4142_s14  ;;  %p2643_p0 = scmp.ge.s32.totalorder %s2644_s30, %s4142_s14 }
 0x2aa   : >> { %s5501_s12 = smov (%p2653_p13, %s2652_s12), 0  ;;  %2646 = sbr.rel (!%p2643_p0) target bundleno = 679 (0x2a7), region = 244 }
 0x2ab   : >> { %s3296_s29 = sshll.u32 %s5501_s12, 2  ;;  %s4356_s28 = smov %s5501_s12  }
 0x2ac   : >> { %s2657_s27 = scalar_lea.vmem %s5453_s24, %s3296_s29 [#allocation7]   ;;  %s2658_s22 = scalar_lea.vmem %s2640_s20, %s3296_s29  }
 0x2af PF: > { %p12_p1 = scmp.ge.s32.totalorder %s4407_s16, 4   ;;  %s5487_s12 = smov %s4293_s13 }
 0x2b0   : > { %s5488_s13 = smov %s4417_s19  ;;  %s5489_s14 = smov %s4407_s16 }
 0x2b1   :  { %14 = sbr.rel (!%p12_p1) target bundleno = 3 (0x3), region = 255 }
 0x2b6   :  { %2769 = vsyncpa [#allocation4], 1 }
 0x2b7   :  { %2771 = vsyncpa [#allocation4 + $0x1], 1 }
 0x2b8   :  { %2772 = vsyncpa [#allocation6], 1 }

// kernel: cnn_forward.5
= control target key start
LH: loop header
LB: loop body
LE: loop exit
PB: predicated region body
PF: predicated region fallthrough
CT: control target
= control target key end

     0   :  { %s2889_s12 = smov 0   ;;  %s2891_s13 = smov 0   ;;  %s3844_s0 = inlined_call_operand.vmem [shape: bf16[4,98,288], index: 0, kind: input, shape index: {}]   ;;  %s3845_s1 = inlined_call_operand.vmem [shape: bf16[288,64], index: 1, kind: input, shape index: {}]   ;;  %s3846_s2 = inlined_call_operand.vmem [shape: f32[1,64], index: 2, kind: input, shape index: {}]   ;;  %s3847_s3 = inlined_call_operand.vmem [shape: bf16[98,64], index: 3, kind: output, shape index: {}]  }
   0x1   :  { %s2893_s14 = smov 0  }
   0x2 LB: > { %s2905_s15 = sadd.s32 4294967295, %s2771_s14   ;;  %s2908_s16 = sadd.s32 1, %s2771_s14   ;;  %s2771_s14 = sphi %s2893_s14, %s3865_s14   ;;  %s2767_s13 = sphi %s2891_s13, %s3864_s13   ;;  %s2763_s12 = sphi %s2889_s12, %s3863_s12  }
   0x3   : > { %s17_s17 = ssub.s32 %s2771_s14, %s2908_s16  ;;  %s20_s18 = sadd.s32 1, %s2767_s13 }
   0x4   : > { %p18_p0 = scmp.eq.s32.totalorder %s17_s17, 0  ;;  %p27_p1 = scmp.ne.s32.totalorder %s2767_s13, %s2763_s12 }
   0x5   : > { %p28_p2 = scmp.eq.s32.totalorder %s2771_s14, 0  ;;  %p99_p3 = scmp.eq.s32.totalorder %s2905_s15, 1 }
   0x6   : > { %s2918_s19 = scalar_select %p18_p0, %s2767_s13, %s20_s18  }
   0x7   : > { %p29_p4 = por %p28_p2, %p27_p1  ;;  %p2920_p5 = por %p99_p3, %p27_p1 }
   0x8   : > { %p1887_p6 = scmp.ge.s32.totalorder %s2771_s14, 2 }
   0xa   : > { %127 = sbr.rel (%p1887_p6) target bundleno = 168 (0xa8), region = 24 }
   0xf   : > { %130 = sbr.rel (!%p29_p4) target bundleno = 168 (0xa8), region = 28  ;;  %s132_s21 = sand.u32 (%p29_p4), 1, %s2767_s13  }
  0x10   : > { %s135_s22 = smul.u32 (%p29_p4), 7, %s2771_s14 }
  0x11   : > { %s2241_s23 = smul.u32 (%p29_p4), 336, %s132_s21 }
  0x12   : > { %s136_s24 = ssub.s32 (%p29_p4), 13, %s135_s22  ;;  %s2245_s25 = smul.u32 (%p29_p4), 84, %s2771_s14 }
  0x13   : > { %p137_p7 = scmp.lt.s32.totalorder (%p29_p4), %s136_s24, 7  ;;  %s2936_s30 = scalar_lea.vmem (%p29_p4), [#allocation2], %s2241_s23  }
  0x14   : > { %s2931_s28 = scalar_lea.vmem %s3844_s0, %s2245_s25  }
  0x15   : > { %s3867_s24 = smov (!%p137_p7, %s136_s24), 7 }
  0x16   : > { %s1889_s29 = smul.u32 48, %s3867_s24 }
  0x18   : > { %p1892_p8 = scmp.eq.s32.totalorder %s1889_s29, 0 }
  0x19   : > { %s150_s4 = scalar_lea.vmem (!%p1892_p8), %s2931_s28, 8   ;;  %s151_s5 = scalar_lea.vmem (!%p1892_p8), %s2936_s30, 8 [#allocation2]  }
  0x1a   : > { %147 = sbr.rel (%p1892_p8) target bundleno = 168 (0xa8), region = 32 }
  0x1b   : > { %2465 = sdivrem.u32 (!%p1892_p8), %s3867_s24, 6 }
  0x24   : > { %s2941_s6 = spop.drf %2465 }
  0x25   : > { %s2467_s7 = spop.drf %2465  ;;  %p1893_p9 = scmp.le.s32.totalorder %s2941_s6, 0 }
  0x26   : > { %s3849_s8 = smov (!%p1893_p9), %s2936_s30  ;;  %s3850_s9 = smov (!%p1893_p9), %s2931_s28 }
  0x27   : > { %1785 = sbr.rel (%p1893_p9) target bundleno = 69 (0x45), region = 170  ;;  %s2950_s10 = smov (!%p1893_p9), 0  }
  0x28   : > { %s2952_s11 = smov (!%p1893_p9), 0  }
  0x2c LB: >> { %v163_v0 = vld [vmem:[%s2779_s9] sm:$0xff]  ;;  %v165_v1 = vld [vmem:[%s2779_s9 + $0xc] sm:$0xff]  ;;  %v167_v2 = vld [vmem:[%s2779_s9 + $0x18] sm:$0xff]  ;;  %s211_s17 = sadd.s32 1, %s2783_s10  ;;  %s157_s11 = sadd.s32 1, %s2787_s11   ;;  %s2787_s11 = sphi %s2952_s11, %s157_s11   ;;  %s2783_s10 = sphi %s2950_s10, %s3853_s10   ;;  %s2779_s9 = sphi %s3850_s9, %s3852_s9   ;;  %s2775_s8 = sphi %s3849_s8, %s3851_s8  }
  0x2d   : >> { %164 = vst [vmem:[%s2775_s8] sm:$0xff] %v163_v0  ;;  %v169_v3 = vld [vmem:[%s2779_s9 + $0x24] sm:$0xff]  ;;  %p212_p10 = scmp.ge.s32.totalorder %s211_s17, %s2941_s6  ;;  %v171_v4 = vld [vmem:[%s2779_s9 + $0x30] sm:$0xff]  ;;  %v173_v5 = vld [vmem:[%s2779_s9 + $0x3c] sm:$0xff]  ;;  %p156_p11 = scmp.ge.s32.totalorder %s157_s11, %s2941_s6 }
  0x2e   : >> { %166 = vst [vmem:[%s2775_s8 + $0xc] sm:$0xff] %v165_v1  ;;  %v175_v6 = vld [vmem:[%s2779_s9 + $0x9c] sm:$0xff]  ;;  %v177_v7 = vld [vmem:[%s2779_s9 + $0xa8] sm:$0xff]  ;;  %v179_v8 = vld [vmem:[%s2779_s9 + $0xb4] sm:$0xff] }
  0x2f   : >> { %168 = vst [vmem:[%s2775_s8 + $0x18] sm:$0xff] %v167_v2  ;;  %s3869_s17 = smov (%p212_p10, %s211_s17), 0  ;;  %v181_v9 = vld [vmem:[%s2779_s9 + $0xc0] sm:$0xff]  ;;  %v183_v10 = vld [vmem:[%s2779_s9 + $0xcc] sm:$0xff]  ;;  %v185_v11 = vld [vmem:[%s2779_s9 + $0xd8] sm:$0xff] }
  0x30   : >> { %170 = vst [vmem:[%s2775_s8 + $0x24] sm:$0xff] %v169_v3  ;;  %s214_s18 = smul.u32 72, %s3869_s17  ;;  %v187_v12 = vld [vmem:[%s2779_s9 + $0x138] sm:$0xff]  ;;  %v189_v13 = vld [vmem:[%s2779_s9 + $0x144] sm:$0xff]  ;;  %v191_v14 = vld [vmem:[%s2779_s9 + $0x150] sm:$0xff]  ;;  %s3853_s10 = smov %s3869_s17 }
  0x31   : >> { %172 = vst [vmem:[%s2775_s8 + $0x30] sm:$0xff] %v171_v4  ;;  %v193_v15 = vld [vmem:[%s2779_s9 + $0x15c] sm:$0xff]  ;;  %v195_v16 = vld [vmem:[%s2779_s9 + $0x168] sm:$0xff]  ;;  %v197_v17 = vld [vmem:[%s2779_s9 + $0x174] sm:$0xff] }
  0x32   : >> { %174 = vst [vmem:[%s2775_s8 + $0x3c] sm:$0xff] %v173_v5  ;;  %s2986_s21 = scalar_lea.vmem %s2931_s28, %s214_s18   ;;  %s2989_s22 = scalar_lea.vmem %s2936_s30, %s214_s18 [#allocation2]   ;;  %v199_v18 = vld [vmem:[%s2779_s9 + $0x1d4] sm:$0xff]  ;;  %v201_v19 = vld [vmem:[%s2779_s9 + $0x1e0] sm:$0xff]  ;;  %v203_v20 = vld [vmem:[%s2779_s9 + $0x1ec] sm:$0xff] }
  0x33   : >> { %176 = vst [vmem:[%s2775_s8 + $0x54] sm:$0xff] %v175_v6  ;;  %v205_v21 = vld [vmem:[%s2779_s9 + $0x1f8] sm:$0xff]  ;;  %v207_v22 = vld [vmem:[%s2779_s9 + $0x204] sm:$0xff]  ;;  %v209_v23 = vld [vmem:[%s2779_s9 + $0x210] sm:$0xff]  ;;  %s3852_s9 = smov %s2986_s21 }
  0x34   : >> { %178 = vst [vmem:[%s2775_s8 + $0x60] sm:$0xff] %v177_v7 }
  0x35   : >> { %180 = vst [vmem:[%s2775_s8 + $0x6c] sm:$0xff] %v179_v8 }
  0x36   : >> { %182 = vst [vmem:[%s2775_s8 + $0x78] sm:$0xff] %v181_v9 }
  0x37   : >> { %184 = vst [vmem:[%s2775_s8 + $0x84] sm:$0xff] %v183_v10 }
  0x38   : >> { %186 = vst [vmem:[%s2775_s8 + $0x90] sm:$0xff] %v185_v11 }
  0x39   : >> { %188 = vst [vmem:[%s2775_s8 + $0xa8] sm:$0xff] %v187_v12 }
  0x3a   : >> { %190 = vst [vmem:[%s2775_s8 + $0xb4] sm:$0xff] %v189_v13 }
  0x3b   : >> { %192 = vst [vmem:[%s2775_s8 + $0xc0] sm:$0xff] %v191_v14 }
  0x3c   : >> { %194 = vst [vmem:[%s2775_s8 + $0xcc] sm:$0xff] %v193_v15 }
  0x3d   : >> { %196 = vst [vmem:[%s2775_s8 + $0xd8] sm:$0xff] %v195_v16 }
  0x3e   : >> { %198 = vst [vmem:[%s2775_s8 + $0xe4] sm:$0xff] %v197_v17 }
  0x3f   : >> { %200 = vst [vmem:[%s2775_s8 + $0xfc] sm:$0xff] %v199_v18 }
  0x40   : >> { %202 = vst [vmem:[%s2775_s8 + $0x108] sm:$0xff] %v201_v19  ;;  %159 = sbr.rel (!%p156_p11) target bundleno = 44 (0x2c), region = 176 }
  0x41   : >> { %204 = vst [vmem:[%s2775_s8 + $0x114] sm:$0xff] %v203_v20 }
  0x42   : >> { %206 = vst [vmem:[%s2775_s8 + $0x120] sm:$0xff] %v205_v21 }
  0x43   : >> { %208 = vst [vmem:[%s2775_s8 + $0x12c] sm:$0xff] %v207_v22 }
  0x44   : >> { %210 = vst [vmem:[%s2775_s8 + $0x138] sm:$0xff] %v209_v23  ;;  %s3851_s8 = smov %s2989_s22 }
  0x45 PF: > { %2468 = sdivrem.u32 %s3867_s24, 6 }
  0x46   : > { %s1894_s23 = smul.u32 72, %s2941_s6 }
  0x48   : > { %s3038_s25 = scalar_lea.vmem %s2931_s28, %s1894_s23   ;;  %s3041_s26 = scalar_lea.vmem %s2936_s30, %s1894_s23 [#allocation2]  }
  0x4e   : > { %s2469_s27 = spop.drf %2468 }
  0x4f   : > { %s3043_s29 = spop.drf %2468 }
  0x50   : > { %p1896_p12 = scmp.le.s32.totalorder %s3043_s29, 0 }
  0x51   : > { %s3854_s7 = smov (!%p1896_p12), %s3041_s26  ;;  %s3855_s8 = smov (!%p1896_p12), %s3038_s25 }
  0x52   : > { %1799 = sbr.rel (%p1896_p12) target bundleno = 95 (0x5f), region = 181  ;;  %s2797_s9 = smov (!%p1896_p12), 0  }
  0x53   : > { %s2801_s10 = smov (!%p1896_p12), 0  }
  0x57 LB: >> { %v234_v24 = vld [vmem:[%s2795_s8] sm:$0xff]  ;;  %v238_v26 = vld [vmem:[%s2795_s8 + $0x138] sm:$0xff]  ;;  %s242_s6 = sadd.s32 1, %s2799_s9  ;;  %s228_s10 = sadd.s32 1, %s2803_s10   ;;  %s2803_s10 = sphi %s2801_s10, %s228_s10   ;;  %s2799_s9 = sphi %s2797_s9, %s2798_s9   ;;  %s2795_s8 = sphi %s3855_s8, %s247_s8   ;;  %s2791_s7 = sphi %s3854_s7, %s248_s7  }
  0x58   : >> { %v236_v25 = vld [vmem:[%s2795_s8 + $0x9c] sm:$0xff]  ;;  %235 = vst [vmem:[%s2791_s7] sm:$0xff] %v234_v24  ;;  %v240_v27 = vld [vmem:[%s2795_s8 + $0x1d4] sm:$0xff]  ;;  %p243_p13 = scmp.ge.s32.totalorder %s242_s6, %s3043_s29  ;;  %p227_p0 = scmp.ge.s32.totalorder %s228_s10, %s3043_s29 }
  0x59   : >> { %237 = vst [vmem:[%s2791_s7 + $0x54] sm:$0xff] %v236_v25 }
  0x5a   : >> { %239 = vst [vmem:[%s2791_s7 + $0xa8] sm:$0xff] %v238_v26  ;;  %s3871_s6 = smov (%p243_p13, %s242_s6), 0  ;;  %230 = sbr.rel (!%p227_p0) target bundleno = 87 (0x57), region = 187 }
  0x5b   : >> { %241 = vst [vmem:[%s2791_s7 + $0xfc] sm:$0xff] %v240_v27  ;;  %s245_s11 = smul.u32 12, %s3871_s6  ;;  %s2798_s9 = smov %s3871_s6  }
  0x5d   : >> { %s247_s8 = scalar_lea.vmem %s3038_s25, %s245_s11   ;;  %s248_s7 = scalar_lea.vmem %s3041_s26, %s245_s11 [#allocation2]  }
  0x5f PF: > { %2471 = sdivrem.u32 %s3867_s24, 7 }
  0x68   : > { %s3063_s17 = spop.drf %2471 }
  0x69   : > { %s2473_s18 = spop.drf %2471  ;;  %p1897_p1 = scmp.le.s32.totalorder %s3063_s17, 0 }
  0x6a   : > { %s3074_s21 = smov (!%p1897_p1), 0   ;;  %s3076_s22 = smov (!%p1897_p1), 0  }
  0x6b   : > { %1813 = sbr.rel (%p1897_p1) target bundleno = 141 (0x8d), region = 192 }
  0x70 LB: >> { %v262_v28 = vld [vmem:[%s2811_s4] sm:$0xf]  ;;  %v264_v29 = vld [vmem:[%s2811_s4 + $0xc] sm:$0xf]  ;;  %v266_v30 = vld [vmem:[%s2811_s4 + $0x18] sm:$0xf]  ;;  %s2819_s22 = sphi %s3076_s22, %s256_s22   ;;  %s2815_s21 = sphi %s3074_s21, %s3858_s21   ;;  %s2811_s4 = sphi %s150_s4, %s3857_s4   ;;  %s2807_s5 = sphi %s151_s5, %s3856_s5  }
  0x71   : >> { %263 = vst [vmem:[%s2807_s5] sm:$0xf] %v262_v28  ;;  %v268_v31 = vld [vmem:[%s2811_s4 + $0x24] sm:$0xf]  ;;  %v270_v32 = vld [vmem:[%s2811_s4 + $0x30] sm:$0xf]  ;;  %s318_s23 = sadd.s32 1, %s2815_s21 }
  0x72   : >> { %265 = vst [vmem:[%s2807_s5 + $0xc] sm:$0xf] %v264_v29  ;;  %v272_v33 = vld [vmem:[%s2811_s4 + $0x3c] sm:$0xf]  ;;  %v274_v34 = vld [vmem:[%s2811_s4 + $0x48] sm:$0xf]  ;;  %p319_p2 = scmp.ge.s32.totalorder %s318_s23, %s3063_s17 }
  0x73   : >> { %267 = vst [vmem:[%s2807_s5 + $0x18] sm:$0xf] %v266_v30  ;;  %v276_v35 = vld [vmem:[%s2811_s4 + $0x9c] sm:$0xf]  ;;  %v278_v36 = vld [vmem:[%s2811_s4 + $0xa8] sm:$0xf] }
  0x74   : >> { %269 = vst [vmem:[%s2807_s5 + $0x24] sm:$0xf] %v268_v31  ;;  %v280_v37 = vld [vmem:[%s2811_s4 + $0xb4] sm:$0xf]  ;;  %v282_v38 = vld [vmem:[%s2811_s4 + $0xc0] sm:$0xf] }
  0x75   : >> { %271 = vst [vmem:[%s2807_s5 + $0x30] sm:$0xf] %v270_v32  ;;  %v284_v39 = vld [vmem:[%s2811_s4 + $0xcc] sm:$0xf]  ;;  %v286_v40 = vld [vmem:[%s2811_s4 + $0xd8] sm:$0xf] }
  0x76   : >> { %273 = vst [vmem:[%s2807_s5 + $0x3c] sm:$0xf] %v272_v33  ;;  %v288_v41 = vld [vmem:[%s2811_s4 + $0xe4] sm:$0xf]  ;;  %v290_v42 = vld [vmem:[%s2811_s4 + $0x138] sm:$0xf] }
  0x77   : >> { %275 = vst [vmem:[%s2807_s5 + $0x48] sm:$0xf] %v274_v34  ;;  %v292_v43 = vld [vmem:[%s2811_s4 + $0x144] sm:$0xf]  ;;  %s3873_s23 = smov (%p319_p2, %s318_s23), 0  ;;  %s256_s22 = sadd.s32 1, %s2819_s22  }
  0x78   : >> { %277 = vst [vmem:[%s2807_s5 + $0x54] sm:$0xf] %v276_v35  ;;  %v294_v44 = vld [vmem:[%s2811_s4 + $0x150] sm:$0xf]  ;;  %v296_v45 = vld [vmem:[%s2811_s4 + $0x15c] sm:$0xf]  ;;  %p255_p3 = scmp.ge.s32.totalorder %s256_s22, %s3063_s17  ;;  %s3858_s21 = smov %s3873_s23 }
  0x79   : >> { %279 = vst [vmem:[%s2807_s5 + $0x60] sm:$0xf] %v278_v36  ;;  %s1726_s25 = smul.u32 84, %s3873_s23  ;;  %v298_v46 = vld [vmem:[%s2811_s4 + $0x168] sm:$0xf] }
  0x7a   : >> { %281 = vst [vmem:[%s2807_s5 + $0x6c] sm:$0xf] %v280_v37  ;;  %v300_v47 = vld [vmem:[%s2811_s4 + $0x174] sm:$0xf]  ;;  %v302_v48 = vld [vmem:[%s2811_s4 + $0x180] sm:$0xf] }
  0x7b   : >> { %283 = vst [vmem:[%s2807_s5 + $0x78] sm:$0xf] %v282_v38  ;;  %s1727_s26 = scalar_lea.vmem %s2931_s28, %s1726_s25  ;;  %s1730_s27 = scalar_lea.vmem %s2936_s30, %s1726_s25 [#allocation2]  ;;  %v304_v49 = vld [vmem:[%s2811_s4 + $0x1d4] sm:$0xf]  ;;  %v306_v50 = vld [vmem:[%s2811_s4 + $0x1e0] sm:$0xf] }
  0x7c   : >> { %285 = vst [vmem:[%s2807_s5 + $0x84] sm:$0xf] %v284_v39  ;;  %s1728_s29 = scalar_lea.vmem %s1727_s26, 8   ;;  %s1731_s7 = scalar_lea.vmem %s1730_s27, 8 [#allocation2]   ;;  %v308_v51 = vld [vmem:[%s2811_s4 + $0x1ec] sm:$0xf] }
  0x7d   : >> { %287 = vst [vmem:[%s2807_s5 + $0x90] sm:$0xf] %v286_v40  ;;  %v310_v52 = vld [vmem:[%s2811_s4 + $0x1f8] sm:$0xf]  ;;  %v312_v53 = vld [vmem:[%s2811_s4 + $0x204] sm:$0xf] }
  0x7e   : >> { %289 = vst [vmem:[%s2807_s5 + $0x9c] sm:$0xf] %v288_v41  ;;  %v314_v54 = vld [vmem:[%s2811_s4 + $0x210] sm:$0xf]  ;;  %v316_v55 = vld [vmem:[%s2811_s4 + $0x21c] sm:$0xf]  ;;  %s3857_s4 = smov %s1728_s29 }
  0x7f   : >> { %291 = vst [vmem:[%s2807_s5 + $0xa8] sm:$0xf] %v290_v42 }
  0x80   : >> { %293 = vst [vmem:[%s2807_s5 + $0xb4] sm:$0xf] %v292_v43 }
  0x81   : >> { %295 = vst [vmem:[%s2807_s5 + $0xc0] sm:$0xf] %v294_v44 }
  0x82   : >> { %297 = vst [vmem:[%s2807_s5 + $0xcc] sm:$0xf] %v296_v45 }
  0x83   : >> { %299 = vst [vmem:[%s2807_s5 + $0xd8] sm:$0xf] %v298_v46 }
  0x84   : >> { %301 = vst [vmem:[%s2807_s5 + $0xe4] sm:$0xf] %v300_v47 }
  0x85   : >> { %303 = vst [vmem:[%s2807_s5 + $0xf0] sm:$0xf] %v302_v48 }
  0x86   : >> { %305 = vst [vmem:[%s2807_s5 + $0xfc] sm:$0xf] %v304_v49 }
  0x87   : >> { %307 = vst [vmem:[%s2807_s5 + $0x108] sm:$0xf] %v306_v50 }
  0x88   : >> { %309 = vst [vmem:[%s2807_s5 + $0x114] sm:$0xf] %v308_v51  ;;  %258 = sbr.rel (!%p255_p3) target bundleno = 112 (0x70), region = 198 }
  0x89   : >> { %311 = vst [vmem:[%s2807_s5 + $0x120] sm:$0xf] %v310_v52 }
  0x8a   : >> { %313 = vst [vmem:[%s2807_s5 + $0x12c] sm:$0xf] %v312_v53 }
  0x8b   : >> { %315 = vst [vmem:[%s2807_s5 + $0x138] sm:$0xf] %v314_v54 }
  0x8c   : >> { %317 = vst [vmem:[%s2807_s5 + $0x144] sm:$0xf] %v316_v55  ;;  %s3856_s5 = smov %s1731_s7 }
  0x8d PF: > { %2474 = sdivrem.u32 %s3867_s24, 7 }
  0x8e   : > { %s1732_s8 = smul.u32 84, %s3063_s17 }
  0x90   : > { %s3167_s9 = scalar_lea.vmem %s2931_s28, %s1732_s8  ;;  %s3170_s10 = scalar_lea.vmem %s2936_s30, %s1732_s8 [#allocation2] }
  0x91   : > { %s1734_s6 = scalar_lea.vmem %s3167_s9, 8   ;;  %s1737_s11 = scalar_lea.vmem %s3170_s10, 8 [#allocation2]  }
  0x96   : > { %s2475_s18 = spop.drf %2474 }
  0x97   : > { %s3174_s23 = spop.drf %2474 }
  0x98   : > { %p1898_p4 = scmp.le.s32.totalorder %s3174_s23, 0 }
  0x99   : > { %s3181_s24 = smov (!%p1898_p4), 0   ;;  %s2833_s28 = smov (!%p1898_p4), 0  }
  0x9a   : > { %1827 = sbr.rel (%p1898_p4) target bundleno = 168 (0xa8), region = 203 }
  0x9f LB: >> { %v341_v56 = vld [vmem:[%s2827_s6] sm:$0xf]  ;;  %v343_v57 = vld [vmem:[%s2827_s6 + $0x9c] sm:$0xf]  ;;  %v345_v58 = vld [vmem:[%s2827_s6 + $0x138] sm:$0xf]  ;;  %s2835_s28 = sphi %s2833_s28, %s335_s28   ;;  %s2831_s24 = sphi %s3181_s24, %s3859_s24   ;;  %s2827_s6 = sphi %s1734_s6, %s1740_s6   ;;  %s2823_s11 = sphi %s1737_s11, %s1743_s11  }
  0xa0   : >> { %342 = vst [vmem:[%s2823_s11] sm:$0xf] %v341_v56  ;;  %v347_v59 = vld [vmem:[%s2827_s6 + $0x1d4] sm:$0xf]  ;;  %s349_s30 = sadd.s32 1, %s2831_s24  ;;  %s335_s28 = sadd.s32 1, %s2835_s28  }
  0xa1   : >> { %344 = vst [vmem:[%s2823_s11 + $0x54] sm:$0xf] %v343_v57  ;;  %p350_p6 = scmp.ge.s32.totalorder %s349_s30, %s3174_s23  ;;  %p334_p7 = scmp.ge.s32.totalorder %s335_s28, %s3174_s23 }
  0xa2   : >> { %346 = vst [vmem:[%s2823_s11 + $0xa8] sm:$0xf] %v345_v58 }
  0xa3   : >> { %348 = vst [vmem:[%s2823_s11 + $0xfc] sm:$0xf] %v347_v59  ;;  %s3875_s30 = smov (%p350_p6, %s349_s30), 0  ;;  %337 = sbr.rel (!%p334_p7) target bundleno = 159 (0x9f), region = 209 }
  0xa4   : >> { %s1738_s4 = smul.u32 12, %s3875_s30  ;;  %s3859_s24 = smov %s3875_s30 }
  0xa6   : >> { %s1739_s5 = scalar_lea.vmem %s3167_s9, %s1738_s4  ;;  %s1742_s17 = scalar_lea.vmem %s3170_s10, %s1738_s4 [#allocation2] }
  0xa7   : >> { %s1740_s6 = scalar_lea.vmem %s1739_s5, 8   ;;  %s1743_s11 = scalar_lea.vmem %s1742_s17, 8 [#allocation2]  }
  0xa8 PF: > { %p1899_p8 = scmp.ge.s32.totalorder %s2771_s14, 1  ;;  %p358_p9 = scmp.lt.s32.totalorder %s2771_s14, 3 }
  0xaa   : > { %p359_p10 = pnand %p1899_p8, %p358_p9 }
  0xab   : > { %s365_s14 = sand.u32 (!%p359_p10), 1, %s2763_s12  }
  0xac   : > { %362 = sbr.rel (%p359_p10) target bundleno = 619 (0x26b), region = 68 }
  0xad   : > { %s2243_s7 = smul.u32 (!%p359_p10), 336, %s365_s14 }
  0xae   : > { %s3729_s25 = smul.u32 (!%p359_p10), 28, %s365_s14 }
  0xaf   : > { %s3235_s23 = scalar_lea.vmem (!%p359_p10), [#allocation2], %s2243_s7 }
  0xb0   : > { %s3742_s12 = scalar_lea.vmem (!%p359_p10), [#allocation3], %s3729_s25  }
  0xb1   : > { %v3201_v60 = vld [vmem:[%s3845_s1 + $0x38] sm:$0xff]  ;;  %v3211_v62 = vld [vmem:[%s3845_s1 + $0x88] sm:$0xff]  ;;  %v3221_v63 = vld [vmem:[%s3845_s1 + $0x30] sm:$0xff]  ;;  %vm616_vm0 = vcmask 261120   ;;  %vm1547_vm1 = vcmask 519168   ;;  %s1562_s14 = smul.u32 (%p2920_p5), 7, %s2905_s15 }
  0xb2   : > { %v3206_v61 = vld [vmem:[%s3845_s1 + $0x78] sm:$0xff]  ;;  %629 = vmatpush.bf16.msra.mxu0 %v3201_v60  ;;  %v3226_v0 = vld [vmem:[%s3845_s1 + $0x70] sm:$0xff]  ;;  %691 = vmatpush.bf16.msra.mxu2 %v3211_v62  ;;  %v3233_v1 = vld [vmem:[%s3845_s1 + $0x80] sm:$0xff]  ;;  %s2240_s26 = smul.u32 (%p2920_p5), 28, %s2905_s15 }
  0xb3   : > { %657 = vmatpush.bf16.msra.mxu1 %v3206_v61  ;;  %872 = vmatpush.bf16.msra.mxu3 %v3201_v60  ;;  %v1910_v2 = vld [vmem:[%s3235_s23 + $0x8] sm:$0xf]  ;;  %v2188_v3 = vld [vmem:[%s3235_s23 + $0x10] sm:$0xf0]  ;;  %v1922_v13 = vld [vmem:[%s3235_s23 + $0x20] sm:$0xf] }
  0xb4   : > { %v1911_v4 = vor.u32 %v2188_v3, %v1910_v2  ;;  %v3244_v5 = vld [vmem:[%s3845_s1 + $0x28] sm:$0xff]  ;;  %v3259_v7 = vld [vmem:[%s3845_s1 + $0x20] sm:$0xff]  ;;  %v3273_v9 = vld [vmem:[%s3845_s1 + $0x18] sm:$0xff]  ;;  %s1563_s27 = ssub.s32 (%p2920_p5), 13, %s1562_s14  ;;  %s3791_s8 = scalar_lea.vmem (%p2920_p5), %s3847_s3, %s2240_s26  }
  0xb5   : > { %v3251_v6 = vld [vmem:[%s3845_s1 + $0x68] sm:$0xff]  ;;  %v3266_v8 = vld [vmem:[%s3845_s1 + $0x60] sm:$0xff]  ;;  %v3280_v10 = vld [vmem:[%s3845_s1 + $0x58] sm:$0xff]  ;;  %p1564_p11 = scmp.lt.s32.totalorder (%p2920_p5), %s1563_s27, 7 }
  0xb6   : > { %630 = vmatpush.bf16.msra.mxu0 %v3221_v63  ;;  %692 = vmatpush.bf16.msra.mxu2 %v3233_v1  ;;  %v3287_v11 = vld [vmem:[%s3845_s1 + $0x10] sm:$0xff]  ;;  %v2191_v14 = vld [vmem:[%s3235_s23 + $0x28] sm:$0xf0]  ;;  %v3316_v18 = vld [vmem:[%s3845_s1] sm:$0xff] }
  0xb7   : > { %658 = vmatpush.bf16.msra.mxu1 %v3226_v0  ;;  %873 = vmatpush.bf16.msra.mxu3 %v3221_v63  ;;  %v3294_v12 = vld [vmem:[%s3845_s1 + $0x50] sm:$0xff]  ;;  %v1923_v15 = vor.u32 %v2191_v14, %v1922_v13  ;;  %v3303_v16 = vld [vmem:[%s3845_s1 + $0x8] sm:$0xff]  ;;  %v3321_v19 = vld [vmem:[%s3845_s1 + $0x40] sm:$0xff] }
  0xb8   : > { %v3310_v17 = vld [vmem:[%s3845_s1 + $0x48] sm:$0xff]  ;;  %v1902_v20 = vld [vmem:[%s3235_s23] sm:$0xf]  ;;  %v2186_v22 = vld [vmem:[%s3235_s23 + $0x4] sm:$0xf] }
  0xb9   : > { %2008 = vmatmul.msk.bf16.vlgmr.msra.gmra.mxu2 %vm616_vm0, %v1911_v4  ;;  %v2187_v21 = vld [vmem:[%s3235_s23 + $0x8] sm:$0xf0]  ;;  %v1904_v23 = vld [vmem:[%s3235_s23 + $0xc] sm:$0xf0]  ;;  %v2028_v24 = vld [vmem:[%s3235_s23 + $0x54] sm:$0xf] }
  0xba   : > { %900 = vmatpush.bf16.msrb.mxu2 %v3206_v61  ;;  %631 = vmatpush.bf16.msra.mxu0 %v3244_v5  ;;  %v2214_v25 = vld [vmem:[%s3235_s23 + $0x5c] sm:$0xf0]  ;;  %v1903_v26 = vor.u32 %v2187_v21, %v1902_v20  ;;  %v1907_v27 = vor.u32 %v2186_v22, %v1904_v23  ;;  %v1934_v29 = vld [vmem:[%s3235_s23 + $0x38] sm:$0xf]  ;;  %v2194_v30 = vld [vmem:[%s3235_s23 + $0x40] sm:$0xf0] }
  0xbb   : > { %659 = vmatpush.bf16.msra.mxu1 %v3251_v6  ;;  %874 = vmatpush.bf16.msra.mxu3 %v3244_v5  ;;  %v2029_v28 = vor.u32 %v2214_v25, %v2028_v24  ;;  %v1935_v31 = vor.u32 %v2194_v30, %v1934_v29  ;;  %v1914_v32 = vld [vmem:[%s3235_s23 + $0x18] sm:$0xf]  ;;  %v2190_v33 = vld [vmem:[%s3235_s23 + $0x20] sm:$0xf0]  ;;  %v2189_v34 = vld [vmem:[%s3235_s23 + $0x1c] sm:$0xf] }
  0xbc   : > { %v1916_v35 = vld [vmem:[%s3235_s23 + $0x24] sm:$0xf0]  ;;  %v2040_v36 = vld [vmem:[%s3235_s23 + $0x6c] sm:$0xf]  ;;  %v2217_v37 = vld [vmem:[%s3235_s23 + $0x74] sm:$0xf0]  ;;  %v1915_v38 = vor.u32 %v2190_v33, %v1914_v32 }
  0xbd   : > { %v1919_v39 = vor.u32 %v2189_v34, %v1916_v35  ;;  %v2041_v40 = vor.u32 %v2217_v37, %v2040_v36  ;;  %v413_v41 = vld [vmem:[%s3235_s23 + $0x50] sm:$0xf]  ;;  %v2193_v45 = vld [vmem:[%s3235_s23 + $0x38] sm:$0xf0]  ;;  %v2192_v46 = vld [vmem:[%s3235_s23 + $0x34] sm:$0xf] }
  0xbe   : > { %901 = vmatpush.bf16.msrb.mxu2 %v3226_v0  ;;  %632 = vmatpush.bf16.msra.mxu0 %v3259_v7  ;;  %v487_v42 = vunpack.c.l.b16 %v413_v41  ;;  %v1926_v44 = vld [vmem:[%s3235_s23 + $0x30] sm:$0xf]  ;;  %v1928_v47 = vld [vmem:[%s3235_s23 + $0x3c] sm:$0xf0]  ;;  %v2052_v48 = vld [vmem:[%s3235_s23 + $0x84] sm:$0xf] }
  0xbf   : > { %660 = vmatpush.bf16.msra.mxu1 %v3266_v8  ;;  %875 = vmatpush.bf16.msra.mxu3 %v3259_v7  ;;  %v2220_v49 = vld [vmem:[%s3235_s23 + $0x8c] sm:$0xf0]  ;;  %v1927_v50 = vor.u32 %v2193_v45, %v1926_v44  ;;  %v1931_v51 = vor.u32 %v2192_v46, %v1928_v47  ;;  %v2213_v53 = vld [vmem:[%s3235_s23 + $0x58] sm:$0xf]  ;;  %v2030_v54 = vld [vmem:[%s3235_s23 + $0x60] sm:$0xf0] }
  0xc0   : > { %v499_v43 = vpack.c.b16 %v487_v42, %v487_v42  ;;  %v2053_v52 = vor.u32 %v2220_v49, %v2052_v48  ;;  %v2033_v55 = vor.u32 %v2213_v53, %v2030_v54  ;;  %v412_v56 = vld [vmem:[%s3235_s23 + $0x48] sm:$0xff]  ;;  %v2024_v57 = vld [vmem:[%s3235_s23 + $0x9c] sm:$0xff]  ;;  %v2054_v13 = vld [vmem:[%s3235_s23 + $0x90] sm:$0xf0] }
  0xc1   : > { %v485_v58 = vunpack.c.l.b16 %v412_v56  ;;  %v486_v59 = vunpack.c.h.b16 %v412_v56  ;;  %v2036_v3 = vld [vmem:[%s3235_s23 + $0x5c] sm:$0xf]  ;;  %v2215_v4 = vld [vmem:[%s3235_s23 + $0x64] sm:$0xf0]  ;;  %v2096_v20 = vld [vmem:[%s3235_s23 + $0xcc] sm:$0xf0]  ;;  %v838_v24 = vunpack.c.h.b16 %v2024_v57 }
  0xc2   : > { %902 = vmatpush.bf16.msrb.mxu2 %v3251_v6  ;;  %633 = vmatpush.bf16.msra.mxu0 %v3273_v9  ;;  %v2229_v29 = vld [vmem:[%s3235_s23 + $0xe0] sm:$0xf0]  ;;  %v2228_v30 = vld [vmem:[%s3235_s23 + $0xdc] sm:$0xf]  ;;  %v2090_v35 = vld [vmem:[%s3235_s23 + $0xb0] sm:$0xf] }
  0xc3   : > { %661 = vmatpush.bf16.msra.mxu1 %v3280_v10  ;;  %876 = vmatpush.bf16.msra.mxu3 %v3273_v9  ;;  %v850_v25 = vpack.c.b16 %v838_v24, %v838_v24  ;;  %v2224_v36 = vld [vmem:[%s3235_s23 + $0xb8] sm:$0xf0]  ;;  %v2102_v47 = vld [vmem:[%s3235_s23 + $0xc8] sm:$0xf]  ;;  %v2227_v48 = vld [vmem:[%s3235_s23 + $0xd0] sm:$0xf0] }
  0xc4   : > { %v2091_v37 = vor.u32 %v2224_v36, %v2090_v35  ;;  %v2232_v53 = vld [vmem:[%s3235_s23 + $0x104] sm:$0xf0]  ;;  %v2231_v54 = vld [vmem:[%s3235_s23 + $0x100] sm:$0xf]  ;;  %v2144_v56 = vld [vmem:[%s3235_s23 + $0x104] sm:$0xf] }
  0xc6   : > { %903 = vmatpush.bf16.msrb.mxu2 %v3266_v8  ;;  %634 = vmatpush.bf16.msra.mxu0 %v3287_v11 }
  0xc7   : > { %662 = vmatpush.bf16.msra.mxu1 %v3294_v12  ;;  %877 = vmatpush.bf16.msra.mxu3 %v3287_v11 }
  0xc9   : > { %2009 = vmatmul.msk.bf16.gmra.mxu2 %vm616_vm0, %v1923_v15  ;;  %v2048_v15 = vld [vmem:[%s3235_s23 + $0x74] sm:$0xf] }
  0xca   : > { %904 = vmatpush.bf16.msrb.mxu2 %v3280_v10  ;;  %635 = vmatpush.bf16.msra.mxu0 %v3303_v16 }
  0xcb   : > { %663 = vmatpush.bf16.msra.mxu1 %v3310_v17  ;;  %878 = vmatpush.bf16.msra.mxu3 %v3303_v16 }
  0xce   : > { %905 = vmatpush.bf16.msrb.mxu2 %v3294_v12  ;;  %636 = vmatpush.bf16.msra.mxu0 %v3316_v18 }
  0xcf   : > { %664 = vmatpush.bf16.msra.mxu1 %v3321_v19  ;;  %879 = vmatpush.bf16.msra.mxu3 %v3316_v18 }
  0xd1   : > { %637 = vmatmul.bf16.vlgmr.msra.gmra.mxu0 %v1903_v26  ;;  %v2060_v26 = vld [vmem:[%s3235_s23 + $0x8c] sm:$0xf] }
  0xd2   : > { %934 = vmatpush.bf16.msrb.mxu0 %v3211_v62  ;;  %665 = vmatmul.bf16.vlgmr.msra.gmra.mxu1 %v1907_v27  ;;  %v2221_v27 = vld [vmem:[%s3235_s23 + $0x94] sm:$0xf0] }
  0xd3   : > { %1150 = vmatpush.bf16.msrb.mxu3 %v3206_v61  ;;  %1122 = vmatpush.bf16.msrb.mxu1 %v3201_v60  ;;  %v2061_v32 = vor.u32 %v2221_v27, %v2060_v26  ;;  %v2079_v27 = vld [vmem:[%s3235_s23 + $0xf8] sm:$0xf] }
  0xd4   : > { %880 = vmatmul.bf16.vlgmr.msra.gmra.mxu3 %v2029_v28  ;;  %906 = vmatpush.bf16.msrb.mxu2 %v3310_v17  ;;  %v2106_v28 = vld [vmem:[%s3235_s23 + $0xd8] sm:$0xf] }
  0xd5   : > { %v2107_v33 = vor.u32 %v2229_v29, %v2106_v28  ;;  %v1089_v29 = vunpack.c.l.b16 %v2079_v27 }
  0xd6   : > { %935 = vmatpush.bf16.msrb.mxu0 %v3233_v1 }
  0xd7   : > { %1151 = vmatpush.bf16.msrb.mxu3 %v3226_v0  ;;  %1123 = vmatpush.bf16.msrb.mxu1 %v3221_v63 }
  0xd8   : > { %907 = vmatpush.bf16.msrb.mxu2 %v3321_v19 }
  0xd9   : > { %2010 = vmatmul.msk.bf16.gmra.mxu2 %vm616_vm0, %v1935_v31  ;;  %v2108_v31 = vld [vmem:[%s3235_s23 + $0xe4] sm:$0xf0] }
  0xda   : > { %1372 = vmatpush.bf16.msra.mxu0 %v3201_v60  ;;  %v837_v60 = vunpack.c.l.b16 %v2024_v57  ;;  %v2111_v34 = vor.u32 %v2228_v30, %v2108_v31  ;;  %v2233_v57 = vld [vmem:[%s3235_s23 + $0x10c] sm:$0xf0] }
  0xdb   : > { %1152 = vmatpush.bf16.msrb.mxu3 %v3251_v6  ;;  %1124 = vmatpush.bf16.msrb.mxu1 %v3244_v5 }
  0xdc   : > { %1184 = vmatpush.bf16.msra.mxu2 %v3211_v62 }
  0xde   : > { %1373 = vmatpush.bf16.msra.mxu0 %v3221_v63  ;;  %v849_v63 = vpack.c.b16 %v837_v60, %v837_v60 }
  0xdf   : > { %1153 = vmatpush.bf16.msrb.mxu3 %v3266_v8  ;;  %1125 = vmatpush.bf16.msrb.mxu1 %v3259_v7 }
  0xe0   : > { %1185 = vmatpush.bf16.msra.mxu2 %v3233_v1 }
  0xe1   : > { %642 = vmatmul.bf16.gmra.mxu0 %v1915_v38  ;;  %v2025_v38 = vld [vmem:[%s3235_s23 + $0xa4] sm:$0xf] }
  0xe2   : > { %1374 = vmatpush.bf16.msra.mxu0 %v3244_v5  ;;  %670 = vmatmul.bf16.gmra.mxu1 %v1919_v39  ;;  %v2082_v5 = vld [vmem:[%s3235_s23 + $0xa8] sm:$0xf]  ;;  %v2078_v39 = vld [vmem:[%s3235_s23 + $0xf0] sm:$0xff] }
  0xe3   : > { %1154 = vmatpush.bf16.msrb.mxu3 %v3280_v10  ;;  %1126 = vmatpush.bf16.msrb.mxu1 %v3273_v9  ;;  %v1087_v41 = vunpack.c.l.b16 %v2078_v39  ;;  %v1088_v42 = vunpack.c.h.b16 %v2078_v39  ;;  %v2238_v39 = vld [vmem:[%s3235_s23 + $0x134] sm:$0xf0] }
  0xe4   : > { %885 = vmatmul.bf16.gmra.mxu3 %v2041_v40  ;;  %v839_v40 = vunpack.c.l.b16 %v2025_v38  ;;  %v2160_v38 = vld [vmem:[%s3235_s23 + $0x12c] sm:$0xf] }
  0xe5   : > { %v1099_v45 = vpack.c.b16 %v1087_v41, %v1087_v41  ;;  %v1100_v46 = vpack.c.b16 %v1088_v42, %v1088_v42  ;;  %v2162_v42 = vld [vmem:[%s3235_s23 + $0x138] sm:$0xf0] }
  0xe6   : > { %1375 = vmatpush.bf16.msra.mxu0 %v3259_v7  ;;  %v2222_v7 = vld [vmem:[%s3235_s23 + $0xac] sm:$0xf]  ;;  %v851_v44 = vpack.c.b16 %v839_v40, %v839_v40  ;;  %v2237_v40 = vld [vmem:[%s3235_s23 + $0x130] sm:$0xf] }
  0xe7   : > { %1155 = vmatpush.bf16.msrb.mxu3 %v3294_v12  ;;  %1127 = vmatpush.bf16.msrb.mxu1 %v3287_v11 }
  0xe9   : > { %2011 = vmatmul.msk.bf16.gmra.mxu2 %vm616_vm0, %v499_v43 }
  0xea   : > { %1376 = vmatpush.bf16.msra.mxu0 %v3273_v9  ;;  %v2037_v9 = vor.u32 %v2215_v4, %v2036_v3  ;;  %v2114_v3 = vld [vmem:[%s3235_s23 + $0xe0] sm:$0xf]  ;;  %v2230_v4 = vld [vmem:[%s3235_s23 + $0xe8] sm:$0xf0] }
  0xeb   : > { %1156 = vmatpush.bf16.msrb.mxu3 %v3310_v17  ;;  %1128 = vmatpush.bf16.msrb.mxu1 %v3303_v16 }
  0xee   : > { %1377 = vmatpush.bf16.msra.mxu0 %v3287_v11 }
  0xef   : > { %1157 = vmatpush.bf16.msrb.mxu3 %v3321_v19  ;;  %1129 = vmatpush.bf16.msrb.mxu1 %v3316_v18 }
  0xf1   : > { %647 = vmatmul.bf16.gmra.mxu0 %v1927_v50  ;;  %v2103_v50 = vor.u32 %v2227_v48, %v2102_v47  ;;  %v2161_v47 = vor.u32 %v2238_v39, %v2160_v38 }
  0xf2   : > { %1378 = vmatpush.bf16.msra.mxu0 %v3303_v16  ;;  %675 = vmatmul.bf16.gmra.mxu1 %v1931_v51  ;;  %v2218_v16 = vld [vmem:[%s3235_s23 + $0x7c] sm:$0xf0] }
  0xf3   : > { %1434 = vmatpush.bf16.msra.mxu3 %v3211_v62  ;;  %1400 = vmatpush.bf16.msra.mxu1 %v3206_v61  ;;  %v497_v61 = vpack.c.b16 %v485_v58, %v485_v58  ;;  %v498_v62 = vpack.c.b16 %v486_v59, %v486_v59  ;;  %v2049_v21 = vor.u32 %v2218_v16, %v2048_v15  ;;  %v3434_v51 = vld [vmem:[%s3846_s2] ss:$0 sm:$0xff]  ;;  %v2150_v16 = vld [vmem:[%s3235_s23 + $0x120] sm:$0xf0] }
  0xf4   : > { %890 = vmatmul.bf16.gmra.mxu3 %v2053_v52  ;;  %v2136_v52 = vld [vmem:[%s3235_s23 + $0xfc] sm:$0xf] }
  0xf5   : > { %v2137_v59 = vor.u32 %v2232_v53, %v2136_v52 }
  0xf6   : > { %1379 = vmatpush.bf16.msra.mxu0 %v3316_v18  ;;  %v2226_v18 = vld [vmem:[%s3235_s23 + $0xc8] sm:$0xf0] }
  0xf7   : > { %1435 = vmatpush.bf16.msra.mxu3 %v3233_v1  ;;  %1401 = vmatpush.bf16.msra.mxu1 %v3226_v0  ;;  %v2216_v0 = vld [vmem:[%s3235_s23 + $0x70] sm:$0xf]  ;;  %v2042_v1 = vld [vmem:[%s3235_s23 + $0x78] sm:$0xf0] }
  0xf8   : > { %v2045_v2 = vor.u32 %v2216_v0, %v2042_v1 }
  0xf9   : > { %908 = vmatmul.bf16.vlgmr.msrb.gmra.mxu2 %v2033_v55  ;;  %v2138_v55 = vld [vmem:[%s3235_s23 + $0x108] sm:$0xf0] }
  0xfb   : > { %1402 = vmatpush.bf16.msra.mxu1 %v3251_v6  ;;  %v2223_v6 = vld [vmem:[%s3235_s23 + $0xb0] sm:$0xf0] }
  0xff   : > { %1403 = vmatpush.bf16.msra.mxu1 %v3266_v8  ;;  %v2084_v8 = vld [vmem:[%s3235_s23 + $0xb4] sm:$0xf0] }
 0x100   : > { %v2087_v11 = vor.u32 %v2222_v7, %v2084_v8  ;;  %v2115_v8 = vor.u32 %v2230_v4, %v2114_v3 }
 0x101   : > { %652 = vmatmul.bf16.gmra.mxu0 %v497_v61  ;;  %v2141_v61 = vor.u32 %v2231_v54, %v2138_v55 }
 0x102   : > { %680 = vmatmul.bf16.gmra.mxu1 %v498_v62  ;;  %v2145_v62 = vor.u32 %v2233_v57, %v2144_v56 }
 0x103   : > { %1404 = vmatpush.bf16.msra.mxu1 %v3280_v10  ;;  %v2083_v10 = vor.u32 %v2223_v6, %v2082_v5 }
 0x104   : > { %895 = vmatmul.bf16.gmra.mxu3 %v849_v63 }
 0x107   : > { %1405 = vmatpush.bf16.msra.mxu1 %v3294_v12  ;;  %v2219_v12 = vld [vmem:[%s3235_s23 + $0x88] sm:$0xf] }
 0x108   : > { %v2057_v14 = vor.u32 %v2219_v12, %v2054_v13  ;;  %v2148_v12 = vld [vmem:[%s3235_s23 + $0x114] sm:$0xf]  ;;  %v2235_v13 = vld [vmem:[%s3235_s23 + $0x11c] sm:$0xf0] }
 0x109   : > { %913 = vmatmul.bf16.gmra.mxu2 %v2045_v2 }
 0x10b   : > { %1406 = vmatpush.bf16.msra.mxu1 %v3310_v17  ;;  %v2094_v17 = vld [vmem:[%s3235_s23 + $0xc0] sm:$0xf] }
 0x10c   : > { %v2095_v22 = vor.u32 %v2226_v18, %v2094_v17  ;;  %v2156_v17 = vld [vmem:[%s3235_s23 + $0x11c] sm:$0xf]  ;;  %v2236_v18 = vld [vmem:[%s3235_s23 + $0x124] sm:$0xf0] }
 0x10d   : > { %v2157_v24 = vor.u32 %v2236_v18, %v2156_v17 }
 0x10f   : > { %1407 = vmatpush.bf16.msra.mxu1 %v3321_v19  ;;  %v2225_v19 = vld [vmem:[%s3235_s23 + $0xc4] sm:$0xf] }
 0x110   : > { %v2099_v23 = vor.u32 %v2225_v19, %v2096_v20 }
 0x111   : > { %2062 = vmatmul.msk.bf16.vlgmr.msrb.gmra.mxu0 %vm616_vm0, %v2037_v9 }
 0x112   : > { %1130 = vmatmul.bf16.vlgmr.msrb.gmra.mxu1 %v2083_v10 }
 0x114   : > { %1158 = vmatmul.bf16.vlgmr.msrb.gmra.mxu3 %v2087_v11 }
 0x119   : > { %918 = vmatmul.bf16.gmra.mxu2 %v2057_v14  ;;  %v2234_v14 = vld [vmem:[%s3235_s23 + $0x118] sm:$0xf] }
 0x121   : > { %2063 = vmatmul.msk.bf16.gmra.mxu0 %vm616_vm0, %v2049_v21  ;;  %v2149_v21 = vor.u32 %v2235_v13, %v2148_v12 }
 0x122   : > { %1135 = vmatmul.bf16.gmra.mxu1 %v2095_v22 }
 0x124   : > { %1163 = vmatmul.bf16.gmra.mxu3 %v2099_v23  ;;  %v2153_v23 = vor.u32 %v2234_v14, %v2150_v16 }
 0x129   : > { %923 = vmatmul.bf16.gmra.mxu2 %v850_v25 }
 0x131   : > { %2064 = vmatmul.msk.bf16.gmra.mxu0 %vm616_vm0, %v2061_v32 }
 0x132   : > { %1140 = vmatmul.bf16.gmra.mxu1 %v2107_v33 }
 0x134   : > { %1168 = vmatmul.bf16.gmra.mxu3 %v2111_v34  ;;  %v1101_v34 = vpack.c.b16 %v1089_v29, %v1089_v29 }
 0x139   : > { %2116 = vmatmul.msk.bf16.vlgmr.msra.gmra.mxu2 %vm616_vm0, %v2091_v37 }
 0x13c   : > { %v694_v43 = vpop.f32.mrf.mxu2 }
 0x141   : > { %2065 = vmatmul.msk.bf16.gmra.mxu0 %vm616_vm0, %v851_v44  ;;  %v2239_v44 = vld [vmem:[%s3235_s23 + $0x13c] sm:$0xf0] }
 0x142   : > { %1145 = vmatmul.bf16.gmra.mxu1 %v1099_v45 }
 0x144   : > { %1173 = vmatmul.bf16.gmra.mxu3 %v1100_v46  ;;  %v696_v49 = vpop.f32.mrf.mxu2 }
 0x149   : > { %2117 = vmatmul.msk.bf16.gmra.mxu2 %vm616_vm0, %v2103_v50 }
 0x14c   : > { %v699_v58 = vpop.f32.mrf.mxu2 }
 0x14e   : > { %v638_v60 = vpop.f32.mrf.mxu0 }
 0x14f   : > { %v639_v63 = vadd.f32 %v3434_v51, %v638_v60  ;;  %v666_v0 = vpop.f32.mrf.mxu1 }
 0x151   : > { %v667_v1 = vadd.f32 %v666_v0, %v639_v63  ;;  %1380 = vmatmul.bf16.vlgmr.msra.gmra.mxu0 %v2137_v59  ;;  %v2132_v59 = vld [vmem:[%s3235_s23 + $0x144] sm:$0xff] }
 0x152   : > { %1408 = vmatmul.bf16.vlgmr.msra.gmra.mxu1 %v2141_v61  ;;  %v1337_v0 = vunpack.c.l.b16 %v2132_v59 }
 0x153   : > { %v3445_v2 = vadd.f32 %v694_v43, %v667_v1  ;;  %v2168_v43 = vld [vmem:[%s3235_s23 + $0x134] sm:$0xf]  ;;  %v1338_v1 = vunpack.c.h.b16 %v2132_v59 }
 0x154   : > { %2170 = vmatmul.msk.bf16.vlgmr.msra.gmra.mxu3 %vm616_vm0, %v2145_v62  ;;  %v701_v5 = vpop.f32.mrf.mxu2  ;;  %v2169_v50 = vor.u32 %v2239_v44, %v2168_v43  ;;  %v2133_v62 = vld [vmem:[%s3235_s23 + $0x14c] sm:$0xf] }
 0x155   : > { %v1339_v3 = vunpack.c.l.b16 %v2133_v62  ;;  %v1350_v13 = vpack.c.b16 %v1338_v1, %v1338_v1 }
 0x156   : > { %v640_v7 = vpop.f32.mrf.mxu0 }
 0x157   : > { %v3449_v6 = vpop.f32.mrf.mxu3  ;;  %v641_v9 = vadd.f32 %v3434_v51, %v640_v7  ;;  %v668_v10 = vpop.f32.mrf.mxu1  ;;  %v713_v7 = vsub.f32 0.0, %v3445_v2  ;;  %v1351_v14 = vpack.c.b16 %v1339_v3, %v1339_v3 }
 0x159   : > { %v669_v11 = vadd.f32 %v668_v10, %v641_v9  ;;  %2118 = vmatmul.msk.bf16.gmra.mxu2 %vm616_vm0, %v2115_v8  ;;  %v1349_v10 = vpack.c.b16 %v1337_v0, %v1337_v0  ;;  %v720_v18 = vmul.f32 1.442695, %v713_v7 }
 0x15b   : > { %v3456_v15 = vadd.f32 %v696_v49, %v669_v11  ;;  %v2165_v49 = vor.u32 %v2237_v40, %v2162_v42  ;;  %2478 = vpow2.f32 %v720_v18 }
 0x15c   : > { %v704_v19 = vpop.f32.mrf.mxu2 }
 0x15e   : > { %v643_v22 = vpop.f32.mrf.mxu0 }
 0x15f   : > { %v3461_v20 = vpop.f32.mrf.mxu3  ;;  %v644_v25 = vadd.f32 %v3434_v51, %v643_v22  ;;  %v671_v26 = vpop.f32.mrf.mxu1 }
 0x161   : > { %v672_v28 = vadd.f32 %v671_v26, %v644_v25  ;;  %1385 = vmatmul.bf16.gmra.mxu0 %v2149_v21  ;;  %v884_v21 = vadd.f32 %v3434_v51, %v3461_v20  ;;  %v2479_v29 = vpop.eup %2478 }
 0x162   : > { %1413 = vmatmul.bf16.gmra.mxu1 %v2153_v23 }
 0x163   : > { %v3466_v30 = vadd.f32 %v699_v58, %v672_v28 }
 0x164   : > { %2171 = vmatmul.msk.bf16.gmra.mxu3 %vm616_vm0, %v2157_v24  ;;  %v706_v31 = vpop.f32.mrf.mxu2  ;;  %v714_v24 = vsub.f32 0.0, %v3456_v15 }
 0x166   : > { %v645_v33 = vpop.f32.mrf.mxu0  ;;  %v722_v28 = vmul.f32 1.442695, %v714_v24 }
 0x167   : > { %v3468_v32 = vpop.f32.mrf.mxu3  ;;  %v646_v35 = vadd.f32 %v3434_v51, %v645_v33  ;;  %v673_v36 = vpop.f32.mrf.mxu1 }
 0x168   : > { %v887_v33 = vadd.f32 %v3434_v51, %v3468_v32  ;;  %2480 = vpow2.f32 %v722_v28 }
 0x169   : > { %v674_v37 = vadd.f32 %v673_v36, %v646_v35  ;;  %2119 = vmatmul.msk.bf16.gmra.mxu2 %vm616_vm0, %v1101_v34  ;;  %v734_v36 = vadd.f32 1.0, %v2479_v29 }
 0x16b   : > { %v3475_v41 = vadd.f32 %v701_v5, %v674_v37  ;;  %v882_v5 = vadd.f32 %v3434_v51, %v3449_v6  ;;  %2482 = vrcp.f32 %v734_v36 }
 0x16c   : > { %v709_v45 = vpop.f32.mrf.mxu2 }
 0x16e   : > { %v648_v48 = vpop.f32.mrf.mxu0  ;;  %v2481_v44 = vpop.eup %2480 }
 0x16f   : > { %v3480_v46 = vpop.f32.mrf.mxu3  ;;  %v649_v52 = vadd.f32 %v3434_v51, %v648_v48  ;;  %v676_v53 = vpop.f32.mrf.mxu1 }
 0x170   : > { %v889_v32 = vadd.f32 %v3434_v51, %v3480_v46 }
 0x171   : > { %v677_v54 = vadd.f32 %v676_v53, %v649_v52  ;;  %1390 = vmatmul.bf16.gmra.mxu0 %v2161_v47  ;;  %v735_v52 = vadd.f32 1.0, %v2481_v44 }
 0x172   : > { %1418 = vmatmul.bf16.gmra.mxu1 %v2165_v49 }
 0x173   : > { %v3484_v55 = vadd.f32 %v704_v19, %v677_v54 }
 0x174   : > { %2172 = vmatmul.msk.bf16.gmra.mxu3 %vm616_vm0, %v2169_v50  ;;  %v711_v56 = vpop.f32.mrf.mxu2 }
 0x175   : > { %v2483_v56 = vpop.eup %2482 }
 0x176   : > { %v650_v58 = vpop.f32.mrf.mxu0  ;;  %v748_v62 = vadd.f32 2.0, %v2483_v56 }
 0x177   : > { %v3486_v57 = vpop.f32.mrf.mxu3  ;;  %v651_v60 = vadd.f32 %v3434_v51, %v650_v58  ;;  %v678_v61 = vpop.f32.mrf.mxu1 }
 0x178   : > { %v892_v0 = vadd.f32 %v3434_v51, %v3486_v57 }
 0x179   : > { %v679_v63 = vadd.f32 %v678_v61, %v651_v60 }
 0x17b   : > { %v3491_v4 = vadd.f32 %v706_v31, %v679_v63  ;;  %v715_v31 = vsub.f32 0.0, %v3466_v30  ;;  %v717_v63 = vsub.f32 0.0, %v3484_v55 }
 0x17c   : > { %v909_v9 = vpop.f32.mrf.mxu2 }
 0x17d   : > { %v910_v11 = vadd.f32 %v909_v9, %v882_v5  ;;  %v724_v40 = vmul.f32 1.442695, %v715_v31  ;;  %v718_v57 = vsub.f32 0.0, %v3491_v4 }
 0x17e   : > { %v653_v12 = vpop.f32.mrf.mxu0 }
 0x17f   : > { %v3496_v8 = vpop.f32.mrf.mxu3  ;;  %v654_v16 = vadd.f32 %v3434_v51, %v653_v12  ;;  %v681_v17 = vpop.f32.mrf.mxu1  ;;  %2484 = vpow2.f32 %v724_v40 }
 0x181   : > { %v682_v19 = vadd.f32 %v681_v17, %v654_v16  ;;  %1395 = vmatmul.bf16.gmra.mxu0 %v1349_v10 }
 0x182   : > { %1423 = vmatmul.bf16.gmra.mxu1 %v1350_v13  ;;  %v755_v13 = vmul.f32 %v2483_v56, %v748_v62 }
 0x183   : > { %v3500_v6 = vadd.f32 %v709_v45, %v682_v19  ;;  %v716_v45 = vsub.f32 0.0, %v3475_v41 }
 0x184   : > { %2173 = vmatmul.msk.bf16.gmra.mxu3 %vm616_vm0, %v1351_v14  ;;  %v911_v23 = vpop.f32.mrf.mxu2  ;;  %v728_v14 = vmul.f32 1.442695, %v717_v63  ;;  %v769_v24 = vadd.f32 2.0, %v755_v13 }
 0x185   : > { %v912_v25 = vadd.f32 %v911_v23, %v884_v21  ;;  %v726_v58 = vmul.f32 1.442695, %v716_v45  ;;  %v2485_v60 = vpop.eup %2484  ;;  %v719_v56 = vsub.f32 0.0, %v3500_v6 }
 0x186   : > { %v655_v26 = vpop.f32.mrf.mxu0  ;;  %v736_v7 = vadd.f32 1.0, %v2485_v60 }
 0x187   : > { %v3504_v22 = vpop.f32.mrf.mxu3  ;;  %v683_v27 = vpop.f32.mrf.mxu1 }
 0x18c   : > { %v914_v35 = vpop.f32.mrf.mxu2 }
 0x18d   : > { %v915_v20 = vadd.f32 %v914_v35, %v887_v33 }
 0x18e   : > { %v937_v37 = vpop.f32.mrf.mxu0 }
 0x18f   : > { %v898_v34 = vpop.f32.mrf.mxu3  ;;  %v3510_v38 = vadd.f32 %v937_v37, %v910_v11  ;;  %v3512_v39 = vpop.f32.mrf.mxu1 }
 0x190   : > { %v730_v34 = vmul.f32 1.442695, %v718_v57  ;;  %v762_v57 = vmul.f32 %v755_v13, %v3445_v2 }
 0x191   : > { %v956_v42 = vsub.f32 0.0, %v3510_v38 }
 0x193   : > { %v963_v43 = vmul.f32 1.442695, %v956_v42 }
 0x194   : > { %v916_v47 = vpop.f32.mrf.mxu2 }
 0x195   : > { %2486 = vpow2.f32 %v963_v43  ;;  %v917_v49 = vadd.f32 %v916_v47, %v889_v32 }
 0x196   : > { %v939_v50 = vpop.f32.mrf.mxu0  ;;  %2488 = vrcp.f32 %v735_v52 }
 0x197   : > { %v3518_v48 = vpop.f32.mrf.mxu3  ;;  %v3520_v53 = vadd.f32 %v939_v50, %v912_v25  ;;  %v3522_v54 = vpop.f32.mrf.mxu1  ;;  %2490 = vpow2.f32 %v726_v58  ;;  %v894_v25 = vadd.f32 %v3434_v51, %v3496_v8 }
 0x199   : > { %v957_v59 = vsub.f32 0.0, %v3520_v53 }
 0x19b   : > { %v2487_v61 = vpop.eup %2486  ;;  %v965_v46 = vmul.f32 1.442695, %v957_v59 }
 0x19c   : > { %v977_v1 = vadd.f32 1.0, %v2487_v61  ;;  %v919_v3 = vpop.f32.mrf.mxu2  ;;  %v2489_v16 = vpop.eup %2488 }
 0x19d   : > { %2492 = vpow2.f32 %v965_v46  ;;  %v920_v9 = vadd.f32 %v919_v3, %v892_v0  ;;  %v2491_v18 = vpop.eup %2490  ;;  %v749_v27 = vadd.f32 2.0, %v2489_v16 }
 0x19e   : > { %2494 = vrcp.f32 %v977_v1  ;;  %v942_v10 = vpop.f32.mrf.mxu0  ;;  %v737_v28 = vadd.f32 1.0, %v2491_v18 }
 0x19f   : > { %v3528_v5 = vpop.f32.mrf.mxu3  ;;  %v3530_v11 = vadd.f32 %v942_v10, %v915_v20  ;;  %v3532_v12 = vpop.f32.mrf.mxu1  ;;  %2496 = vrcp.f32 %v736_v7  ;;  %v3544_v8 = vmul.f32 %v2489_v16, %v749_v27 }
 0x1a0   : > { %2498 = vpow2.f32 %v728_v14 }
 0x1a1   : > { %v958_v17 = vsub.f32 0.0, %v3530_v11  ;;  %v770_v60 = vadd.f32 2.0, %v3544_v8 }
 0x1a3   : > { %v2493_v19 = vpop.eup %2492  ;;  %v967_v21 = vmul.f32 1.442695, %v958_v17 }
 0x1a4   : > { %v2495_v23 = vpop.eup %2494  ;;  %v978_v26 = vadd.f32 1.0, %v2493_v19  ;;  %v921_v31 = vpop.f32.mrf.mxu2  ;;  %v732_v19 = vmul.f32 1.442695, %v719_v56 }
 0x1a5   : > { %v991_v29 = vadd.f32 2.0, %v2495_v23  ;;  %2500 = vpow2.f32 %v967_v21  ;;  %v3540_v35 = vadd.f32 %v921_v31, %v894_v25  ;;  %v2497_v42 = vpop.eup %2496 }
 0x1a6   : > { %2502 = vrcp.f32 %v978_v26  ;;  %v944_v36 = vpop.f32.mrf.mxu0  ;;  %v2499_v45 = vpop.eup %2498  ;;  %v750_v47 = vadd.f32 2.0, %v2497_v42 }
 0x1a7   : > { %v3538_v33 = vpop.f32.mrf.mxu3  ;;  %v998_v20 = vmul.f32 %v2495_v23, %v991_v29  ;;  %v3542_v37 = vadd.f32 %v944_v36, %v917_v49  ;;  %v1138_v40 = vpop.f32.mrf.mxu1  ;;  %2504 = vrcp.f32 %v769_v24  ;;  %v897_v49 = vadd.f32 %v3434_v51, %v3504_v22 }
 0x1a8   : > { %2506 = vrcp.f32 %v737_v28  ;;  %v1139_v59 = vadd.f32 %v3434_v51, %v1138_v40  ;;  %v738_v0 = vadd.f32 1.0, %v2499_v45  ;;  %v757_v14 = vmul.f32 %v2497_v42, %v750_v47 }
 0x1a9   : > { %v1012_v43 = vadd.f32 2.0, %v998_v20  ;;  %v959_v44 = vsub.f32 0.0, %v3542_v37  ;;  %2508 = vpow2.f32 %v730_v34  ;;  %v1005_v21 = vmul.f32 %v998_v20, %v3510_v38 }
 0x1aa   : > { %v771_v28 = vadd.f32 2.0, %v757_v14 }
 0x1ab   : > { %v2501_v32 = vpop.eup %2500  ;;  %2510 = vrcp.f32 %v1012_v43  ;;  %v969_v50 = vmul.f32 1.442695, %v959_v44 }
 0x1ac   : > { %v2503_v52 = vpop.eup %2502  ;;  %v979_v58 = vadd.f32 1.0, %v2501_v32  ;;  %v924_v62 = vpop.f32.mrf.mxu2 }
 0x1ad   : > { %v992_v61 = vadd.f32 2.0, %v2503_v52  ;;  %2512 = vpow2.f32 %v969_v50  ;;  %v2505_v63 = vpop.eup %2504  ;;  %v3552_v1 = vadd.f32 %v924_v62, %v897_v49  ;;  %v763_v50 = vmul.f32 %v3544_v8, %v3456_v15 }
 0x1ae   : > { %2514 = vrcp.f32 %v979_v58  ;;  %v947_v7 = vpop.f32.mrf.mxu0  ;;  %v2507_v10 = vpop.eup %2506  ;;  %v3563_v26 = vmul.f32 %v2505_v63, %v762_v57 }
 0x1af   : > { %v1166_v46 = vpop.f32.mrf.mxu3  ;;  %v999_v22 = vmul.f32 %v2503_v52, %v992_v61  ;;  %v3556_v16 = vadd.f32 %v947_v7, %v920_v9  ;;  %v3558_v17 = vpop.f32.mrf.mxu1  ;;  %2516 = vrcp.f32 %v770_v60  ;;  %v751_v13 = vadd.f32 2.0, %v2507_v10 }
 0x1b0   : > { %v3554_v3 = vadd.f32 %v1166_v46, %v1139_v59  ;;  %v2509_v18 = vpop.eup %2508  ;;  %2518 = vrcp.f32 %v738_v0  ;;  %v1132_v52 = vadd.f32 %v3434_v51, %v3512_v39 }
 0x1b1   : > { %v2511_v23 = vpop.eup %2510  ;;  %v1013_v24 = vadd.f32 2.0, %v999_v22  ;;  %v960_v25 = vsub.f32 0.0, %v3556_v16  ;;  %v739_v40 = vadd.f32 1.0, %v2509_v18  ;;  %v1006_v56 = vmul.f32 %v999_v22, %v3520_v53 }
 0x1b2   : > { %v3565_v27 = vmul.f32 %v2511_v23, %v1005_v21  ;;  %v3581_v58 = vmul.f32 %v2507_v10, %v751_v13  ;;  %v1160_v39 = vadd.f32 %v3518_v48, %v1132_v52 }
 0x1b3   : > { %v2513_v9 = vpop.eup %2512  ;;  %2520 = vrcp.f32 %v1013_v24  ;;  %v971_v29 = vmul.f32 1.442695, %v960_v25 }
 0x1b4   : > { %v2515_v31 = vpop.eup %2514  ;;  %2522 = vpow2.f32 %v732_v19  ;;  %v1033_v2 = vmax.f32 %v3563_v26, %v3565_v27  ;;  %v980_v38 = vadd.f32 1.0, %v2513_v9  ;;  %v926_v36 = vpop.f32.mrf.mxu2  ;;  %v772_v7 = vadd.f32 2.0, %v3581_v58 }
 0x1b5   : > { %v993_v34 = vadd.f32 2.0, %v2515_v31  ;;  %2524 = vpow2.f32 %v971_v29  ;;  %v2517_v43 = vpop.eup %2516  ;;  %v764_v19 = vmul.f32 %v757_v14, %v3466_v30 }
 0x1b6   : > { %2526 = vrcp.f32 %v980_v38  ;;  %v949_v42 = vpop.f32.mrf.mxu0  ;;  %v2519_v47 = vpop.eup %2518 }
 0x1b7   : > { %v3569_v20 = vpop.f32.mrf.mxu3  ;;  %2528 = vrcp.f32 %v771_v28  ;;  %v1000_v44 = vmul.f32 %v2515_v31, %v993_v34  ;;  %v3572_v45 = vadd.f32 %v949_v42, %v3540_v35  ;;  %v3574_v32 = vpop.f32.mrf.mxu1  ;;  %v3584_v35 = vmul.f32 %v2517_v43, %v763_v50 }
 0x1b8   : > { %2530 = vrcp.f32 %v739_v40  ;;  %v752_v10 = vadd.f32 2.0, %v2519_v47 }
 0x1b9   : > { %v2521_v49 = vpop.eup %2520  ;;  %v1014_v59 = vadd.f32 2.0, %v1000_v44  ;;  %v961_v60 = vsub.f32 0.0, %v3572_v45  ;;  %v1007_v31 = vmul.f32 %v1000_v44, %v3530_v11 }
 0x1ba   : > { %v2523_v61 = vpop.eup %2522  ;;  %v3586_v62 = vmul.f32 %v2521_v49, %v1006_v56  ;;  %v759_v30 = vmul.f32 %v2519_v47, %v752_v10 }
 0x1bb   : > { %v2525_v46 = vpop.eup %2524  ;;  %2532 = vrcp.f32 %v1014_v59  ;;  %v973_v15 = vmul.f32 1.442695, %v961_v60  ;;  %v740_v21 = vadd.f32 1.0, %v2523_v61 }
 0x1bc   : > { %v2527_v8 = vpop.eup %2526  ;;  %v1034_v53 = vmax.f32 %v3584_v35, %v3586_v62  ;;  %v981_v63 = vadd.f32 1.0, %v2525_v46  ;;  %v1187_v57 = vpop.f32.mrf.mxu2  ;;  %v773_v56 = vadd.f32 2.0, %v759_v30 }
 0x1bd   : > { %v2529_v0 = vpop.eup %2528  ;;  %v994_v22 = vadd.f32 2.0, %v2527_v8  ;;  %2534 = vpow2.f32 %v973_v15  ;;  %v3595_v23 = vadd.f32 %v1187_v57, %v1160_v39 }
 0x1be   : > { %2536 = vrcp.f32 %v981_v63  ;;  %v952_v48 = vpop.f32.mrf.mxu0  ;;  %v2531_v28 = vpop.eup %2530  ;;  %v3602_v29 = vmul.f32 %v2529_v0, %v764_v19  ;;  %v765_v63 = vmul.f32 %v3581_v58, %v3475_v41  ;;  %v1137_v0 = vadd.f32 %v3434_v51, %v3532_v12 }
 0x1bf   : > { %v3592_v18 = vpop.f32.mrf.mxu3  ;;  %v1001_v24 = vmul.f32 %v2527_v8, %v994_v22  ;;  %v3598_v25 = vadd.f32 %v952_v48, %v3552_v1  ;;  %v3600_v9 = vpop.f32.mrf.mxu1  ;;  %v1206_v38 = vsub.f32 0.0, %v3595_v23  ;;  %2538 = vrcp.f32 %v772_v7 }
 0x1c0   : > { %2540 = vrcp.f32 %v740_v21  ;;  %v1134_v1 = vadd.f32 %v3434_v51, %v3522_v54  ;;  %v753_v43 = vadd.f32 2.0, %v2531_v28  ;;  %v1165_v12 = vadd.f32 %v3538_v33, %v1137_v0 }
 0x1c1   : > { %v2533_v13 = vpop.eup %2532  ;;  %v1015_v14 = vadd.f32 2.0, %v1001_v24  ;;  %v962_v34 = vsub.f32 0.0, %v3598_v25  ;;  %v1213_v40 = vmul.f32 1.442695, %v1206_v38  ;;  %v1008_v7 = vmul.f32 %v1001_v24, %v3542_v37 }
 0x1c2   : > { %v3609_v36 = vmul.f32 %v2533_v13, %v1007_v31  ;;  %v1162_v44 = vadd.f32 %v3528_v5, %v1134_v1  ;;  %v760_v15 = vmul.f32 %v2531_v28, %v753_v43 }
 0x1c3   : > { %v2535_v42 = vpop.eup %2534  ;;  %2542 = vrcp.f32 %v1015_v14  ;;  %v975_v50 = vmul.f32 1.442695, %v962_v34 }
 0x1c4   : > { %v2537_v11 = vpop.eup %2536  ;;  %v1035_v47 = vmax.f32 %v3602_v29, %v3609_v36  ;;  %v982_v52 = vadd.f32 1.0, %v2535_v42  ;;  %2544 = vpow2.f32 %v1213_v40  ;;  %v1189_v54 = vpop.f32.mrf.mxu2  ;;  %v774_v38 = vadd.f32 2.0, %v760_v15 }
 0x1c5   : > { %v995_v49 = vadd.f32 2.0, %v2537_v11  ;;  %2546 = vpow2.f32 %v975_v50  ;;  %v3616_v60 = vadd.f32 %v1189_v54, %v1162_v44  ;;  %v2539_v46 = vpop.eup %2538 }
 0x1c6   : > { %2548 = vrcp.f32 %v982_v52  ;;  %v954_v61 = vpop.f32.mrf.mxu0  ;;  %v2541_v5 = vpop.eup %2540  ;;  %v3624_v21 = vmul.f32 %v2539_v46, %v765_v63  ;;  %v766_v52 = vmul.f32 %v759_v30, %v3484_v55 }
 0x1c7   : > { %v3614_v59 = vpop.f32.mrf.mxu3  ;;  %v1002_v8 = vmul.f32 %v2537_v11, %v995_v49  ;;  %v1148_v39 = vpop.f32.mrf.mxu1  ;;  %v1207_v10 = vsub.f32 0.0, %v3616_v60  ;;  %2550 = vrcp.f32 %v773_v56  ;;  %v754_v13 = vadd.f32 2.0, %v2541_v5 }
 0x1c9   : > { %v2543_v22 = vpop.eup %2542  ;;  %v1016_v57 = vadd.f32 2.0, %v1002_v8  ;;  %v1215_v28 = vmul.f32 1.442695, %v1207_v10  ;;  %v3633_v50 = vmul.f32 %v2541_v5, %v754_v13  ;;  %v1009_v56 = vmul.f32 %v1002_v8, %v3556_v16 }
 0x1ca   : > { %v2545_v19 = vpop.eup %2544  ;;  %v3626_v48 = vmul.f32 %v2543_v22, %v1008_v7 }
 0x1cb   : > { %v2547_v31 = vpop.eup %2546  ;;  %2552 = vrcp.f32 %v1016_v57  ;;  %v1227_v41 = vadd.f32 1.0, %v2545_v19  ;;  %v775_v10 = vadd.f32 2.0, %v3633_v50 }
 0x1cc   : > { %v2549_v58 = vpop.eup %2548  ;;  %v1036_v37 = vmax.f32 %v3624_v21, %v3626_v48  ;;  %v983_v24 = vadd.f32 1.0, %v2547_v31  ;;  %2554 = vpow2.f32 %v1215_v28  ;;  %v1192_v1 = vpop.f32.mrf.mxu2  ;;  %v767_v31 = vmul.f32 %v760_v15, %v3491_v4 }
 0x1cd   : > { %v996_v14 = vadd.f32 2.0, %v2549_v58  ;;  %2556 = vrcp.f32 %v1227_v41  ;;  %v3631_v40 = vadd.f32 %v1192_v1, %v1165_v12  ;;  %v2551_v43 = vpop.eup %2550  ;;  %v1142_v12 = vadd.f32 %v3434_v51, %v3558_v17 }
 0x1ce   : > { %2558 = vrcp.f32 %v983_v24  ;;  %v1381_v42 = vpop.f32.mrf.mxu0  ;;  %v3639_v39 = vmul.f32 %v2551_v43, %v766_v52 }
 0x1cf   : > { %v1176_v34 = vpop.f32.mrf.mxu3  ;;  %v1003_v11 = vmul.f32 %v2549_v58, %v996_v14  ;;  %v1382_v44 = vadd.f32 %v3434_v51, %v1381_v42  ;;  %v1409_v33 = vpop.f32.mrf.mxu1  ;;  %2560 = vrcp.f32 %v774_v38  ;;  %v1208_v49 = vsub.f32 0.0, %v3631_v40 }
 0x1d1   : > { %v2553_v54 = vpop.eup %2552  ;;  %v1017_v61 = vadd.f32 2.0, %v1003_v11  ;;  %v1217_v5 = vmul.f32 1.442695, %v1208_v49  ;;  %v1410_v0 = vadd.f32 %v1409_v33, %v1382_v44  ;;  %v1010_v24 = vmul.f32 %v1003_v11, %v3572_v45 }
 0x1d2   : > { %v2555_v46 = vpop.eup %2554  ;;  %v3641_v63 = vmul.f32 %v2553_v54, %v1009_v56  ;;  %v1170_v11 = vadd.f32 %v3569_v20, %v1142_v12  ;;  %v768_v20 = vmul.f32 %v3633_v50, %v3500_v6 }
 0x1d3   : > { %v2557_v7 = vpop.eup %2556  ;;  %2562 = vrcp.f32 %v1017_v61  ;;  %v1228_v22 = vadd.f32 1.0, %v2555_v46 }
 0x1d4   : > { %v2559_v55 = vpop.eup %2558  ;;  %v1037_v16 = vmax.f32 %v3639_v39, %v3641_v63  ;;  %v1241_v30 = vadd.f32 2.0, %v2557_v7  ;;  %2564 = vpow2.f32 %v1217_v5  ;;  %v1194_v57 = vpop.f32.mrf.mxu2 }
 0x1d5   : > { %v997_v8 = vadd.f32 2.0, %v2559_v55  ;;  %2566 = vrcp.f32 %v1228_v22  ;;  %v2561_v28 = vpop.eup %2560  ;;  %v3648_v13 = vadd.f32 %v1194_v57, %v3554_v3 }
 0x1d6   : > { %v1248_v38 = vmul.f32 %v2557_v7, %v1241_v30  ;;  %v1383_v58 = vpop.f32.mrf.mxu0  ;;  %2568 = vrcp.f32 %v775_v10  ;;  %v3658_v43 = vmul.f32 %v2561_v28, %v767_v31 }
 0x1d7   : > { %v1437_v19 = vpop.f32.mrf.mxu3  ;;  %v1004_v14 = vmul.f32 %v2559_v55, %v997_v8  ;;  %v1411_v34 = vpop.f32.mrf.mxu1  ;;  %v1209_v42 = vsub.f32 0.0, %v3648_v13  ;;  %v1384_v15 = vadd.f32 %v3434_v51, %v1383_v58 }
 0x1d8   : > { %v3650_v41 = vadd.f32 %v1437_v19, %v1410_v0  ;;  %v1262_v1 = vadd.f32 2.0, %v1248_v38  ;;  %v1255_v8 = vmul.f32 %v1248_v38, %v3595_v23 }
 0x1d9   : > { %v2563_v3 = vpop.eup %2562  ;;  %v1018_v44 = vadd.f32 2.0, %v1004_v14  ;;  %v1219_v17 = vmul.f32 1.442695, %v1209_v42  ;;  %v1412_v46 = vadd.f32 %v1411_v34, %v1384_v15  ;;  %v1011_v31 = vmul.f32 %v1004_v14, %v3598_v25 }
 0x1da   : > { %v1456_v4 = vsub.f32 0.0, %v3650_v41  ;;  %v2565_v33 = vpop.eup %2564  ;;  %v3660_v52 = vmul.f32 %v2563_v3, %v1010_v24  ;;  %2570 = vrcp.f32 %v1262_v1  ;;  %v1144_v42 = vadd.f32 %v3434_v51, %v3574_v32 }
 0x1db   : > { %v2567_v45 = vpop.eup %2566  ;;  %2572 = vrcp.f32 %v1018_v44  ;;  %v1229_v49 = vadd.f32 1.0, %v2565_v33 }
 0x1dc   : > { %v1463_v56 = vmul.f32 1.442695, %v1456_v4  ;;  %v1038_v54 = vmax.f32 %v3658_v43, %v3660_v52  ;;  %v1242_v61 = vadd.f32 2.0, %v2567_v45  ;;  %2574 = vpow2.f32 %v1219_v17  ;;  %v2569_v5 = vpop.eup %2568  ;;  %v1197_v0 = vpop.f32.mrf.mxu2 }
 0x1dd   : > { %2576 = vrcp.f32 %v1229_v49  ;;  %v3665_v22 = vadd.f32 %v1197_v0, %v1170_v11  ;;  %v3676_v1 = vmul.f32 %v2569_v5, %v768_v20  ;;  %v1172_v33 = vadd.f32 %v3592_v18, %v1144_v42 }
 0x1de   : > { %v1249_v10 = vmul.f32 %v2567_v45, %v1242_v61  ;;  %2578 = vpow2.f32 %v1463_v56  ;;  %v1386_v30 = vpop.f32.mrf.mxu0  ;;  %v1147_v5 = vadd.f32 %v3434_v51, %v3600_v9 }
 0x1df   : > { %v1439_v7 = vpop.f32.mrf.mxu3  ;;  %v1387_v57 = vadd.f32 %v3434_v51, %v1386_v30  ;;  %v1414_v19 = vpop.f32.mrf.mxu1  ;;  %v1210_v12 = vsub.f32 0.0, %v3665_v22 }
 0x1e0   : > { %v3667_v55 = vadd.f32 %v1439_v7, %v1412_v46  ;;  %v2571_v28 = vpop.eup %2570  ;;  %v1263_v58 = vadd.f32 2.0, %v1249_v10 }
 0x1e1   : > { %v2573_v34 = vpop.eup %2572  ;;  %v1276_v6 = vmul.f32 %v2571_v28, %v1255_v8  ;;  %v1415_v50 = vadd.f32 %v1414_v19, %v1387_v57  ;;  %v1221_v4 = vmul.f32 1.442695, %v1210_v12 }
 0x1e2   : > { %v1457_v24 = vsub.f32 0.0, %v3667_v55  ;;  %v2575_v23 = vpop.eup %2574  ;;  %v3680_v38 = vmul.f32 %v2573_v34, %v1011_v31  ;;  %2580 = vrcp.f32 %v1263_v58  ;;  %v1175_v58 = vadd.f32 %v3614_v59, %v1147_v5 }
 0x1e3   : > { %v2577_v25 = vpop.eup %2576  ;;  %v3685_v14 = vmax.f32 %v1033_v2, %v1276_v6  ;;  %v1230_v3 = vadd.f32 1.0, %v2575_v23  ;;  %2582 = vpow2.f32 %v1221_v4  ;;  %v1256_v2 = vmul.f32 %v1249_v10, %v3616_v60 }
 0x1e4   : > { %v1465_v15 = vmul.f32 1.442695, %v1457_v24  ;;  %v2579_v44 = vpop.eup %2578  ;;  %v1039_v32 = vmax.f32 %v3676_v1, %v3680_v38  ;;  %v1243_v17 = vadd.f32 2.0, %v2577_v25  ;;  %v1199_v45 = vpop.f32.mrf.mxu2 }
 0x1e5   : > { %2584 = vrcp.f32 %v1230_v3  ;;  %v1477_v56 = vadd.f32 1.0, %v2579_v44  ;;  %v3690_v61 = vadd.f32 %v1199_v45, %v1172_v33 }
 0x1e6   : > { %v1250_v49 = vmul.f32 %v2577_v25, %v1243_v17  ;;  %2586 = vpow2.f32 %v1465_v15  ;;  %v1388_v27 = vpop.f32.mrf.mxu0 }
 0x1e7   : > { %v1442_v11 = vpop.f32.mrf.mxu3  ;;  %2588 = vrcp.f32 %v1477_v56  ;;  %v1416_v18 = vpop.f32.mrf.mxu1  ;;  %v1211_v7 = vsub.f32 0.0, %v3690_v61  ;;  %v1389_v8 = vadd.f32 %v3434_v51, %v1388_v27 }
 0x1e8   : > { %v3692_v26 = vadd.f32 %v1442_v11, %v1415_v50  ;;  %v2581_v46 = vpop.eup %2580  ;;  %v1264_v0 = vadd.f32 2.0, %v1250_v49  ;;  %v1257_v62 = vmul.f32 %v1250_v49, %v3631_v40 }
 0x1e9   : > { %v1277_v20 = vmul.f32 %v2581_v46, %v1256_v2  ;;  %v2583_v57 = vpop.eup %2582  ;;  %v1223_v19 = vmul.f32 1.442695, %v1211_v7  ;;  %v1417_v42 = vadd.f32 %v1416_v18, %v1389_v8 }
 0x1ea   : > { %v1458_v30 = vsub.f32 0.0, %v3692_v26  ;;  %2590 = vrcp.f32 %v1264_v0  ;;  %v1231_v10 = vadd.f32 1.0, %v2583_v57 }
 0x1eb   : > { %v2585_v31 = vpop.eup %2584  ;;  %v3703_v60 = vmax.f32 %v1034_v53, %v1277_v20  ;;  %2592 = vpow2.f32 %v1223_v19 }
 0x1ec   : > { %v1467_v28 = vmul.f32 1.442695, %v1458_v30  ;;  %v2587_v9 = vpop.eup %2586  ;;  %v1244_v12 = vadd.f32 2.0, %v2585_v31  ;;  %2594 = vrcp.f32 %v1231_v10  ;;  %v1202_v6 = vpop.f32.mrf.mxu2 }
 0x1ed   : > { %v2589_v24 = vpop.eup %2588  ;;  %v1478_v34 = vadd.f32 1.0, %v2587_v9  ;;  %v3706_v15 = vadd.f32 %v1202_v6, %v1175_v58  ;;  %v2646_v58 = vld [vmem:[%s3846_s2] ss:$0 sm:$0xff] }
 0x1ee   : > { %v1251_v23 = vmul.f32 %v2585_v31, %v1244_v12  ;;  %v1491_v4 = vadd.f32 2.0, %v2589_v24  ;;  %2596 = vpow2.f32 %v1467_v28  ;;  %v1391_v35 = vpop.f32.mrf.mxu0 }
 0x1ef   : > { %v1444_v50 = vpop.f32.mrf.mxu3  ;;  %2598 = vrcp.f32 %v1478_v34  ;;  %v1392_v59 = vadd.f32 %v3434_v51, %v1391_v35  ;;  %v1419_v25 = vpop.f32.mrf.mxu1  ;;  %v1212_v17 = vsub.f32 0.0, %v3706_v15 }
 0x1f0   : > { %v3709_v53 = vadd.f32 %v1444_v50, %v1417_v42  ;;  %v2591_v3 = vpop.eup %2590  ;;  %v1265_v44 = vadd.f32 2.0, %v1251_v23  ;;  %v1498_v33 = vmul.f32 %v2589_v24, %v1491_v4  ;;  %v1258_v29 = vmul.f32 %v1251_v23, %v3648_v13 }
 0x1f1   : > { %v1278_v56 = vmul.f32 %v2591_v3, %v1257_v62  ;;  %v2593_v11 = vpop.eup %2592  ;;  %v1225_v2 = vmul.f32 1.442695, %v1212_v17  ;;  %v1420_v18 = vadd.f32 %v1419_v25, %v1392_v59 }
 0x1f2   : > { %v1459_v45 = vsub.f32 0.0, %v3709_v53  ;;  %2600 = vrcp.f32 %v1265_v44  ;;  %v1512_v27 = vadd.f32 2.0, %v1498_v33  ;;  %v2595_v40 = vpop.eup %2594  ;;  %v1232_v51 = vadd.f32 1.0, %v2593_v11 }
 0x1f3   : > { %v3717_v49 = vmax.f32 %v1035_v47, %v1278_v56  ;;  %v1245_v5 = vadd.f32 2.0, %v2595_v40  ;;  %v1505_v34 = vmul.f32 %v1498_v33, %v3650_v41 }
 0x1f4   : > { %v2597_v46 = vpop.eup %2596  ;;  %2602 = vrcp.f32 %v1512_v27  ;;  %v1469_v0 = vmul.f32 1.442695, %v1459_v45  ;;  %v1204_v8 = vpop.f32.mrf.mxu2 }
 0x1f5   : > { %v2599_v7 = vpop.eup %2598  ;;  %2604 = vrcp.f32 %v1232_v51  ;;  %v1479_v30 = vadd.f32 1.0, %v2597_v46  ;;  %v1252_v57 = vmul.f32 %v2595_v40, %v1245_v5 }
 0x1f6   : > { %v1492_v19 = vadd.f32 2.0, %v2599_v7  ;;  %2606 = vpow2.f32 %v1225_v2  ;;  %v1393_v31 = vpop.f32.mrf.mxu0 }
 0x1f7   : > { %v1447_v20 = vpop.f32.mrf.mxu3  ;;  %2608 = vrcp.f32 %v1479_v30  ;;  %v1421_v36 = vpop.f32.mrf.mxu1  ;;  %v1266_v10 = vadd.f32 2.0, %v1252_v57  ;;  %v1394_v12 = vadd.f32 %v2646_v58, %v1393_v31  ;;  %v1259_v56 = vmul.f32 %v1252_v57, %v3665_v22 }
 0x1f8   : > { %v3719_v28 = vadd.f32 %v1447_v20, %v1420_v18  ;;  %v2601_v47 = vpop.eup %2600  ;;  %v1499_v9 = vmul.f32 %v2599_v7, %v1492_v19  ;;  %2610 = vpow2.f32 %v1469_v0 }
 0x1f9   : > { %v1279_v24 = vmul.f32 %v2601_v47, %v1258_v29  ;;  %2612 = vrcp.f32 %v1266_v10  ;;  %v1422_v41 = vadd.f32 %v1421_v36, %v1394_v12 }
 0x1fa   : > { %v1460_v42 = vsub.f32 0.0, %v3719_v28  ;;  %v2603_v6 = vpop.eup %2602  ;;  %v1513_v13 = vadd.f32 2.0, %v1499_v9  ;;  %v1506_v5 = vmul.f32 %v1499_v9, %v3667_v55 }
 0x1fb   : > { %v2605_v50 = vpop.eup %2604  ;;  %v3734_v23 = vmax.f32 %v1036_v37, %v1279_v24  ;;  %v1526_v4 = vmul.f32 %v2603_v6, %v1505_v34 }
 0x1fc   : > { %v1471_v35 = vmul.f32 1.442695, %v1460_v42  ;;  %v2607_v62 = vpop.eup %2606  ;;  %2614 = vrcp.f32 %v1513_v13  ;;  %v1246_v59 = vadd.f32 2.0, %v2605_v50 }
 0x1fd   : > { %v2609_v25 = vpop.eup %2608  ;;  %v1533_v3 = vmax.f32 %v3685_v14, %v1526_v4  ;;  %v1233_v44 = vadd.f32 1.0, %v2607_v62 }
 0x1fe   : > { %2616 = vpow2.f32 %v1471_v35  ;;  %v2611_v17 = vpop.eup %2610  ;;  %v1253_v21 = vmul.f32 %v2605_v50, %v1246_v59  ;;  %v1493_v48 = vadd.f32 2.0, %v2609_v25  ;;  %v1396_v45 = vpop.f32.mrf.mxu0 }
 0x1ff   : > { %v1449_v33 = vpop.f32.mrf.mxu3  ;;  %v1540_v11 = vpack.c.bf16 %v1533_v3, %v1533_v3  ;;  %2618 = vrcp.f32 %v1233_v44  ;;  %v1480_v27 = vadd.f32 1.0, %v2611_v17  ;;  %v1397_v2 = vadd.f32 %v2646_v58, %v1396_v45  ;;  %v1424_v18 = vpop.f32.mrf.mxu1 }
 0x200   : > { %v3738_v37 = vadd.f32 %v1449_v33, %v1422_v41  ;;  %v2613_v40 = vpop.eup %2612  ;;  %v1267_v14 = vadd.f32 2.0, %v1253_v21  ;;  %v1500_v51 = vmul.f32 %v2609_v25, %v1493_v48  ;;  %v1260_v39 = vmul.f32 %v1253_v21, %v3690_v61 }
 0x201   : > { %1548 = vst.msk [vmem:[%s3742_s12] sm:$0xf] %vm1547_vm1, %v1540_v11  ;;  %v1280_v22 = vmul.f32 %v2613_v40, %v1259_v56  ;;  %2620 = vrcp.f32 %v1480_v27  ;;  %v1425_v20 = vadd.f32 %v1424_v18, %v1397_v2 }
 0x202   : > { %v1461_v46 = vsub.f32 0.0, %v3738_v37  ;;  %v2615_v0 = vpop.eup %2614  ;;  %2622 = vrcp.f32 %v1267_v14  ;;  %v1514_v7 = vadd.f32 2.0, %v1500_v51  ;;  %v1507_v6 = vmul.f32 %v1500_v51, %v3692_v26 }
 0x203   : > { %v3750_v57 = vmax.f32 %v1037_v16, %v1280_v22  ;;  %v1527_v19 = vmul.f32 %v2615_v0, %v1506_v5 }
 0x204   : > { %v1473_v30 = vmul.f32 1.442695, %v1461_v46  ;;  %v2617_v8 = vpop.eup %2616  ;;  %2624 = vrcp.f32 %v1514_v7 }
 0x205   : > { %v1481_v31 = vadd.f32 1.0, %v2617_v8  ;;  %v2619_v29 = vpop.eup %2618  ;;  %v1534_v36 = vmax.f32 %v3703_v60, %v1527_v19 }
 0x206   : > { %2626 = vpow2.f32 %v1473_v30  ;;  %v1247_v47 = vadd.f32 2.0, %v2619_v29  ;;  %v1398_v9 = vpop.f32.mrf.mxu0 }
 0x207   : > { %v1452_v55 = vpop.f32.mrf.mxu3  ;;  %2628 = vrcp.f32 %v1481_v31  ;;  %v2621_v58 = vpop.eup %2620  ;;  %v1541_v12 = vpack.c.bf16 %v1534_v36, %v1534_v36 }
 0x208   : > { %v3753_v10 = vadd.f32 %v1452_v55, %v1425_v20  ;;  %v1426_v63 = vpop.f32.mrf.mxu1  ;;  %v2623_v16 = vpop.eup %2622  ;;  %v1254_v24 = vmul.f32 %v2619_v29, %v1247_v47  ;;  %v1494_v34 = vadd.f32 2.0, %v2621_v58 }
 0x209   : > { %1549 = vst.msk [vmem:[%s3742_s12 + $0x4] sm:$0xf] %vm1547_vm1, %v1541_v12  ;;  %v1281_v60 = vmul.f32 %v2623_v16, %v1260_v39 }
 0x20a   : > { %v1462_v42 = vsub.f32 0.0, %v3753_v10  ;;  %v2625_v13 = vpop.eup %2624  ;;  %v1268_v50 = vadd.f32 2.0, %v1254_v24  ;;  %v1501_v4 = vmul.f32 %v2621_v58, %v1494_v34  ;;  %v1261_v21 = vmul.f32 %v1254_v24, %v3706_v15 }
 0x20b   : > { %v1288_v61 = vmax.f32 %v1038_v54, %v1281_v60  ;;  %v1528_v59 = vmul.f32 %v2625_v13, %v1507_v6 }
 0x20c   : > { %v1475_v35 = vmul.f32 1.442695, %v1462_v42  ;;  %v2627_v62 = vpop.eup %2626  ;;  %2630 = vrcp.f32 %v1268_v50  ;;  %v1515_v25 = vadd.f32 2.0, %v1501_v4  ;;  %v1508_v45 = vmul.f32 %v1501_v4, %v3709_v53 }
 0x20d   : > { %v2629_v41 = vpop.eup %2628  ;;  %v1482_v3 = vadd.f32 1.0, %v2627_v62  ;;  %v1535_v44 = vmax.f32 %v3717_v49, %v1528_v59 }
 0x20e   : > { %v1495_v33 = vadd.f32 2.0, %v2629_v41  ;;  %2632 = vpow2.f32 %v1475_v35 }
 0x20f   : > { %v1454_v26 = vpop.f32.mrf.mxu3  ;;  %2634 = vrcp.f32 %v1515_v25  ;;  %v1542_v17 = vpack.c.bf16 %v1535_v44, %v1535_v44 }
 0x210   : > { %v1502_v56 = vmul.f32 %v2629_v41, %v1495_v33  ;;  %2636 = vrcp.f32 %v1482_v3 }
 0x211   : > { %1550 = vst.msk [vmem:[%s3742_s12 + $0x8] sm:$0xf] %vm1547_vm1, %v1542_v17 }
 0x212   : > { %v1516_v43 = vadd.f32 2.0, %v1502_v56  ;;  %v2631_v52 = vpop.eup %2630  ;;  %v1509_v14 = vmul.f32 %v1502_v56, %v3719_v28 }
 0x213   : > { %v1282_v48 = vmul.f32 %v2631_v52, %v1261_v21 }
 0x214   : > { %v2633_v54 = vpop.eup %2632  ;;  %2638 = vrcp.f32 %v1516_v43 }
 0x215   : > { %v2635_v49 = vpop.eup %2634  ;;  %v1483_v11 = vadd.f32 1.0, %v2633_v54  ;;  %v1289_v2 = vmax.f32 %v1039_v32, %v1282_v48 }
 0x216   : > { %v2637_v27 = vpop.eup %2636  ;;  %v1529_v18 = vmul.f32 %v2635_v49, %v1508_v45 }
 0x217   : > { %v1496_v40 = vadd.f32 2.0, %v2637_v27  ;;  %2640 = vrcp.f32 %v1483_v11 }
 0x218   : > { %v1536_v15 = vmax.f32 %v3734_v23, %v1529_v18 }
 0x219   : > { %v1503_v51 = vmul.f32 %v2637_v27, %v1496_v40 }
 0x21a   : > { %v2639_v46 = vpop.eup %2638  ;;  %v1543_v53 = vpack.c.bf16 %v1536_v15, %v1536_v15 }
 0x21b   : > { %v1530_v22 = vmul.f32 %v2639_v46, %v1509_v14  ;;  %v1517_v5 = vadd.f32 2.0, %v1503_v51  ;;  %v1510_v28 = vmul.f32 %v1503_v51, %v3738_v37 }
 0x21c   : > { %1551 = vst.msk [vmem:[%s3742_s12 + $0xc] sm:$0xf] %vm1547_vm1, %v1543_v53 }
 0x21d   : > { %v2641_v0 = vpop.eup %2640  ;;  %v1537_v1 = vmax.f32 %v3750_v57, %v1530_v22  ;;  %2642 = vrcp.f32 %v1517_v5 }
 0x21e   : > { %v1497_v38 = vadd.f32 2.0, %v2641_v0 }
 0x21f   : > { %v1544_v32 = vpack.c.bf16 %v1537_v1, %v1537_v1 }
 0x220   : > { %v1504_v7 = vmul.f32 %v2641_v0, %v1497_v38 }
 0x221   : > { %1552 = vst.msk [vmem:[%s3742_s12 + $0x10] sm:$0xf] %vm1547_vm1, %v1544_v32 }
 0x222   : > { %v1518_v23 = vadd.f32 2.0, %v1504_v7  ;;  %v1511_v31 = vmul.f32 %v1504_v7, %v3753_v10 }
 0x223   : > { %v2643_v30 = vpop.eup %2642 }
 0x224   : > { %v1531_v20 = vmul.f32 %v2643_v30, %v1510_v28  ;;  %2644 = vrcp.f32 %v1518_v23 }
 0x226   : > { %v1538_v8 = vmax.f32 %v1288_v61, %v1531_v20 }
 0x228   : > { %v1545_v19 = vpack.c.bf16 %v1538_v8, %v1538_v8 }
 0x22a   : > { %v2645_v29 = vpop.eup %2644  ;;  %1553 = vst.msk [vmem:[%s3742_s12 + $0x14] sm:$0xf] %vm1547_vm1, %v1545_v19 }
 0x22b   : > { %v1532_v57 = vmul.f32 %v2645_v29, %v1511_v31 }
 0x22d   : > { %v1539_v36 = vmax.f32 %v1289_v2, %v1532_v57  ;;  %1561 = sbr.rel (!%p2920_p5) target bundleno = 619 (0x26b), region = 76 }
 0x22f   : > { %v1546_v55 = vpack.c.bf16 %v1539_v36, %v1539_v36 }
 0x231   : > { %1554 = vst.msk [vmem:[%s3742_s12 + $0x18] sm:$0xf] %vm1547_vm1, %v1546_v55 }
 0x232   : > { %s3877_s27 = smov (!%p1564_p11, %s1563_s27), 7 }
 0x233   : > { %s2174_s9 = sshll.u32 %s3877_s27, 2 }
 0x234   : > { %p2177_p12 = scmp.eq.s32.totalorder %s2174_s9, 0 }
 0x235   : > { %2647 = sdivrem.u32 (!%p2177_p12), %s3877_s27, 7 }
 0x236   : > { %1572 = sbr.rel (%p2177_p12) target bundleno = 619 (0x26b), region = 80 }
 0x23e   : > { %s3797_s20 = spop.drf %2647 }
 0x23f   : > { %s2649_s10 = spop.drf %2647  ;;  %p2178_p5 = scmp.le.s32.totalorder %s3797_s20, 0 }
 0x240   : > { %s3860_s15 = smov (!%p2178_p5), %s3791_s8  ;;  %s3861_s6 = smov (!%p2178_p5), %s3742_s12 }
 0x241   : > { %1841 = sbr.rel (%p2178_p5) target bundleno = 593 (0x251), region = 214  ;;  %s3806_s11 = smov (!%p2178_p5), 0  }
 0x242   : > { %s3808_s18 = smov (!%p2178_p5), 0  }
 0x246 LB: >> { %v1590_v37 = vld [vmem:[%s2843_s6] sm:$0xf]  ;;  %v1592_v47 = vld [vmem:[%s2843_s6 + $0x4] sm:$0xf]  ;;  %v1594_v10 = vld [vmem:[%s2843_s6 + $0x8] sm:$0xf]  ;;  %s2851_s18 = sphi %s3808_s18, %s1584_s18   ;;  %s2847_s11 = sphi %s3806_s11, %s3862_s11   ;;  %s2843_s6 = sphi %s3861_s6, %s1609_s6   ;;  %s2839_s15 = sphi %s3860_s15, %s1610_s15  }
 0x247   : >> { %1591 = vst [vmem:[%s2839_s15] sm:$0xf] %v1590_v37  ;;  %v1596_v9 = vld [vmem:[%s2843_s6 + $0xc] sm:$0xf]  ;;  %s1604_s24 = sadd.s32 1, %s2847_s11  ;;  %v1598_v58 = vld [vmem:[%s2843_s6 + $0x10] sm:$0xf] }
 0x248   : >> { %1593 = vst [vmem:[%s2839_s15 + $0x4] sm:$0xf] %v1592_v47  ;;  %p1605_p13 = scmp.ge.s32.totalorder %s1604_s24, %s3797_s20  ;;  %v1600_v12 = vld [vmem:[%s2843_s6 + $0x14] sm:$0xf]  ;;  %v1602_v39 = vld [vmem:[%s2843_s6 + $0x18] sm:$0xf] }
 0x249   : >> { %1595 = vst [vmem:[%s2839_s15 + $0x8] sm:$0xf] %v1594_v10  ;;  %s1584_s18 = sadd.s32 1, %s2851_s18  }
 0x24a   : >> { %1597 = vst [vmem:[%s2839_s15 + $0xc] sm:$0xf] %v1596_v9  ;;  %s3879_s24 = smov (%p1605_p13, %s1604_s24), 0  ;;  %p1583_p0 = scmp.ge.s32.totalorder %s1584_s18, %s3797_s20 }
 0x24b   : >> { %1599 = vst [vmem:[%s2839_s15 + $0x10] sm:$0xf] %v1598_v58  ;;  %s1607_s28 = smul.u32 28, %s3879_s24  ;;  %s3862_s11 = smov %s3879_s24 }
 0x24c   : >> { %1601 = vst [vmem:[%s2839_s15 + $0x14] sm:$0xf] %v1600_v12  ;;  %1586 = sbr.rel (!%p1583_p0) target bundleno = 582 (0x246), region = 220 }
 0x24d   : >> { %1603 = vst [vmem:[%s2839_s15 + $0x18] sm:$0xf] %v1602_v39  ;;  %s1609_s6 = scalar_lea.vmem %s3742_s12, %s1607_s28 [#allocation3]   ;;  %s1610_s15 = scalar_lea.vmem %s3791_s8, %s1607_s28  }
 0x251 PF: > { %2650 = sdivrem.u32 %s3877_s27, 7 }
 0x252   : > { %s2179_s30 = smul.u32 28, %s3797_s20 }
 0x254   : > { %s3829_s4 = scalar_lea.vmem %s3742_s12, %s2179_s30 [#allocation3]   ;;  %s1617_s5 = scalar_lea.vmem %s3791_s8, %s2179_s30  }
 0x25a   : > { %s2651_s17 = spop.drf %2650 }
 0x25b   : > { %s2652_s21 = spop.drf %2650 }
 0x25c   : > { %p2181_p1 = scmp.le.s32.totalorder %s2652_s21, 0 }
 0x25d   : > { %s2853_s23 = smov (!%p2181_p1), %s1617_s5   ;;  %s2857_s22 = smov (!%p2181_p1), %s3829_s4  }
 0x25e   : > { %1855 = sbr.rel (%p2181_p1) target bundleno = 619 (0x26b), region = 225  ;;  %s2861_s25 = smov (!%p2181_p1), 0  }
 0x25f   : > { %s2865_s14 = smov (!%p2181_p1), 0  }
 0x263 LB: >> { %v1627_v63 = vld [vmem:[%s2859_s22] sm:$0xf]  ;;  %s1629_s12 = sadd.s32 1, %s2863_s25  ;;  %s1621_s14 = sadd.s32 1, %s2867_s14   ;;  %s2867_s14 = sphi %s2865_s14, %s1621_s14   ;;  %s2863_s25 = sphi %s2861_s25, %s2862_s25   ;;  %s2859_s22 = sphi %s2857_s22, %s1634_s22   ;;  %s2855_s23 = sphi %s2853_s23, %s1635_s23  }
 0x264   : >> { %1628 = vst [vmem:[%s2855_s23] sm:$0xf] %v1627_v63  ;;  %p1630_p2 = scmp.ge.s32.totalorder %s1629_s12, %s2652_s21  ;;  %p1620_p3 = scmp.ge.s32.totalorder %s1621_s14, %s2652_s21 }
 0x266   : >> { %s3881_s12 = smov (%p1630_p2, %s1629_s12), 0  ;;  %1623 = sbr.rel (!%p1620_p3) target bundleno = 611 (0x263), region = 231 }
 0x267   : >> { %s2182_s26 = sshll.u32 %s3881_s12, 2  ;;  %s2862_s25 = smov %s3881_s12  }
 0x268   : >> { %s1634_s22 = scalar_lea.vmem %s3829_s4, %s2182_s26 [#allocation3]   ;;  %s1635_s23 = scalar_lea.vmem %s1617_s5, %s2182_s26  }
 0x26b PF: > { %p10_p4 = scmp.ge.s32.totalorder %s2908_s16, 4   ;;  %s3863_s12 = smov %s2767_s13 }
 0x26c   : > { %s3864_s13 = smov %s2918_s19  ;;  %s3865_s14 = smov %s2908_s16 }
 0x26d   :  { %12 = sbr.rel (!%p10_p4) target bundleno = 2 (0x2), region = 242 }

// kernel: cnn_forward.6
= control target key start
LH: loop header
LB: loop body
LE: loop exit
PB: predicated region body
PF: predicated region fallthrough
CT: control target
= control target key end

     0   :  { %s1650_s12 = smov 0   ;;  %s1652_s13 = smov 0   ;;  %s1953_s0 = inlined_call_operand.vmem [shape: bf16[98,576], index: 0, kind: input, shape index: {}]   ;;  %s1954_s1 = inlined_call_operand.vmem [shape: bf16[576,128], index: 1, kind: input, shape index: {}]   ;;  %s1955_s2 = inlined_call_operand.vmem [shape: f32[1,128], index: 2, kind: input, shape index: {}]   ;;  %s1956_s3 = inlined_call_operand.vmem [shape: bf16[98,128], index: 3, kind: output, shape index: {}]  }
   0x1   :  { %s1654_s14 = smov 0  }
   0x2 LB: > { %s1663_s15 = sadd.s32 4294967295, %s1596_s14   ;;  %s1665_s16 = sadd.s32 1, %s1596_s14   ;;  %s1596_s14 = sphi %s1654_s14, %s1963_s14   ;;  %s1592_s13 = sphi %s1652_s13, %s1962_s13   ;;  %s1588_s12 = sphi %s1650_s12, %s1961_s12  }
   0x3   : > { %s85_s17 = ssub.s32 %s1596_s14, %s1665_s16  ;;  %s88_s18 = sadd.s32 1, %s1592_s13 }
   0x4   : > { %p86_p0 = scmp.eq.s32.totalorder %s85_s17, 0  ;;  %p98_p1 = scmp.ne.s32.totalorder %s1592_s13, %s1588_s12 }
   0x5   : > { %p99_p2 = scmp.eq.s32.totalorder %s1663_s15, 1  ;;  %p1095_p3 = scmp.ge.s32.totalorder %s1596_s14, 1 }
   0x6   : > { %s1673_s19 = scalar_select %p86_p0, %s1592_s13, %s88_s18  }
   0x7   : > { %p1675_p4 = por %p99_p2, %p98_p1  ;;  %p149_p5 = scmp.lt.s32.totalorder %s1596_s14, 3 }
   0x9   : > { %p150_p6 = pnand %p1095_p3, %p149_p5 }
   0xa   : > { %s1692_s29 = smul.u32 (!%p150_p6), 7, %s1663_s15  ;;  %s175_s21 = sand.u32 (!%p150_p6), 1, %s1588_s12  }
   0xb   : > { %153 = sbr.rel (%p150_p6) target bundleno = 361 (0x169), region = 32 }
   0xc   : > { %p184_p7 = scmp.lt.s32.totalorder (!%p150_p6), %s1692_s29, 12 }
  0x10   : > { %v1339_v0 = vld [vmem:[%s1954_s1 + $0x38] sm:$0xff]  ;;  %v1338_v1 = vld [vmem:[%s1954_s1 + $0x30] sm:$0xff]  ;;  %v1337_v4 = vld [vmem:[%s1954_s1 + $0x28] sm:$0xff]  ;;  %s185_s11 = scalar_select %p184_p7, %s1692_s29, 12  ;;  %vm606_vm0 = vcmask 523264  }
  0x11   : > { %1386 = vmatpush.bf16.msra.mxu1 %v1339_v0  ;;  %1387 = vmatpush.bf16.msra.mxu2 %v1339_v0  ;;  %v1363_v2 = vld [vmem:[%s1954_s1 + $0xf8] sm:$0xff]  ;;  %v1362_v3 = vld [vmem:[%s1954_s1 + $0xf0] sm:$0xff]  ;;  %v1361_v5 = vld [vmem:[%s1954_s1 + $0xe8] sm:$0xff]  ;;  %s858_s23 = ssub.s32 (%p1675_p4), 13, %s1692_s29  ;;  %s1368_s24 = smul.u32 (%p1675_p4), 28, %s1663_s15 }
  0x12   : > { %619 = vmatpush.bf16.msra.mxu0 %v1339_v0  ;;  %703 = vmatpush.bf16.msra.mxu3 %v1363_v2  ;;  %v1336_v6 = vld [vmem:[%s1954_s1 + $0x20] sm:$0xff]  ;;  %v1335_v8 = vld [vmem:[%s1954_s1 + $0x18] sm:$0xff]  ;;  %s1403_s22 = smul.u32 20, %s185_s11  ;;  %v1334_v10 = vld [vmem:[%s1954_s1 + $0x10] sm:$0xff]  ;;  %p859_p8 = scmp.lt.s32.totalorder (%p1675_p4), %s858_s23, 7 }
  0x13   : > { %v1360_v7 = vld [vmem:[%s1954_s1 + $0xe0] sm:$0xff]  ;;  %v1359_v9 = vld [vmem:[%s1954_s1 + $0xd8] sm:$0xff]  ;;  %v1358_v11 = vld [vmem:[%s1954_s1 + $0xd0] sm:$0xff]  ;;  %s1900_s27 = scalar_lea.vmem (%p1675_p4), %s1956_s3, %s1368_s24  }
  0x14   : > { %s1723_s30 = scalar_lea.vmem %s1953_s0, %s1403_s22  ;;  %v1333_v12 = vld [vmem:[%s1954_s1 + $0x8] sm:$0xff]  ;;  %v1332_v16 = vld [vmem:[%s1954_s1] sm:$0xff]  ;;  %v1355_v19 = vld [vmem:[%s1954_s1 + $0xb8] sm:$0xff]  ;;  %s1402_s22 = smul.u32 28, %s175_s21 }
  0x15   : > { %1388 = vmatpush.bf16.msra.mxu1 %v1338_v1  ;;  %1389 = vmatpush.bf16.msra.mxu2 %v1338_v1  ;;  %v1729_v13 = vld [vmem:[%s1723_s30 + $0x78] sm:$0xff]  ;;  %v1357_v14 = vld [vmem:[%s1954_s1 + $0xc8] sm:$0xff]  ;;  %v1099_v21 = vld [vmem:[%s1723_s30] sm:$0xf] }
  0x16   : > { %620 = vmatpush.bf16.msra.mxu0 %v1338_v1  ;;  %704 = vmatpush.bf16.msra.mxu3 %v1362_v3  ;;  %v349_v15 = vunpack.c.l.b16 %v1729_v13  ;;  %v1119_v17 = vld [vmem:[%s1723_s30 + $0x28] sm:$0xf]  ;;  %v1324_v18 = vld [vmem:[%s1723_s30 + $0x38] sm:$0xf0]  ;;  %v1356_v22 = vld [vmem:[%s1954_s1 + $0xc0] sm:$0xff]  ;;  %s1883_s12 = scalar_lea.vmem [#allocation2], %s1402_s22  }
  0x17   : > { %v1347_v20 = vld [vmem:[%s1954_s1 + $0x78] sm:$0xff]  ;;  %v1120_v23 = vor.u32 %v1324_v18, %v1119_v17  ;;  %v1319_v25 = vld [vmem:[%s1723_s30 + $0x10] sm:$0xf0]  ;;  %v1318_v26 = vld [vmem:[%s1723_s30 + $0xc] sm:$0xf] }
  0x18   : > { %v369_v24 = vpack.c.b16 %v349_v15, %v349_v15  ;;  %v1109_v27 = vld [vmem:[%s1723_s30 + $0x1c] sm:$0xf0]  ;;  %v1367_v28 = vld [vmem:[%s1954_s1 + $0x118] sm:$0xff]  ;;  %v1354_v29 = vld [vmem:[%s1954_s1 + $0xb0] sm:$0xff]  ;;  %v1100_v31 = vor.u32 %v1319_v25, %v1099_v21 }
  0x19   : > { %1390 = vmatpush.bf16.msra.mxu1 %v1337_v4  ;;  %1391 = vmatpush.bf16.msra.mxu2 %v1337_v4  ;;  %v1346_v30 = vld [vmem:[%s1954_s1 + $0x70] sm:$0xff]  ;;  %v1112_v32 = vor.u32 %v1318_v26, %v1109_v27  ;;  %v1353_v34 = vld [vmem:[%s1954_s1 + $0xa8] sm:$0xff]  ;;  %v1352_v37 = vld [vmem:[%s1954_s1 + $0xa0] sm:$0xff] }
  0x1a   : > { %621 = vmatpush.bf16.msra.mxu0 %v1337_v4  ;;  %705 = vmatpush.bf16.msra.mxu3 %v1361_v5  ;;  %v1366_v33 = vld [vmem:[%s1954_s1 + $0x110] sm:$0xff]  ;;  %v1345_v35 = vld [vmem:[%s1954_s1 + $0x68] sm:$0xff]  ;;  %v1344_v38 = vld [vmem:[%s1954_s1 + $0x60] sm:$0xff] }
  0x1b   : > { %v1365_v36 = vld [vmem:[%s1954_s1 + $0x108] sm:$0xff]  ;;  %v1139_v39 = vld [vmem:[%s1723_s30 + $0x50] sm:$0xf]  ;;  %v1329_v40 = vld [vmem:[%s1723_s30 + $0x60] sm:$0xf0] }
  0x1c   : > { %v1364_v41 = vld [vmem:[%s1954_s1 + $0x100] sm:$0xff]  ;;  %v1351_v42 = vld [vmem:[%s1954_s1 + $0x98] sm:$0xff]  ;;  %v1115_v44 = vld [vmem:[%s1723_s30 + $0x10] sm:$0xf]  ;;  %v1140_v45 = vor.u32 %v1329_v40, %v1139_v39 }
  0x1d   : > { %1392 = vmatpush.bf16.msra.mxu1 %v1336_v6  ;;  %1393 = vmatpush.bf16.msra.mxu2 %v1336_v6  ;;  %v1343_v43 = vld [vmem:[%s1954_s1 + $0x58] sm:$0xff]  ;;  %v1321_v46 = vld [vmem:[%s1723_s30 + $0x20] sm:$0xf0]  ;;  %v1323_v47 = vld [vmem:[%s1723_s30 + $0x34] sm:$0xf] }
  0x1e   : > { %622 = vmatpush.bf16.msra.mxu0 %v1336_v6  ;;  %706 = vmatpush.bf16.msra.mxu3 %v1360_v7  ;;  %v1129_v48 = vld [vmem:[%s1723_s30 + $0x44] sm:$0xf0]  ;;  %v1350_v49 = vld [vmem:[%s1954_s1 + $0x90] sm:$0xff]  ;;  %v1116_v51 = vor.u32 %v1321_v46, %v1115_v44  ;;  %v1348_v55 = vld [vmem:[%s1954_s1 + $0x80] sm:$0xff] }
  0x1f   : > { %v1342_v50 = vld [vmem:[%s1954_s1 + $0x50] sm:$0xff]  ;;  %v1132_v52 = vor.u32 %v1323_v47, %v1129_v48  ;;  %v1349_v53 = vld [vmem:[%s1954_s1 + $0x88] sm:$0xff]  ;;  %v1340_v56 = vld [vmem:[%s1954_s1 + $0x40] sm:$0xff] }
  0x20   : > { %v1341_v54 = vld [vmem:[%s1954_s1 + $0x48] sm:$0xff]  ;;  %v1320_v58 = vld [vmem:[%s1723_s30 + $0x18] sm:$0xf0]  ;;  %v1317_v60 = vld [vmem:[%s1723_s30 + $0x4] sm:$0xf] }
  0x21   : > { %1394 = vmatpush.bf16.msra.mxu1 %v1335_v8  ;;  %1395 = vmatpush.bf16.msra.mxu2 %v1335_v8  ;;  %v1107_v57 = vld [vmem:[%s1723_s30 + $0x8] sm:$0xf]  ;;  %v1101_v61 = vld [vmem:[%s1723_s30 + $0x14] sm:$0xf0]  ;;  %v1326_v0 = vld [vmem:[%s1723_s30 + $0x48] sm:$0xf0] }
  0x22   : > { %623 = vmatpush.bf16.msra.mxu0 %v1335_v8  ;;  %707 = vmatpush.bf16.msra.mxu3 %v1359_v9  ;;  %v1108_v59 = vor.u32 %v1320_v58, %v1107_v57  ;;  %v1135_v62 = vld [vmem:[%s1723_s30 + $0x38] sm:$0xf]  ;;  %v1104_v63 = vor.u32 %v1317_v60, %v1101_v61  ;;  %v1328_v1 = vld [vmem:[%s1723_s30 + $0x5c] sm:$0xf]  ;;  %v1149_v2 = vld [vmem:[%s1723_s30 + $0x6c] sm:$0xf0] }
  0x23   : > { %v1136_v3 = vor.u32 %v1326_v0, %v1135_v62  ;;  %v1152_v4 = vor.u32 %v1328_v1, %v1149_v2  ;;  %v1127_v5 = vld [vmem:[%s1723_s30 + $0x30] sm:$0xf]  ;;  %v1325_v6 = vld [vmem:[%s1723_s30 + $0x40] sm:$0xf0]  ;;  %v1322_v9 = vld [vmem:[%s1723_s30 + $0x2c] sm:$0xf] }
  0x24   : > { %v220_v7 = vld [vmem:[%s1723_s30 + $0x80] sm:$0xff]  ;;  %v1128_v8 = vor.u32 %v1325_v6, %v1127_v5  ;;  %v1331_v15 = vld [vmem:[%s1723_s30 + $0x70] sm:$0xf0]  ;;  %v1147_v18 = vld [vmem:[%s1723_s30 + $0x58] sm:$0xf] }
  0x25   : > { %1396 = vmatpush.bf16.msra.mxu1 %v1334_v10  ;;  %1397 = vmatpush.bf16.msra.mxu2 %v1334_v10  ;;  %v351_v27 = vunpack.c.l.b16 %v220_v7 }
  0x26   : > { %624 = vmatpush.bf16.msra.mxu0 %v1334_v10  ;;  %708 = vmatpush.bf16.msra.mxu3 %v1358_v11  ;;  %v1121_v10 = vld [vmem:[%s1723_s30 + $0x3c] sm:$0xf0]  ;;  %v352_v11 = vunpack.c.h.b16 %v220_v7 }
  0x28   : > { %v372_v17 = vpack.c.b16 %v352_v11, %v352_v11 }
  0x29   : > { %1398 = vmatpush.bf16.msra.mxu1 %v1333_v12  ;;  %1399 = vmatpush.bf16.msra.mxu2 %v1333_v12 }
  0x2a   : > { %625 = vmatpush.bf16.msra.mxu0 %v1333_v12  ;;  %709 = vmatpush.bf16.msra.mxu3 %v1357_v14  ;;  %v1124_v12 = vor.u32 %v1322_v9, %v1121_v10  ;;  %v1155_v14 = vld [vmem:[%s1723_s30 + $0x60] sm:$0xf] }
  0x2d   : > { %1400 = vmatpush.bf16.msra.mxu1 %v1332_v16  ;;  %1401 = vmatpush.bf16.msra.mxu2 %v1332_v16 }
  0x2e   : > { %626 = vmatpush.bf16.msra.mxu0 %v1332_v16  ;;  %710 = vmatpush.bf16.msra.mxu3 %v1356_v22  ;;  %v1156_v16 = vor.u32 %v1331_v15, %v1155_v14  ;;  %v1327_v22 = vld [vmem:[%s1723_s30 + $0x54] sm:$0xf] }
  0x30   : > { %632 = vmatmul.bf16.vlgmr.msra.gmra.mxu1 %v1120_v23  ;;  %642 = vmatmul.bf16.vlgmr.msra.gmra.mxu2 %v369_v24  ;;  %v1141_v23 = vld [vmem:[%s1723_s30 + $0x64] sm:$0xf0] }
  0x31   : > { %675 = vmatpush.bf16.msrb.mxu2 %v1355_v19  ;;  %647 = vmatpush.bf16.msrb.mxu1 %v1347_v20  ;;  %v1330_v19 = vld [vmem:[%s1723_s30 + $0x68] sm:$0xf0]  ;;  %v221_v20 = vld [vmem:[%s1723_s30 + $0x88] sm:$0xf]  ;;  %v1144_v25 = vor.u32 %v1327_v22, %v1141_v23 }
  0x32   : > { %735 = vmatpush.bf16.msrb.mxu0 %v1367_v28  ;;  %711 = vmatmul.bf16.vlgmr.msra.gmra.mxu3 %v1112_v32  ;;  %v1148_v21 = vor.u32 %v1330_v19, %v1147_v18  ;;  %v353_v24 = vunpack.c.l.b16 %v221_v20  ;;  %v350_v28 = vunpack.c.h.b16 %v1729_v13  ;;  %v1845_v13 = vld [vmem:[%s1955_s2] ss:$0 sm:$0xff] }
  0x33   : > { %627 = vmatmul.bf16.vlgmr.msra.gmra.mxu0 %v1100_v31 }
  0x34   : > { %v373_v26 = vpack.c.b16 %v353_v24, %v353_v24 }
  0x35   : > { %676 = vmatpush.bf16.msrb.mxu2 %v1354_v29  ;;  %648 = vmatpush.bf16.msrb.mxu1 %v1346_v30  ;;  %v371_v29 = vpack.c.b16 %v351_v27, %v351_v27  ;;  %v370_v30 = vpack.c.b16 %v350_v28, %v350_v28 }
  0x36   : > { %736 = vmatpush.bf16.msrb.mxu0 %v1366_v33 }
  0x39   : > { %677 = vmatpush.bf16.msrb.mxu2 %v1353_v34  ;;  %649 = vmatpush.bf16.msrb.mxu1 %v1345_v35 }
  0x3a   : > { %737 = vmatpush.bf16.msrb.mxu0 %v1365_v36 }
  0x3d   : > { %678 = vmatpush.bf16.msrb.mxu2 %v1352_v37  ;;  %650 = vmatpush.bf16.msrb.mxu1 %v1344_v38 }
  0x3e   : > { %738 = vmatpush.bf16.msrb.mxu0 %v1364_v41 }
  0x40   : > { %637 = vmatmul.bf16.gmra.mxu1 %v1140_v45 }
  0x41   : > { %679 = vmatpush.bf16.msrb.mxu2 %v1351_v42  ;;  %651 = vmatpush.bf16.msrb.mxu1 %v1343_v43 }
  0x42   : > { %716 = vmatmul.bf16.gmra.mxu3 %v1132_v52 }
  0x43   : > { %1301 = vmatmul.msk.bf16.vlgmr.msrb.gmra.mxu0 %vm606_vm0, %v1116_v51 }
  0x45   : > { %680 = vmatpush.bf16.msrb.mxu2 %v1350_v49  ;;  %652 = vmatpush.bf16.msrb.mxu1 %v1342_v50 }
  0x49   : > { %681 = vmatpush.bf16.msrb.mxu2 %v1349_v53  ;;  %653 = vmatpush.bf16.msrb.mxu1 %v1341_v54 }
  0x4d   : > { %682 = vmatpush.bf16.msrb.mxu2 %v1348_v55  ;;  %654 = vmatpush.bf16.msrb.mxu1 %v1340_v56 }
  0x50   : > { %683 = vmatmul.bf16.vlgmr.msrb.gmra.mxu2 %v1108_v59  ;;  %655 = vmatmul.bf16.vlgmr.msrb.gmra.mxu1 %v1104_v63 }
  0x52   : > { %721 = vmatmul.bf16.gmra.mxu3 %v1152_v4 }
  0x53   : > { %1302 = vmatmul.msk.bf16.gmra.mxu0 %vm606_vm0, %v1136_v3 }
  0x60   : > { %688 = vmatmul.bf16.gmra.mxu2 %v1128_v8  ;;  %660 = vmatmul.bf16.gmra.mxu1 %v1124_v12 }
  0x62   : > { %726 = vmatmul.bf16.gmra.mxu3 %v372_v17 }
  0x63   : > { %1303 = vmatmul.msk.bf16.gmra.mxu0 %vm606_vm0, %v1156_v16 }
  0x70   : > { %693 = vmatmul.bf16.gmra.mxu2 %v1148_v21  ;;  %665 = vmatmul.bf16.gmra.mxu1 %v1144_v25 }
  0x73   : > { %1304 = vmatmul.msk.bf16.gmra.mxu0 %vm606_vm0, %v373_v26 }
  0x80   : > { %698 = vmatmul.bf16.gmra.mxu2 %v371_v29  ;;  %670 = vmatmul.bf16.gmra.mxu1 %v370_v30 }
  0xad   : > { %v633_v31 = vpop.f32.mrf.mxu1 }
  0xae   : > { %v634_v63 = vadd.f32 %v1845_v13, %v633_v31 }
  0xb0   : > { %v628_v32 = vpop.f32.mrf.mxu0 }
  0xb1   : > { %v629_v44 = vadd.f32 %v1845_v13, %v628_v32 }
  0xb3   : > { %v1838_v33 = vpop.f32.mrf.mxu2 }
  0xb5   : > { %v635_v34 = vpop.f32.mrf.mxu1  ;;  %v712_v35 = vpop.f32.mrf.mxu3 }
  0xb6   : > { %v636_v12 = vadd.f32 %v1845_v13, %v635_v34 }
  0xb8   : > { %v630_v36 = vpop.f32.mrf.mxu0 }
  0xb9   : > { %v631_v52 = vadd.f32 %v1845_v13, %v630_v36 }
  0xbb   : > { %v645_v37 = vpop.f32.mrf.mxu2 }
  0xbd   : > { %v638_v38 = vpop.f32.mrf.mxu1  ;;  %v714_v39 = vpop.f32.mrf.mxu3 }
  0xbe   : > { %v639_v28 = vadd.f32 %v1845_v13, %v638_v38 }
  0xc0   : > { %v740_v40 = vpop.f32.mrf.mxu0 }
  0xc5   : > { %v1840_v41 = vpop.f32.mrf.mxu1  ;;  %v717_v42 = vpop.f32.mrf.mxu3 }
  0xc8   : > { %v742_v43 = vpop.f32.mrf.mxu0 }
  0xcd   : > { %v656_v45 = vpop.f32.mrf.mxu1  ;;  %v719_v47 = vpop.f32.mrf.mxu3 }
  0xce   : > { %v657_v46 = vadd.f32 %v656_v45, %v629_v44 }
  0xd0   : > { %v745_v49 = vpop.f32.mrf.mxu0 }
  0xd3   : > { %v684_v48 = vpop.f32.mrf.mxu2 }
  0xd4   : > { %v685_v50 = vadd.f32 %v684_v48, %v657_v46 }
  0xd5   : > { %v658_v54 = vpop.f32.mrf.mxu1  ;;  %v722_v56 = vpop.f32.mrf.mxu3 }
  0xd6   : > { %v713_v51 = vadd.f32 %v712_v35, %v685_v50  ;;  %v659_v55 = vadd.f32 %v658_v54, %v631_v52 }
  0xd8   : > { %v1849_v53 = vadd.f32 %v740_v40, %v713_v51  ;;  %v747_v59 = vpop.f32.mrf.mxu0 }
  0xda   : > { %v759_v57 = vsub.f32 0.0, %v1849_v53 }
  0xdb   : > { %v686_v58 = vpop.f32.mrf.mxu2 }
  0xdc   : > { %v766_v60 = vmul.f32 1.442695, %v759_v57  ;;  %v687_v61 = vadd.f32 %v686_v58, %v659_v55 }
  0xdd   : > { %v661_v1 = vpop.f32.mrf.mxu1  ;;  %v1855_v3 = vpop.f32.mrf.mxu3 }
  0xde   : > { %1494 = vpow2.f32 %v766_v60  ;;  %v715_v62 = vadd.f32 %v714_v39, %v687_v61  ;;  %v662_v2 = vadd.f32 %v661_v1, %v634_v63  ;;  %v644_v63 = vadd.f32 %v1845_v13, %v1838_v33 }
  0xe0   : > { %v1853_v0 = vadd.f32 %v742_v43, %v715_v62  ;;  %v750_v6 = vpop.f32.mrf.mxu0 }
  0xe2   : > { %v760_v4 = vsub.f32 0.0, %v1853_v0 }
  0xe3   : > { %v689_v5 = vpop.f32.mrf.mxu2 }
  0xe4   : > { %v1495_v7 = vpop.eup %1494  ;;  %v768_v8 = vmul.f32 1.442695, %v760_v4  ;;  %v690_v9 = vadd.f32 %v689_v5, %v662_v2 }
  0xe5   : > { %v780_v10 = vadd.f32 1.0, %v1495_v7  ;;  %v663_v15 = vpop.f32.mrf.mxu1  ;;  %v1861_v17 = vpop.f32.mrf.mxu3 }
  0xe6   : > { %1496 = vpow2.f32 %v768_v8  ;;  %v718_v11 = vadd.f32 %v717_v42, %v690_v9  ;;  %v664_v16 = vadd.f32 %v663_v15, %v636_v12 }
  0xe7   : > { %1498 = vrcp.f32 %v780_v10 }
  0xe8   : > { %v1859_v14 = vadd.f32 %v745_v49, %v718_v11  ;;  %v752_v20 = vpop.f32.mrf.mxu0 }
  0xea   : > { %v761_v18 = vsub.f32 0.0, %v1859_v14 }
  0xeb   : > { %v691_v19 = vpop.f32.mrf.mxu2 }
  0xec   : > { %v1497_v21 = vpop.eup %1496  ;;  %v770_v22 = vmul.f32 1.442695, %v761_v18  ;;  %v692_v23 = vadd.f32 %v691_v19, %v664_v16 }
  0xed   : > { %v1499_v24 = vpop.eup %1498  ;;  %v781_v25 = vadd.f32 1.0, %v1497_v21  ;;  %v666_v30 = vpop.f32.mrf.mxu1 }
  0xee   : > { %v794_v26 = vadd.f32 2.0, %v1499_v24  ;;  %1500 = vpow2.f32 %v770_v22  ;;  %v720_v27 = vadd.f32 %v719_v47, %v692_v23  ;;  %v667_v31 = vadd.f32 %v666_v30, %v639_v28  ;;  %v729_v32 = vpop.f32.mrf.mxu3 }
  0xef   : > { %1502 = vrcp.f32 %v781_v25  ;;  %v641_v47 = vadd.f32 %v1845_v13, %v1840_v41 }
  0xf0   : > { %v1865_v29 = vadd.f32 %v747_v59, %v720_v27  ;;  %v801_v34 = vmul.f32 %v1499_v24, %v794_v26  ;;  %v755_v37 = vpop.f32.mrf.mxu0 }
  0xf2   : > { %v762_v35 = vsub.f32 0.0, %v1865_v29  ;;  %v815_v45 = vadd.f32 2.0, %v801_v34  ;;  %v808_v5 = vmul.f32 %v801_v34, %v1849_v53 }
  0xf3   : > { %v694_v36 = vpop.f32.mrf.mxu2 }
  0xf4   : > { %v1501_v39 = vpop.eup %1500  ;;  %v772_v40 = vmul.f32 1.442695, %v762_v35  ;;  %v695_v42 = vadd.f32 %v694_v36, %v667_v31 }
  0xf5   : > { %v1503_v43 = vpop.eup %1502  ;;  %v782_v44 = vadd.f32 1.0, %v1501_v39  ;;  %v668_v50 = vpop.f32.mrf.mxu1 }
  0xf6   : > { %v795_v46 = vadd.f32 2.0, %v1503_v43  ;;  %1504 = vpow2.f32 %v772_v40  ;;  %v723_v38 = vadd.f32 %v722_v56, %v695_v42  ;;  %v669_v51 = vadd.f32 %v668_v50, %v641_v47 }
  0xf7   : > { %1506 = vrcp.f32 %v782_v44 }
  0xf8   : > { %v802_v48 = vmul.f32 %v1503_v43, %v795_v46  ;;  %v1870_v49 = vadd.f32 %v750_v6, %v723_v38  ;;  %1508 = vrcp.f32 %v815_v45  ;;  %v757_v57 = vpop.f32.mrf.mxu0 }
  0xfa   : > { %v816_v52 = vadd.f32 2.0, %v802_v48  ;;  %v763_v54 = vsub.f32 0.0, %v1870_v49  ;;  %v809_v6 = vmul.f32 %v802_v48, %v1853_v0 }
  0xfb   : > { %v696_v55 = vpop.f32.mrf.mxu2 }
  0xfc   : > { %v1505_v58 = vpop.eup %1504  ;;  %1510 = vrcp.f32 %v816_v52  ;;  %v774_v59 = vmul.f32 1.442695, %v763_v54  ;;  %v697_v56 = vadd.f32 %v696_v55, %v669_v51 }
  0xfd   : > { %v1507_v60 = vpop.eup %1506  ;;  %v783_v41 = vadd.f32 1.0, %v1505_v58  ;;  %v671_v4 = vpop.f32.mrf.mxu1 }
  0xfe   : > { %v796_v61 = vadd.f32 2.0, %v1507_v60  ;;  %1512 = vpow2.f32 %v774_v59  ;;  %v725_v62 = vadd.f32 %v1855_v3, %v697_v56  ;;  %v1509_v1 = vpop.eup %1508  ;;  %v672_v7 = vadd.f32 %v671_v4, %v644_v63 }
  0xff   : > { %1514 = vrcp.f32 %v783_v41  ;;  %v829_v11 = vmul.f32 %v1509_v1, %v808_v5 }
 0x100   : > { %v1877_v2 = vadd.f32 %v752_v20, %v725_v62  ;;  %v803_v9 = vmul.f32 %v1507_v60, %v796_v61 }
 0x102   : > { %v1511_v8 = vpop.eup %1510  ;;  %v764_v10 = vsub.f32 0.0, %v1877_v2  ;;  %v817_v20 = vadd.f32 2.0, %v803_v9  ;;  %v810_v34 = vmul.f32 %v803_v9, %v1859_v14 }
 0x103   : > { %v830_v3 = vmul.f32 %v1511_v8, %v809_v6  ;;  %v699_v12 = vpop.f32.mrf.mxu2 }
 0x104   : > { %v1513_v15 = vpop.eup %1512  ;;  %v776_v33 = vmul.f32 1.442695, %v764_v10  ;;  %v700_v13 = vadd.f32 %v699_v12, %v672_v7 }
 0x105   : > { %v1515_v16 = vpop.eup %1514  ;;  %v1372_v18 = vpack.c.bf16 %v830_v3, %v829_v11  ;;  %v784_v19 = vadd.f32 1.0, %v1513_v15  ;;  %v673_v23 = vpop.f32.mrf.mxu1 }
 0x106   : > { %v797_v21 = vadd.f32 2.0, %v1515_v16  ;;  %1516 = vpow2.f32 %v776_v33  ;;  %v728_v53 = vadd.f32 %v1861_v17, %v700_v13 }
 0x107   : > { %1373 = vst [vmem:[%s1883_s12] sm:$0xff] %v1372_v18   ;;  %1518 = vrcp.f32 %v784_v19 }
 0x108   : > { %v804_v0 = vmul.f32 %v1515_v16, %v797_v21  ;;  %v756_v22 = vadd.f32 %v755_v37, %v728_v53  ;;  %1520 = vrcp.f32 %v817_v20 }
 0x10a   : > { %v818_v24 = vadd.f32 2.0, %v804_v0  ;;  %v765_v25 = vsub.f32 0.0, %v756_v22  ;;  %v811_v35 = vmul.f32 %v804_v0, %v1865_v29 }
 0x10b   : > { %v701_v26 = vpop.f32.mrf.mxu2 }
 0x10c   : > { %v1517_v27 = vpop.eup %1516  ;;  %1522 = vrcp.f32 %v818_v24  ;;  %v778_v28 = vmul.f32 1.442695, %v765_v25 }
 0x10d   : > { %v1519_v30 = vpop.eup %1518  ;;  %v785_v31 = vadd.f32 1.0, %v1517_v27 }
 0x10e   : > { %v798_v32 = vadd.f32 2.0, %v1519_v30  ;;  %1524 = vpow2.f32 %v778_v28  ;;  %v1521_v17 = vpop.eup %1520 }
 0x10f   : > { %1526 = vrcp.f32 %v785_v31  ;;  %v831_v39 = vmul.f32 %v1521_v17, %v810_v34 }
 0x110   : > { %v805_v37 = vmul.f32 %v1519_v30, %v798_v32 }
 0x112   : > { %v1523_v36 = vpop.eup %1522  ;;  %v819_v46 = vadd.f32 2.0, %v805_v37  ;;  %v812_v52 = vmul.f32 %v805_v37, %v1870_v49 }
 0x113   : > { %v832_v40 = vmul.f32 %v1523_v36, %v811_v35 }
 0x114   : > { %v1525_v42 = vpop.eup %1524 }
 0x115   : > { %v1527_v43 = vpop.eup %1526  ;;  %v1377_v44 = vpack.c.bf16 %v832_v40, %v831_v39  ;;  %v786_v45 = vadd.f32 1.0, %v1525_v42 }
 0x116   : > { %v799_v38 = vadd.f32 2.0, %v1527_v43 }
 0x117   : > { %1384 = vst [vmem:[%s1883_s12 + $0x8] sm:$0xff] %v1377_v44   ;;  %1528 = vrcp.f32 %v786_v45 }
 0x118   : > { %v806_v47 = vmul.f32 %v1527_v43, %v799_v38  ;;  %1530 = vrcp.f32 %v819_v46 }
 0x11a   : > { %v820_v48 = vadd.f32 2.0, %v806_v47  ;;  %v813_v54 = vmul.f32 %v806_v47, %v1877_v2 }
 0x11c   : > { %1532 = vrcp.f32 %v820_v48 }
 0x11d   : > { %v1529_v14 = vpop.eup %1528 }
 0x11e   : > { %v800_v50 = vadd.f32 2.0, %v1529_v14  ;;  %v1531_v29 = vpop.eup %1530 }
 0x11f   : > { %v833_v58 = vmul.f32 %v1531_v29, %v812_v52 }
 0x120   : > { %v807_v51 = vmul.f32 %v1529_v14, %v800_v50 }
 0x122   : > { %v1533_v55 = vpop.eup %1532  ;;  %v821_v57 = vadd.f32 2.0, %v807_v51  ;;  %v814_v60 = vmul.f32 %v807_v51, %v756_v22 }
 0x123   : > { %v834_v59 = vmul.f32 %v1533_v55, %v813_v54 }
 0x124   : > { %1534 = vrcp.f32 %v821_v57 }
 0x125   : > { %v1382_v56 = vpack.c.bf16 %v834_v59, %v833_v58 }
 0x127   : > { %1385 = vst [vmem:[%s1883_s12 + $0x10] sm:$0xff] %v1382_v56  }
 0x12a   : > { %v1535_v41 = vpop.eup %1534 }
 0x12b   : > { %v835_v61 = vmul.f32 %v1535_v41, %v814_v60  ;;  %856 = sbr.rel (!%p1675_p4) target bundleno = 361 (0x169), region = 36 }
 0x12d   : > { %v842_v62 = vpack.c.bf16 %v835_v61, %v835_v61 }
 0x12f   : > { %849 = vst [vmem:[%s1883_s12 + $0x18] sm:$0xf] %v842_v62 }
 0x130   : > { %s1965_s23 = smov (!%p859_p8, %s858_s23), 7 }
 0x131   : > { %s1305_s28 = sshll.u32 %s1965_s23, 2 }
 0x132   : > { %p1308_p9 = scmp.eq.s32.totalorder %s1305_s28, 0 }
 0x133   : > { %1536 = sdivrem.u32 (!%p1308_p9), %s1965_s23, 7 }
 0x134   : > { %867 = sbr.rel (%p1308_p9) target bundleno = 361 (0x169), region = 40 }
 0x13c   : > { %s1906_s20 = spop.drf %1536 }
 0x13d   : > { %s1538_s4 = spop.drf %1536  ;;  %p1309_p10 = scmp.le.s32.totalorder %s1906_s20, 0 }
 0x13e   : > { %s1958_s15 = smov (!%p1309_p10), %s1900_s27  ;;  %s1959_s29 = smov (!%p1309_p10), %s1883_s12 }
 0x13f   : > { %1048 = sbr.rel (%p1309_p10) target bundleno = 335 (0x14f), region = 112  ;;  %s1915_s5 = smov (!%p1309_p10), 0  }
 0x140   : > { %s1917_s6 = smov (!%p1309_p10), 0  }
 0x144 LB: >> { %v885_v49 = vld [vmem:[%s1604_s29] sm:$0xf]  ;;  %v887_v63 = vld [vmem:[%s1604_s29 + $0x4] sm:$0xf]  ;;  %v889_v1 = vld [vmem:[%s1604_s29 + $0x8] sm:$0xf]  ;;  %s1612_s6 = sphi %s1917_s6, %s879_s6   ;;  %s1608_s5 = sphi %s1915_s5, %s1960_s5   ;;  %s1604_s29 = sphi %s1959_s29, %s904_s29   ;;  %s1600_s15 = sphi %s1958_s15, %s905_s15  }
 0x145   : >> { %886 = vst [vmem:[%s1600_s15] sm:$0xf] %v885_v49  ;;  %v891_v2 = vld [vmem:[%s1604_s29 + $0xc] sm:$0xf]  ;;  %s899_s7 = sadd.s32 1, %s1608_s5  ;;  %v893_v4 = vld [vmem:[%s1604_s29 + $0x10] sm:$0xf] }
 0x146   : >> { %888 = vst [vmem:[%s1600_s15 + $0x4] sm:$0xf] %v887_v63  ;;  %p900_p11 = scmp.ge.s32.totalorder %s899_s7, %s1906_s20  ;;  %v895_v5 = vld [vmem:[%s1604_s29 + $0x14] sm:$0xf]  ;;  %v897_v6 = vld [vmem:[%s1604_s29 + $0x18] sm:$0xf] }
 0x147   : >> { %890 = vst [vmem:[%s1600_s15 + $0x8] sm:$0xf] %v889_v1  ;;  %s879_s6 = sadd.s32 1, %s1612_s6  }
 0x148   : >> { %892 = vst [vmem:[%s1600_s15 + $0xc] sm:$0xf] %v891_v2  ;;  %s1967_s7 = smov (%p900_p11, %s899_s7), 0  ;;  %p878_p12 = scmp.ge.s32.totalorder %s879_s6, %s1906_s20 }
 0x149   : >> { %894 = vst [vmem:[%s1600_s15 + $0x10] sm:$0xf] %v893_v4  ;;  %s902_s8 = smul.u32 28, %s1967_s7  ;;  %s1960_s5 = smov %s1967_s7 }
 0x14a   : >> { %896 = vst [vmem:[%s1600_s15 + $0x14] sm:$0xf] %v895_v5  ;;  %881 = sbr.rel (!%p878_p12) target bundleno = 324 (0x144), region = 118 }
 0x14b   : >> { %898 = vst [vmem:[%s1600_s15 + $0x18] sm:$0xf] %v897_v6  ;;  %s904_s29 = scalar_lea.vmem %s1883_s12, %s902_s8 [#allocation2]   ;;  %s905_s15 = scalar_lea.vmem %s1900_s27, %s902_s8  }
 0x14f PF: > { %1539 = sdivrem.u32 %s1965_s23, 7 }
 0x150   : > { %s1310_s9 = smul.u32 28, %s1906_s20 }
 0x152   : > { %s1938_s10 = scalar_lea.vmem %s1883_s12, %s1310_s9 [#allocation2]   ;;  %s912_s11 = scalar_lea.vmem %s1900_s27, %s1310_s9  }
 0x158   : > { %s1540_s14 = spop.drf %1539 }
 0x159   : > { %s1541_s17 = spop.drf %1539 }
 0x15a   : > { %p1312_p13 = scmp.le.s32.totalorder %s1541_s17, 0 }
 0x15b   : > { %s1614_s30 = smov (!%p1312_p13), %s912_s11   ;;  %s1618_s18 = smov (!%p1312_p13), %s1938_s10  }
 0x15c   : > { %1062 = sbr.rel (%p1312_p13) target bundleno = 361 (0x169), region = 123  ;;  %s1622_s21 = smov (!%p1312_p13), 0  }
 0x15d   : > { %s1626_s22 = smov (!%p1312_p13), 0  }
 0x161 LB: >> { %v922_v7 = vld [vmem:[%s1620_s18] sm:$0xf]  ;;  %s924_s12 = sadd.s32 1, %s1624_s21  ;;  %s916_s22 = sadd.s32 1, %s1628_s22   ;;  %s1628_s22 = sphi %s1626_s22, %s916_s22   ;;  %s1624_s21 = sphi %s1622_s21, %s1623_s21   ;;  %s1620_s18 = sphi %s1618_s18, %s929_s18   ;;  %s1616_s30 = sphi %s1614_s30, %s930_s30  }
 0x162   : >> { %923 = vst [vmem:[%s1616_s30] sm:$0xf] %v922_v7  ;;  %p925_p0 = scmp.ge.s32.totalorder %s924_s12, %s1541_s17  ;;  %p915_p1 = scmp.ge.s32.totalorder %s916_s22, %s1541_s17 }
 0x164   : >> { %s1969_s12 = smov (%p925_p0, %s924_s12), 0  ;;  %918 = sbr.rel (!%p915_p1) target bundleno = 353 (0x161), region = 129 }
 0x165   : >> { %s1313_s23 = sshll.u32 %s1969_s12, 2  ;;  %s1623_s21 = smov %s1969_s12  }
 0x166   : >> { %s929_s18 = scalar_lea.vmem %s1938_s10, %s1313_s23 [#allocation2]   ;;  %s930_s30 = scalar_lea.vmem %s912_s11, %s1313_s23  }
 0x169 PF: > { %p10_p2 = scmp.ge.s32.totalorder %s1665_s16, 4   ;;  %s1961_s12 = smov %s1592_s13 }
 0x16a   : > { %s1962_s13 = smov %s1673_s19  ;;  %s1963_s14 = smov %s1665_s16 }
 0x16b   :  { %12 = sbr.rel (!%p10_p2) target bundleno = 2 (0x2), region = 140 }

// kernel: cnn_forward.7
= control target key start
LH: loop header
LB: loop body
LE: loop exit
PB: predicated region body
PF: predicated region fallthrough
CT: control target
= control target key end

     0   :  { %s15454_s0 = inlined_call_operand.vmem [shape: bf16[2,6272], index: 0, kind: input, shape index: {}]   ;;  %s15455_s1 = inlined_call_operand.vmem [shape: bf16[6272,256], index: 1, kind: input, shape index: {}]   ;;  %s15456_s2 = inlined_call_operand.vmem [shape: f32[1,256], index: 2, kind: input, shape index: {}]   ;;  %s15457_s3 = inlined_call_operand.vmem [shape: bf16[256,10], index: 3, kind: input, shape index: {}]   ;;  %s15458_s4 = inlined_call_operand.vmem [shape: f32[1,10], index: 4, kind: input, shape index: {}]   ;;  %s15459_s5 = inlined_call_operand.hbm [shape: f32[2,10], index: 5, kind: output, shape index: {}]  }
   0x1   :  { %v6394_v0 = vld [vmem:[%s15455_s1 + $0x70] sm:$0xf]  ;;  %v9551_v1 = vld [vmem:[%s15455_s1 + $0x74] sm:$0xf0]  ;;  %v6386_v11 = vld [vmem:[%s15455_s1 + $0x60] sm:$0xf] }
   0x2   :  { %v6458_v2 = vld [vmem:[%s15455_s1 + $0xf0] sm:$0xf]  ;;  %v6395_v3 = vor.u32 %v9551_v1, %v6394_v0  ;;  %v9567_v4 = vld [vmem:[%s15455_s1 + $0xf4] sm:$0xf0]  ;;  %v9549_v13 = vld [vmem:[%s15455_s1 + $0x64] sm:$0xf0] }
   0x3   :  { %v6522_v5 = vld [vmem:[%s15455_s1 + $0x170] sm:$0xf]  ;;  %v9583_v6 = vld [vmem:[%s15455_s1 + $0x174] sm:$0xf0]  ;;  %v6459_v7 = vor.u32 %v9567_v4, %v6458_v2  ;;  %v6450_v14 = vld [vmem:[%s15455_s1 + $0xe0] sm:$0xf]  ;;  %v6387_v16 = vor.u32 %v9549_v13, %v6386_v11 }
   0x4   :  { %v6523_v8 = vor.u32 %v9583_v6, %v6522_v5  ;;  %v6586_v9 = vld [vmem:[%s15455_s1 + $0x1f0] sm:$0xf]  ;;  %v9599_v10 = vld [vmem:[%s15455_s1 + $0x1f4] sm:$0xf0]  ;;  %4850 = vmatpush.bf16.msra.mxu0 %v6395_v3  ;;  %v9565_v15 = vld [vmem:[%s15455_s1 + $0xe4] sm:$0xf0] }
   0x5   :  { %v6587_v12 = vor.u32 %v9599_v10, %v6586_v9  ;;  %4863 = vmatpush.bf16.msra.mxu1 %v6459_v7  ;;  %v6451_v17 = vor.u32 %v9565_v15, %v6450_v14  ;;  %v6514_v18 = vld [vmem:[%s15455_s1 + $0x160] sm:$0xf]  ;;  %v9581_v19 = vld [vmem:[%s15455_s1 + $0x164] sm:$0xf0]  ;;  %v6378_v23 = vld [vmem:[%s15455_s1 + $0x50] sm:$0xf] }
   0x6   :  { %4876 = vmatpush.bf16.msra.mxu2 %v6523_v8  ;;  %v6578_v20 = vld [vmem:[%s15455_s1 + $0x1e0] sm:$0xf]  ;;  %v6515_v21 = vor.u32 %v9581_v19, %v6514_v18  ;;  %v9597_v22 = vld [vmem:[%s15455_s1 + $0x1e4] sm:$0xf0]  ;;  %v9547_v24 = vld [vmem:[%s15455_s1 + $0x54] sm:$0xf0] }
   0x7   :  { %4889 = vmatpush.bf16.msra.mxu3 %v6587_v12  ;;  %v6579_v25 = vor.u32 %v9597_v22, %v6578_v20  ;;  %v6442_v26 = vld [vmem:[%s15455_s1 + $0xd0] sm:$0xf]  ;;  %v9563_v27 = vld [vmem:[%s15455_s1 + $0xd4] sm:$0xf0]  ;;  %v6379_v29 = vor.u32 %v9547_v24, %v6378_v23  ;;  %v6370_v35 = vld [vmem:[%s15455_s1 + $0x40] sm:$0xf] }
   0x8   :  { %v6506_v28 = vld [vmem:[%s15455_s1 + $0x150] sm:$0xf]  ;;  %4851 = vmatpush.bf16.msra.mxu0 %v6387_v16  ;;  %v9579_v30 = vld [vmem:[%s15455_s1 + $0x154] sm:$0xf0]  ;;  %v6443_v33 = vor.u32 %v9563_v27, %v6442_v26  ;;  %v9545_v36 = vld [vmem:[%s15455_s1 + $0x44] sm:$0xf0] }
   0x9   :  { %v6570_v31 = vld [vmem:[%s15455_s1 + $0x1d0] sm:$0xf]  ;;  %v9595_v32 = vld [vmem:[%s15455_s1 + $0x1d4] sm:$0xf0]  ;;  %4864 = vmatpush.bf16.msra.mxu1 %v6451_v17  ;;  %v6507_v34 = vor.u32 %v9579_v30, %v6506_v28  ;;  %v6434_v37 = vld [vmem:[%s15455_s1 + $0xc0] sm:$0xf]  ;;  %v6371_v44 = vor.u32 %v9545_v36, %v6370_v35 }
   0xa   :  { %4877 = vmatpush.bf16.msra.mxu2 %v6515_v21  ;;  %v6571_v38 = vor.u32 %v9595_v32, %v6570_v31  ;;  %v9561_v39 = vld [vmem:[%s15455_s1 + $0xc4] sm:$0xf0]  ;;  %v6498_v40 = vld [vmem:[%s15455_s1 + $0x140] sm:$0xf]  ;;  %v6362_v47 = vld [vmem:[%s15455_s1 + $0x30] sm:$0xf] }
   0xb   :  { %4890 = vmatpush.bf16.msra.mxu3 %v6579_v25  ;;  %v9577_v41 = vld [vmem:[%s15455_s1 + $0x144] sm:$0xf0]  ;;  %v6562_v42 = vld [vmem:[%s15455_s1 + $0x1c0] sm:$0xf]  ;;  %v6435_v45 = vor.u32 %v9561_v39, %v6434_v37  ;;  %v9543_v48 = vld [vmem:[%s15455_s1 + $0x34] sm:$0xf0] }
   0xc   :  { %v9593_v43 = vld [vmem:[%s15455_s1 + $0x1c4] sm:$0xf0]  ;;  %4852 = vmatpush.bf16.msra.mxu0 %v6379_v29  ;;  %v6499_v46 = vor.u32 %v9577_v41, %v6498_v40  ;;  %v6426_v49 = vld [vmem:[%s15455_s1 + $0xb0] sm:$0xf]  ;;  %v9559_v51 = vld [vmem:[%s15455_s1 + $0xb4] sm:$0xf0]  ;;  %v6363_v56 = vor.u32 %v9543_v48, %v6362_v47 }
   0xd   :  { %4865 = vmatpush.bf16.msra.mxu1 %v6443_v33  ;;  %v6563_v50 = vor.u32 %v9593_v43, %v6562_v42  ;;  %v6490_v52 = vld [vmem:[%s15455_s1 + $0x130] sm:$0xf]  ;;  %v9575_v53 = vld [vmem:[%s15455_s1 + $0x134] sm:$0xf0]  ;;  %v6427_v57 = vor.u32 %v9559_v51, %v6426_v49  ;;  %v6354_v59 = vld [vmem:[%s15455_s1 + $0x20] sm:$0xf] }
   0xe   :  { %4878 = vmatpush.bf16.msra.mxu2 %v6507_v34  ;;  %v6554_v54 = vld [vmem:[%s15455_s1 + $0x1b0] sm:$0xf]  ;;  %v9591_v55 = vld [vmem:[%s15455_s1 + $0x1b4] sm:$0xf0]  ;;  %v6491_v58 = vor.u32 %v9575_v53, %v6490_v52  ;;  %v9541_v60 = vld [vmem:[%s15455_s1 + $0x24] sm:$0xf0] }
   0xf   :  { %4891 = vmatpush.bf16.msra.mxu3 %v6571_v38  ;;  %v6418_v61 = vld [vmem:[%s15455_s1 + $0xa0] sm:$0xf]  ;;  %v6555_v62 = vor.u32 %v9591_v55, %v6554_v54  ;;  %v9557_v63 = vld [vmem:[%s15455_s1 + $0xa4] sm:$0xf0]  ;;  %v6355_v4 = vor.u32 %v9541_v60, %v6354_v59  ;;  %v6346_v7 = vld [vmem:[%s15455_s1 + $0x10] sm:$0xf] }
  0x10   :  { %4853 = vmatpush.bf16.msra.mxu0 %v6371_v44  ;;  %v6482_v0 = vld [vmem:[%s15455_s1 + $0x120] sm:$0xf]  ;;  %v9573_v1 = vld [vmem:[%s15455_s1 + $0x124] sm:$0xf0]  ;;  %v6419_v5 = vor.u32 %v9557_v63, %v6418_v61  ;;  %v9539_v8 = vld [vmem:[%s15455_s1 + $0x14] sm:$0xf0] }
  0x11   :  { %4866 = vmatpush.bf16.msra.mxu1 %v6435_v45  ;;  %v6546_v2 = vld [vmem:[%s15455_s1 + $0x1a0] sm:$0xf]  ;;  %v9589_v3 = vld [vmem:[%s15455_s1 + $0x1a4] sm:$0xf0]  ;;  %v6483_v6 = vor.u32 %v9573_v1, %v6482_v0  ;;  %v6410_v9 = vld [vmem:[%s15455_s1 + $0x90] sm:$0xf]  ;;  %v6347_v16 = vor.u32 %v9539_v8, %v6346_v7 }
  0x12   :  { %4879 = vmatpush.bf16.msra.mxu2 %v6499_v46  ;;  %v6547_v10 = vor.u32 %v9589_v3, %v6546_v2  ;;  %v9555_v11 = vld [vmem:[%s15455_s1 + $0x94] sm:$0xf0]  ;;  %v6474_v12 = vld [vmem:[%s15455_s1 + $0x110] sm:$0xf]  ;;  %v6338_v17 = vld [vmem:[%s15455_s1] sm:$0xf] }
  0x13   :  { %4892 = vmatpush.bf16.msra.mxu3 %v6563_v50  ;;  %v9571_v13 = vld [vmem:[%s15455_s1 + $0x114] sm:$0xf0]  ;;  %v6538_v14 = vld [vmem:[%s15455_s1 + $0x190] sm:$0xf]  ;;  %v9537_v18 = vld [vmem:[%s15455_s1 + $0x4] sm:$0xf0]  ;;  %v6411_v19 = vor.u32 %v9555_v11, %v6410_v9 }
  0x14   :  { %4854 = vmatpush.bf16.msra.mxu0 %v6363_v56  ;;  %v9587_v15 = vld [vmem:[%s15455_s1 + $0x194] sm:$0xf0]  ;;  %v6475_v20 = vor.u32 %v9571_v13, %v6474_v12  ;;  %v6402_v21 = vld [vmem:[%s15455_s1 + $0x80] sm:$0xf]  ;;  %v9553_v22 = vld [vmem:[%s15455_s1 + $0x84] sm:$0xf0]  ;;  %v6339_v31 = vor.u32 %v9537_v18, %v6338_v17 }
  0x15   :  { %4867 = vmatpush.bf16.msra.mxu1 %v6427_v57  ;;  %v6466_v23 = vld [vmem:[%s15455_s1 + $0x100] sm:$0xf]  ;;  %v6539_v24 = vor.u32 %v9587_v15, %v6538_v14  ;;  %v9569_v25 = vld [vmem:[%s15455_s1 + $0x104] sm:$0xf0]  ;;  %v6650_v26 = vld [vmem:[%s15455_s1 + $0x270] sm:$0xf]  ;;  %v6403_v35 = vor.u32 %v9553_v22, %v6402_v21 }
  0x16   :  { %4880 = vmatpush.bf16.msra.mxu2 %v6491_v58  ;;  %v9615_v27 = vld [vmem:[%s15455_s1 + $0x274] sm:$0xf0]  ;;  %v6714_v28 = vld [vmem:[%s15455_s1 + $0x2f0] sm:$0xf]  ;;  %v6530_v33 = vld [vmem:[%s15455_s1 + $0x180] sm:$0xf]  ;;  %v6467_v36 = vor.u32 %v9569_v25, %v6466_v23 }
  0x17   :  { %4893 = vmatpush.bf16.msra.mxu3 %v6555_v62  ;;  %v9631_v29 = vld [vmem:[%s15455_s1 + $0x2f4] sm:$0xf0]  ;;  %v6778_v30 = vld [vmem:[%s15455_s1 + $0x370] sm:$0xf]  ;;  %v9585_v34 = vld [vmem:[%s15455_s1 + $0x184] sm:$0xf0]  ;;  %v6651_v39 = vor.u32 %v9615_v27, %v6650_v26 }
  0x18   :  { %4855 = vmatpush.bf16.msra.mxu0 %v6355_v4  ;;  %v9647_v32 = vld [vmem:[%s15455_s1 + $0x374] sm:$0xf0]  ;;  %v6842_v37 = vld [vmem:[%s15455_s1 + $0x3f0] sm:$0xf]  ;;  %v6715_v40 = vor.u32 %v9631_v29, %v6714_v28  ;;  %v6642_v41 = vld [vmem:[%s15455_s1 + $0x260] sm:$0xf]  ;;  %v6531_v43 = vor.u32 %v9585_v34, %v6530_v33 }
  0x19   :  { %4868 = vmatpush.bf16.msra.mxu1 %v6419_v5  ;;  %v9663_v38 = vld [vmem:[%s15455_s1 + $0x3f4] sm:$0xf0]  ;;  %v6779_v42 = vor.u32 %v9647_v32, %v6778_v30  ;;  %v9613_v44 = vld [vmem:[%s15455_s1 + $0x264] sm:$0xf0]  ;;  %v6706_v45 = vld [vmem:[%s15455_s1 + $0x2e0] sm:$0xf] }
  0x1a   :  { %4881 = vmatpush.bf16.msra.mxu2 %v6483_v6  ;;  %v9629_v46 = vld [vmem:[%s15455_s1 + $0x2e4] sm:$0xf0]  ;;  %v6843_v47 = vor.u32 %v9663_v38, %v6842_v37  ;;  %v6770_v48 = vld [vmem:[%s15455_s1 + $0x360] sm:$0xf]  ;;  %v6643_v52 = vor.u32 %v9613_v44, %v6642_v41  ;;  %v6634_v54 = vld [vmem:[%s15455_s1 + $0x250] sm:$0xf] }
  0x1b   :  { %4894 = vmatpush.bf16.msra.mxu3 %v6547_v10  ;;  %v9645_v49 = vld [vmem:[%s15455_s1 + $0x364] sm:$0xf0]  ;;  %v6834_v50 = vld [vmem:[%s15455_s1 + $0x3e0] sm:$0xf]  ;;  %v6707_v53 = vor.u32 %v9629_v46, %v6706_v45  ;;  %v9611_v55 = vld [vmem:[%s15455_s1 + $0x254] sm:$0xf0] }
  0x1c   :  { %4856 = vmatpush.bf16.msra.mxu0 %v6347_v16  ;;  %v9661_v51 = vld [vmem:[%s15455_s1 + $0x3e4] sm:$0xf0]  ;;  %v6771_v56 = vor.u32 %v9645_v49, %v6770_v48  ;;  %v6698_v57 = vld [vmem:[%s15455_s1 + $0x2d0] sm:$0xf]  ;;  %v9627_v58 = vld [vmem:[%s15455_s1 + $0x2d4] sm:$0xf0]  ;;  %v6635_v1 = vor.u32 %v9611_v55, %v6634_v54 }
  0x1d   :  { %4869 = vmatpush.bf16.msra.mxu1 %v6411_v19  ;;  %v21_v59 = vld [vmem:[%s15454_s0] sm:$0xff]  ;;  %v6835_v60 = vor.u32 %v9661_v51, %v6834_v50  ;;  %v6762_v61 = vld [vmem:[%s15455_s1 + $0x350] sm:$0xf]  ;;  %v9643_v62 = vld [vmem:[%s15455_s1 + $0x354] sm:$0xf0]  ;;  %v6699_v2 = vor.u32 %v9627_v58, %v6698_v57 }
  0x1e   :  { %4882 = vmatpush.bf16.msra.mxu2 %v6475_v20  ;;  %819 = vst [vmem:[#allocation1] ss:$9 sm:$0xff] %v21_v59  ;;  %v6826_v63 = vld [vmem:[%s15455_s1 + $0x3d0] sm:$0xf]  ;;  %v9659_v0 = vld [vmem:[%s15455_s1 + $0x3d4] sm:$0xf0]  ;;  %v6763_v4 = vor.u32 %v9643_v62, %v6762_v61 }
  0x1f   :  { %4895 = vmatpush.bf16.msra.mxu3 %v6539_v24  ;;  %v6626_v3 = vld [vmem:[%s15455_s1 + $0x240] sm:$0xf]  ;;  %v9609_v5 = vld [vmem:[%s15455_s1 + $0x244] sm:$0xf0]  ;;  %v6827_v8 = vor.u32 %v9659_v0, %v6826_v63  ;;  %v6618_v13 = vld [vmem:[%s15455_s1 + $0x230] sm:$0xf] }
  0x20   :  { %4857 = vmatpush.bf16.msra.mxu0 %v6339_v31  ;;  %v6690_v6 = vld [vmem:[%s15455_s1 + $0x2c0] sm:$0xf]  ;;  %v9625_v7 = vld [vmem:[%s15455_s1 + $0x2c4] sm:$0xf0]  ;;  %v6627_v14 = vor.u32 %v9609_v5, %v6626_v3  ;;  %v9607_v16 = vld [vmem:[%s15455_s1 + $0x234] sm:$0xf0] }
  0x21   :  { %4870 = vmatpush.bf16.msra.mxu1 %v6403_v35  ;;  %v6754_v9 = vld [vmem:[%s15455_s1 + $0x340] sm:$0xf]  ;;  %v9641_v10 = vld [vmem:[%s15455_s1 + $0x344] sm:$0xf0]  ;;  %v6691_v15 = vor.u32 %v9625_v7, %v6690_v6  ;;  %v6682_v17 = vld [vmem:[%s15455_s1 + $0x2b0] sm:$0xf]  ;;  %v6619_v29 = vor.u32 %v9607_v16, %v6618_v13 }
  0x22   :  { %4883 = vmatpush.bf16.msra.mxu2 %v6467_v36  ;;  %v6818_v11 = vld [vmem:[%s15455_s1 + $0x3c0] sm:$0xf]  ;;  %v9657_v12 = vld [vmem:[%s15455_s1 + $0x3c4] sm:$0xf0]  ;;  %v9623_v18 = vld [vmem:[%s15455_s1 + $0x2b4] sm:$0xf0]  ;;  %v6755_v19 = vor.u32 %v9641_v10, %v6754_v9 }
  0x23   :  { %4896 = vmatpush.bf16.msra.mxu3 %v6531_v43  ;;  %v6819_v23 = vor.u32 %v9657_v12, %v6818_v11  ;;  %v6746_v24 = vld [vmem:[%s15455_s1 + $0x330] sm:$0xf]  ;;  %v9639_v25 = vld [vmem:[%s15455_s1 + $0x334] sm:$0xf0]  ;;  %v6683_v30 = vor.u32 %v9623_v18, %v6682_v17  ;;  %v6610_v31 = vld [vmem:[%s15455_s1 + $0x220] sm:$0xf] }
  0x24   :  { %4902 = vmatpush.bf16.msrb.mxu0 %v6651_v39  ;;  %v6810_v27 = vld [vmem:[%s15455_s1 + $0x3b0] sm:$0xf]  ;;  %v9655_v28 = vld [vmem:[%s15455_s1 + $0x3b4] sm:$0xf0]  ;;  %v6747_v32 = vor.u32 %v9639_v25, %v6746_v24  ;;  %v9605_v33 = vld [vmem:[%s15455_s1 + $0x224] sm:$0xf0] }
  0x25   :  { %4915 = vmatpush.bf16.msrb.mxu1 %v6715_v40  ;;  %v10716_v20 = vld [vmem:[#allocation1 + $0x12] sm:$0xff]  ;;  %v10718_v21 = vld [vmem:[#allocation1] sm:$0xff]  ;;  %v10729_v26 = vld [vmem:[#allocation1 + $0x9] sm:$0xff]  ;;  %v6811_v36 = vor.u32 %v9655_v28, %v6810_v27  ;;  %v6611_v41 = vor.u32 %v9605_v33, %v6610_v31 }
  0x26   :  { %4928 = vmatpush.bf16.msrb.mxu2 %v6779_v42  ;;  %v10720_v22 = vld [vmem:[#allocation1 + $0x1b] sm:$0xff]  ;;  %4858 = vmatmul.bf16.vlgmr.msra.gmra.mxu0 %v10718_v21  ;;  %v9621_v35 = vld [vmem:[%s15455_s1 + $0x2a4] sm:$0xf0]  ;;  %v6602_v43 = vld [vmem:[%s15455_s1 + $0x210] sm:$0xf] }
  0x27   :  { %4941 = vmatpush.bf16.msrb.mxu3 %v6843_v47  ;;  %4884 = vmatmul.bf16.vlgmr.msra.gmra.mxu2 %v10716_v20  ;;  %v6674_v34 = vld [vmem:[%s15455_s1 + $0x2a0] sm:$0xf]  ;;  %v9637_v38 = vld [vmem:[%s15455_s1 + $0x324] sm:$0xf0]  ;;  %v9603_v44 = vld [vmem:[%s15455_s1 + $0x214] sm:$0xf0] }
  0x28   :  { %4903 = vmatpush.bf16.msrb.mxu0 %v6643_v52  ;;  %4897 = vmatmul.bf16.vlgmr.msra.gmra.mxu3 %v10720_v22  ;;  %v6738_v37 = vld [vmem:[%s15455_s1 + $0x320] sm:$0xf]  ;;  %v9653_v40 = vld [vmem:[%s15455_s1 + $0x3a4] sm:$0xf0]  ;;  %v6675_v42 = vor.u32 %v9621_v35, %v6674_v34  ;;  %v6666_v46 = vld [vmem:[%s15455_s1 + $0x290] sm:$0xf]  ;;  %v6603_v59 = vor.u32 %v9603_v44, %v6602_v43 }
  0x29   :  { %4916 = vmatpush.bf16.msrb.mxu1 %v6707_v53  ;;  %v6802_v39 = vld [vmem:[%s15455_s1 + $0x3a0] sm:$0xf]  ;;  %v6739_v45 = vor.u32 %v9637_v38, %v6738_v37  ;;  %v9619_v47 = vld [vmem:[%s15455_s1 + $0x294] sm:$0xf0]  ;;  %v6730_v48 = vld [vmem:[%s15455_s1 + $0x310] sm:$0xf] }
  0x2a   :  { %4929 = vmatpush.bf16.msrb.mxu2 %v6771_v56  ;;  %4871 = vmatmul.bf16.vlgmr.msra.gmra.mxu1 %v10729_v26  ;;  %v6803_v49 = vor.u32 %v9653_v40, %v6802_v39  ;;  %v9635_v50 = vld [vmem:[%s15455_s1 + $0x314] sm:$0xf0]  ;;  %v6794_v51 = vld [vmem:[%s15455_s1 + $0x390] sm:$0xf]  ;;  %v6594_v53 = vld [vmem:[%s15455_s1 + $0x200] sm:$0xf] }
  0x2b   :  { %4942 = vmatpush.bf16.msrb.mxu3 %v6835_v60  ;;  %v9651_v52 = vld [vmem:[%s15455_s1 + $0x394] sm:$0xf0]  ;;  %v9601_v54 = vld [vmem:[%s15455_s1 + $0x204] sm:$0xf0]  ;;  %v6658_v55 = vld [vmem:[%s15455_s1 + $0x280] sm:$0xf]  ;;  %v6667_v60 = vor.u32 %v9619_v47, %v6666_v46  ;;  %v6731_v0 = vor.u32 %v9635_v50, %v6730_v48 }
  0x2c   :  { %4904 = vmatpush.bf16.msrb.mxu0 %v6635_v1  ;;  %v9617_v56 = vld [vmem:[%s15455_s1 + $0x284] sm:$0xf0]  ;;  %v10800_v57 = vld [vmem:[#allocation1 + $0x36] sm:$0xff]  ;;  %v10804_v61 = vld [vmem:[#allocation1 + $0x3f] sm:$0xff]  ;;  %v6795_v3 = vor.u32 %v9651_v52, %v6794_v51  ;;  %v6595_v10 = vor.u32 %v9601_v54, %v6594_v53 }
  0x2d   :  { %4917 = vmatpush.bf16.msrb.mxu1 %v6699_v2  ;;  %v10802_v58 = vld [vmem:[#allocation1 + $0x24] sm:$0xff]  ;;  %v10809_v63 = vld [vmem:[#allocation1 + $0x2d] sm:$0xff]  ;;  %v6722_v1 = vld [vmem:[%s15455_s1 + $0x300] sm:$0xf]  ;;  %v6659_v11 = vor.u32 %v9617_v56, %v6658_v55 }
  0x2e   :  { %4930 = vmatpush.bf16.msrb.mxu2 %v6763_v4  ;;  %v22_v62 = vld [vmem:[%s15454_s0 + $0x8] sm:$0xff]  ;;  %v6906_v4 = vld [vmem:[%s15455_s1 + $0x470] sm:$0xf]  ;;  %v9679_v5 = vld [vmem:[%s15455_s1 + $0x474] sm:$0xf0] }
  0x2f   :  { %4943 = vmatpush.bf16.msrb.mxu3 %v6827_v8  ;;  %v9633_v2 = vld [vmem:[%s15455_s1 + $0x304] sm:$0xf0]  ;;  %829 = vst [vmem:[#allocation1] ss:$9 sm:$0xff] %v22_v62  ;;  %v6970_v6 = vld [vmem:[%s15455_s1 + $0x4f0] sm:$0xf] }
  0x30   :  { %4905 = vmatpush.bf16.msrb.mxu0 %v6627_v14  ;;  %v9695_v7 = vld [vmem:[%s15455_s1 + $0x4f4] sm:$0xf0]  ;;  %v7034_v8 = vld [vmem:[%s15455_s1 + $0x570] sm:$0xf]  ;;  %v6786_v12 = vld [vmem:[%s15455_s1 + $0x380] sm:$0xf]  ;;  %v6723_v14 = vor.u32 %v9633_v2, %v6722_v1 }
  0x31   :  { %4918 = vmatpush.bf16.msrb.mxu1 %v6691_v15  ;;  %v9711_v9 = vld [vmem:[%s15455_s1 + $0x574] sm:$0xf0]  ;;  %v9649_v13 = vld [vmem:[%s15455_s1 + $0x384] sm:$0xf0]  ;;  %v6907_v15 = vor.u32 %v9679_v5, %v6906_v4  ;;  %v7098_v16 = vld [vmem:[%s15455_s1 + $0x5f0] sm:$0xf]  ;;  %v6971_v18 = vor.u32 %v9695_v7, %v6970_v6 }
  0x32   :  { %4931 = vmatpush.bf16.msrb.mxu2 %v6755_v19  ;;  %v9727_v17 = vld [vmem:[%s15455_s1 + $0x5f4] sm:$0xf0]  ;;  %v7035_v19 = vor.u32 %v9711_v9, %v7034_v8  ;;  %v9677_v24 = vld [vmem:[%s15455_s1 + $0x464] sm:$0xf0]  ;;  %v6962_v25 = vld [vmem:[%s15455_s1 + $0x4e0] sm:$0xf]  ;;  %v6787_v27 = vor.u32 %v9649_v13, %v6786_v12 }
  0x33   :  { %4944 = vmatpush.bf16.msrb.mxu3 %v6819_v23  ;;  %v6898_v23 = vld [vmem:[%s15455_s1 + $0x460] sm:$0xf]  ;;  %v9693_v28 = vld [vmem:[%s15455_s1 + $0x4e4] sm:$0xf0]  ;;  %v7099_v31 = vor.u32 %v9727_v17, %v7098_v16  ;;  %v6890_v37 = vld [vmem:[%s15455_s1 + $0x450] sm:$0xf] }
  0x34   :  { %4906 = vmatpush.bf16.msrb.mxu0 %v6619_v29  ;;  %v7026_v29 = vld [vmem:[%s15455_s1 + $0x560] sm:$0xf]  ;;  %v9725_v34 = vld [vmem:[%s15455_s1 + $0x5e4] sm:$0xf0]  ;;  %v6963_v35 = vor.u32 %v9693_v28, %v6962_v25  ;;  %v9675_v38 = vld [vmem:[%s15455_s1 + $0x454] sm:$0xf0] }
  0x35   :  { %4919 = vmatpush.bf16.msrb.mxu1 %v6683_v30  ;;  %v9709_v30 = vld [vmem:[%s15455_s1 + $0x564] sm:$0xf0]  ;;  %v7090_v33 = vld [vmem:[%s15455_s1 + $0x5e0] sm:$0xf]  ;;  %v6954_v39 = vld [vmem:[%s15455_s1 + $0x4d0] sm:$0xf]  ;;  %v6891_v44 = vor.u32 %v9675_v38, %v6890_v37 }
  0x36   :  { %4932 = vmatpush.bf16.msrb.mxu2 %v6747_v32  ;;  %v6899_v32 = vor.u32 %v9677_v24, %v6898_v23  ;;  %v9691_v40 = vld [vmem:[%s15455_s1 + $0x4d4] sm:$0xf0]  ;;  %v7091_v43 = vor.u32 %v9725_v34, %v7090_v33  ;;  %v9673_v50 = vld [vmem:[%s15455_s1 + $0x444] sm:$0xf0]  ;;  %v6946_v51 = vld [vmem:[%s15455_s1 + $0x4c0] sm:$0xf] }
  0x37   :  { %4945 = vmatpush.bf16.msrb.mxu3 %v6811_v36  ;;  %v7027_v36 = vor.u32 %v9709_v30, %v7026_v29  ;;  %v9723_v46 = vld [vmem:[%s15455_s1 + $0x5d4] sm:$0xf0]  ;;  %v6955_v47 = vor.u32 %v9691_v40, %v6954_v39  ;;  %v9689_v52 = vld [vmem:[%s15455_s1 + $0x4c4] sm:$0xf0]  ;;  %v7010_v53 = vld [vmem:[%s15455_s1 + $0x540] sm:$0xf] }
  0x38   :  { %4907 = vmatpush.bf16.msrb.mxu0 %v6611_v41  ;;  %v7018_v41 = vld [vmem:[%s15455_s1 + $0x550] sm:$0xf]  ;;  %v9705_v54 = vld [vmem:[%s15455_s1 + $0x544] sm:$0xf0]  ;;  %v6947_v62 = vor.u32 %v9689_v52, %v6946_v51  ;;  %v9671_v2 = vld [vmem:[%s15455_s1 + $0x434] sm:$0xf0] }
  0x39   :  { %4920 = vmatpush.bf16.msrb.mxu1 %v6675_v42  ;;  %v9707_v42 = vld [vmem:[%s15455_s1 + $0x554] sm:$0xf0]  ;;  %v6874_v1 = vld [vmem:[%s15455_s1 + $0x430] sm:$0xf]  ;;  %v6866_v13 = vld [vmem:[%s15455_s1 + $0x420] sm:$0xf] }
  0x3a   :  { %4933 = vmatpush.bf16.msrb.mxu2 %v6739_v45  ;;  %v7082_v45 = vld [vmem:[%s15455_s1 + $0x5d0] sm:$0xf]  ;;  %v7019_v48 = vor.u32 %v9707_v42, %v7018_v41  ;;  %v9687_v4 = vld [vmem:[%s15455_s1 + $0x4b4] sm:$0xf0]  ;;  %v6875_v8 = vor.u32 %v9671_v2, %v6874_v1  ;;  %v9685_v16 = vld [vmem:[%s15455_s1 + $0x4a4] sm:$0xf0] }
  0x3b   :  { %4946 = vmatpush.bf16.msrb.mxu3 %v6803_v49  ;;  %v6882_v49 = vld [vmem:[%s15455_s1 + $0x440] sm:$0xf]  ;;  %v7083_v55 = vor.u32 %v9723_v46, %v7082_v45  ;;  %v7002_v5 = vld [vmem:[%s15455_s1 + $0x530] sm:$0xf]  ;;  %v9703_v6 = vld [vmem:[%s15455_s1 + $0x534] sm:$0xf0] }
  0x3c   :  { %4908 = vmatpush.bf16.msrb.mxu0 %v6603_v59  ;;  %v6883_v56 = vor.u32 %v9673_v50, %v6882_v49  ;;  %v7074_v59 = vld [vmem:[%s15455_s1 + $0x5c0] sm:$0xf]  ;;  %v7066_v9 = vld [vmem:[%s15455_s1 + $0x5b0] sm:$0xf]  ;;  %v7003_v12 = vor.u32 %v9703_v6, %v7002_v5  ;;  %v9717_v25 = vld [vmem:[%s15455_s1 + $0x5a4] sm:$0xf0] }
  0x3d   :  { %4921 = vmatpush.bf16.msrb.mxu1 %v6667_v60  ;;  %v9721_v60 = vld [vmem:[%s15455_s1 + $0x5c4] sm:$0xf0]  ;;  %v6994_v17 = vld [vmem:[%s15455_s1 + $0x520] sm:$0xf]  ;;  %v6858_v29 = vld [vmem:[%s15455_s1 + $0x410] sm:$0xf] }
  0x3e   :  { %4934 = vmatpush.bf16.msrb.mxu2 %v6731_v0  ;;  %v7011_v0 = vor.u32 %v9705_v54, %v7010_v53  ;;  %v7075_v7 = vor.u32 %v9721_v60, %v7074_v59  ;;  %v7058_v24 = vld [vmem:[%s15455_s1 + $0x5a0] sm:$0xf]  ;;  %v9667_v30 = vld [vmem:[%s15455_s1 + $0x414] sm:$0xf0]  ;;  %v6986_v33 = vld [vmem:[%s15455_s1 + $0x510] sm:$0xf] }
  0x3f   :  { %4947 = vmatpush.bf16.msrb.mxu3 %v6795_v3  ;;  %v6938_v3 = vld [vmem:[%s15455_s1 + $0x4b0] sm:$0xf]  ;;  %v9699_v34 = vld [vmem:[%s15455_s1 + $0x514] sm:$0xf0]  ;;  %v6859_v37 = vor.u32 %v9667_v30, %v6858_v29  ;;  %v6850_v39 = vld [vmem:[%s15455_s1 + $0x400] sm:$0xf] }
  0x40   :  { %4909 = vmatpush.bf16.msrb.mxu0 %v6595_v10  ;;  %v9719_v10 = vld [vmem:[%s15455_s1 + $0x5b4] sm:$0xf0]  ;;  %v9665_v40 = vld [vmem:[%s15455_s1 + $0x404] sm:$0xf0]  ;;  %v6987_v42 = vor.u32 %v9699_v34, %v6986_v33  ;;  %v6978_v45 = vld [vmem:[%s15455_s1 + $0x500] sm:$0xf] }
  0x41   :  { %4922 = vmatpush.bf16.msrb.mxu1 %v6659_v11  ;;  %v6939_v11 = vor.u32 %v9687_v4, %v6938_v3  ;;  %v9715_v38 = vld [vmem:[%s15455_s1 + $0x594] sm:$0xf0]  ;;  %v9697_v46 = vld [vmem:[%s15455_s1 + $0x504] sm:$0xf0]  ;;  %v7226_v50 = vld [vmem:[%s15455_s1 + $0x6f0] sm:$0xf]  ;;  %v6851_v53 = vor.u32 %v9665_v40, %v6850_v39 }
  0x42   :  { %4935 = vmatpush.bf16.msrb.mxu2 %v6723_v14  ;;  %v9669_v14 = vld [vmem:[%s15455_s1 + $0x424] sm:$0xf0]  ;;  %v9759_v51 = vld [vmem:[%s15455_s1 + $0x6f4] sm:$0xf0]  ;;  %v7290_v52 = vld [vmem:[%s15455_s1 + $0x770] sm:$0xf]  ;;  %v6979_v60 = vor.u32 %v9697_v46, %v6978_v45 }
  0x43   :  { %4948 = vmatpush.bf16.msrb.mxu3 %v6787_v27  ;;  %4910 = vmatmul.bf16.vlgmr.msrb.gmra.mxu0 %v10802_v58  ;;  %v6867_v23 = vor.u32 %v9669_v14, %v6866_v13  ;;  %v9775_v54 = vld [vmem:[%s15455_s1 + $0x774] sm:$0xf0]  ;;  %v7354_v1 = vld [vmem:[%s15455_s1 + $0x7f0] sm:$0xf]  ;;  %v7154_v5 = vld [vmem:[%s15455_s1 + $0x660] sm:$0xf] }
  0x44   :  { %4954 = vmatpush.bf16.msra.mxu0 %v6907_v15  ;;  %4923 = vmatmul.bf16.vlgmr.msrb.gmra.mxu1 %v10809_v63  ;;  %v6930_v15 = vld [vmem:[%s15455_s1 + $0x4a0] sm:$0xf]  ;;  %v9791_v2 = vld [vmem:[%s15455_s1 + $0x7f4] sm:$0xf0]  ;;  %v7291_v3 = vor.u32 %v9775_v54, %v7290_v52  ;;  %v9741_v6 = vld [vmem:[%s15455_s1 + $0x664] sm:$0xf0] }
  0x45   :  { %4967 = vmatpush.bf16.msra.mxu1 %v6971_v18  ;;  %4936 = vmatmul.bf16.vlgmr.msrb.gmra.mxu2 %v10800_v57  ;;  %v9701_v18 = vld [vmem:[%s15455_s1 + $0x524] sm:$0xf0]  ;;  %v6931_v27 = vor.u32 %v9685_v16, %v6930_v15  ;;  %v7355_v13 = vor.u32 %v9791_v2, %v7354_v1  ;;  %v11067_v15 = vld [vmem:[#allocation1 + $0x1b] sm:$0xff]  ;;  %v7155_v16 = vor.u32 %v9741_v6, %v7154_v5  ;;  %v7274_v29 = vld [vmem:[%s15455_s1 + $0x750] sm:$0xf] }
  0x46   :  { %4980 = vmatpush.bf16.msra.mxu2 %v7035_v19  ;;  %4949 = vmatmul.bf16.vlgmr.msrb.gmra.mxu3 %v10804_v61  ;;  %v7067_v19 = vor.u32 %v9719_v10, %v7066_v9  ;;  %v6995_v28 = vor.u32 %v9701_v18, %v6994_v17  ;;  %v7282_v9 = vld [vmem:[%s15455_s1 + $0x760] sm:$0xf]  ;;  %v9773_v10 = vld [vmem:[%s15455_s1 + $0x764] sm:$0xf0]  ;;  %v9771_v30 = vld [vmem:[%s15455_s1 + $0x754] sm:$0xf0] }
  0x47   :  { %4993 = vmatpush.bf16.msra.mxu3 %v7099_v31  ;;  %v6922_v31 = vld [vmem:[%s15455_s1 + $0x490] sm:$0xf]  ;;  %v7346_v17 = vld [vmem:[%s15455_s1 + $0x7e0] sm:$0xf]  ;;  %v9789_v18 = vld [vmem:[%s15455_s1 + $0x7e4] sm:$0xf0] }
  0x48   :  { %4955 = vmatpush.bf16.msra.mxu0 %v6899_v32  ;;  %v9683_v32 = vld [vmem:[%s15455_s1 + $0x494] sm:$0xf0]  ;;  %v11065_v14 = vld [vmem:[#allocation1 + $0x9] sm:$0xff]  ;;  %v7202_v39 = vld [vmem:[%s15455_s1 + $0x6c0] sm:$0xf] }
  0x49   :  { %4968 = vmatpush.bf16.msra.mxu1 %v6963_v35  ;;  %v7059_v35 = vor.u32 %v9717_v25, %v7058_v24  ;;  %v6923_v41 = vor.u32 %v9683_v32, %v6922_v31  ;;  %v7146_v24 = vld [vmem:[%s15455_s1 + $0x650] sm:$0xf]  ;;  %v9739_v25 = vld [vmem:[%s15455_s1 + $0x654] sm:$0xf0]  ;;  %v7347_v31 = vor.u32 %v9789_v18, %v7346_v17  ;;  %v9753_v40 = vld [vmem:[%s15455_s1 + $0x6c4] sm:$0xf0] }
  0x4a   :  { %4981 = vmatpush.bf16.msra.mxu2 %v7027_v36  ;;  %v7050_v36 = vld [vmem:[%s15455_s1 + $0x590] sm:$0xf]  ;;  %v7147_v32 = vor.u32 %v9739_v25, %v7146_v24  ;;  %v9787_v34 = vld [vmem:[%s15455_s1 + $0x7d4] sm:$0xf0]  ;;  %v7330_v45 = vld [vmem:[%s15455_s1 + $0x7c0] sm:$0xf] }
  0x4b   :  { %4994 = vmatpush.bf16.msra.mxu3 %v7091_v43  ;;  %v6914_v43 = vld [vmem:[%s15455_s1 + $0x480] sm:$0xf]  ;;  %v7051_v49 = vor.u32 %v9715_v38, %v7050_v36  ;;  %v7338_v33 = vld [vmem:[%s15455_s1 + $0x7d0] sm:$0xf]  ;;  %v7275_v36 = vor.u32 %v9771_v30, %v7274_v29  ;;  %v9737_v38 = vld [vmem:[%s15455_s1 + $0x644] sm:$0xf0] }
  0x4c   :  { %4956 = vmatpush.bf16.msra.mxu0 %v6891_v44  ;;  %v9681_v44 = vld [vmem:[%s15455_s1 + $0x484] sm:$0xf0]  ;;  %v9751_v52 = vld [vmem:[%s15455_s1 + $0x6b4] sm:$0xf0] }
  0x4d   :  { %4969 = vmatpush.bf16.msra.mxu1 %v6955_v47  ;;  %v7162_v47 = vld [vmem:[%s15455_s1 + $0x670] sm:$0xf]  ;;  %v6915_v59 = vor.u32 %v9681_v44, %v6914_v43  ;;  %v7339_v43 = vor.u32 %v9787_v34, %v7338_v33  ;;  %v9785_v46 = vld [vmem:[%s15455_s1 + $0x7c4] sm:$0xf0]  ;;  %v9767_v54 = vld [vmem:[%s15455_s1 + $0x734] sm:$0xf0] }
  0x4e   :  { %4982 = vmatpush.bf16.msra.mxu2 %v7019_v48  ;;  %v9743_v48 = vld [vmem:[%s15455_s1 + $0x674] sm:$0xf0] }
  0x4f   :  { %4995 = vmatpush.bf16.msra.mxu3 %v7083_v55  ;;  %v7042_v55 = vld [vmem:[%s15455_s1 + $0x580] sm:$0xf] }
  0x50   :  { %4957 = vmatpush.bf16.msra.mxu0 %v6883_v56  ;;  %v9713_v56 = vld [vmem:[%s15455_s1 + $0x584] sm:$0xf0] }
  0x51   :  { %4970 = vmatpush.bf16.msra.mxu1 %v6947_v62  ;;  %v7163_v62 = vor.u32 %v9743_v48, %v7162_v47  ;;  %v7043_v4 = vor.u32 %v9713_v56, %v7042_v55  ;;  %v7130_v47 = vld [vmem:[%s15455_s1 + $0x630] sm:$0xf]  ;;  %v7203_v48 = vor.u32 %v9753_v40, %v7202_v39  ;;  %v7331_v55 = vor.u32 %v9785_v46, %v7330_v45 }
  0x52   :  { %4983 = vmatpush.bf16.msra.mxu2 %v7011_v0  ;;  %v7227_v0 = vor.u32 %v9759_v51, %v7226_v50  ;;  %v9735_v50 = vld [vmem:[%s15455_s1 + $0x634] sm:$0xf0]  ;;  %v7194_v51 = vld [vmem:[%s15455_s1 + $0x6b0] sm:$0xf] }
  0x53   :  { %4996 = vmatpush.bf16.msra.mxu3 %v7075_v7  ;;  %v7218_v7 = vld [vmem:[%s15455_s1 + $0x6e0] sm:$0xf] }
  0x54   :  { %4958 = vmatpush.bf16.msra.mxu0 %v6875_v8  ;;  %v9757_v8 = vld [vmem:[%s15455_s1 + $0x6e4] sm:$0xf0] }
  0x55   :  { %4971 = vmatpush.bf16.msra.mxu1 %v6939_v11  ;;  %v11061_v11 = vld [vmem:[#allocation1] sm:$0xff] }
  0x56   :  { %4984 = vmatpush.bf16.msra.mxu2 %v7003_v12  ;;  %v11063_v12 = vld [vmem:[#allocation1 + $0x12] sm:$0xff] }
  0x57   :  { %4997 = vmatpush.bf16.msra.mxu3 %v7067_v19  ;;  %v7219_v19 = vor.u32 %v9757_v8, %v7218_v7 }
  0x58   :  { %4959 = vmatpush.bf16.msra.mxu0 %v6867_v23  ;;  %v7283_v23 = vor.u32 %v9773_v10, %v7282_v9 }
  0x59   :  { %4972 = vmatpush.bf16.msra.mxu1 %v6931_v27  ;;  %v7210_v27 = vld [vmem:[%s15455_s1 + $0x6d0] sm:$0xf] }
  0x5a   :  { %4985 = vmatpush.bf16.msra.mxu2 %v6995_v28  ;;  %v9755_v28 = vld [vmem:[%s15455_s1 + $0x6d4] sm:$0xf0] }
  0x5b   :  { %4998 = vmatpush.bf16.msra.mxu3 %v7059_v35  ;;  %v7211_v35 = vor.u32 %v9755_v28, %v7210_v27 }
  0x5c   :  { %4960 = vmatpush.bf16.msra.mxu0 %v6859_v37  ;;  %v7138_v37 = vld [vmem:[%s15455_s1 + $0x640] sm:$0xf] }
  0x5d   :  { %4973 = vmatpush.bf16.msra.mxu1 %v6923_v41  ;;  %v7266_v41 = vld [vmem:[%s15455_s1 + $0x740] sm:$0xf]  ;;  %v7139_v44 = vor.u32 %v9737_v38, %v7138_v37 }
  0x5e   :  { %4986 = vmatpush.bf16.msra.mxu2 %v6987_v42  ;;  %v9769_v42 = vld [vmem:[%s15455_s1 + $0x744] sm:$0xf0] }
  0x5f   :  { %4999 = vmatpush.bf16.msra.mxu3 %v7051_v49  ;;  %v7267_v49 = vor.u32 %v9769_v42, %v7266_v41 }
  0x60   :  { %4961 = vmatpush.bf16.msra.mxu0 %v6851_v53  ;;  %v7258_v53 = vld [vmem:[%s15455_s1 + $0x730] sm:$0xf] }
  0x61   :  { %4974 = vmatpush.bf16.msra.mxu1 %v6915_v59 }
  0x62   :  { %4987 = vmatpush.bf16.msra.mxu2 %v6979_v60 }
  0x63   :  { %5000 = vmatpush.bf16.msra.mxu3 %v7043_v4  ;;  %4962 = vmatmul.bf16.vlgmr.msra.gmra.mxu0 %v11061_v11 }
  0x64   :  { %5006 = vmatpush.bf16.msrb.mxu0 %v7163_v62  ;;  %4975 = vmatmul.bf16.vlgmr.msra.gmra.mxu1 %v11065_v14 }
  0x65   :  { %5019 = vmatpush.bf16.msrb.mxu1 %v7227_v0  ;;  %4988 = vmatmul.bf16.vlgmr.msra.gmra.mxu2 %v11063_v12 }
  0x66   :  { %5032 = vmatpush.bf16.msrb.mxu2 %v7291_v3  ;;  %5001 = vmatmul.bf16.vlgmr.msra.gmra.mxu3 %v11067_v15 }
  0x67   :  { %5045 = vmatpush.bf16.msrb.mxu3 %v7355_v13 }
  0x68   :  { %5007 = vmatpush.bf16.msrb.mxu0 %v7155_v16 }
  0x69   :  { %5020 = vmatpush.bf16.msrb.mxu1 %v7219_v19 }
  0x6a   :  { %5033 = vmatpush.bf16.msrb.mxu2 %v7283_v23 }
  0x6b   :  { %5046 = vmatpush.bf16.msrb.mxu3 %v7347_v31 }
  0x6c   :  { %5008 = vmatpush.bf16.msrb.mxu0 %v7147_v32 }
  0x6d   :  { %5021 = vmatpush.bf16.msrb.mxu1 %v7211_v35 }
  0x6e   :  { %5034 = vmatpush.bf16.msrb.mxu2 %v7275_v36 }
  0x6f   :  { %5047 = vmatpush.bf16.msrb.mxu3 %v7339_v43 }
  0x70   :  { %10 = vsyncpa [#allocation3], 0  ;;  %5009 = vmatpush.bf16.msrb.mxu0 %v7139_v44  ;;  %v7131_v56 = vor.u32 %v9735_v50, %v7130_v47  ;;  %v7322_v59 = vld [vmem:[%s15455_s1 + $0x7b0] sm:$0xf]  ;;  %v9783_v60 = vld [vmem:[%s15455_s1 + $0x7b4] sm:$0xf0]  ;;  %v7195_v62 = vor.u32 %v9751_v52, %v7194_v51  ;;  %v7259_v0 = vor.u32 %v9767_v54, %v7258_v53 }
  0x71   :  { %5022 = vmatpush.bf16.msrb.mxu1 %v7203_v48  ;;  %v7122_v1 = vld [vmem:[%s15455_s1 + $0x620] sm:$0xf]  ;;  %v9733_v2 = vld [vmem:[%s15455_s1 + $0x624] sm:$0xf0]  ;;  %v7323_v7 = vor.u32 %v9783_v60, %v7322_v59  ;;  %v7114_v13 = vld [vmem:[%s15455_s1 + $0x610] sm:$0xf] }
  0x72   :  { %5035 = vmatpush.bf16.msrb.mxu2 %v7267_v49  ;;  %v7186_v3 = vld [vmem:[%s15455_s1 + $0x6a0] sm:$0xf]  ;;  %v9749_v4 = vld [vmem:[%s15455_s1 + $0x6a4] sm:$0xf0]  ;;  %v7123_v8 = vor.u32 %v9733_v2, %v7122_v1  ;;  %v9731_v18 = vld [vmem:[%s15455_s1 + $0x614] sm:$0xf0] }
  0x73   :  { %v7250_v5 = vld [vmem:[%s15455_s1 + $0x720] sm:$0xf]  ;;  %v9765_v6 = vld [vmem:[%s15455_s1 + $0x724] sm:$0xf0]  ;;  %5048 = vmatpush.bf16.msrb.mxu3 %v7331_v55  ;;  %v7187_v16 = vor.u32 %v9749_v4, %v7186_v3  ;;  %v7178_v19 = vld [vmem:[%s15455_s1 + $0x690] sm:$0xf]  ;;  %v7115_v32 = vor.u32 %v9731_v18, %v7114_v13 }
  0x74   :  { %5010 = vmatpush.bf16.msrb.mxu0 %v7131_v56  ;;  %v7314_v9 = vld [vmem:[%s15455_s1 + $0x7a0] sm:$0xf]  ;;  %v9781_v10 = vld [vmem:[%s15455_s1 + $0x7a4] sm:$0xf0]  ;;  %v7251_v17 = vor.u32 %v9765_v6, %v7250_v5  ;;  %v9747_v23 = vld [vmem:[%s15455_s1 + $0x694] sm:$0xf0] }
  0x75   :  { %5023 = vmatpush.bf16.msrb.mxu1 %v7195_v62  ;;  %v7242_v24 = vld [vmem:[%s15455_s1 + $0x710] sm:$0xf]  ;;  %v9763_v25 = vld [vmem:[%s15455_s1 + $0x714] sm:$0xf0]  ;;  %v7315_v28 = vor.u32 %v9781_v10, %v7314_v9  ;;  %v7106_v30 = vld [vmem:[%s15455_s1 + $0x600] sm:$0xf]  ;;  %v7179_v37 = vor.u32 %v9747_v23, %v7178_v19 }
  0x76   :  { %5036 = vmatpush.bf16.msrb.mxu2 %v7259_v0  ;;  %v7306_v27 = vld [vmem:[%s15455_s1 + $0x790] sm:$0xf]  ;;  %v9779_v29 = vld [vmem:[%s15455_s1 + $0x794] sm:$0xf0]  ;;  %v9729_v31 = vld [vmem:[%s15455_s1 + $0x604] sm:$0xf0]  ;;  %v7243_v38 = vor.u32 %v9763_v25, %v7242_v24 }
  0x77   :  { %5049 = vmatpush.bf16.msrb.mxu3 %v7323_v7  ;;  %v7170_v33 = vld [vmem:[%s15455_s1 + $0x680] sm:$0xf]  ;;  %v9745_v34 = vld [vmem:[%s15455_s1 + $0x684] sm:$0xf0]  ;;  %v7418_v39 = vld [vmem:[%s15455_s1 + $0x870] sm:$0xf]  ;;  %v7307_v47 = vor.u32 %v9779_v29, %v7306_v27  ;;  %v7107_v50 = vor.u32 %v9729_v31, %v7106_v30 }
  0x78   :  { %5011 = vmatpush.bf16.msrb.mxu0 %v7123_v8  ;;  %v7234_v35 = vld [vmem:[%s15455_s1 + $0x700] sm:$0xf]  ;;  %v9761_v36 = vld [vmem:[%s15455_s1 + $0x704] sm:$0xf0]  ;;  %v9807_v40 = vld [vmem:[%s15455_s1 + $0x874] sm:$0xf0]  ;;  %v7171_v54 = vor.u32 %v9745_v34, %v7170_v33 }
  0x79   :  { %5024 = vmatpush.bf16.msrb.mxu1 %v7187_v16  ;;  %v7482_v41 = vld [vmem:[%s15455_s1 + $0x8f0] sm:$0xf]  ;;  %v11226_v42 = vld [vmem:[#allocation1 + $0x24] sm:$0xff]  ;;  %v11228_v43 = vld [vmem:[#allocation1 + $0x36] sm:$0xff]  ;;  %v7235_v55 = vor.u32 %v9761_v36, %v7234_v35  ;;  %v7419_v56 = vor.u32 %v9807_v40, %v7418_v39  ;;  %vm6306_vm0 = vcmask 74752  }
  0x7a   :  { %5037 = vmatpush.bf16.msrb.mxu2 %v7251_v17  ;;  %v11230_v44 = vld [vmem:[#allocation1 + $0x2d] sm:$0xff]  ;;  %v11232_v45 = vld [vmem:[#allocation1 + $0x3f] sm:$0xff]  ;;  %v9823_v48 = vld [vmem:[%s15455_s1 + $0x8f4] sm:$0xf0] }
  0x7b   :  { %v23_v46 = vld [vmem:[%s15454_s0 + $0x10] sm:$0xff]  ;;  %5050 = vmatpush.bf16.msrb.mxu3 %v7315_v28  ;;  %v9839_v51 = vld [vmem:[%s15455_s1 + $0x974] sm:$0xf0]  ;;  %v7298_v52 = vld [vmem:[%s15455_s1 + $0x780] sm:$0xf]  ;;  %v7483_v59 = vor.u32 %v9823_v48, %v7482_v41 }
  0x7c   :  { %v7546_v49 = vld [vmem:[%s15455_s1 + $0x970] sm:$0xf]  ;;  %839 = vst [vmem:[#allocation1] ss:$9 sm:$0xff] %v23_v46  ;;  %5012 = vmatpush.bf16.msrb.mxu0 %v7115_v32  ;;  %v9777_v53 = vld [vmem:[%s15455_s1 + $0x784] sm:$0xf0] }
  0x7d   :  { %5025 = vmatpush.bf16.msrb.mxu1 %v7179_v37  ;;  %v7610_v60 = vld [vmem:[%s15455_s1 + $0x9f0] sm:$0xf]  ;;  %v9855_v62 = vld [vmem:[%s15455_s1 + $0x9f4] sm:$0xf0]  ;;  %v7547_v0 = vor.u32 %v9839_v51, %v7546_v49  ;;  %v7299_v1 = vor.u32 %v9777_v53, %v7298_v52  ;;  %v7410_v2 = vld [vmem:[%s15455_s1 + $0x860] sm:$0xf] }
  0x7e   :  { %5038 = vmatpush.bf16.msrb.mxu2 %v7243_v38  ;;  %v9805_v3 = vld [vmem:[%s15455_s1 + $0x864] sm:$0xf0]  ;;  %v7474_v4 = vld [vmem:[%s15455_s1 + $0x8e0] sm:$0xf]  ;;  %v7611_v8 = vor.u32 %v9855_v62, %v7610_v60  ;;  %v7402_v18 = vld [vmem:[%s15455_s1 + $0x850] sm:$0xf] }
  0x7f   :  { %5051 = vmatpush.bf16.msrb.mxu3 %v7307_v47  ;;  %v9821_v5 = vld [vmem:[%s15455_s1 + $0x8e4] sm:$0xf0]  ;;  %v7538_v6 = vld [vmem:[%s15455_s1 + $0x960] sm:$0xf]  ;;  %v7411_v9 = vor.u32 %v9805_v3, %v7410_v2  ;;  %v9803_v19 = vld [vmem:[%s15455_s1 + $0x854] sm:$0xf0] }
  0x80   :  { %5013 = vmatpush.bf16.msrb.mxu0 %v7107_v50  ;;  %v9837_v7 = vld [vmem:[%s15455_s1 + $0x964] sm:$0xf0]  ;;  %v7602_v10 = vld [vmem:[%s15455_s1 + $0x9e0] sm:$0xf]  ;;  %v7475_v16 = vor.u32 %v9821_v5, %v7474_v4  ;;  %v7466_v23 = vld [vmem:[%s15455_s1 + $0x8d0] sm:$0xf]  ;;  %v7403_v29 = vor.u32 %v9803_v19, %v7402_v18 }
  0x81   :  { %5026 = vmatpush.bf16.msrb.mxu1 %v7171_v54  ;;  %v9853_v13 = vld [vmem:[%s15455_s1 + $0x9e4] sm:$0xf0]  ;;  %v7539_v17 = vor.u32 %v9837_v7, %v7538_v6  ;;  %v9819_v24 = vld [vmem:[%s15455_s1 + $0x8d4] sm:$0xf0]  ;;  %v7530_v25 = vld [vmem:[%s15455_s1 + $0x950] sm:$0xf] }
  0x82   :  { %5039 = vmatpush.bf16.msrb.mxu2 %v7235_v55  ;;  %v9835_v27 = vld [vmem:[%s15455_s1 + $0x954] sm:$0xf0]  ;;  %v7603_v28 = vor.u32 %v9853_v13, %v7602_v10  ;;  %v7594_v30 = vld [vmem:[%s15455_s1 + $0x9d0] sm:$0xf]  ;;  %v7467_v32 = vor.u32 %v9819_v24, %v7466_v23  ;;  %v7394_v34 = vld [vmem:[%s15455_s1 + $0x840] sm:$0xf] }
  0x83   :  { %5052 = vmatpush.bf16.msrb.mxu3 %v7299_v1  ;;  %5014 = vmatmul.bf16.vlgmr.msrb.gmra.mxu0 %v11226_v42  ;;  %v9851_v31 = vld [vmem:[%s15455_s1 + $0x9d4] sm:$0xf0]  ;;  %v7531_v33 = vor.u32 %v9835_v27, %v7530_v25  ;;  %v9801_v35 = vld [vmem:[%s15455_s1 + $0x844] sm:$0xf0]  ;;  %v7458_v36 = vld [vmem:[%s15455_s1 + $0x8c0] sm:$0xf] }
  0x84   :  { %5058 = vmatpush.bf16.msra.mxu0 %v7419_v56  ;;  %5027 = vmatmul.bf16.vlgmr.msrb.gmra.mxu1 %v11230_v44  ;;  %v9817_v37 = vld [vmem:[%s15455_s1 + $0x8c4] sm:$0xf0]  ;;  %v7522_v38 = vld [vmem:[%s15455_s1 + $0x940] sm:$0xf]  ;;  %v7595_v40 = vor.u32 %v9851_v31, %v7594_v30  ;;  %v7395_v41 = vor.u32 %v9801_v35, %v7394_v34  ;;  %v7386_v50 = vld [vmem:[%s15455_s1 + $0x830] sm:$0xf] }
  0x85   :  { %5071 = vmatpush.bf16.msra.mxu1 %v7483_v59  ;;  %5040 = vmatmul.bf16.vlgmr.msrb.gmra.mxu2 %v11228_v43  ;;  %v9833_v39 = vld [vmem:[%s15455_s1 + $0x944] sm:$0xf0]  ;;  %v7586_v46 = vld [vmem:[%s15455_s1 + $0x9c0] sm:$0xf]  ;;  %v7459_v48 = vor.u32 %v9817_v37, %v7458_v36  ;;  %v9799_v51 = vld [vmem:[%s15455_s1 + $0x834] sm:$0xf0] }
  0x86   :  { %5084 = vmatpush.bf16.msra.mxu2 %v7547_v0  ;;  %5053 = vmatmul.bf16.vlgmr.msrb.gmra.mxu3 %v11232_v45  ;;  %v9849_v47 = vld [vmem:[%s15455_s1 + $0x9c4] sm:$0xf0]  ;;  %v7523_v49 = vor.u32 %v9833_v39, %v7522_v38  ;;  %v7450_v52 = vld [vmem:[%s15455_s1 + $0x8b0] sm:$0xf]  ;;  %v9815_v53 = vld [vmem:[%s15455_s1 + $0x8b4] sm:$0xf0]  ;;  %v7387_v59 = vor.u32 %v9799_v51, %v7386_v50 }
  0x87   :  { %5097 = vmatpush.bf16.msra.mxu3 %v7611_v8  ;;  %v7514_v54 = vld [vmem:[%s15455_s1 + $0x930] sm:$0xf]  ;;  %v9831_v55 = vld [vmem:[%s15455_s1 + $0x934] sm:$0xf0]  ;;  %v7587_v56 = vor.u32 %v9849_v47, %v7586_v46  ;;  %v7451_v0 = vor.u32 %v9815_v53, %v7450_v52  ;;  %v7378_v2 = vld [vmem:[%s15455_s1 + $0x820] sm:$0xf] }
  0x88   :  { %5059 = vmatpush.bf16.msra.mxu0 %v7411_v9  ;;  %v7578_v60 = vld [vmem:[%s15455_s1 + $0x9b0] sm:$0xf]  ;;  %v9847_v62 = vld [vmem:[%s15455_s1 + $0x9b4] sm:$0xf0]  ;;  %v7515_v1 = vor.u32 %v9831_v55, %v7514_v54  ;;  %v9797_v3 = vld [vmem:[%s15455_s1 + $0x824] sm:$0xf0] }
  0x89   :  { %5072 = vmatpush.bf16.msra.mxu1 %v7475_v16  ;;  %v7442_v4 = vld [vmem:[%s15455_s1 + $0x8a0] sm:$0xf]  ;;  %v9813_v5 = vld [vmem:[%s15455_s1 + $0x8a4] sm:$0xf0]  ;;  %v7579_v8 = vor.u32 %v9847_v62, %v7578_v60  ;;  %v7379_v9 = vor.u32 %v9797_v3, %v7378_v2  ;;  %v7370_v18 = vld [vmem:[%s15455_s1 + $0x810] sm:$0xf] }
  0x8a   :  { %5085 = vmatpush.bf16.msra.mxu2 %v7539_v17  ;;  %v7506_v6 = vld [vmem:[%s15455_s1 + $0x920] sm:$0xf]  ;;  %v9829_v7 = vld [vmem:[%s15455_s1 + $0x924] sm:$0xf0]  ;;  %v7443_v16 = vor.u32 %v9813_v5, %v7442_v4  ;;  %v9795_v19 = vld [vmem:[%s15455_s1 + $0x814] sm:$0xf0] }
  0x8b   :  { %5098 = vmatpush.bf16.msra.mxu3 %v7603_v28  ;;  %v7570_v10 = vld [vmem:[%s15455_s1 + $0x9a0] sm:$0xf]  ;;  %v9845_v13 = vld [vmem:[%s15455_s1 + $0x9a4] sm:$0xf0]  ;;  %v7507_v17 = vor.u32 %v9829_v7, %v7506_v6  ;;  %v7434_v23 = vld [vmem:[%s15455_s1 + $0x890] sm:$0xf]  ;;  %v7371_v30 = vor.u32 %v9795_v19, %v7370_v18 }
  0x8c   :  { %5060 = vmatpush.bf16.msra.mxu0 %v7403_v29  ;;  %v9811_v24 = vld [vmem:[%s15455_s1 + $0x894] sm:$0xf0]  ;;  %v7498_v25 = vld [vmem:[%s15455_s1 + $0x910] sm:$0xf]  ;;  %v7571_v28 = vor.u32 %v9845_v13, %v7570_v10  ;;  %v7426_v36 = vld [vmem:[%s15455_s1 + $0x880] sm:$0xf] }
  0x8d   :  { %5073 = vmatpush.bf16.msra.mxu1 %v7467_v32  ;;  %v9827_v27 = vld [vmem:[%s15455_s1 + $0x914] sm:$0xf0]  ;;  %v7562_v29 = vld [vmem:[%s15455_s1 + $0x990] sm:$0xf]  ;;  %v7362_v32 = vld [vmem:[%s15455_s1 + $0x800] sm:$0xf]  ;;  %v7435_v34 = vor.u32 %v9811_v24, %v7434_v23 }
  0x8e   :  { %5086 = vmatpush.bf16.msra.mxu2 %v7531_v33  ;;  %v9843_v31 = vld [vmem:[%s15455_s1 + $0x994] sm:$0xf0]  ;;  %v9793_v33 = vld [vmem:[%s15455_s1 + $0x804] sm:$0xf0]  ;;  %v7499_v35 = vor.u32 %v9827_v27, %v7498_v25  ;;  %v7490_v38 = vld [vmem:[%s15455_s1 + $0x900] sm:$0xf] }
  0x8f   :  { %5099 = vmatpush.bf16.msra.mxu3 %v7595_v40  ;;  %v9809_v37 = vld [vmem:[%s15455_s1 + $0x884] sm:$0xf0]  ;;  %v7674_v40 = vld [vmem:[%s15455_s1 + $0xa70] sm:$0xf]  ;;  %v7563_v46 = vor.u32 %v9843_v31, %v7562_v29  ;;  %v7363_v50 = vor.u32 %v9793_v33, %v7362_v32  ;;  %v9903_v51 = vld [vmem:[%s15455_s1 + $0xb74] sm:$0xf0] }
  0x90   :  { %5061 = vmatpush.bf16.msra.mxu0 %v7395_v41  ;;  %v9825_v39 = vld [vmem:[%s15455_s1 + $0x904] sm:$0xf0]  ;;  %v9871_v41 = vld [vmem:[%s15455_s1 + $0xa74] sm:$0xf0]  ;;  %v7738_v47 = vld [vmem:[%s15455_s1 + $0xaf0] sm:$0xf]  ;;  %v7427_v54 = vor.u32 %v9809_v37, %v7426_v36 }
  0x91   :  { %5074 = vmatpush.bf16.msra.mxu1 %v7459_v48  ;;  %v9887_v48 = vld [vmem:[%s15455_s1 + $0xaf4] sm:$0xf0]  ;;  %v7554_v52 = vld [vmem:[%s15455_s1 + $0x980] sm:$0xf]  ;;  %v9841_v53 = vld [vmem:[%s15455_s1 + $0x984] sm:$0xf0]  ;;  %v7491_v55 = vor.u32 %v9825_v39, %v7490_v38 }
  0x92   :  { %5087 = vmatpush.bf16.msra.mxu2 %v7523_v49  ;;  %v7802_v49 = vld [vmem:[%s15455_s1 + $0xb70] sm:$0xf]  ;;  %v9919_v62 = vld [vmem:[%s15455_s1 + $0xbf4] sm:$0xf0]  ;;  %v7666_v2 = vld [vmem:[%s15455_s1 + $0xa60] sm:$0xf] }
  0x93   :  { %5100 = vmatpush.bf16.msra.mxu3 %v7587_v56  ;;  %v7675_v56 = vor.u32 %v9871_v41, %v7674_v40  ;;  %v7866_v60 = vld [vmem:[%s15455_s1 + $0xbf0] sm:$0xf]  ;;  %v9869_v3 = vld [vmem:[%s15455_s1 + $0xa64] sm:$0xf0]  ;;  %v7730_v4 = vld [vmem:[%s15455_s1 + $0xae0] sm:$0xf] }
  0x94   :  { %5062 = vmatpush.bf16.msra.mxu0 %v7387_v59  ;;  %v7739_v59 = vor.u32 %v9887_v48, %v7738_v47  ;;  %v9885_v5 = vld [vmem:[%s15455_s1 + $0xae4] sm:$0xf0]  ;;  %v7794_v6 = vld [vmem:[%s15455_s1 + $0xb60] sm:$0xf]  ;;  %v7867_v10 = vor.u32 %v9919_v62, %v7866_v60  ;;  %v7658_v25 = vld [vmem:[%s15455_s1 + $0xa50] sm:$0xf] }
  0x95   :  { %5075 = vmatpush.bf16.msra.mxu1 %v7451_v0  ;;  %v7803_v0 = vor.u32 %v9903_v51, %v7802_v49  ;;  %v9901_v7 = vld [vmem:[%s15455_s1 + $0xb64] sm:$0xf0]  ;;  %v7858_v18 = vld [vmem:[%s15455_s1 + $0xbe0] sm:$0xf]  ;;  %v7731_v23 = vor.u32 %v9885_v5, %v7730_v4  ;;  %v9867_v27 = vld [vmem:[%s15455_s1 + $0xa54] sm:$0xf0] }
  0x96   :  { %5088 = vmatpush.bf16.msra.mxu2 %v7515_v1  ;;  %v7555_v1 = vor.u32 %v9841_v53, %v7554_v52  ;;  %v11476_v13 = vld [vmem:[#allocation1 + $0x9] sm:$0xff]  ;;  %v7795_v24 = vor.u32 %v9901_v7, %v7794_v6  ;;  %v9883_v29 = vld [vmem:[%s15455_s1 + $0xad4] sm:$0xf0]  ;;  %v7659_v33 = vor.u32 %v9867_v27, %v7658_v25  ;;  %v7650_v38 = vld [vmem:[%s15455_s1 + $0xa40] sm:$0xf] }
  0x97   :  { %5101 = vmatpush.bf16.msra.mxu3 %v7579_v8  ;;  %v11472_v8 = vld [vmem:[#allocation1] sm:$0xff]  ;;  %v9917_v19 = vld [vmem:[%s15455_s1 + $0xbe4] sm:$0xf0]  ;;  %v9899_v31 = vld [vmem:[%s15455_s1 + $0xb54] sm:$0xf0] }
  0x98   :  { %5063 = vmatpush.bf16.msra.mxu0 %v7379_v9  ;;  %v11474_v9 = vld [vmem:[#allocation1 + $0x12] sm:$0xff]  ;;  %v7859_v32 = vor.u32 %v9917_v19, %v7858_v18  ;;  %v9865_v39 = vld [vmem:[%s15455_s1 + $0xa44] sm:$0xf0]  ;;  %v7714_v40 = vld [vmem:[%s15455_s1 + $0xac0] sm:$0xf] }
  0x99   :  { %5076 = vmatpush.bf16.msra.mxu1 %v7443_v16  ;;  %v11478_v16 = vld [vmem:[#allocation1 + $0x1b] sm:$0xff]  ;;  %v9881_v41 = vld [vmem:[%s15455_s1 + $0xac4] sm:$0xf0]  ;;  %v7651_v49 = vor.u32 %v9865_v39, %v7650_v38  ;;  %v7770_v60 = vld [vmem:[%s15455_s1 + $0xb30] sm:$0xf] }
  0x9a   :  { %5089 = vmatpush.bf16.msra.mxu2 %v7507_v17  ;;  %v7667_v17 = vor.u32 %v9869_v3, %v7666_v2  ;;  %v9897_v47 = vld [vmem:[%s15455_s1 + $0xb44] sm:$0xf0]  ;;  %v7715_v52 = vor.u32 %v9881_v41, %v7714_v40  ;;  %v9895_v62 = vld [vmem:[%s15455_s1 + $0xb34] sm:$0xf0]  ;;  %v7834_v3 = vld [vmem:[%s15455_s1 + $0xbb0] sm:$0xf] }
  0x9b   :  { %5102 = vmatpush.bf16.msra.mxu3 %v7571_v28  ;;  %v7722_v28 = vld [vmem:[%s15455_s1 + $0xad0] sm:$0xf]  ;;  %v9913_v51 = vld [vmem:[%s15455_s1 + $0xbc4] sm:$0xf0]  ;;  %v9911_v4 = vld [vmem:[%s15455_s1 + $0xbb4] sm:$0xf0]  ;;  %v7771_v7 = vor.u32 %v9895_v62, %v7770_v60 }
  0x9c   :  { %5064 = vmatpush.bf16.msra.mxu0 %v7371_v30  ;;  %v7786_v30 = vld [vmem:[%s15455_s1 + $0xb50] sm:$0xf]  ;;  %v7723_v36 = vor.u32 %v9883_v29, %v7722_v28  ;;  %v7634_v5 = vld [vmem:[%s15455_s1 + $0xa20] sm:$0xf]  ;;  %v9877_v18 = vld [vmem:[%s15455_s1 + $0xaa4] sm:$0xf0]  ;;  %v7835_v25 = vor.u32 %v9911_v4, %v7834_v3 }
  0x9d   :  { %5077 = vmatpush.bf16.msra.mxu1 %v7435_v34  ;;  %v7850_v34 = vld [vmem:[%s15455_s1 + $0xbd0] sm:$0xf]  ;;  %v7787_v37 = vor.u32 %v9899_v31, %v7786_v30  ;;  %v7762_v19 = vld [vmem:[%s15455_s1 + $0xb20] sm:$0xf]  ;;  %v9909_v29 = vld [vmem:[%s15455_s1 + $0xba4] sm:$0xf0] }
  0x9e   :  { %5090 = vmatpush.bf16.msra.mxu2 %v7499_v35  ;;  %v9915_v35 = vld [vmem:[%s15455_s1 + $0xbd4] sm:$0xf0]  ;;  %v7826_v28 = vld [vmem:[%s15455_s1 + $0xba0] sm:$0xf]  ;;  %v7626_v30 = vld [vmem:[%s15455_s1 + $0xa10] sm:$0xf] }
  0x9f   :  { %5103 = vmatpush.bf16.msra.mxu3 %v7563_v46  ;;  %v7778_v46 = vld [vmem:[%s15455_s1 + $0xb40] sm:$0xf]  ;;  %v7851_v48 = vor.u32 %v9915_v35, %v7850_v34  ;;  %v7690_v34 = vld [vmem:[%s15455_s1 + $0xa90] sm:$0xf]  ;;  %v9875_v35 = vld [vmem:[%s15455_s1 + $0xa94] sm:$0xf0]  ;;  %v7827_v41 = vor.u32 %v9909_v29, %v7826_v28 }
  0xa0   :  { %5065 = vmatpush.bf16.msra.mxu0 %v7363_v50  ;;  %v7842_v50 = vld [vmem:[%s15455_s1 + $0xbc0] sm:$0xf]  ;;  %v7779_v53 = vor.u32 %v9897_v47, %v7778_v46  ;;  %v9891_v38 = vld [vmem:[%s15455_s1 + $0xb14] sm:$0xf0]  ;;  %v7818_v39 = vld [vmem:[%s15455_s1 + $0xb90] sm:$0xf] }
  0xa1   :  { %5078 = vmatpush.bf16.msra.mxu1 %v7427_v54  ;;  %v7642_v54 = vld [vmem:[%s15455_s1 + $0xa30] sm:$0xf]  ;;  %v9907_v46 = vld [vmem:[%s15455_s1 + $0xb94] sm:$0xf0]  ;;  %v7618_v47 = vld [vmem:[%s15455_s1 + $0xa00] sm:$0xf] }
  0xa2   :  { %5091 = vmatpush.bf16.msra.mxu2 %v7491_v55  ;;  %v9863_v55 = vld [vmem:[%s15455_s1 + $0xa34] sm:$0xf0]  ;;  %v7930_v60 = vld [vmem:[%s15455_s1 + $0xc70] sm:$0xf]  ;;  %v11646_v4 = vld [vmem:[#allocation1 + $0x3f] sm:$0xff] }
  0xa3   :  { %5104 = vmatpush.bf16.msra.mxu3 %v7555_v1  ;;  %5066 = vmatmul.bf16.vlgmr.msra.gmra.mxu0 %v11472_v8  ;;  %v812_v1 = vld [vmem:[%s15456_s2] sm:$0x3]  ;;  %v7643_v2 = vor.u32 %v9863_v55, %v7642_v54  ;;  %v9889_v54 = vld [vmem:[%s15455_s1 + $0xb04] sm:$0xf0]  ;;  %v9935_v62 = vld [vmem:[%s15455_s1 + $0xc74] sm:$0xf0] }
  0xa4   :  { %5110 = vmatpush.bf16.msrb.mxu0 %v7675_v56  ;;  %5079 = vmatmul.bf16.vlgmr.msra.gmra.mxu1 %v11476_v13  ;;  %v7706_v56 = vld [vmem:[%s15455_s1 + $0xab0] sm:$0xf] }
  0xa5   :  { %5123 = vmatpush.bf16.msrb.mxu1 %v7739_v59  ;;  %5092 = vmatmul.bf16.vlgmr.msra.gmra.mxu2 %v11474_v9  ;;  %v9879_v59 = vld [vmem:[%s15455_s1 + $0xab4] sm:$0xf0]  ;;  %v11644_v3 = vld [vmem:[#allocation1 + $0x2d] sm:$0xff] }
  0xa6   :  { %5136 = vmatpush.bf16.msrb.mxu2 %v7803_v0  ;;  %5105 = vmatmul.bf16.vlgmr.msra.gmra.mxu3 %v11478_v16  ;;  %v7843_v0 = vor.u32 %v9913_v51, %v7842_v50  ;;  %v7707_v6 = vor.u32 %v9879_v59, %v7706_v56  ;;  %v7682_v51 = vld [vmem:[%s15455_s1 + $0xa80] sm:$0xf]  ;;  %v7691_v56 = vor.u32 %v9875_v35, %v7690_v34  ;;  %v8122_v34 = vld [vmem:[%s15455_s1 + $0xdf0] sm:$0xf]  ;;  %v9983_v35 = vld [vmem:[%s15455_s1 + $0xdf4] sm:$0xf0] }
  0xa7   :  { %5149 = vmatpush.bf16.msrb.mxu3 %v7867_v10  ;;  %v9861_v10 = vld [vmem:[%s15455_s1 + $0xa24] sm:$0xf0] }
  0xa8   :  { %5111 = vmatpush.bf16.msrb.mxu0 %v7667_v17  ;;  %v7698_v17 = vld [vmem:[%s15455_s1 + $0xaa0] sm:$0xf]  ;;  %v7635_v27 = vor.u32 %v9861_v10, %v7634_v5  ;;  %v9951_v10 = vld [vmem:[%s15455_s1 + $0xcf4] sm:$0xf0] }
  0xa9   :  { %5124 = vmatpush.bf16.msrb.mxu1 %v7731_v23  ;;  %v9893_v23 = vld [vmem:[%s15455_s1 + $0xb24] sm:$0xf0]  ;;  %v7699_v31 = vor.u32 %v9877_v18, %v7698_v17  ;;  %v8058_v17 = vld [vmem:[%s15455_s1 + $0xd70] sm:$0xf] }
  0xaa   :  { %5137 = vmatpush.bf16.msrb.mxu2 %v7795_v24  ;;  %v814_v24 = vperm.slane %v812_v1, 0  ;;  %v11640_v1 = vld [vmem:[#allocation1 + $0x24] sm:$0xff]  ;;  %v4885_v5 = vpop.f32.mrf.mxu2 }
  0xab   :  { %5150 = vmatpush.bf16.msrb.mxu3 %v7859_v32  ;;  %v7763_v32 = vor.u32 %v9893_v23, %v7762_v19  ;;  %v4898_v19 = vpop.f32.mrf.mxu3 }
  0xac   :  { %5112 = vmatpush.bf16.msrb.mxu0 %v7659_v33  ;;  %v9859_v33 = vld [vmem:[%s15455_s1 + $0xa14] sm:$0xf0] }
  0xad   :  { %5125 = vmatpush.bf16.msrb.mxu1 %v7723_v36  ;;  %v4859_v36 = vpop.f32.mrf.mxu0  ;;  %v7627_v50 = vor.u32 %v9859_v33, %v7626_v30 }
  0xae   :  { %5138 = vmatpush.bf16.msrb.mxu2 %v7787_v37  ;;  %v7754_v37 = vld [vmem:[%s15455_s1 + $0xb10] sm:$0xf]  ;;  %v4860_v40 = vadd.f32 %v4859_v36, %v814_v24  ;;  %v9967_v24 = vld [vmem:[%s15455_s1 + $0xd74] sm:$0xf0] }
  0xaf   :  { %5151 = vmatpush.bf16.msrb.mxu3 %v7851_v48  ;;  %v9857_v48 = vld [vmem:[%s15455_s1 + $0xa04] sm:$0xf0]  ;;  %v7755_v59 = vor.u32 %v9891_v38, %v7754_v37  ;;  %v8059_v36 = vor.u32 %v9967_v24, %v8058_v17  ;;  %v7922_v38 = vld [vmem:[%s15455_s1 + $0xc60] sm:$0xf]  ;;  %v8106_v17 = vld [vmem:[%s15455_s1 + $0xdd0] sm:$0xf] }
  0xb0   :  { %5113 = vmatpush.bf16.msrb.mxu0 %v7651_v49  ;;  %v4872_v49 = vpop.f32.mrf.mxu1  ;;  %v7619_v23 = vor.u32 %v9857_v48, %v7618_v47  ;;  %v8050_v47 = vld [vmem:[%s15455_s1 + $0xd60] sm:$0xf]  ;;  %v9965_v48 = vld [vmem:[%s15455_s1 + $0xd64] sm:$0xf0] }
  0xb1   :  { %5126 = vmatpush.bf16.msrb.mxu1 %v7715_v52  ;;  %v9873_v52 = vld [vmem:[%s15455_s1 + $0xa84] sm:$0xf0]  ;;  %v4873_v55 = vadd.f32 %v4872_v49, %v4860_v40  ;;  %v7986_v40 = vld [vmem:[%s15455_s1 + $0xce0] sm:$0xf]  ;;  %v8123_v49 = vor.u32 %v9983_v35, %v8122_v34 }
  0xb2   :  { %5139 = vmatpush.bf16.msrb.mxu2 %v7779_v53  ;;  %v7746_v53 = vld [vmem:[%s15455_s1 + $0xb00] sm:$0xf]  ;;  %v7683_v28 = vor.u32 %v9873_v52, %v7682_v51  ;;  %v9981_v52 = vld [vmem:[%s15455_s1 + $0xde4] sm:$0xf0] }
  0xb3   :  { %5152 = vmatpush.bf16.msrb.mxu3 %v7843_v0  ;;  %v7994_v0 = vld [vmem:[%s15455_s1 + $0xcf0] sm:$0xf]  ;;  %v4886_v18 = vadd.f32 %v4885_v5, %v4873_v55  ;;  %v7747_v29 = vor.u32 %v9889_v54, %v7746_v53  ;;  %v8114_v51 = vld [vmem:[%s15455_s1 + $0xde0] sm:$0xf]  ;;  %v4887_v53 = vpop.f32.mrf.mxu2  ;;  %v8051_v55 = vor.u32 %v9965_v48, %v8050_v47 }
  0xb4   :  { %5114 = vmatpush.bf16.msrb.mxu0 %v7643_v2  ;;  %v11642_v2 = vld [vmem:[#allocation1 + $0x36] sm:$0xff]  ;;  %v7995_v33 = vor.u32 %v9951_v10, %v7994_v0  ;;  %v8042_v5 = vld [vmem:[%s15455_s1 + $0xd50] sm:$0xf]  ;;  %v7906_v24 = vld [vmem:[%s15455_s1 + $0xc40] sm:$0xf] }
  0xb5   :  { %5127 = vmatpush.bf16.msrb.mxu1 %v7707_v6  ;;  %v24_v6 = vld [vmem:[%s15454_s0 + $0x18] sm:$0xff]  ;;  %v11666_v30 = vadd.f32 %v4898_v19, %v4886_v18  ;;  %v8098_v35 = vld [vmem:[%s15455_s1 + $0xdc0] sm:$0xf]  ;;  %v8026_v48 = vld [vmem:[%s15455_s1 + $0xd30] sm:$0xf] }
  0xb6   :  { %5140 = vmatpush.bf16.msrb.mxu2 %v7771_v7  ;;  %v7819_v7 = vor.u32 %v9907_v46, %v7818_v39  ;;  %849 = vst [vmem:[#allocation1] ss:$9 sm:$0xff] %v24_v6  ;;  %v9933_v39 = vld [vmem:[%s15455_s1 + $0xc64] sm:$0xf0]  ;;  %v9947_v0 = vld [vmem:[%s15455_s1 + $0xcd4] sm:$0xf0] }
  0xb7   :  { %5153 = vmatpush.bf16.msrb.mxu3 %v7835_v25  ;;  %v7810_v25 = vld [vmem:[%s15455_s1 + $0xb80] sm:$0xf]  ;;  %v9949_v46 = vld [vmem:[%s15455_s1 + $0xce4] sm:$0xf0]  ;;  %v9963_v6 = vld [vmem:[%s15455_s1 + $0xd54] sm:$0xf0] }
  0xb8   :  { %5115 = vmatpush.bf16.msrb.mxu0 %v7635_v27  ;;  %v9905_v27 = vld [vmem:[%s15455_s1 + $0xb84] sm:$0xf0]  ;;  %v7987_v54 = vor.u32 %v9949_v46, %v7986_v40  ;;  %v9979_v18 = vld [vmem:[%s15455_s1 + $0xdd4] sm:$0xf0]  ;;  %v7898_v40 = vld [vmem:[%s15455_s1 + $0xc30] sm:$0xf] }
  0xb9   :  { %5128 = vmatpush.bf16.msrb.mxu1 %v7699_v31  ;;  %v4861_v31 = vpop.f32.mrf.mxu0  ;;  %v7811_v37 = vor.u32 %v9905_v27, %v7810_v25  ;;  %v9929_v25 = vld [vmem:[%s15455_s1 + $0xc44] sm:$0xf0]  ;;  %v7970_v27 = vld [vmem:[%s15455_s1 + $0xcc0] sm:$0xf]  ;;  %v7962_v46 = vld [vmem:[%s15455_s1 + $0xcb0] sm:$0xf] }
  0xba   :  { %5141 = vmatpush.bf16.msrb.mxu2 %v7763_v32  ;;  %v7931_v32 = vor.u32 %v9935_v62, %v7930_v60  ;;  %v7978_v60 = vld [vmem:[%s15455_s1 + $0xcd0] sm:$0xf]  ;;  %v4900_v62 = vpop.f32.mrf.mxu3  ;;  %v9961_v31 = vld [vmem:[%s15455_s1 + $0xd44] sm:$0xf0]  ;;  %v7907_v34 = vor.u32 %v9929_v25, %v7906_v24 }
  0xbb   :  { %5154 = vmatpush.bf16.msrb.mxu3 %v7827_v41  ;;  %v4874_v41 = vpop.f32.mrf.mxu1  ;;  %v7979_v19 = vor.u32 %v9947_v0, %v7978_v60  ;;  %v8090_v53 = vld [vmem:[%s15455_s1 + $0xdb0] sm:$0xf]  ;;  %v9925_v60 = vld [vmem:[%s15455_s1 + $0xc24] sm:$0xf0]  ;;  %v7954_v62 = vld [vmem:[%s15455_s1 + $0xca0] sm:$0xf] }
  0xbc   :  { %5116 = vmatpush.bf16.msrb.mxu0 %v7627_v50  ;;  %v7923_v50 = vor.u32 %v9933_v39, %v7922_v38  ;;  %v9927_v41 = vld [vmem:[%s15455_s1 + $0xc34] sm:$0xf0]  ;;  %v9941_v0 = vld [vmem:[%s15455_s1 + $0xca4] sm:$0xf0] }
  0xbd   :  { %5129 = vmatpush.bf16.msrb.mxu1 %v7691_v56  ;;  %v7914_v56 = vld [vmem:[%s15455_s1 + $0xc50] sm:$0xf]  ;;  %v9973_v24 = vld [vmem:[%s15455_s1 + $0xda4] sm:$0xf0]  ;;  %v7955_v25 = vor.u32 %v9941_v0, %v7954_v62 }
  0xbe   :  { %5142 = vmatpush.bf16.msrb.mxu2 %v7755_v59  ;;  %v9931_v59 = vld [vmem:[%s15455_s1 + $0xc54] sm:$0xf0]  ;;  %v8314_v62 = vld [vmem:[%s15455_s1 + $0xf70] sm:$0xf] }
  0xbf   :  { %5155 = vmatpush.bf16.msrb.mxu3 %v7819_v7  ;;  %v8115_v7 = vor.u32 %v9981_v52, %v8114_v51  ;;  %v7915_v10 = vor.u32 %v9931_v59, %v7914_v56  ;;  %v7899_v52 = vor.u32 %v9927_v41, %v7898_v40  ;;  %v7890_v59 = vld [vmem:[%s15455_s1 + $0xc20] sm:$0xf]  ;;  %v9971_v41 = vld [vmem:[%s15455_s1 + $0xd94] sm:$0xf0] }
  0xc0   :  { %5117 = vmatpush.bf16.msrb.mxu0 %v7619_v23  ;;  %v8043_v23 = vor.u32 %v9963_v6, %v8042_v5  ;;  %v8018_v5 = vld [vmem:[%s15455_s1 + $0xd20] sm:$0xf]  ;;  %v9957_v6 = vld [vmem:[%s15455_s1 + $0xd24] sm:$0xf0] }
  0xc1   :  { %5130 = vmatpush.bf16.msrb.mxu1 %v7683_v28  ;;  %v9945_v28 = vld [vmem:[%s15455_s1 + $0xcc4] sm:$0xf0] }
  0xc2   :  { %5143 = vmatpush.bf16.msrb.mxu2 %v7747_v29  ;;  %v8034_v29 = vld [vmem:[%s15455_s1 + $0xd40] sm:$0xf]  ;;  %v7971_v38 = vor.u32 %v9945_v28, %v7970_v27  ;;  %v8019_v27 = vor.u32 %v9957_v6, %v8018_v5  ;;  %v10031_v5 = vld [vmem:[%s15455_s1 + $0xf74] sm:$0xf0] }
  0xc3   :  { %5156 = vmatpush.bf16.msrb.mxu3 %v7811_v37  ;;  %5118 = vmatmul.bf16.vlgmr.msrb.gmra.mxu0 %v11640_v1  ;;  %v8035_v39 = vor.u32 %v9961_v31, %v8034_v29  ;;  %v4924_v47 = vpop.f32.mrf.mxu1  ;;  %v7882_v29 = vld [vmem:[%s15455_s1 + $0xc10] sm:$0xf]  ;;  %v9923_v31 = vld [vmem:[%s15455_s1 + $0xc14] sm:$0xf0]  ;;  %v8066_v6 = vld [vmem:[%s15455_s1 + $0xd80] sm:$0xf] }
  0xc4   :  { %5162 = vmatpush.bf16.msra.mxu0 %v7931_v32  ;;  %5131 = vmatmul.bf16.vlgmr.msrb.gmra.mxu1 %v11644_v3  ;;  %v8107_v32 = vor.u32 %v9979_v18, %v8106_v17  ;;  %v7883_v40 = vor.u32 %v9923_v31, %v7882_v29  ;;  %v8178_v29 = vld [vmem:[%s15455_s1 + $0xe60] sm:$0xf]  ;;  %v9997_v31 = vld [vmem:[%s15455_s1 + $0xe64] sm:$0xf0] }
  0xc5   :  { %5175 = vmatpush.bf16.msra.mxu1 %v7995_v33  ;;  %5144 = vmatmul.bf16.vlgmr.msrb.gmra.mxu2 %v11642_v2  ;;  %v4911_v33 = vpop.f32.mrf.mxu0 }
  0xc6   :  { %5188 = vmatpush.bf16.msra.mxu2 %v8059_v36  ;;  %5157 = vmatmul.bf16.vlgmr.msrb.gmra.mxu3 %v11646_v4  ;;  %v9977_v36 = vld [vmem:[%s15455_s1 + $0xdc4] sm:$0xf0]  ;;  %v4912_v37 = vadd.f32 %v4911_v33, %v11666_v30  ;;  %v9943_v30 = vld [vmem:[%s15455_s1 + $0xcb4] sm:$0xf0] }
  0xc7   :  { %5201 = vmatpush.bf16.msra.mxu3 %v8123_v49  ;;  %v9959_v49 = vld [vmem:[%s15455_s1 + $0xd34] sm:$0xf0]  ;;  %v8099_v51 = vor.u32 %v9977_v36, %v8098_v35  ;;  %v8010_v36 = vld [vmem:[%s15455_s1 + $0xd10] sm:$0xf] }
  0xc8   :  { %5163 = vmatpush.bf16.msra.mxu0 %v7923_v50  ;;  %v4925_v50 = vadd.f32 %v4924_v47, %v4912_v37  ;;  %v8027_v56 = vor.u32 %v9959_v49, %v8026_v48  ;;  %v9939_v35 = vld [vmem:[%s15455_s1 + $0xc94] sm:$0xf0]  ;;  %v9921_v47 = vld [vmem:[%s15455_s1 + $0xc04] sm:$0xf0]  ;;  %v7938_v49 = vld [vmem:[%s15455_s1 + $0xc80] sm:$0xf] }
  0xc9   :  { %5176 = vmatpush.bf16.msra.mxu1 %v7987_v54  ;;  %v9975_v54 = vld [vmem:[%s15455_s1 + $0xdb4] sm:$0xf0]  ;;  %v4950_v28 = vpop.f32.mrf.mxu3 }
  0xca   :  { %5189 = vmatpush.bf16.msra.mxu2 %v8051_v55  ;;  %v7963_v55 = vor.u32 %v9943_v30, %v7962_v46  ;;  %v9955_v37 = vld [vmem:[%s15455_s1 + $0xd14] sm:$0xf0]  ;;  %v7874_v46 = vld [vmem:[%s15455_s1 + $0xc00] sm:$0xf] }
  0xcb   :  { %5202 = vmatpush.bf16.msra.mxu3 %v8115_v7  ;;  %v4937_v7 = vpop.f32.mrf.mxu2  ;;  %v4926_v33 = vpop.f32.mrf.mxu1  ;;  %v8011_v48 = vor.u32 %v9955_v37, %v8010_v36  ;;  %v7875_v0 = vor.u32 %v9921_v47, %v7874_v46  ;;  %v10029_v36 = vld [vmem:[%s15455_s1 + $0xf64] sm:$0xf0]  ;;  %v11891_v37 = vld [vmem:[#allocation1] sm:$0xff]  ;;  %v8179_v46 = vor.u32 %v9997_v31, %v8178_v29 }
  0xcc   :  { %5164 = vmatpush.bf16.msra.mxu0 %v7915_v10  ;;  %v8091_v10 = vor.u32 %v9975_v54, %v8090_v53  ;;  %v4938_v17 = vadd.f32 %v4937_v7, %v4925_v50  ;;  %v9937_v50 = vld [vmem:[%s15455_s1 + $0xc84] sm:$0xf0]  ;;  %v8186_v53 = vld [vmem:[%s15455_s1 + $0xe70] sm:$0xf]  ;;  %v9999_v54 = vld [vmem:[%s15455_s1 + $0xe74] sm:$0xf0] }
  0xcd   :  { %5177 = vmatpush.bf16.msra.mxu1 %v7979_v19  ;;  %v4913_v18 = vpop.f32.mrf.mxu0  ;;  %v7891_v19 = vor.u32 %v9925_v60, %v7890_v59  ;;  %v8250_v59 = vld [vmem:[%s15455_s1 + $0xef0] sm:$0xf]  ;;  %v10015_v60 = vld [vmem:[%s15455_s1 + $0xef4] sm:$0xf0]  ;;  %v9969_v7 = vld [vmem:[%s15455_s1 + $0xd84] sm:$0xf0] }
  0xce   :  { %5190 = vmatpush.bf16.msra.mxu2 %v8043_v23  ;;  %v8082_v23 = vld [vmem:[%s15455_s1 + $0xda0] sm:$0xf]  ;;  %v10013_v33 = vld [vmem:[%s15455_s1 + $0xee4] sm:$0xf0] }
  0xcf   :  { %5203 = vmatpush.bf16.msra.mxu3 %v8107_v32  ;;  %v7946_v32 = vld [vmem:[%s15455_s1 + $0xc90] sm:$0xf]  ;;  %v8370_v47 = vld [vmem:[%s15455_s1 + $0xfe0] sm:$0xf]  ;;  %v10041_v31 = vld [vmem:[%s15455_s1 + $0xfc4] sm:$0xf0] }
  0xd0   :  { %5165 = vmatpush.bf16.msra.mxu0 %v7907_v34  ;;  %v11808_v34 = vadd.f32 %v4950_v28, %v4938_v17  ;;  %v7947_v30 = vor.u32 %v9939_v35, %v7946_v32  ;;  %v8067_v28 = vor.u32 %v9969_v7, %v8066_v6  ;;  %v8242_v32 = vld [vmem:[%s15455_s1 + $0xee0] sm:$0xf]  ;;  %v9993_v7 = vld [vmem:[%s15455_s1 + $0xe44] sm:$0xf0] }
  0xd1   :  { %5178 = vmatpush.bf16.msra.mxu1 %v7971_v38  ;;  %v8083_v38 = vor.u32 %v9973_v24, %v8082_v23  ;;  %v4952_v18 = vpop.f32.mrf.mxu3  ;;  %v8251_v23 = vor.u32 %v10015_v60, %v8250_v59  ;;  %v8378_v24 = vld [vmem:[%s15455_s1 + $0xff0] sm:$0xf]  ;;  %v8306_v35 = vld [vmem:[%s15455_s1 + $0xf60] sm:$0xf] }
  0xd2   :  { %5191 = vmatpush.bf16.msra.mxu2 %v8035_v39  ;;  %v8074_v39 = vld [vmem:[%s15455_s1 + $0xd90] sm:$0xf]  ;;  %v8162_v6 = vld [vmem:[%s15455_s1 + $0xe40] sm:$0xf] }
  0xd3   :  { %5204 = vmatpush.bf16.msra.mxu3 %v8099_v51  ;;  %v8002_v51 = vld [vmem:[%s15455_s1 + $0xd00] sm:$0xf]  ;;  %v8362_v60 = vld [vmem:[%s15455_s1 + $0xfd0] sm:$0xf] }
  0xd4   :  { %5166 = vmatpush.bf16.msra.mxu0 %v7899_v52  ;;  %v9953_v52 = vld [vmem:[%s15455_s1 + $0xd04] sm:$0xf0]  ;;  %v8290_v18 = vld [vmem:[%s15455_s1 + $0xf40] sm:$0xf] }
  0xd5   :  { %5179 = vmatpush.bf16.msra.mxu1 %v7963_v55  ;;  %v4939_v55 = vpop.f32.mrf.mxu2  ;;  %v8003_v17 = vor.u32 %v9953_v52, %v8002_v51  ;;  %v9995_v51 = vld [vmem:[%s15455_s1 + $0xe54] sm:$0xf0]  ;;  %v8234_v52 = vld [vmem:[%s15455_s1 + $0xed0] sm:$0xf]  ;;  %v8354_v29 = vld [vmem:[%s15455_s1 + $0xfc0] sm:$0xf] }
  0xd6   :  { %5192 = vmatpush.bf16.msra.mxu2 %v8027_v56  ;;  %v8075_v56 = vor.u32 %v9971_v41, %v8074_v39  ;;  %v11897_v41 = vld [vmem:[#allocation1 + $0x1b] sm:$0xff] }
  0xd7   :  { %5205 = vmatpush.bf16.msra.mxu3 %v8091_v10  ;;  %v7939_v10 = vor.u32 %v9937_v50, %v7938_v49  ;;  %v8307_v49 = vor.u32 %v10029_v36, %v8306_v35  ;;  %v8170_v50 = vld [vmem:[%s15455_s1 + $0xe50] sm:$0xf]  ;;  %v10027_v55 = vld [vmem:[%s15455_s1 + $0xf54] sm:$0xf0] }
  0xd8   :  { %5167 = vmatpush.bf16.msra.mxu0 %v7891_v19  ;;  %v8187_v19 = vor.u32 %v9999_v54, %v8186_v53  ;;  %v10011_v53 = vld [vmem:[%s15455_s1 + $0xed4] sm:$0xf0]  ;;  %v8298_v54 = vld [vmem:[%s15455_s1 + $0xf50] sm:$0xf]  ;;  %v8171_v59 = vor.u32 %v9995_v51, %v8170_v50 }
  0xd9   :  { %5180 = vmatpush.bf16.msra.mxu1 %v7955_v25  ;;  %v10047_v25 = vld [vmem:[%s15455_s1 + $0xff4] sm:$0xf0]  ;;  %v8154_v35 = vld [vmem:[%s15455_s1 + $0xe30] sm:$0xf] }
  0xda   :  { %5193 = vmatpush.bf16.msra.mxu2 %v8019_v27  ;;  %v8315_v27 = vor.u32 %v10031_v5, %v8314_v62  ;;  %v8379_v39 = vor.u32 %v10047_v25, %v8378_v24  ;;  %v10043_v62 = vld [vmem:[%s15455_s1 + $0xfd4] sm:$0xf0]  ;;  %v8299_v5 = vor.u32 %v10027_v55, %v8298_v54  ;;  %v8218_v36 = vld [vmem:[%s15455_s1 + $0xeb0] sm:$0xf]  ;;  %v8146_v55 = vld [vmem:[%s15455_s1 + $0xe20] sm:$0xf] }
  0xdb   :  { %5206 = vmatpush.bf16.msra.mxu3 %v8083_v38  ;;  %v11893_v38 = vld [vmem:[#allocation1 + $0x12] sm:$0xff] }
  0xdc   :  { %5168 = vmatpush.bf16.msra.mxu0 %v7883_v40  ;;  %v11895_v40 = vld [vmem:[#allocation1 + $0x9] sm:$0xff]  ;;  %v10039_v51 = vld [vmem:[%s15455_s1 + $0xfb4] sm:$0xf0] }
  0xdd   :  { %5181 = vmatpush.bf16.msra.mxu1 %v7947_v30  ;;  %v10045_v30 = vld [vmem:[%s15455_s1 + $0xfe4] sm:$0xf0]  ;;  %v8346_v50 = vld [vmem:[%s15455_s1 + $0xfb0] sm:$0xf] }
  0xde   :  { %5194 = vmatpush.bf16.msra.mxu2 %v8011_v48  ;;  %v8243_v48 = vor.u32 %v10013_v33, %v8242_v32 }
  0xdf   :  { %5207 = vmatpush.bf16.msra.mxu3 %v8075_v56  ;;  %v8371_v56 = vor.u32 %v10045_v30, %v8370_v47  ;;  %v8282_v47 = vld [vmem:[%s15455_s1 + $0xf30] sm:$0xf]  ;;  %v10023_v30 = vld [vmem:[%s15455_s1 + $0xf34] sm:$0xf0] }
  0xe0   :  { %5169 = vmatpush.bf16.msra.mxu0 %v7875_v0  ;;  %v8235_v0 = vor.u32 %v10011_v53, %v8234_v52  ;;  %v4963_v24 = vpop.f32.mrf.mxu0  ;;  %v8283_v53 = vor.u32 %v10023_v30, %v8282_v47  ;;  %v9985_v47 = vld [vmem:[%s15455_s1 + $0xe04] sm:$0xf0] }
  0xe1   :  { %5182 = vmatpush.bf16.msra.mxu1 %v7939_v10  ;;  %v8226_v10 = vld [vmem:[%s15455_s1 + $0xec0] sm:$0xf]  ;;  %v4964_v25 = vadd.f32 %v4963_v24, %v11808_v34  ;;  %v9991_v34 = vld [vmem:[%s15455_s1 + $0xe34] sm:$0xf0]  ;;  %v8138_v24 = vld [vmem:[%s15455_s1 + $0xe10] sm:$0xf] }
  0xe2   :  { %5195 = vmatpush.bf16.msra.mxu2 %v8003_v17  ;;  %v10009_v17 = vld [vmem:[%s15455_s1 + $0xec4] sm:$0xf0] }
  0xe3   :  { %5208 = vmatpush.bf16.msra.mxu3 %v8067_v28  ;;  %5170 = vmatmul.bf16.vlgmr.msra.gmra.mxu0 %v11891_v37  ;;  %v4976_v28 = vpop.f32.mrf.mxu1  ;;  %v8227_v32 = vor.u32 %v10009_v17, %v8226_v10 }
  0xe4   :  { %5214 = vmatpush.bf16.msrb.mxu0 %v8187_v19  ;;  %5183 = vmatmul.bf16.vlgmr.msra.gmra.mxu1 %v11895_v40  ;;  %v10025_v19 = vld [vmem:[%s15455_s1 + $0xf44] sm:$0xf0] }
  0xe5   :  { %5227 = vmatpush.bf16.msrb.mxu1 %v8251_v23  ;;  %5196 = vmatmul.bf16.vlgmr.msra.gmra.mxu2 %v11893_v38  ;;  %v8363_v23 = vor.u32 %v10043_v62, %v8362_v60  ;;  %v8291_v33 = vor.u32 %v10025_v19, %v8290_v18  ;;  %v10005_v62 = vld [vmem:[%s15455_s1 + $0xea4] sm:$0xf0]  ;;  %v8338_v19 = vld [vmem:[%s15455_s1 + $0xfa0] sm:$0xf] }
  0xe6   :  { %5240 = vmatpush.bf16.msrb.mxu2 %v8315_v27  ;;  %5209 = vmatmul.bf16.vlgmr.msra.gmra.mxu3 %v11897_v41  ;;  %v8163_v27 = vor.u32 %v9993_v7, %v8162_v6  ;;  %v8347_v6 = vor.u32 %v10039_v51, %v8346_v50  ;;  %v8258_v50 = vld [vmem:[%s15455_s1 + $0xf00] sm:$0xf]  ;;  %v10017_v51 = vld [vmem:[%s15455_s1 + $0xf04] sm:$0xf0] }
  0xe7   :  { %5253 = vmatpush.bf16.msrb.mxu3 %v8379_v39  ;;  %v4977_v39 = vadd.f32 %v4976_v28, %v4964_v25 }
  0xe8   :  { %5215 = vmatpush.bf16.msrb.mxu0 %v8179_v46  ;;  %v10007_v46 = vld [vmem:[%s15455_s1 + $0xeb4] sm:$0xf0]  ;;  %v4989_v54 = vpop.f32.mrf.mxu2  ;;  %v4965_v10 = vpop.f32.mrf.mxu0 }
  0xe9   :  { %5228 = vmatpush.bf16.msrb.mxu1 %v8243_v48  ;;  %v8355_v48 = vor.u32 %v10041_v31, %v8354_v29  ;;  %v8219_v52 = vor.u32 %v10007_v46, %v8218_v36  ;;  %v4990_v60 = vadd.f32 %v4989_v54, %v4977_v39  ;;  %v5002_v7 = vpop.f32.mrf.mxu3  ;;  %v9987_v29 = vld [vmem:[%s15455_s1 + $0xe14] sm:$0xf0]  ;;  %v8202_v31 = vld [vmem:[%s15455_s1 + $0xe90] sm:$0xf]  ;;  %v8130_v46 = vld [vmem:[%s15455_s1 + $0xe00] sm:$0xf] }
  0xea   :  { %5241 = vmatpush.bf16.msrb.mxu2 %v8307_v49  ;;  %v8155_v49 = vor.u32 %v9991_v34, %v8154_v35  ;;  %v10019_v35 = vld [vmem:[%s15455_s1 + $0xf14] sm:$0xf0]  ;;  %v8330_v34 = vld [vmem:[%s15455_s1 + $0xf90] sm:$0xf]  ;;  %v8139_v30 = vor.u32 %v9987_v29, %v8138_v24  ;;  %v8259_v29 = vor.u32 %v10017_v51, %v8258_v50 }
  0xeb   :  { %5254 = vmatpush.bf16.msrb.mxu3 %v8371_v56  ;;  %v9989_v56 = vld [vmem:[%s15455_s1 + $0xe24] sm:$0xf0]  ;;  %v12000_v17 = vadd.f32 %v5002_v7, %v4990_v60  ;;  %v4978_v25 = vpop.f32.mrf.mxu1  ;;  %v10035_v39 = vld [vmem:[%s15455_s1 + $0xf94] sm:$0xf0]  ;;  %v8442_v54 = vld [vmem:[%s15455_s1 + $0x1070] sm:$0xf] }
  0xec   :  { %5216 = vmatpush.bf16.msrb.mxu0 %v8171_v59  ;;  %v8210_v59 = vld [vmem:[%s15455_s1 + $0xea0] sm:$0xf]  ;;  %v8147_v18 = vor.u32 %v9989_v56, %v8146_v55  ;;  %v10063_v55 = vld [vmem:[%s15455_s1 + $0x1074] sm:$0xf0]  ;;  %v8506_v56 = vld [vmem:[%s15455_s1 + $0x10f0] sm:$0xf]  ;;  %v8331_v7 = vor.u32 %v10035_v39, %v8330_v34 }
  0xed   :  { %5229 = vmatpush.bf16.msrb.mxu1 %v8235_v0  ;;  %v8274_v0 = vld [vmem:[%s15455_s1 + $0xf20] sm:$0xf]  ;;  %v12061_v60 = vld [vmem:[#allocation1 + $0x36] sm:$0xff] }
  0xee   :  { %5242 = vmatpush.bf16.msrb.mxu2 %v8299_v5  ;;  %v10021_v5 = vld [vmem:[%s15455_s1 + $0xf24] sm:$0xf0]  ;;  %v10079_v10 = vld [vmem:[%s15455_s1 + $0x10f4] sm:$0xf0]  ;;  %v8322_v25 = vld [vmem:[%s15455_s1 + $0xf80] sm:$0xf] }
  0xef   :  { %5255 = vmatpush.bf16.msrb.mxu3 %v8363_v23  ;;  %v10037_v23 = vld [vmem:[%s15455_s1 + $0xfa4] sm:$0xf0]  ;;  %v8275_v28 = vor.u32 %v10021_v5, %v8274_v0  ;;  %v12063_v0 = vld [vmem:[#allocation1 + $0x2d] sm:$0xff]  ;;  %v12065_v5 = vld [vmem:[#allocation1 + $0x3f] sm:$0xff] }
  0xf0   :  { %5217 = vmatpush.bf16.msrb.mxu0 %v8163_v27  ;;  %v8211_v27 = vor.u32 %v10005_v62, %v8210_v59  ;;  %v8339_v36 = vor.u32 %v10037_v23, %v8338_v19  ;;  %v12059_v59 = vld [vmem:[#allocation1 + $0x24] sm:$0xff]  ;;  %v4991_v62 = vpop.f32.mrf.mxu2  ;;  %v8131_v23 = vor.u32 %v9985_v47, %v8130_v46  ;;  %v10095_v24 = vld [vmem:[%s15455_s1 + $0x1174] sm:$0xf0]  ;;  %v8434_v39 = vld [vmem:[%s15455_s1 + $0x1060] sm:$0xf] }
  0xf1   :  { %5230 = vmatpush.bf16.msrb.mxu1 %v8227_v32  ;;  %v10003_v32 = vld [vmem:[%s15455_s1 + $0xe94] sm:$0xf0]  ;;  %v5004_v19 = vpop.f32.mrf.mxu3  ;;  %v10061_v46 = vld [vmem:[%s15455_s1 + $0x1064] sm:$0xf0]  ;;  %v8498_v47 = vld [vmem:[%s15455_s1 + $0x10e0] sm:$0xf] }
  0xf2   :  { %5243 = vmatpush.bf16.msrb.mxu2 %v8291_v33  ;;  %v8266_v33 = vld [vmem:[%s15455_s1 + $0xf10] sm:$0xf]  ;;  %v8435_v51 = vor.u32 %v10061_v46, %v8434_v39  ;;  %v10059_v62 = vld [vmem:[%s15455_s1 + $0x1054] sm:$0xf0] }
  0xf3   :  { %5256 = vmatpush.bf16.msrb.mxu3 %v8355_v48  ;;  %v8194_v48 = vld [vmem:[%s15455_s1 + $0xe80] sm:$0xf] }
  0xf4   :  { %5218 = vmatpush.bf16.msrb.mxu0 %v8155_v49  ;;  %v10001_v49 = vld [vmem:[%s15455_s1 + $0xe84] sm:$0xf0] }
  0xf5   :  { %5231 = vmatpush.bf16.msrb.mxu1 %v8219_v52  ;;  %v8203_v52 = vor.u32 %v10003_v32, %v8202_v31  ;;  %v8443_v31 = vor.u32 %v10063_v55, %v8442_v54  ;;  %v8507_v32 = vor.u32 %v10079_v10, %v8506_v56  ;;  %v8426_v56 = vld [vmem:[%s15455_s1 + $0x1050] sm:$0xf] }
  0xf6   :  { %5244 = vmatpush.bf16.msrb.mxu2 %v8283_v53  ;;  %v8267_v53 = vor.u32 %v10019_v35, %v8266_v33  ;;  %v8634_v33 = vld [vmem:[%s15455_s1 + $0x11f0] sm:$0xf]  ;;  %v10111_v35 = vld [vmem:[%s15455_s1 + $0x11f4] sm:$0xf0] }
  0xf7   :  { %5257 = vmatpush.bf16.msrb.mxu3 %v8347_v6  ;;  %v25_v6 = vld [vmem:[%s15454_s0 + $0x20] sm:$0xff]  ;;  %v8635_v50 = vor.u32 %v10111_v35, %v8634_v33  ;;  %v8554_v10 = vld [vmem:[%s15455_s1 + $0x1150] sm:$0xf]  ;;  %v10073_v33 = vld [vmem:[%s15455_s1 + $0x10c4] sm:$0xf0] }
  0xf8   :  { %5219 = vmatpush.bf16.msrb.mxu0 %v8147_v18  ;;  %v8570_v18 = vld [vmem:[%s15455_s1 + $0x1170] sm:$0xf]  ;;  %859 = vst [vmem:[#allocation1] ss:$9 sm:$0xff] %v25_v6  ;;  %v8546_v35 = vld [vmem:[%s15455_s1 + $0x1140] sm:$0xf] }
  0xf9   :  { %5232 = vmatpush.bf16.msrb.mxu1 %v8211_v27  ;;  %v10033_v27 = vld [vmem:[%s15455_s1 + $0xf84] sm:$0xf0]  ;;  %v8571_v34 = vor.u32 %v10095_v24, %v8570_v18  ;;  %v8490_v6 = vld [vmem:[%s15455_s1 + $0x10d0] sm:$0xf]  ;;  %v10091_v18 = vld [vmem:[%s15455_s1 + $0x1154] sm:$0xf0] }
  0xfa   :  { %5245 = vmatpush.bf16.msrb.mxu2 %v8275_v28  ;;  %v8195_v28 = vor.u32 %v10001_v49, %v8194_v48  ;;  %v8562_v48 = vld [vmem:[%s15455_s1 + $0x1160] sm:$0xf]  ;;  %v10093_v49 = vld [vmem:[%s15455_s1 + $0x1164] sm:$0xf0]  ;;  %v8618_v24 = vld [vmem:[%s15455_s1 + $0x11d0] sm:$0xf] }
  0xfb   :  { %5258 = vmatpush.bf16.msrb.mxu3 %v8339_v36  ;;  %v8323_v36 = vor.u32 %v10033_v27, %v8322_v25  ;;  %v8563_v55 = vor.u32 %v10093_v49, %v8562_v48  ;;  %v10107_v25 = vld [vmem:[%s15455_s1 + $0x11d4] sm:$0xf0]  ;;  %v8610_v48 = vld [vmem:[%s15455_s1 + $0x11c0] sm:$0xf]  ;;  %v10105_v49 = vld [vmem:[%s15455_s1 + $0x11c4] sm:$0xf0] }
  0xfc   :  { %5220 = vmatpush.bf16.msrb.mxu0 %v8139_v30  ;;  %v10077_v30 = vld [vmem:[%s15455_s1 + $0x10e4] sm:$0xf0] }
  0xfd   :  { %5233 = vmatpush.bf16.msrb.mxu1 %v8203_v52  ;;  %v8626_v52 = vld [vmem:[%s15455_s1 + $0x11e0] sm:$0xf]  ;;  %v8499_v54 = vor.u32 %v10077_v30, %v8498_v47 }
  0xfe   :  { %5246 = vmatpush.bf16.msrb.mxu2 %v8267_v53  ;;  %v10109_v53 = vld [vmem:[%s15455_s1 + $0x11e4] sm:$0xf0] }
  0xff   :  { %5259 = vmatpush.bf16.msrb.mxu3 %v8331_v7  ;;  %v10075_v7 = vld [vmem:[%s15455_s1 + $0x10d4] sm:$0xf0]  ;;  %v8627_v19 = vor.u32 %v10109_v53, %v8626_v52  ;;  %v8410_v52 = vld [vmem:[%s15455_s1 + $0x1030] sm:$0xf] }
 0x100   :  { %5221 = vmatpush.bf16.msrb.mxu0 %v8131_v23  ;;  %v8427_v23 = vor.u32 %v10059_v62, %v8426_v56  ;;  %v8491_v27 = vor.u32 %v10075_v7, %v8490_v6  ;;  %v5015_v39 = vpop.f32.mrf.mxu0  ;;  %v8474_v53 = vld [vmem:[%s15455_s1 + $0x10b0] sm:$0xf]  ;;  %v10087_v62 = vld [vmem:[%s15455_s1 + $0x1134] sm:$0xf0]  ;;  %v8611_v6 = vor.u32 %v10105_v49, %v8610_v48 }
 0x101   :  { %5234 = vmatpush.bf16.msrb.mxu1 %v8195_v28  ;;  %v8555_v28 = vor.u32 %v10091_v18, %v8554_v10  ;;  %v5016_v46 = vadd.f32 %v5015_v39, %v12000_v17  ;;  %v5028_v30 = vpop.f32.mrf.mxu1  ;;  %v10055_v17 = vld [vmem:[%s15455_s1 + $0x1034] sm:$0xf0]  ;;  %v8538_v56 = vld [vmem:[%s15455_s1 + $0x1130] sm:$0xf] }
 0x102   :  { %5247 = vmatpush.bf16.msrb.mxu2 %v8259_v29  ;;  %v8418_v29 = vld [vmem:[%s15455_s1 + $0x1040] sm:$0xf]  ;;  %v8411_v7 = vor.u32 %v10055_v17, %v8410_v52  ;;  %v8602_v10 = vld [vmem:[%s15455_s1 + $0x11b0] sm:$0xf]  ;;  %v10103_v18 = vld [vmem:[%s15455_s1 + $0x11b4] sm:$0xf0] }
 0x103   :  { %5260 = vmatpush.bf16.msrb.mxu3 %v8323_v36  ;;  %5222 = vmatmul.bf16.vlgmr.msrb.gmra.mxu0 %v12059_v59  ;;  %v8619_v36 = vor.u32 %v10107_v25, %v8618_v24  ;;  %v8402_v25 = vld [vmem:[%s15455_s1 + $0x1020] sm:$0xf]  ;;  %v10051_v52 = vld [vmem:[%s15455_s1 + $0x1014] sm:$0xf0]  ;;  %v8458_v17 = vld [vmem:[%s15455_s1 + $0x1090] sm:$0xf] }
 0x104   :  { %5266 = vmatpush.bf16.msra.mxu0 %v8443_v31  ;;  %5235 = vmatmul.bf16.vlgmr.msrb.gmra.mxu1 %v12063_v0  ;;  %v10057_v31 = vld [vmem:[%s15455_s1 + $0x1044] sm:$0xf0] }
 0x105   :  { %5279 = vmatpush.bf16.msra.mxu1 %v8507_v32  ;;  %5248 = vmatmul.bf16.vlgmr.msrb.gmra.mxu2 %v12061_v60  ;;  %v8482_v32 = vld [vmem:[%s15455_s1 + $0x10c0] sm:$0xf]  ;;  %v8419_v47 = vor.u32 %v10057_v31, %v8418_v29  ;;  %v10069_v31 = vld [vmem:[%s15455_s1 + $0x10a4] sm:$0xf0] }
 0x106   :  { %5292 = vmatpush.bf16.msra.mxu2 %v8571_v34  ;;  %5261 = vmatmul.bf16.vlgmr.msrb.gmra.mxu3 %v12065_v5  ;;  %v10089_v34 = vld [vmem:[%s15455_s1 + $0x1144] sm:$0xf0] }
 0x107   :  { %5305 = vmatpush.bf16.msra.mxu3 %v8635_v50  ;;  %v8483_v50 = vor.u32 %v10073_v33, %v8482_v32  ;;  %v8530_v32 = vld [vmem:[%s15455_s1 + $0x1120] sm:$0xf]  ;;  %v10085_v33 = vld [vmem:[%s15455_s1 + $0x1124] sm:$0xf0] }
 0x108   :  { %5267 = vmatpush.bf16.msra.mxu0 %v8435_v51  ;;  %v8547_v51 = vor.u32 %v10089_v34, %v8546_v35  ;;  %v5041_v24 = vpop.f32.mrf.mxu2  ;;  %v8603_v35 = vor.u32 %v10103_v18, %v8602_v10  ;;  %v8386_v10 = vld [vmem:[%s15455_s1 + $0x1000] sm:$0xf]  ;;  %v10049_v18 = vld [vmem:[%s15455_s1 + $0x1004] sm:$0xf0] }
 0x109   :  { %5280 = vmatpush.bf16.msra.mxu1 %v8499_v54  ;;  %v5029_v54 = vadd.f32 %v5028_v30, %v5016_v46  ;;  %v5054_v34 = vpop.f32.mrf.mxu3  ;;  %v10101_v30 = vld [vmem:[%s15455_s1 + $0x11a4] sm:$0xf0]  ;;  %v5030_v48 = vpop.f32.mrf.mxu1 }
 0x10a   :  { %5293 = vmatpush.bf16.msra.mxu2 %v8563_v55  ;;  %v10071_v55 = vld [vmem:[%s15455_s1 + $0x10b4] sm:$0xf0]  ;;  %v8578_v48 = vld [vmem:[%s15455_s1 + $0x1180] sm:$0xf] }
 0x10b   :  { %5306 = vmatpush.bf16.msra.mxu3 %v8627_v19  ;;  %v8475_v19 = vor.u32 %v10071_v55, %v8474_v53  ;;  %v5042_v29 = vadd.f32 %v5041_v24, %v5029_v54  ;;  %v10067_v53 = vld [vmem:[%s15455_s1 + $0x1094] sm:$0xf0]  ;;  %v8522_v54 = vld [vmem:[%s15455_s1 + $0x1110] sm:$0xf]  ;;  %v8450_v24 = vld [vmem:[%s15455_s1 + $0x1080] sm:$0xf] }
 0x10c   :  { %5268 = vmatpush.bf16.msra.mxu0 %v8427_v23  ;;  %v8539_v23 = vor.u32 %v10087_v62, %v8538_v56  ;;  %v10083_v55 = vld [vmem:[%s15455_s1 + $0x1114] sm:$0xf0]  ;;  %v8586_v62 = vld [vmem:[%s15455_s1 + $0x1190] sm:$0xf] }
 0x10d   :  { %5281 = vmatpush.bf16.msra.mxu1 %v8491_v27  ;;  %v10053_v27 = vld [vmem:[%s15455_s1 + $0x1024] sm:$0xf0]  ;;  %v12210_v39 = vadd.f32 %v5054_v34, %v5042_v29  ;;  %v10143_v34 = vld [vmem:[%s15455_s1 + $0x12f4] sm:$0xf0] }
 0x10e   :  { %5294 = vmatpush.bf16.msra.mxu2 %v8555_v28  ;;  %v8466_v28 = vld [vmem:[%s15455_s1 + $0x10a0] sm:$0xf]  ;;  %v8403_v46 = vor.u32 %v10053_v27, %v8402_v25  ;;  %v10065_v25 = vld [vmem:[%s15455_s1 + $0x1084] sm:$0xf0] }
 0x10f   :  { %5307 = vmatpush.bf16.msra.mxu3 %v8619_v36  ;;  %v5017_v36 = vpop.f32.mrf.mxu0  ;;  %v8467_v49 = vor.u32 %v10069_v31, %v8466_v28  ;;  %v8514_v27 = vld [vmem:[%s15455_s1 + $0x1100] sm:$0xf]  ;;  %v10081_v29 = vld [vmem:[%s15455_s1 + $0x1104] sm:$0xf0]  ;;  %v8698_v31 = vld [vmem:[%s15455_s1 + $0x1270] sm:$0xf] }
 0x110   :  { %5269 = vmatpush.bf16.msra.mxu0 %v8419_v47  ;;  %v8594_v47 = vld [vmem:[%s15455_s1 + $0x11a0] sm:$0xf]  ;;  %v5043_v28 = vpop.f32.mrf.mxu2  ;;  %v8826_v36 = vld [vmem:[%s15455_s1 + $0x1370] sm:$0xf] }
 0x111   :  { %5282 = vmatpush.bf16.msra.mxu1 %v8483_v50  ;;  %v8531_v50 = vor.u32 %v10085_v33, %v8530_v32  ;;  %v8595_v56 = vor.u32 %v10101_v30, %v8594_v47  ;;  %v10127_v32 = vld [vmem:[%s15455_s1 + $0x1274] sm:$0xf0]  ;;  %v8387_v47 = vor.u32 %v10049_v18, %v8386_v10  ;;  %v10141_v10 = vld [vmem:[%s15455_s1 + $0x12e4] sm:$0xf0]  ;;  %v8818_v18 = vld [vmem:[%s15455_s1 + $0x1360] sm:$0xf] }
 0x112   :  { %5295 = vmatpush.bf16.msra.mxu2 %v8547_v51  ;;  %v8394_v51 = vld [vmem:[%s15455_s1 + $0x1010] sm:$0xf]  ;;  %v10159_v30 = vld [vmem:[%s15455_s1 + $0x1374] sm:$0xf0] }
 0x113   :  { %5308 = vmatpush.bf16.msra.mxu3 %v8611_v6  ;;  %v8395_v6 = vor.u32 %v10051_v52, %v8394_v51  ;;  %v8515_v51 = vor.u32 %v10081_v29, %v8514_v27  ;;  %v8699_v52 = vor.u32 %v10127_v32, %v8698_v31  ;;  %v12312_v27 = vld [vmem:[#allocation1 + $0x9] sm:$0xff]  ;;  %v12314_v28 = vld [vmem:[#allocation1 + $0x1b] sm:$0xff] }
 0x114   :  { %5270 = vmatpush.bf16.msra.mxu0 %v8411_v7  ;;  %v10099_v7 = vld [vmem:[%s15455_s1 + $0x1194] sm:$0xf0]  ;;  %15469 = vst [vmem:[#allocation5_spill] sm:$0xff] %v12314_v28  ;;  %v8882_v31 = vld [vmem:[%s15455_s1 + $0x13e0] sm:$0xf] }
 0x115   :  { %5283 = vmatpush.bf16.msra.mxu1 %v8475_v19  ;;  %v8459_v19 = vor.u32 %v10067_v53, %v8458_v17  ;;  %v8587_v33 = vor.u32 %v10099_v7, %v8586_v62  ;;  %v8890_v53 = vld [vmem:[%s15455_s1 + $0x13f0] sm:$0xf]  ;;  %v8690_v62 = vld [vmem:[%s15455_s1 + $0x1260] sm:$0xf]  ;;  %v10173_v32 = vld [vmem:[%s15455_s1 + $0x13e4] sm:$0xf0] }
 0x116   :  { %5296 = vmatpush.bf16.msra.mxu2 %v8539_v23  ;;  %v8523_v23 = vor.u32 %v10083_v55, %v8522_v54  ;;  %v10175_v54 = vld [vmem:[%s15455_s1 + $0x13f4] sm:$0xf0]  ;;  %v8827_v55 = vor.u32 %v10159_v30, %v8826_v36  ;;  %v8754_v7 = vld [vmem:[%s15455_s1 + $0x12e0] sm:$0xf]  ;;  %v8810_v30 = vld [vmem:[%s15455_s1 + $0x1350] sm:$0xf] }
 0x117   :  { %5309 = vmatpush.bf16.msra.mxu3 %v8603_v35  ;;  %v8762_v35 = vld [vmem:[%s15455_s1 + $0x12f0] sm:$0xf]  ;;  %v10123_v36 = vld [vmem:[%s15455_s1 + $0x1254] sm:$0xf0] }
 0x118   :  { %5271 = vmatpush.bf16.msra.mxu0 %v8403_v46  ;;  %v5056_v46 = vpop.f32.mrf.mxu3  ;;  %v8763_v17 = vor.u32 %v10143_v34, %v8762_v35  ;;  %v8682_v34 = vld [vmem:[%s15455_s1 + $0x1250] sm:$0xf] }
 0x119   :  { %5284 = vmatpush.bf16.msra.mxu1 %v8467_v49  ;;  %v10097_v49 = vld [vmem:[%s15455_s1 + $0x1184] sm:$0xf0]  ;;  %v8746_v46 = vld [vmem:[%s15455_s1 + $0x12d0] sm:$0xf] }
 0x11a   :  { %5297 = vmatpush.bf16.msra.mxu2 %v8531_v50  ;;  %v8451_v50 = vor.u32 %v10065_v25, %v8450_v24  ;;  %v12310_v24 = vld [vmem:[#allocation1 + $0x12] sm:$0xff]  ;;  %v8891_v25 = vor.u32 %v10175_v54, %v8890_v53  ;;  %v8674_v54 = vld [vmem:[%s15455_s1 + $0x1240] sm:$0xf] }
 0x11b   :  { %5310 = vmatpush.bf16.msra.mxu3 %v8595_v56  ;;  %v8579_v56 = vor.u32 %v10097_v49, %v8578_v48  ;;  %v10155_v48 = vld [vmem:[%s15455_s1 + $0x1354] sm:$0xf0]  ;;  %v8883_v49 = vor.u32 %v10173_v32, %v8882_v31  ;;  %v8866_v31 = vld [vmem:[%s15455_s1 + $0x13c0] sm:$0xf]  ;;  %v10169_v32 = vld [vmem:[%s15455_s1 + $0x13c4] sm:$0xf0] }
 0x11c   :  { %5272 = vmatpush.bf16.msra.mxu0 %v8395_v6  ;;  %v10125_v6 = vld [vmem:[%s15455_s1 + $0x1264] sm:$0xf0]  ;;  %v8811_v53 = vor.u32 %v10155_v48, %v8810_v30  ;;  %v8794_v30 = vld [vmem:[%s15455_s1 + $0x1330] sm:$0xf]  ;;  %v10151_v48 = vld [vmem:[%s15455_s1 + $0x1334] sm:$0xf0] }
 0x11d   :  { %5285 = vmatpush.bf16.msra.mxu1 %v8459_v19  ;;  %v10157_v19 = vld [vmem:[%s15455_s1 + $0x1364] sm:$0xf0]  ;;  %v8691_v29 = vor.u32 %v10125_v6, %v8690_v62  ;;  %v8802_v6 = vld [vmem:[%s15455_s1 + $0x1340] sm:$0xf] }
 0x11e   :  { %5298 = vmatpush.bf16.msra.mxu2 %v8523_v23  ;;  %v12308_v23 = vld [vmem:[#allocation1] sm:$0xff]  ;;  %v8819_v35 = vor.u32 %v10157_v19, %v8818_v18  ;;  %v10137_v62 = vld [vmem:[%s15455_s1 + $0x12c4] sm:$0xf0] }
 0x11f   :  { %5311 = vmatpush.bf16.msra.mxu3 %v8587_v33  ;;  %v8755_v33 = vor.u32 %v10141_v10, %v8754_v7  ;;  %v10153_v7 = vld [vmem:[%s15455_s1 + $0x1344] sm:$0xf0] }
 0x120   :  { %5273 = vmatpush.bf16.msra.mxu0 %v8387_v47  ;;  %v10139_v47 = vld [vmem:[%s15455_s1 + $0x12d4] sm:$0xf0]  ;;  %v5067_v18 = vpop.f32.mrf.mxu0 }
 0x121   :  { %5286 = vmatpush.bf16.msra.mxu1 %v8451_v50  ;;  %v8683_v50 = vor.u32 %v10123_v36, %v8682_v34  ;;  %v5068_v19 = vadd.f32 %v5067_v18, %v12210_v39  ;;  %v8666_v34 = vld [vmem:[%s15455_s1 + $0x1230] sm:$0xf]  ;;  %v10119_v39 = vld [vmem:[%s15455_s1 + $0x1234] sm:$0xf0]  ;;  %v10149_v18 = vld [vmem:[%s15455_s1 + $0x1324] sm:$0xf0] }
 0x122   :  { %5299 = vmatpush.bf16.msra.mxu2 %v8515_v51  ;;  %v8874_v51 = vld [vmem:[%s15455_s1 + $0x13d0] sm:$0xf] }
 0x123   :  { %5312 = vmatpush.bf16.msra.mxu3 %v8579_v56  ;;  %5274 = vmatmul.bf16.vlgmr.msra.gmra.mxu0 %v12308_v23  ;;  %v8738_v56 = vld [vmem:[%s15455_s1 + $0x12c0] sm:$0xf]  ;;  %v8730_v36 = vld [vmem:[%s15455_s1 + $0x12b0] sm:$0xf] }
 0x124   :  { %5318 = vmatpush.bf16.msrb.mxu0 %v8699_v52  ;;  %5287 = vmatmul.bf16.vlgmr.msra.gmra.mxu1 %v12312_v27  ;;  %v10171_v52 = vld [vmem:[%s15455_s1 + $0x13d4] sm:$0xf0] }
 0x125   :  { %5331 = vmatpush.bf16.msrb.mxu1 %v8763_v17  ;;  %5300 = vmatmul.bf16.vlgmr.msra.gmra.mxu2 %v12310_v24  ;;  %v8747_v17 = vor.u32 %v10139_v47, %v8746_v46  ;;  %v8875_v10 = vor.u32 %v10171_v52, %v8874_v51  ;;  %v10135_v47 = vld [vmem:[%s15455_s1 + $0x12b4] sm:$0xf0]  ;;  %v8858_v51 = vld [vmem:[%s15455_s1 + $0x13b0] sm:$0xf] }
 0x126   :  { %5344 = vmatpush.bf16.msrb.mxu2 %v8827_v55  ;;  %5313 = vmatmul.bf16.vlgmr.msra.gmra.mxu3 %v12314_v28  ;;  %v10121_v55 = vld [vmem:[%s15455_s1 + $0x1244] sm:$0xf0]  ;;  %v10167_v52 = vld [vmem:[%s15455_s1 + $0x13b4] sm:$0xf0] }
 0x127   :  { %5357 = vmatpush.bf16.msrb.mxu3 %v8891_v25  ;;  %v8675_v25 = vor.u32 %v10121_v55, %v8674_v54  ;;  %v8658_v55 = vld [vmem:[%s15455_s1 + $0x1220] sm:$0xf] }
 0x128   :  { %5319 = vmatpush.bf16.msrb.mxu0 %v8691_v29  ;;  %v5080_v29 = vpop.f32.mrf.mxu1  ;;  %v5093_v54 = vpop.f32.mrf.mxu2 }
 0x129   :  { %5332 = vmatpush.bf16.msrb.mxu1 %v8755_v33  ;;  %v8739_v33 = vor.u32 %v10137_v62, %v8738_v56  ;;  %v5081_v46 = vadd.f32 %v5080_v29, %v5068_v19  ;;  %v10117_v56 = vld [vmem:[%s15455_s1 + $0x1224] sm:$0xf0]  ;;  %v8722_v62 = vld [vmem:[%s15455_s1 + $0x12a0] sm:$0xf]  ;;  %v8859_v19 = vor.u32 %v10167_v52, %v8858_v51  ;;  %v5069_v29 = vpop.f32.mrf.mxu0  ;;  %v8842_v51 = vld [vmem:[%s15455_s1 + $0x1390] sm:$0xf] }
 0x12a   :  { %5345 = vmatpush.bf16.msrb.mxu2 %v8819_v35  ;;  %v8803_v35 = vor.u32 %v10153_v7, %v8802_v6  ;;  %v10133_v7 = vld [vmem:[%s15455_s1 + $0x12a4] sm:$0xf0]  ;;  %v9018_v29 = vld [vmem:[%s15455_s1 + $0x14f0] sm:$0xf] }
 0x12b   :  { %5358 = vmatpush.bf16.msrb.mxu3 %v8883_v49  ;;  %v8867_v49 = vor.u32 %v10169_v32, %v8866_v31  ;;  %v5094_v6 = vadd.f32 %v5093_v54, %v5081_v46  ;;  %v8659_v32 = vor.u32 %v10117_v56, %v8658_v55  ;;  %v10113_v54 = vld [vmem:[%s15455_s1 + $0x1204] sm:$0xf0]  ;;  %v8706_v56 = vld [vmem:[%s15455_s1 + $0x1280] sm:$0xf] }
 0x12c   :  { %5320 = vmatpush.bf16.msrb.mxu0 %v8683_v50  ;;  %v8667_v50 = vor.u32 %v10119_v39, %v8666_v34  ;;  %v8650_v34 = vld [vmem:[%s15455_s1 + $0x1210] sm:$0xf] }
 0x12d   :  { %5333 = vmatpush.bf16.msrb.mxu1 %v8747_v17  ;;  %v8731_v17 = vor.u32 %v10135_v47, %v8730_v36  ;;  %v8723_v36 = vor.u32 %v10133_v7, %v8722_v62  ;;  %v10115_v47 = vld [vmem:[%s15455_s1 + $0x1214] sm:$0xf0]  ;;  %v10129_v62 = vld [vmem:[%s15455_s1 + $0x1284] sm:$0xf0] }
 0x12e   :  { %5346 = vmatpush.bf16.msrb.mxu2 %v8811_v53  ;;  %v8795_v53 = vor.u32 %v10151_v48, %v8794_v30  ;;  %v8714_v30 = vld [vmem:[%s15455_s1 + $0x1290] sm:$0xf]  ;;  %v10131_v48 = vld [vmem:[%s15455_s1 + $0x1294] sm:$0xf0]  ;;  %v8651_v55 = vor.u32 %v10115_v47, %v8650_v34  ;;  %v10145_v7 = vld [vmem:[%s15455_s1 + $0x1304] sm:$0xf0] }
 0x12f   :  { %5359 = vmatpush.bf16.msrb.mxu3 %v8875_v10  ;;  %v8786_v10 = vld [vmem:[%s15455_s1 + $0x1320] sm:$0xf]  ;;  %v12480_v34 = vld [vmem:[#allocation1 + $0x2d] sm:$0xff]  ;;  %v10207_v47 = vld [vmem:[%s15455_s1 + $0x14f4] sm:$0xf0] }
 0x130   :  { %5321 = vmatpush.bf16.msrb.mxu0 %v8675_v25  ;;  %v5106_v25 = vpop.f32.mrf.mxu3  ;;  %v5082_v39 = vpop.f32.mrf.mxu1  ;;  %v8787_v46 = vor.u32 %v10149_v18, %v8786_v10  ;;  %v8715_v10 = vor.u32 %v10131_v48, %v8714_v30  ;;  %15472 = vst [vmem:[#allocation8_spill] sm:$0xff] %v12480_v34  ;;  %v9082_v30 = vld [vmem:[%s15455_s1 + $0x1570] sm:$0xf] }
 0x131   :  { %5334 = vmatpush.bf16.msrb.mxu1 %v8739_v33  ;;  %v12417_v31 = vadd.f32 %v5106_v25, %v5094_v6  ;;  %v8850_v33 = vld [vmem:[%s15455_s1 + $0x13a0] sm:$0xf]  ;;  %v10191_v25 = vld [vmem:[%s15455_s1 + $0x1474] sm:$0xf0] }
 0x132   :  { %5347 = vmatpush.bf16.msrb.mxu2 %v8803_v35  ;;  %v10165_v35 = vld [vmem:[%s15455_s1 + $0x13a4] sm:$0xf0]  ;;  %v8770_v6 = vld [vmem:[%s15455_s1 + $0x1300] sm:$0xf] }
 0x133   :  { %5360 = vmatpush.bf16.msrb.mxu3 %v8867_v49  ;;  %v8778_v49 = vld [vmem:[%s15455_s1 + $0x1310] sm:$0xf]  ;;  %v8851_v52 = vor.u32 %v10165_v35, %v8850_v33  ;;  %v12478_v33 = vld [vmem:[#allocation1 + $0x36] sm:$0xff]  ;;  %v5095_v35 = vpop.f32.mrf.mxu2  ;;  %v12482_v39 = vld [vmem:[#allocation1 + $0x3f] sm:$0xff] }
 0x134   :  { %5322 = vmatpush.bf16.msrb.mxu0 %v8667_v50  ;;  %v10147_v50 = vld [vmem:[%s15455_s1 + $0x1314] sm:$0xf0]  ;;  %15471 = vst [vmem:[#allocation7_spill] sm:$0xff] %v12478_v33  ;;  %v8771_v35 = vor.u32 %v10145_v7, %v8770_v6  ;;  %v10205_v6 = vld [vmem:[%s15455_s1 + $0x14e4] sm:$0xf0] }
 0x135   :  { %5335 = vmatpush.bf16.msrb.mxu1 %v8731_v17  ;;  %v10163_v17 = vld [vmem:[%s15455_s1 + $0x1394] sm:$0xf0]  ;;  %v8779_v18 = vor.u32 %v10147_v50, %v8778_v49  ;;  %15473 = vst [vmem:[#allocation9_spill] sm:$0xff] %v12482_v39  ;;  %v9074_v7 = vld [vmem:[%s15455_s1 + $0x1560] sm:$0xf] }
 0x136   :  { %5348 = vmatpush.bf16.msrb.mxu2 %v8795_v53  ;;  %v8642_v53 = vld [vmem:[%s15455_s1 + $0x1200] sm:$0xf]  ;;  %v10223_v50 = vld [vmem:[%s15455_s1 + $0x1574] sm:$0xf0] }
 0x137   :  { %5361 = vmatpush.bf16.msrb.mxu3 %v8859_v19  ;;  %v8954_v19 = vld [vmem:[%s15455_s1 + $0x1470] sm:$0xf]  ;;  %v8643_v49 = vor.u32 %v10113_v54, %v8642_v53  ;;  %v10239_v54 = vld [vmem:[%s15455_s1 + $0x15f4] sm:$0xf0] }
 0x138   :  { %5323 = vmatpush.bf16.msrb.mxu0 %v8659_v32  ;;  %v12476_v32 = vld [vmem:[#allocation1 + $0x24] sm:$0xff]  ;;  %v5108_v48 = vpop.f32.mrf.mxu3  ;;  %v9146_v53 = vld [vmem:[%s15455_s1 + $0x15f0] sm:$0xf] }
 0x139   :  { %5336 = vmatpush.bf16.msrb.mxu1 %v8723_v36  ;;  %15470 = vst [vmem:[#allocation6_spill] sm:$0xff] %v12476_v32  ;;  %v26_v36 = vld [vmem:[%s15454_s0 + $0x28] sm:$0xff]  ;;  %v8955_v48 = vor.u32 %v10191_v25, %v8954_v19  ;;  %v9147_v19 = vor.u32 %v10239_v54, %v9146_v53  ;;  %v10235_v53 = vld [vmem:[%s15455_s1 + $0x15d4] sm:$0xf0] }
 0x13a   :  { %5349 = vmatpush.bf16.msrb.mxu2 %v8787_v46  ;;  %v8843_v46 = vor.u32 %v10163_v17, %v8842_v51  ;;  %869 = vst [vmem:[#allocation1] ss:$9 sm:$0xff] %v26_v36  ;;  %v8834_v51 = vld [vmem:[%s15455_s1 + $0x1380] sm:$0xf]  ;;  %v8707_v17 = vor.u32 %v10129_v62, %v8706_v56  ;;  %v9019_v36 = vor.u32 %v10207_v47, %v9018_v29  ;;  %v10189_v56 = vld [vmem:[%s15455_s1 + $0x1464] sm:$0xf0] }
 0x13b   :  { %5362 = vmatpush.bf16.msrb.mxu3 %v8851_v52  ;;  %v10161_v52 = vld [vmem:[%s15455_s1 + $0x1384] sm:$0xf0]  ;;  %v9010_v62 = vld [vmem:[%s15455_s1 + $0x14e0] sm:$0xf] }
 0x13c   :  { %5324 = vmatpush.bf16.msrb.mxu0 %v8651_v55  ;;  %v9083_v55 = vor.u32 %v10223_v50, %v9082_v30  ;;  %v8835_v28 = vor.u32 %v10161_v52, %v8834_v51  ;;  %v9138_v29 = vld [vmem:[%s15455_s1 + $0x15e0] sm:$0xf]  ;;  %v9011_v47 = vor.u32 %v10205_v6, %v9010_v62  ;;  %v10187_v50 = vld [vmem:[%s15455_s1 + $0x1454] sm:$0xf0]  ;;  %v9002_v51 = vld [vmem:[%s15455_s1 + $0x14d0] sm:$0xf] }
 0x13d   :  { %5337 = vmatpush.bf16.msrb.mxu1 %v8715_v10  ;;  %v8946_v10 = vld [vmem:[%s15455_s1 + $0x1460] sm:$0xf]  ;;  %v9066_v52 = vld [vmem:[%s15455_s1 + $0x1550] sm:$0xf]  ;;  %v10201_v6 = vld [vmem:[%s15455_s1 + $0x14c4] sm:$0xf0] }
 0x13e   :  { %5350 = vmatpush.bf16.msrb.mxu2 %v8779_v18  ;;  %v10221_v18 = vld [vmem:[%s15455_s1 + $0x1564] sm:$0xf0]  ;;  %v8947_v25 = vor.u32 %v10189_v56, %v8946_v10  ;;  %v8930_v10 = vld [vmem:[%s15455_s1 + $0x1440] sm:$0xf] }
 0x13f   :  { %5363 = vmatpush.bf16.msrb.mxu3 %v8843_v46  ;;  %v10237_v46 = vld [vmem:[%s15455_s1 + $0x15e4] sm:$0xf0]  ;;  %v9075_v30 = vor.u32 %v10221_v18, %v9074_v7  ;;  %v8994_v62 = vld [vmem:[%s15455_s1 + $0x14c0] sm:$0xf] }
 0x140   :  { %5325 = vmatpush.bf16.msrb.mxu0 %v8643_v49  ;;  %v8938_v49 = vld [vmem:[%s15455_s1 + $0x1450] sm:$0xf]  ;;  %v10185_v56 = vld [vmem:[%s15455_s1 + $0x1444] sm:$0xf0]  ;;  %v9058_v7 = vld [vmem:[%s15455_s1 + $0x1540] sm:$0xf] }
 0x141   :  { %5338 = vmatpush.bf16.msrb.mxu1 %v8707_v17  ;;  %v10219_v17 = vld [vmem:[%s15455_s1 + $0x1554] sm:$0xf0]  ;;  %v10217_v18 = vld [vmem:[%s15455_s1 + $0x1544] sm:$0xf0] }
 0x142   :  { %5351 = vmatpush.bf16.msrb.mxu2 %v8771_v35  ;;  %v9139_v35 = vor.u32 %v10237_v46, %v9138_v29  ;;  %v8931_v46 = vor.u32 %v10185_v56, %v8930_v10  ;;  %v10231_v10 = vld [vmem:[%s15455_s1 + $0x15b4] sm:$0xf0] }
 0x143   :  { %5364 = vmatpush.bf16.msrb.mxu3 %v8835_v28  ;;  %5326 = vmatmul.bf16.vlgmr.msrb.gmra.mxu0 %v12476_v32  ;;  %v10203_v28 = vld [vmem:[%s15455_s1 + $0x14d4] sm:$0xf0] }
 0x144   :  { %5370 = vmatpush.bf16.msra.mxu0 %v8955_v48  ;;  %5339 = vmatmul.bf16.vlgmr.msrb.gmra.mxu1 %v12480_v34  ;;  %v8939_v48 = vor.u32 %v10187_v50, %v8938_v49  ;;  %v9003_v54 = vor.u32 %v10203_v28, %v9002_v51  ;;  %v10233_v49 = vld [vmem:[%s15455_s1 + $0x15c4] sm:$0xf0]  ;;  %v8995_v50 = vor.u32 %v10201_v6, %v8994_v62  ;;  %v8922_v28 = vld [vmem:[%s15455_s1 + $0x1430] sm:$0xf] }
 0x145   :  { %5383 = vmatpush.bf16.msra.mxu1 %v9019_v36  ;;  %5352 = vmatmul.bf16.vlgmr.msrb.gmra.mxu2 %v12478_v33  ;;  %v9130_v36 = vld [vmem:[%s15455_s1 + $0x15d0] sm:$0xf]  ;;  %v9059_v51 = vor.u32 %v10217_v18, %v9058_v7  ;;  %v8914_v7 = vld [vmem:[%s15455_s1 + $0x1420] sm:$0xf]  ;;  %v10181_v18 = vld [vmem:[%s15455_s1 + $0x1424] sm:$0xf0] }
 0x146   :  { %5396 = vmatpush.bf16.msra.mxu2 %v9083_v55  ;;  %5365 = vmatmul.bf16.vlgmr.msrb.gmra.mxu3 %v12482_v39  ;;  %v9067_v55 = vor.u32 %v10219_v17, %v9066_v52  ;;  %v8986_v52 = vld [vmem:[%s15455_s1 + $0x14b0] sm:$0xf]  ;;  %v6460_v33 = vld [vmem:[%s15455_s1 + $0xf8] sm:$0xf0] }
 0x147   :  { %5409 = vmatpush.bf16.msra.mxu3 %v9147_v19  ;;  %v9131_v19 = vor.u32 %v10235_v53, %v9130_v36  ;;  %v10215_v36 = vld [vmem:[%s15455_s1 + $0x1534] sm:$0xf0] }
 0x148   :  { %5371 = vmatpush.bf16.msra.mxu0 %v8947_v25  ;;  %v5119_v25 = vpop.f32.mrf.mxu0  ;;  %v5145_v6 = vpop.f32.mrf.mxu2 }
 0x149   :  { %5384 = vmatpush.bf16.msra.mxu1 %v9011_v47  ;;  %v5120_v29 = vadd.f32 %v5119_v25, %v12417_v31  ;;  %v5132_v47 = vpop.f32.mrf.mxu1  ;;  %v10183_v31 = vld [vmem:[%s15455_s1 + $0x1434] sm:$0xf0] }
 0x14a   :  { %5397 = vmatpush.bf16.msra.mxu2 %v9075_v30  ;;  %v9122_v30 = vld [vmem:[%s15455_s1 + $0x15c0] sm:$0xf] }
 0x14b   :  { %5410 = vmatpush.bf16.msra.mxu3 %v9139_v35  ;;  %v5133_v17 = vadd.f32 %v5132_v47, %v5120_v29  ;;  %v10199_v35 = vld [vmem:[%s15455_s1 + $0x14b4] sm:$0xf0]  ;;  %v9123_v53 = vor.u32 %v10233_v49, %v9122_v30  ;;  %v10197_v29 = vld [vmem:[%s15455_s1 + $0x14a4] sm:$0xf0]  ;;  %v5158_v49 = vpop.f32.mrf.mxu3 }
 0x14c   :  { %5372 = vmatpush.bf16.msra.mxu0 %v8939_v48  ;;  %v9050_v48 = vld [vmem:[%s15455_s1 + $0x1530] sm:$0xf]  ;;  %v8987_v56 = vor.u32 %v10199_v35, %v8986_v52  ;;  %v10213_v47 = vld [vmem:[%s15455_s1 + $0x1524] sm:$0xf0] }
 0x14d   :  { %5385 = vmatpush.bf16.msra.mxu1 %v9003_v54  ;;  %v8923_v54 = vor.u32 %v10183_v31, %v8922_v28  ;;  %v9051_v62 = vor.u32 %v10215_v36, %v9050_v48  ;;  %v5146_v25 = vadd.f32 %v5145_v6, %v5133_v17  ;;  %v8915_v28 = vor.u32 %v10181_v18, %v8914_v7  ;;  %v9106_v31 = vld [vmem:[%s15455_s1 + $0x15a0] sm:$0xf]  ;;  %v10229_v52 = vld [vmem:[%s15455_s1 + $0x15a4] sm:$0xf0]  ;;  %v8906_v36 = vld [vmem:[%s15455_s1 + $0x1410] sm:$0xf] }
 0x14e   :  { %5398 = vmatpush.bf16.msra.mxu2 %v9067_v55  ;;  %v9114_v55 = vld [vmem:[%s15455_s1 + $0x15b0] sm:$0xf]  ;;  %v10227_v18 = vld [vmem:[%s15455_s1 + $0x1594] sm:$0xf0] }
 0x14f   :  { %5411 = vmatpush.bf16.msra.mxu3 %v9131_v19  ;;  %v8978_v19 = vld [vmem:[%s15455_s1 + $0x14a0] sm:$0xf]  ;;  %v9115_v30 = vor.u32 %v10231_v10, %v9114_v55  ;;  %v10195_v55 = vld [vmem:[%s15455_s1 + $0x1494] sm:$0xf0]  ;;  %v9034_v10 = vld [vmem:[%s15455_s1 + $0x1510] sm:$0xf] }
 0x150   :  { %5373 = vmatpush.bf16.msra.mxu0 %v8931_v46  ;;  %v9042_v46 = vld [vmem:[%s15455_s1 + $0x1520] sm:$0xf]  ;;  %v8979_v35 = vor.u32 %v10197_v29, %v8978_v19  ;;  %v9098_v6 = vld [vmem:[%s15455_s1 + $0x1590] sm:$0xf] }
 0x151   :  { %5386 = vmatpush.bf16.msra.mxu1 %v8995_v50  ;;  %v5121_v50 = vpop.f32.mrf.mxu0  ;;  %v5134_v17 = vpop.f32.mrf.mxu1  ;;  %v9043_v48 = vor.u32 %v10213_v47, %v9042_v46  ;;  %v8898_v19 = vld [vmem:[%s15455_s1 + $0x1400] sm:$0xf] }
 0x152   :  { %5399 = vmatpush.bf16.msra.mxu2 %v9059_v51  ;;  %v12627_v51 = vadd.f32 %v5158_v49, %v5146_v25  ;;  %v10177_v25 = vld [vmem:[%s15455_s1 + $0x1404] sm:$0xf0]  ;;  %v8962_v47 = vld [vmem:[%s15455_s1 + $0x1480] sm:$0xf]  ;;  %v5147_v50 = vpop.f32.mrf.mxu2  ;;  %v9099_v17 = vor.u32 %v10227_v18, %v9098_v6 }
 0x153   :  { %5412 = vmatpush.bf16.msra.mxu3 %v9123_v53  ;;  %v10179_v53 = vld [vmem:[%s15455_s1 + $0x1414] sm:$0xf0]  ;;  %v9026_v49 = vld [vmem:[%s15455_s1 + $0x1500] sm:$0xf] }
 0x154   :  { %5374 = vmatpush.bf16.msra.mxu0 %v8923_v54  ;;  %v8970_v54 = vld [vmem:[%s15455_s1 + $0x1490] sm:$0xf]  ;;  %v8907_v7 = vor.u32 %v10179_v53, %v8906_v36  ;;  %v5160_v53 = vpop.f32.mrf.mxu3 }
 0x155   :  { %5387 = vmatpush.bf16.msra.mxu1 %v8987_v56  ;;  %v10211_v56 = vld [vmem:[%s15455_s1 + $0x1514] sm:$0xf0]  ;;  %v8971_v29 = vor.u32 %v10195_v55, %v8970_v54  ;;  %v9338_v36 = vld [vmem:[%s15455_s1 + $0x1770] sm:$0xf]  ;;  %v8899_v54 = vor.u32 %v10177_v25, %v8898_v19 }
 0x156   :  { %5400 = vmatpush.bf16.msra.mxu2 %v9051_v62  ;;  %v9107_v62 = vor.u32 %v10229_v52, %v9106_v31  ;;  %v9035_v46 = vor.u32 %v10211_v56, %v9034_v10  ;;  %v9210_v31 = vld [vmem:[%s15455_s1 + $0x1670] sm:$0xf]  ;;  %v10255_v52 = vld [vmem:[%s15455_s1 + $0x1674] sm:$0xf0]  ;;  %v9090_v10 = vld [vmem:[%s15455_s1 + $0x1580] sm:$0xf] }
 0x157   :  { %5413 = vmatpush.bf16.msra.mxu3 %v9115_v30  ;;  %v10193_v30 = vld [vmem:[%s15455_s1 + $0x1484] sm:$0xf0]  ;;  %v10287_v55 = vld [vmem:[%s15455_s1 + $0x1774] sm:$0xf0]  ;;  %v9211_v18 = vor.u32 %v10255_v52, %v9210_v31  ;;  %v12725_v31 = vld [vmem:[#allocation1] sm:$0xff] }
 0x158   :  { %5375 = vmatpush.bf16.msra.mxu0 %v8915_v28  ;;  %v10209_v28 = vld [vmem:[%s15455_s1 + $0x1504] sm:$0xf0]  ;;  %v10303_v19 = vld [vmem:[%s15455_s1 + $0x17f4] sm:$0xf0]  ;;  %v9339_v25 = vor.u32 %v10287_v55, %v9338_v36  ;;  %15474 = vst [vmem:[#allocation10_spill] sm:$0xff] %v12725_v31 }
 0x159   :  { %5388 = vmatpush.bf16.msra.mxu1 %v8979_v35  ;;  %v9274_v35 = vld [vmem:[%s15455_s1 + $0x16f0] sm:$0xf]  ;;  %v10225_v56 = vld [vmem:[%s15455_s1 + $0x1584] sm:$0xf0]  ;;  %v9027_v6 = vor.u32 %v10209_v28, %v9026_v49  ;;  %v9330_v49 = vld [vmem:[%s15455_s1 + $0x1760] sm:$0xf] }
 0x15a   :  { %5401 = vmatpush.bf16.msra.mxu2 %v9043_v48  ;;  %v10271_v48 = vld [vmem:[%s15455_s1 + $0x16f4] sm:$0xf0]  ;;  %v9091_v53 = vor.u32 %v10225_v56, %v9090_v10  ;;  %v10285_v28 = vld [vmem:[%s15455_s1 + $0x1764] sm:$0xf0] }
 0x15b   :  { %5414 = vmatpush.bf16.msra.mxu3 %v9107_v62  ;;  %v8963_v62 = vor.u32 %v10193_v30, %v8962_v47  ;;  %v9275_v50 = vor.u32 %v10271_v48, %v9274_v35  ;;  %v9266_v47 = vld [vmem:[%s15455_s1 + $0x16e0] sm:$0xf]  ;;  %v10269_v30 = vld [vmem:[%s15455_s1 + $0x16e4] sm:$0xf0]  ;;  %v12727_v52 = vld [vmem:[#allocation1 + $0x12] sm:$0xff]  ;;  %v9331_v56 = vor.u32 %v10285_v28, %v9330_v49 }
 0x15c   :  { %5376 = vmatpush.bf16.msra.mxu0 %v8907_v7  ;;  %v9402_v7 = vld [vmem:[%s15455_s1 + $0x17f0] sm:$0xf]  ;;  %15475 = vst [vmem:[#allocation11_spill] sm:$0xff] %v12727_v52  ;;  %v12731_v48 = vld [vmem:[#allocation1 + $0x1b] sm:$0xff]  ;;  %v10301_v55 = vld [vmem:[%s15455_s1 + $0x17e4] sm:$0xf0]  ;;  %v9267_v10 = vor.u32 %v10269_v30, %v9266_v47 }
 0x15d   :  { %5389 = vmatpush.bf16.msra.mxu1 %v8971_v29  ;;  %v9202_v29 = vld [vmem:[%s15455_s1 + $0x1660] sm:$0xf]  ;;  %v12729_v35 = vld [vmem:[#allocation1 + $0x9] sm:$0xff]  ;;  %15477 = vst [vmem:[#allocation13_spill] sm:$0xff] %v12731_v48 }
 0x15e   :  { %5402 = vmatpush.bf16.msra.mxu2 %v9035_v46  ;;  %v10253_v46 = vld [vmem:[%s15455_s1 + $0x1664] sm:$0xf0]  ;;  %15476 = vst [vmem:[#allocation12_spill] sm:$0xff] %v12729_v35  ;;  %v9186_v49 = vld [vmem:[%s15455_s1 + $0x1640] sm:$0xf] }
 0x15f   :  { %5415 = vmatpush.bf16.msra.mxu3 %v9099_v17  ;;  %v9403_v17 = vor.u32 %v10303_v19, %v9402_v7  ;;  %v9203_v36 = vor.u32 %v10253_v46, %v9202_v29  ;;  %v9322_v7 = vld [vmem:[%s15455_s1 + $0x1750] sm:$0xf]  ;;  %v10283_v19 = vld [vmem:[%s15455_s1 + $0x1754] sm:$0xf0]  ;;  %v10249_v28 = vld [vmem:[%s15455_s1 + $0x1644] sm:$0xf0] }
 0x160   :  { %5377 = vmatpush.bf16.msra.mxu0 %v8899_v54  ;;  %v9394_v54 = vld [vmem:[%s15455_s1 + $0x17e0] sm:$0xf]  ;;  %v9386_v29 = vld [vmem:[%s15455_s1 + $0x17d0] sm:$0xf]  ;;  %v10299_v46 = vld [vmem:[%s15455_s1 + $0x17d4] sm:$0xf0]  ;;  %v9323_v30 = vor.u32 %v10283_v19, %v9322_v7 }
 0x161   :  { %5390 = vmatpush.bf16.msra.mxu1 %v8963_v62  ;;  %v9194_v62 = vld [vmem:[%s15455_s1 + $0x1650] sm:$0xf]  ;;  %v10297_v7 = vld [vmem:[%s15455_s1 + $0x17c4] sm:$0xf0] }
 0x162   :  { %5403 = vmatpush.bf16.msra.mxu2 %v9027_v6  ;;  %v10251_v6 = vld [vmem:[%s15455_s1 + $0x1654] sm:$0xf0] }
 0x163   :  { %5416 = vmatpush.bf16.msra.mxu3 %v9091_v53  ;;  %5378 = vmatmul.bf16.vlgmr.msra.gmra.mxu0 %v12725_v31  ;;  %v9195_v53 = vor.u32 %v10251_v6, %v9194_v62  ;;  %v9187_v6 = vor.u32 %v10249_v28, %v9186_v49  ;;  %v12895_v31 = vld [vmem:[#allocation1 + $0x36] sm:$0xff] }
 0x164   :  { %5422 = vmatpush.bf16.msrb.mxu0 %v9211_v18  ;;  %v9258_v18 = vld [vmem:[%s15455_s1 + $0x16d0] sm:$0xf]  ;;  %5391 = vmatmul.bf16.vlgmr.msra.gmra.mxu1 %v12729_v35  ;;  %v9566_v35 = vld [vmem:[%s15455_s1 + $0xf4] sm:$0xf] }
 0x165   :  { %5435 = vmatpush.bf16.msrb.mxu1 %v9275_v50  ;;  %5404 = vmatmul.bf16.vlgmr.msra.gmra.mxu2 %v12727_v52  ;;  %v10267_v50 = vld [vmem:[%s15455_s1 + $0x16d4] sm:$0xf0]  ;;  %v12893_v52 = vld [vmem:[#allocation1 + $0x24] sm:$0xff] }
 0x166   :  { %5448 = vmatpush.bf16.msrb.mxu2 %v9339_v25  ;;  %v9395_v25 = vor.u32 %v10301_v55, %v9394_v54  ;;  %5417 = vmatmul.bf16.vlgmr.msra.gmra.mxu3 %v12731_v48  ;;  %v9259_v47 = vor.u32 %v10267_v50, %v9258_v18  ;;  %v9314_v54 = vld [vmem:[%s15455_s1 + $0x1740] sm:$0xf]  ;;  %v10281_v55 = vld [vmem:[%s15455_s1 + $0x1744] sm:$0xf0]  ;;  %v5184_v18 = vpop.f32.mrf.mxu1 }
 0x167   :  { %5461 = vmatpush.bf16.msrb.mxu3 %v9403_v17  ;;  %v9250_v17 = vld [vmem:[%s15455_s1 + $0x16c0] sm:$0xf]  ;;  %v9315_v48 = vor.u32 %v10281_v55, %v9314_v54 }
 0x168   :  { %5423 = vmatpush.bf16.msrb.mxu0 %v9203_v36  ;;  %v10265_v36 = vld [vmem:[%s15455_s1 + $0x16c4] sm:$0xf0]  ;;  %v9378_v50 = vld [vmem:[%s15455_s1 + $0x17c0] sm:$0xf] }
 0x169   :  { %5436 = vmatpush.bf16.msrb.mxu1 %v9267_v10  ;;  %v9387_v10 = vor.u32 %v10299_v46, %v9386_v29  ;;  %v9251_v19 = vor.u32 %v10265_v36, %v9250_v17  ;;  %v10263_v46 = vld [vmem:[%s15455_s1 + $0x16b4] sm:$0xf0]  ;;  %v9379_v49 = vor.u32 %v10297_v7, %v9378_v50  ;;  %v9370_v17 = vld [vmem:[%s15455_s1 + $0x17b0] sm:$0xf]  ;;  %v9298_v50 = vld [vmem:[%s15455_s1 + $0x1720] sm:$0xf] }
 0x16a   :  { %5449 = vmatpush.bf16.msrb.mxu2 %v9331_v56  ;;  %v5171_v56 = vpop.f32.mrf.mxu0  ;;  %v10295_v36 = vld [vmem:[%s15455_s1 + $0x17b4] sm:$0xf0]  ;;  %v10277_v7 = vld [vmem:[%s15455_s1 + $0x1724] sm:$0xf0] }
 0x16b   :  { %5462 = vmatpush.bf16.msrb.mxu3 %v9395_v25  ;;  %v5172_v62 = vadd.f32 %v5171_v56, %v12627_v51  ;;  %v9178_v25 = vld [vmem:[%s15455_s1 + $0x1630] sm:$0xf]  ;;  %v10247_v51 = vld [vmem:[%s15455_s1 + $0x1634] sm:$0xf0]  ;;  %v5197_v56 = vpop.f32.mrf.mxu2 }
 0x16c   :  { %5424 = vmatpush.bf16.msrb.mxu0 %v9195_v53  ;;  %v9242_v53 = vld [vmem:[%s15455_s1 + $0x16b0] sm:$0xf]  ;;  %v9179_v28 = vor.u32 %v10247_v51, %v9178_v25  ;;  %v5210_v25 = vpop.f32.mrf.mxu3 }
 0x16d   :  { %5437 = vmatpush.bf16.msrb.mxu1 %v9259_v47  ;;  %v5185_v29 = vadd.f32 %v5184_v18, %v5172_v62  ;;  %v9306_v47 = vld [vmem:[%s15455_s1 + $0x1730] sm:$0xf]  ;;  %v9243_v54 = vor.u32 %v10263_v46, %v9242_v53  ;;  %v10245_v62 = vld [vmem:[%s15455_s1 + $0x1624] sm:$0xf0]  ;;  %v9362_v46 = vld [vmem:[%s15455_s1 + $0x17a0] sm:$0xf] }
 0x16e   :  { %5450 = vmatpush.bf16.msrb.mxu2 %v9323_v30  ;;  %v10279_v30 = vld [vmem:[%s15455_s1 + $0x1734] sm:$0xf0] }
 0x16f   :  { %5463 = vmatpush.bf16.msrb.mxu3 %v9387_v10  ;;  %v9307_v55 = vor.u32 %v10279_v30, %v9306_v47  ;;  %v9170_v10 = vld [vmem:[%s15455_s1 + $0x1620] sm:$0xf]  ;;  %v5198_v18 = vadd.f32 %v5197_v56, %v5185_v29  ;;  %v10293_v47 = vld [vmem:[%s15455_s1 + $0x17a4] sm:$0xf0]  ;;  %v9162_v30 = vld [vmem:[%s15455_s1 + $0x1610] sm:$0xf] }
 0x170   :  { %5425 = vmatpush.bf16.msrb.mxu0 %v9187_v6  ;;  %v9234_v6 = vld [vmem:[%s15455_s1 + $0x16a0] sm:$0xf]  ;;  %v9171_v29 = vor.u32 %v10245_v62, %v9170_v10  ;;  %v9226_v56 = vld [vmem:[%s15455_s1 + $0x1690] sm:$0xf]  ;;  %v10259_v10 = vld [vmem:[%s15455_s1 + $0x1694] sm:$0xf0] }
 0x171   :  { %5438 = vmatpush.bf16.msrb.mxu1 %v9251_v19  ;;  %v9371_v19 = vor.u32 %v10295_v36, %v9370_v17  ;;  %v12834_v53 = vadd.f32 %v5210_v25, %v5198_v18  ;;  %v10243_v36 = vld [vmem:[%s15455_s1 + $0x1614] sm:$0xf0]  ;;  %v9290_v62 = vld [vmem:[%s15455_s1 + $0x1710] sm:$0xf]  ;;  %v9218_v25 = vld [vmem:[%s15455_s1 + $0x1680] sm:$0xf] }
 0x172   :  { %5451 = vmatpush.bf16.msrb.mxu2 %v9315_v48  ;;  %v10261_v48 = vld [vmem:[%s15455_s1 + $0x16a4] sm:$0xf0]  ;;  %v5173_v51 = vpop.f32.mrf.mxu0  ;;  %v10291_v18 = vld [vmem:[%s15455_s1 + $0x1794] sm:$0xf0] }
 0x173   :  { %5464 = vmatpush.bf16.msrb.mxu3 %v9379_v49  ;;  %v5186_v49 = vpop.f32.mrf.mxu1  ;;  %v9235_v17 = vor.u32 %v10261_v48, %v9234_v6  ;;  %v9363_v6 = vor.u32 %v10293_v47, %v9362_v46  ;;  %v9154_v48 = vld [vmem:[%s15455_s1 + $0x1600] sm:$0xf]  ;;  %v10273_v46 = vld [vmem:[%s15455_s1 + $0x1704] sm:$0xf0] }
 0x174   :  { %5426 = vmatpush.bf16.msrb.mxu0 %v9179_v28  ;;  %v9299_v28 = vor.u32 %v10277_v7, %v9298_v50  ;;  %v10241_v50 = vld [vmem:[%s15455_s1 + $0x1604] sm:$0xf0]  ;;  %v9163_v7 = vor.u32 %v10243_v36, %v9162_v30  ;;  %v9282_v51 = vld [vmem:[%s15455_s1 + $0x1700] sm:$0xf]  ;;  %v9466_v30 = vld [vmem:[%s15455_s1 + $0x1870] sm:$0xf]  ;;  %v5212_v39 = vpop.f32.mrf.mxu3 }
 0x175   :  { %5439 = vmatpush.bf16.msrb.mxu1 %v9243_v54  ;;  %v10275_v54 = vld [vmem:[%s15455_s1 + $0x1714] sm:$0xf0]  ;;  %v9550_v36 = vld [vmem:[%s15455_s1 + $0x74] sm:$0xf]  ;;  %v9283_v32 = vor.u32 %v10273_v46, %v9282_v51  ;;  %v6388_v51 = vld [vmem:[%s15455_s1 + $0x68] sm:$0xf0] }
 0x176   :  { %5452 = vmatpush.bf16.msrb.mxu2 %v9307_v55  ;;  %v9354_v55 = vld [vmem:[%s15455_s1 + $0x1790] sm:$0xf]  ;;  %v9291_v47 = vor.u32 %v10275_v54, %v9290_v62  ;;  %v10319_v49 = vld [vmem:[%s15455_s1 + $0x1874] sm:$0xf0]  ;;  %v6396_v54 = vld [vmem:[%s15455_s1 + $0x78] sm:$0xf0] }
 0x177   :  { %5465 = vmatpush.bf16.msrb.mxu3 %v9371_v19  ;;  %v10257_v19 = vld [vmem:[%s15455_s1 + $0x1684] sm:$0xf0]  ;;  %v9355_v62 = vor.u32 %v10291_v18, %v9354_v55  ;;  %v9346_v55 = vld [vmem:[%s15455_s1 + $0x1780] sm:$0xf]  ;;  %v9467_v39 = vor.u32 %v10319_v49, %v9466_v30  ;;  %v9580_v30 = vld [vmem:[%s15455_s1 + $0x164] sm:$0xf] }
 0x178   :  { %5427 = vmatpush.bf16.msrb.mxu0 %v9171_v29  ;;  %v9227_v29 = vor.u32 %v10259_v10, %v9226_v56  ;;  %v12899_v56 = vld [vmem:[#allocation1 + $0x3f] sm:$0xff]  ;;  %v27_v10 = vld [vmem:[%s15454_s0 + $0x30] sm:$0x1]  ;;  %v9219_v18 = vor.u32 %v10257_v19, %v9218_v25  ;;  %v10317_v25 = vld [vmem:[%s15455_s1 + $0x1864] sm:$0xf0] }
 0x179   :  { %5440 = vmatpush.bf16.msrb.mxu1 %v9235_v17  ;;  %v5199_v17 = vpop.f32.mrf.mxu2  ;;  %v9548_v19 = vld [vmem:[%s15455_s1 + $0x64] sm:$0xf]  ;;  %v6516_v49 = vld [vmem:[%s15455_s1 + $0x168] sm:$0xf0] }
 0x17a   :  { %5453 = vmatpush.bf16.msrb.mxu2 %v9299_v28  ;;  %v12897_v28 = vld [vmem:[#allocation1 + $0x2d] sm:$0xff]  ;;  %v9155_v17 = vor.u32 %v10241_v50, %v9154_v48  ;;  %v6524_v50 = vld [vmem:[%s15455_s1 + $0x178] sm:$0xf0] }
 0x17b   :  { %5466 = vmatpush.bf16.msrb.mxu3 %v9363_v6  ;;  %879 = vst [vmem:[#allocation1] ss:$9 sm:$0xff] %v27_v10  ;;  %v10289_v6 = vld [vmem:[%s15455_s1 + $0x1784] sm:$0xf0]  ;;  %v6399_v10 = vor.u32 %v9550_v36, %v6396_v54  ;;  %v9582_v48 = vld [vmem:[%s15455_s1 + $0x174] sm:$0xf]  ;;  %v6391_v36 = vor.u32 %v9548_v19, %v6388_v51 }
 0x17c   :  { %5428 = vmatpush.bf16.msrb.mxu0 %v9163_v7  ;;  %v6463_v7 = vor.u32 %v9566_v35, %v6460_v33  ;;  %v9347_v34 = vor.u32 %v10289_v6, %v9346_v55  ;;  %v9564_v33 = vld [vmem:[%s15455_s1 + $0xe4] sm:$0xf]  ;;  %v6452_v35 = vld [vmem:[%s15455_s1 + $0xe8] sm:$0xf0]  ;;  %v6527_v46 = vor.u32 %v9582_v48, %v6524_v50  ;;  %v10315_v54 = vld [vmem:[%s15455_s1 + $0x1854] sm:$0xf0] }
 0x17d   :  { %5441 = vmatpush.bf16.msrb.mxu1 %v9227_v29  ;;  %v9458_v29 = vld [vmem:[%s15455_s1 + $0x1860] sm:$0xf]  ;;  %v9562_v55 = vld [vmem:[%s15455_s1 + $0xd4] sm:$0xf]  ;;  %v6444_v6 = vld [vmem:[%s15455_s1 + $0xd8] sm:$0xf0] }
 0x17e   :  { %5454 = vmatpush.bf16.msrb.mxu2 %v9291_v47  ;;  %v9459_v47 = vor.u32 %v10317_v25, %v9458_v29  ;;  %v6508_v48 = vld [vmem:[%s15455_s1 + $0x158] sm:$0xf0]  ;;  %v9442_v29 = vld [vmem:[%s15455_s1 + $0x1840] sm:$0xf]  ;;  %v10313_v25 = vld [vmem:[%s15455_s1 + $0x1844] sm:$0xf0] }
 0x17f   :  { %5467 = vmatpush.bf16.msrb.mxu3 %v9355_v62  ;;  %v6455_v62 = vor.u32 %v9564_v33, %v6452_v35  ;;  %v9544_v19 = vld [vmem:[%s15455_s1 + $0x44] sm:$0xf]  ;;  %v6372_v51 = vld [vmem:[%s15455_s1 + $0x48] sm:$0xf0] }
 0x180   :  { %5429 = vmatpush.bf16.msrb.mxu0 %v9155_v17  ;;  %v9546_v17 = vld [vmem:[%s15455_s1 + $0x54] sm:$0xf]  ;;  %v9560_v33 = vld [vmem:[%s15455_s1 + $0xc4] sm:$0xf]  ;;  %v6436_v35 = vld [vmem:[%s15455_s1 + $0xc8] sm:$0xf0] }
 0x181   :  { %5442 = vmatpush.bf16.msrb.mxu1 %v9219_v18  ;;  %v6519_v18 = vor.u32 %v9580_v30, %v6516_v49  ;;  %v9443_v49 = vor.u32 %v10313_v25, %v9442_v29  ;;  %v6492_v29 = vld [vmem:[%s15455_s1 + $0x138] sm:$0xf0] }
 0x182   :  { %5455 = vmatpush.bf16.msrb.mxu2 %v9283_v32  ;;  %v9450_v32 = vld [vmem:[%s15455_s1 + $0x1850] sm:$0xf] }
 0x183   :  { %5468 = vmatpush.bf16.msrb.mxu3 %v9347_v34  ;;  %5430 = vmatmul.bf16.vlgmr.msrb.gmra.mxu0 %v12893_v52  ;;  %v6380_v34 = vld [vmem:[%s15455_s1 + $0x58] sm:$0xf0] }
 0x184   :  { %5474 = vmatpush.bf16.msra.mxu0 %v9467_v39  ;;  %5443 = vmatmul.bf16.vlgmr.msrb.gmra.mxu1 %v12897_v28  ;;  %v9451_v39 = vor.u32 %v10315_v54, %v9450_v32  ;;  %v6383_v50 = vor.u32 %v9546_v17, %v6380_v34  ;;  %v6500_v32 = vld [vmem:[%s15455_s1 + $0x148] sm:$0xf0]  ;;  %v6375_v54 = vor.u32 %v9544_v19, %v6372_v51  ;;  %v9434_v34 = vld [vmem:[%s15455_s1 + $0x1830] sm:$0xf] }
 0x185   :  { %5487 = vmatpush.bf16.msra.mxu1 %v6399_v10  ;;  %5456 = vmatmul.bf16.vlgmr.msrb.gmra.mxu2 %v12895_v31  ;;  %v9578_v10 = vld [vmem:[%s15455_s1 + $0x154] sm:$0xf]  ;;  %v6439_v17 = vor.u32 %v9560_v33, %v6436_v35  ;;  %v9426_v33 = vld [vmem:[%s15455_s1 + $0x1820] sm:$0xf]  ;;  %v10309_v35 = vld [vmem:[%s15455_s1 + $0x1824] sm:$0xf0] }
 0x186   :  { %5500 = vmatpush.bf16.msra.mxu2 %v6463_v7  ;;  %5469 = vmatmul.bf16.vlgmr.msrb.gmra.mxu3 %v12899_v56  ;;  %v6447_v7 = vor.u32 %v9562_v55, %v6444_v6  ;;  %v9542_v55 = vld [vmem:[%s15455_s1 + $0x34] sm:$0xf] }
 0x187   :  { %5513 = vmatpush.bf16.msra.mxu3 %v6527_v46  ;;  %v6511_v46 = vor.u32 %v9578_v10, %v6508_v48  ;;  %v6428_v10 = vld [vmem:[%s15455_s1 + $0xb8] sm:$0xf0] }
 0x188   :  { %5475 = vmatpush.bf16.msra.mxu0 %v9459_v47  ;;  %v5223_v47 = vpop.f32.mrf.mxu0  ;;  %v5249_v51 = vpop.f32.mrf.mxu2 }
 0x189   :  { %5488 = vmatpush.bf16.msra.mxu1 %v6391_v36  ;;  %v5224_v30 = vadd.f32 %v5223_v47, %v12834_v53  ;;  %v5236_v36 = vpop.f32.mrf.mxu1  ;;  %v10311_v53 = vld [vmem:[%s15455_s1 + $0x1834] sm:$0xf0] }
 0x18a   :  { %5501 = vmatpush.bf16.msra.mxu2 %v6455_v62  ;;  %v9576_v62 = vld [vmem:[%s15455_s1 + $0x144] sm:$0xf] }
 0x18b   :  { %5514 = vmatpush.bf16.msra.mxu3 %v6519_v18  ;;  %v5237_v6 = vadd.f32 %v5236_v36, %v5224_v30  ;;  %v6364_v18 = vld [vmem:[%s15455_s1 + $0x38] sm:$0xf0]  ;;  %v6503_v48 = vor.u32 %v9576_v62, %v6500_v32  ;;  %v6356_v30 = vld [vmem:[%s15455_s1 + $0x28] sm:$0xf0]  ;;  %v5262_v32 = vpop.f32.mrf.mxu3 }
 0x18c   :  { %5476 = vmatpush.bf16.msra.mxu0 %v9451_v39  ;;  %v9558_v39 = vld [vmem:[%s15455_s1 + $0xb4] sm:$0xf]  ;;  %v6367_v25 = vor.u32 %v9542_v55, %v6364_v18  ;;  %v6420_v36 = vld [vmem:[%s15455_s1 + $0xa8] sm:$0xf0] }
 0x18d   :  { %5489 = vmatpush.bf16.msra.mxu1 %v6383_v50  ;;  %v9435_v50 = vor.u32 %v10311_v53, %v9434_v34  ;;  %v6431_v19 = vor.u32 %v9558_v39, %v6428_v10  ;;  %v5250_v47 = vadd.f32 %v5249_v51, %v5237_v6  ;;  %v9427_v34 = vor.u32 %v10309_v35, %v9426_v33  ;;  %v9572_v53 = vld [vmem:[%s15455_s1 + $0x124] sm:$0xf]  ;;  %v6484_v55 = vld [vmem:[%s15455_s1 + $0x128] sm:$0xf0]  ;;  %v9418_v10 = vld [vmem:[%s15455_s1 + $0x1810] sm:$0xf] }
 0x18e   :  { %5502 = vmatpush.bf16.msra.mxu2 %v6447_v7  ;;  %v9574_v7 = vld [vmem:[%s15455_s1 + $0x134] sm:$0xf]  ;;  %v6476_v35 = vld [vmem:[%s15455_s1 + $0x118] sm:$0xf0] }
 0x18f   :  { %5515 = vmatpush.bf16.msra.mxu3 %v6511_v46  ;;  %v9540_v46 = vld [vmem:[%s15455_s1 + $0x24] sm:$0xf]  ;;  %v6495_v62 = vor.u32 %v9574_v7, %v6492_v29  ;;  %v6348_v7 = vld [vmem:[%s15455_s1 + $0x18] sm:$0xf0]  ;;  %v9554_v29 = vld [vmem:[%s15455_s1 + $0x94] sm:$0xf] }
 0x190   :  { %5477 = vmatpush.bf16.msra.mxu0 %v9443_v49  ;;  %v9556_v49 = vld [vmem:[%s15455_s1 + $0xa4] sm:$0xf]  ;;  %v6359_v18 = vor.u32 %v9540_v46, %v6356_v30  ;;  %v9570_v51 = vld [vmem:[%s15455_s1 + $0x114] sm:$0xf]  ;;  %v9410_v46 = vld [vmem:[%s15455_s1 + $0x1800] sm:$0xf] }
 0x191   :  { %5490 = vmatpush.bf16.msra.mxu1 %v6375_v54  ;;  %v5225_v54 = vpop.f32.mrf.mxu0  ;;  %v5238_v6 = vpop.f32.mrf.mxu1  ;;  %v6423_v39 = vor.u32 %v9556_v49, %v6420_v36  ;;  %v9536_v36 = vld [vmem:[%s15455_s1 + $0x4] sm:$0xf] }
 0x192   :  { %5503 = vmatpush.bf16.msra.mxu2 %v6439_v17  ;;  %v13044_v17 = vadd.f32 %v5262_v32, %v5250_v47  ;;  %v10305_v47 = vld [vmem:[%s15455_s1 + $0x1804] sm:$0xf0]  ;;  %v9552_v32 = vld [vmem:[%s15455_s1 + $0x84] sm:$0xf]  ;;  %v5251_v54 = vpop.f32.mrf.mxu2  ;;  %v6479_v6 = vor.u32 %v9570_v51, %v6476_v35  ;;  %v6780_v35 = vld [vmem:[%s15455_s1 + $0x378] sm:$0xf0] }
 0x193   :  { %5516 = vmatpush.bf16.msra.mxu3 %v6503_v48  ;;  %v10307_v48 = vld [vmem:[%s15455_s1 + $0x1814] sm:$0xf0]  ;;  %v9596_v54 = vld [vmem:[%s15455_s1 + $0x1e4] sm:$0xf] }
 0x194   :  { %5478 = vmatpush.bf16.msra.mxu0 %v9435_v50  ;;  %v9538_v50 = vld [vmem:[%s15455_s1 + $0x14] sm:$0xf]  ;;  %v9419_v33 = vor.u32 %v10307_v48, %v9418_v10  ;;  %v5264_v48 = vpop.f32.mrf.mxu3 }
 0x195   :  { %5491 = vmatpush.bf16.msra.mxu1 %v6367_v25  ;;  %v6412_v25 = vld [vmem:[%s15455_s1 + $0x98] sm:$0xf0]  ;;  %v6351_v30 = vor.u32 %v9538_v50, %v6348_v7  ;;  %v9630_v10 = vld [vmem:[%s15455_s1 + $0x2f4] sm:$0xf]  ;;  %v9411_v50 = vor.u32 %v10305_v47, %v9410_v46 }
 0x196   :  { %5504 = vmatpush.bf16.msra.mxu2 %v6431_v19  ;;  %v6487_v19 = vor.u32 %v9572_v53, %v6484_v55  ;;  %v6415_v49 = vor.u32 %v9554_v29, %v6412_v25  ;;  %v9598_v53 = vld [vmem:[%s15455_s1 + $0x1f4] sm:$0xf]  ;;  %v6588_v55 = vld [vmem:[%s15455_s1 + $0x1f8] sm:$0xf0]  ;;  %v9568_v29 = vld [vmem:[%s15455_s1 + $0x104] sm:$0xf] }
 0x197   :  { %5517 = vmatpush.bf16.msra.mxu3 %v6495_v62  ;;  %v6340_v62 = vld [vmem:[%s15455_s1 + $0x8] sm:$0xf0]  ;;  %v6716_v7 = vld [vmem:[%s15455_s1 + $0x2f8] sm:$0xf0]  ;;  %v6591_v46 = vor.u32 %v9598_v53, %v6588_v55  ;;  %v880_v55 = vld [vmem:[#allocation1] sm:$0xff] }
 0x198   :  { %5479 = vmatpush.bf16.msra.mxu0 %v9427_v34  ;;  %v6404_v34 = vld [vmem:[%s15455_s1 + $0x88] sm:$0xf0]  ;;  %v6719_v48 = vor.u32 %v9630_v10, %v6716_v7 }
 0x199   :  { %5492 = vmatpush.bf16.msra.mxu1 %v6359_v18  ;;  %v9614_v18 = vld [vmem:[%s15455_s1 + $0x274] sm:$0xf]  ;;  %v6468_v25 = vld [vmem:[%s15455_s1 + $0x108] sm:$0xf0]  ;;  %v6407_v51 = vor.u32 %v9552_v32, %v6404_v34  ;;  %v9628_v34 = vld [vmem:[%s15455_s1 + $0x2e4] sm:$0xf] }
 0x19a   :  { %5505 = vmatpush.bf16.msra.mxu2 %v6423_v39  ;;  %v6652_v39 = vld [vmem:[%s15455_s1 + $0x278] sm:$0xf0]  ;;  %v6708_v53 = vld [vmem:[%s15455_s1 + $0x2e8] sm:$0xf0] }
 0x19b   :  { %5518 = vmatpush.bf16.msra.mxu3 %v6487_v19  ;;  %v6343_v19 = vor.u32 %v9536_v36, %v6340_v62  ;;  %v6655_v47 = vor.u32 %v9614_v18, %v6652_v39  ;;  %v9612_v36 = vld [vmem:[%s15455_s1 + $0x264] sm:$0xf]  ;;  %v6644_v62 = vld [vmem:[%s15455_s1 + $0x268] sm:$0xf0]  ;;  %v6711_v7 = vor.u32 %v9628_v34, %v6708_v53 }
 0x19c   :  { %5480 = vmatpush.bf16.msra.mxu0 %v9419_v33  ;;  %v9646_v33 = vld [vmem:[%s15455_s1 + $0x374] sm:$0xf]  ;;  %v6772_v18 = vld [vmem:[%s15455_s1 + $0x368] sm:$0xf0]  ;;  %v6647_v10 = vor.u32 %v9612_v36, %v6644_v62 }
 0x19d   :  { %5493 = vmatpush.bf16.msra.mxu1 %v6351_v30  ;;  %v6471_v30 = vor.u32 %v9568_v29, %v6468_v25  ;;  %v6783_v32 = vor.u32 %v9646_v33, %v6780_v35  ;;  %v6572_v29 = vld [vmem:[%s15455_s1 + $0x1d8] sm:$0xf0]  ;;  %v9610_v25 = vld [vmem:[%s15455_s1 + $0x254] sm:$0xf]  ;;  %v6564_v36 = vld [vmem:[%s15455_s1 + $0x1c8] sm:$0xf0] }
 0x19e   :  { %5506 = vmatpush.bf16.msra.mxu2 %v6415_v49  ;;  %v6580_v49 = vld [vmem:[%s15455_s1 + $0x1e8] sm:$0xf0]  ;;  %v9626_v33 = vld [vmem:[%s15455_s1 + $0x2d4] sm:$0xf]  ;;  %v6700_v35 = vld [vmem:[%s15455_s1 + $0x2d8] sm:$0xf0] }
 0x19f   :  { %5519 = vmatpush.bf16.msra.mxu3 %v6479_v6  ;;  %v9644_v6 = vld [vmem:[%s15455_s1 + $0x364] sm:$0xf]  ;;  %v6583_v39 = vor.u32 %v9596_v54, %v6580_v49  ;;  %v6703_v49 = vor.u32 %v9626_v33, %v6700_v35  ;;  %v6692_v34 = vld [vmem:[%s15455_s1 + $0x2c8] sm:$0xf0]  ;;  %v9622_v33 = vld [vmem:[%s15455_s1 + $0x2b4] sm:$0xf] }
 0x1a0   :  { %5481 = vmatpush.bf16.msra.mxu0 %v9411_v50  ;;  %v9594_v50 = vld [vmem:[%s15455_s1 + $0x1d4] sm:$0xf]  ;;  %v5275_v53 = vpop.f32.mrf.mxu0  ;;  %v6684_v35 = vld [vmem:[%s15455_s1 + $0x2b8] sm:$0xf0] }
 0x1a1   :  { %5494 = vmatpush.bf16.msra.mxu1 %v6343_v19  ;;  %v6636_v19 = vld [vmem:[%s15455_s1 + $0x258] sm:$0xf0]  ;;  %v6575_v54 = vor.u32 %v9594_v50, %v6572_v29  ;;  %v9590_v50 = vld [vmem:[%s15455_s1 + $0x1b4] sm:$0xf] }
 0x1a2   :  { %5507 = vmatpush.bf16.msra.mxu2 %v6407_v51  ;;  %v6775_v51 = vor.u32 %v9644_v6, %v6772_v18  ;;  %v6756_v6 = vld [vmem:[%s15455_s1 + $0x348] sm:$0xf0]  ;;  %v6556_v29 = vld [vmem:[%s15455_s1 + $0x1b8] sm:$0xf0] }
 0x1a3   :  { %5520 = vmatpush.bf16.msra.mxu3 %v6471_v30  ;;  %5482 = vmatmul.bf16.vlgmr.msra.gmra.mxu0 %v880_v55  ;;  %v9592_v30 = vld [vmem:[%s15455_s1 + $0x1c4] sm:$0xf] }
 0x1a4   :  { %5526 = vmatpush.bf16.msrb.mxu0 %v6591_v46  ;;  %v9642_v46 = vld [vmem:[%s15455_s1 + $0x354] sm:$0xf]  ;;  %5495 = vmatmul.bf16.vlgmr.msra.gmra.mxu1 %v10718_v21  ;;  %v6628_v21 = vld [vmem:[%s15455_s1 + $0x248] sm:$0xf0]  ;;  %v9640_v55 = vld [vmem:[%s15455_s1 + $0x344] sm:$0xf]  ;;  %v6567_v18 = vor.u32 %v9592_v30, %v6564_v36 }
 0x1a5   :  { %5539 = vmatpush.bf16.msrb.mxu1 %v6655_v47  ;;  %v6764_v47 = vld [vmem:[%s15455_s1 + $0x358] sm:$0xf0]  ;;  %5508 = vmatmul.bf16.vlgmr.msra.gmra.mxu2 %v10729_v26  ;;  %v9608_v26 = vld [vmem:[%s15455_s1 + $0x244] sm:$0xf] }
 0x1a6   :  { %5552 = vmatpush.bf16.msrb.mxu2 %v6719_v48  ;;  %v6639_v48 = vor.u32 %v9610_v25, %v6636_v19  ;;  %5521 = vmatmul.bf16.vlgmr.msra.gmra.mxu3 %v10716_v20  ;;  %v6767_v62 = vor.u32 %v9642_v46, %v6764_v47  ;;  %v5276_v20 = vadd.f32 %v5275_v53, %v13044_v17  ;;  %v9606_v25 = vld [vmem:[%s15455_s1 + $0x234] sm:$0xf]  ;;  %v6620_v17 = vld [vmem:[%s15455_s1 + $0x238] sm:$0xf0]  ;;  %v9588_v30 = vld [vmem:[%s15455_s1 + $0x1a4] sm:$0xf] }
 0x1a7   :  { %5565 = vmatpush.bf16.msrb.mxu3 %v6783_v32  ;;  %v9624_v32 = vld [vmem:[%s15455_s1 + $0x2c4] sm:$0xf]  ;;  %v9638_v46 = vld [vmem:[%s15455_s1 + $0x334] sm:$0xf]  ;;  %v6748_v47 = vld [vmem:[%s15455_s1 + $0x338] sm:$0xf0] }
 0x1a8   :  { %5527 = vmatpush.bf16.msrb.mxu0 %v6583_v39  ;;  %v6631_v39 = vor.u32 %v9608_v26, %v6628_v21  ;;  %v5301_v36 = vpop.f32.mrf.mxu2  ;;  %v6548_v26 = vld [vmem:[%s15455_s1 + $0x1a8] sm:$0xf0]  ;;  %v9604_v21 = vld [vmem:[%s15455_s1 + $0x224] sm:$0xf] }
 0x1a9   :  { %5540 = vmatpush.bf16.msrb.mxu1 %v6647_v10  ;;  %v5288_v10 = vpop.f32.mrf.mxu1  ;;  %v9620_v53 = vld [vmem:[%s15455_s1 + $0x2a4] sm:$0xf] }
 0x1aa   :  { %5553 = vmatpush.bf16.msrb.mxu2 %v6711_v7  ;;  %v6695_v7 = vor.u32 %v9624_v32, %v6692_v34  ;;  %v5289_v19 = vadd.f32 %v5288_v10, %v5276_v20  ;;  %v6751_v34 = vor.u32 %v9638_v46, %v6748_v47  ;;  %v9636_v20 = vld [vmem:[%s15455_s1 + $0x324] sm:$0xf]  ;;  %v9618_v46 = vld [vmem:[%s15455_s1 + $0x294] sm:$0xf]  ;;  %v6668_v47 = vld [vmem:[%s15455_s1 + $0x298] sm:$0xf0] }
 0x1ab   :  { %5566 = vmatpush.bf16.msrb.mxu3 %v6775_v51  ;;  %v6759_v51 = vor.u32 %v9640_v55, %v6756_v6  ;;  %v6676_v55 = vld [vmem:[%s15455_s1 + $0x2a8] sm:$0xf0]  ;;  %v5314_v6 = vpop.f32.mrf.mxu3 }
 0x1ac   :  { %5528 = vmatpush.bf16.msrb.mxu0 %v6575_v54  ;;  %v6559_v54 = vor.u32 %v9590_v50, %v6556_v29  ;;  %v5302_v32 = vadd.f32 %v5301_v36, %v5289_v19  ;;  %v6551_v50 = vor.u32 %v9588_v30, %v6548_v26  ;;  %v9586_v29 = vld [vmem:[%s15455_s1 + $0x194] sm:$0xf]  ;;  %v6540_v19 = vld [vmem:[%s15455_s1 + $0x198] sm:$0xf0]  ;;  %v9584_v36 = vld [vmem:[%s15455_s1 + $0x184] sm:$0xf] }
 0x1ad   :  { %5541 = vmatpush.bf16.msrb.mxu1 %v6639_v48  ;;  %v6623_v48 = vor.u32 %v9606_v25, %v6620_v17  ;;  %v6679_v17 = vor.u32 %v9620_v53, %v6676_v55  ;;  %v6543_v30 = vor.u32 %v9586_v29, %v6540_v19  ;;  %v6532_v26 = vld [vmem:[%s15455_s1 + $0x188] sm:$0xf0]  ;;  %v6972_v29 = vld [vmem:[%s15455_s1 + $0x4f8] sm:$0xf0] }
 0x1ae   :  { %5554 = vmatpush.bf16.msrb.mxu2 %v6703_v49  ;;  %v6687_v49 = vor.u32 %v9622_v33, %v6684_v35  ;;  %v13248_v10 = vadd.f32 %v5314_v6, %v5302_v32  ;;  %v6604_v33 = vld [vmem:[%s15455_s1 + $0x218] sm:$0xf0]  ;;  %v6596_v32 = vld [vmem:[%s15455_s1 + $0x208] sm:$0xf0] }
 0x1af   :  { %5567 = vmatpush.bf16.msrb.mxu3 %v6767_v62  ;;  %v6612_v62 = vld [vmem:[%s15455_s1 + $0x228] sm:$0xf0] }
 0x1b0   :  { %5529 = vmatpush.bf16.msrb.mxu0 %v6567_v18  ;;  %v6740_v18 = vld [vmem:[%s15455_s1 + $0x328] sm:$0xf0]  ;;  %v5303_v55 = vpop.f32.mrf.mxu2 }
 0x1b1   :  { %5542 = vmatpush.bf16.msrb.mxu1 %v6631_v39  ;;  %v5277_v39 = vpop.f32.mrf.mxu0  ;;  %v5290_v25 = vpop.f32.mrf.mxu1  ;;  %v6743_v35 = vor.u32 %v9636_v20, %v6740_v18  ;;  %v6660_v53 = vld [vmem:[%s15455_s1 + $0x288] sm:$0xf0]  ;;  %v9662_v20 = vld [vmem:[%s15455_s1 + $0x3f4] sm:$0xf]  ;;  %v6844_v18 = vld [vmem:[%s15455_s1 + $0x3f8] sm:$0xf0] }
 0x1b2   :  { %5555 = vmatpush.bf16.msrb.mxu2 %v6695_v7  ;;  %v6615_v7 = vor.u32 %v9604_v21, %v6612_v62  ;;  %v9600_v21 = vld [vmem:[%s15455_s1 + $0x204] sm:$0xf]  ;;  %v6671_v62 = vor.u32 %v9618_v46, %v6668_v47  ;;  %v9678_v39 = vld [vmem:[%s15455_s1 + $0x474] sm:$0xf]  ;;  %v6847_v46 = vor.u32 %v9662_v20, %v6844_v18  ;;  %v7028_v20 = vld [vmem:[%s15455_s1 + $0x568] sm:$0xf0] }
 0x1b3   :  { %5568 = vmatpush.bf16.msrb.mxu3 %v6759_v51  ;;  %v9602_v51 = vld [vmem:[%s15455_s1 + $0x214] sm:$0xf]  ;;  %v5316_v25 = vpop.f32.mrf.mxu3  ;;  %v6599_v19 = vor.u32 %v9600_v21, %v6596_v32  ;;  %v9692_v32 = vld [vmem:[%s15455_s1 + $0x4e4] sm:$0xf] }
 0x1b4   :  { %5530 = vmatpush.bf16.msrb.mxu0 %v6559_v54  ;;  %v9634_v54 = vld [vmem:[%s15455_s1 + $0x314] sm:$0xf]  ;;  %v6892_v25 = vld [vmem:[%s15455_s1 + $0x458] sm:$0xf0] }
 0x1b5   :  { %5543 = vmatpush.bf16.msrb.mxu1 %v6623_v48  ;;  %v6732_v48 = vld [vmem:[%s15455_s1 + $0x318] sm:$0xf0]  ;;  %v9710_v47 = vld [vmem:[%s15455_s1 + $0x574] sm:$0xf] }
 0x1b6   :  { %5556 = vmatpush.bf16.msrb.mxu2 %v6687_v49  ;;  %v6607_v49 = vor.u32 %v9602_v51, %v6604_v33  ;;  %v6735_v6 = vor.u32 %v9634_v54, %v6732_v48  ;;  %v9632_v51 = vld [vmem:[%s15455_s1 + $0x304] sm:$0xf]  ;;  %v6724_v33 = vld [vmem:[%s15455_s1 + $0x308] sm:$0xf0]  ;;  %v7036_v54 = vld [vmem:[%s15455_s1 + $0x578] sm:$0xf0] }
 0x1b7   :  { %5569 = vmatpush.bf16.msrb.mxu3 %v6751_v34  ;;  %v9616_v34 = vld [vmem:[%s15455_s1 + $0x284] sm:$0xf]  ;;  %v6727_v21 = vor.u32 %v9632_v51, %v6724_v33 }
 0x1b8   :  { %5531 = vmatpush.bf16.msrb.mxu0 %v6551_v50  ;;  %v6908_v50 = vld [vmem:[%s15455_s1 + $0x478] sm:$0xf0] }
 0x1b9   :  { %5544 = vmatpush.bf16.msrb.mxu1 %v6615_v7  ;;  %v9694_v7 = vld [vmem:[%s15455_s1 + $0x4f4] sm:$0xf]  ;;  %v6911_v48 = vor.u32 %v9678_v39, %v6908_v50 }
 0x1ba   :  { %5557 = vmatpush.bf16.msrb.mxu2 %v6679_v17  ;;  %v6535_v17 = vor.u32 %v9584_v36, %v6532_v26  ;;  %v6836_v36 = vld [vmem:[%s15455_s1 + $0x3e8] sm:$0xf0]  ;;  %v9676_v26 = vld [vmem:[%s15455_s1 + $0x464] sm:$0xf]  ;;  %v9658_v50 = vld [vmem:[%s15455_s1 + $0x3d4] sm:$0xf] }
 0x1bb   :  { %5570 = vmatpush.bf16.msrb.mxu3 %v6743_v35  ;;  %v6663_v35 = vor.u32 %v9616_v34, %v6660_v53  ;;  %v6964_v34 = vld [vmem:[%s15455_s1 + $0x4e8] sm:$0xf0]  ;;  %v7039_v53 = vor.u32 %v9710_v47, %v7036_v54  ;;  %v9672_v54 = vld [vmem:[%s15455_s1 + $0x444] sm:$0xf] }
 0x1bc   :  { %5532 = vmatpush.bf16.msrb.mxu0 %v6543_v30  ;;  %v6975_v30 = vor.u32 %v9694_v7, %v6972_v29  ;;  %v6967_v39 = vor.u32 %v9692_v32, %v6964_v34  ;;  %v6828_v7 = vld [vmem:[%s15455_s1 + $0x3d8] sm:$0xf0]  ;;  %v9674_v29 = vld [vmem:[%s15455_s1 + $0x454] sm:$0xf] }
 0x1bd   :  { %5545 = vmatpush.bf16.msrb.mxu1 %v6607_v49  ;;  %v9660_v49 = vld [vmem:[%s15455_s1 + $0x3e4] sm:$0xf]  ;;  %v6831_v33 = vor.u32 %v9658_v50, %v6828_v7  ;;  %v6940_v50 = vld [vmem:[%s15455_s1 + $0x4b8] sm:$0xf0] }
 0x1be   :  { %5558 = vmatpush.bf16.msrb.mxu2 %v6671_v62  ;;  %v6900_v62 = vld [vmem:[%s15455_s1 + $0x468] sm:$0xf0]  ;;  %v6839_v55 = vor.u32 %v9660_v49, %v6836_v36 }
 0x1bf   :  { %5571 = vmatpush.bf16.msrb.mxu3 %v6735_v6  ;;  %v9708_v6 = vld [vmem:[%s15455_s1 + $0x564] sm:$0xf]  ;;  %v6903_v18 = vor.u32 %v9676_v26, %v6900_v62  ;;  %v6948_v49 = vld [vmem:[%s15455_s1 + $0x4c8] sm:$0xf0] }
 0x1c0   :  { %5533 = vmatpush.bf16.msrb.mxu0 %v6535_v17  ;;  %v9690_v17 = vld [vmem:[%s15455_s1 + $0x4d4] sm:$0xf]  ;;  %v7031_v51 = vor.u32 %v9708_v6, %v7028_v20  ;;  %v5327_v26 = vpop.f32.mrf.mxu0  ;;  %v7012_v62 = vld [vmem:[%s15455_s1 + $0x548] sm:$0xf0]  ;;  %v6812_v20 = vld [vmem:[%s15455_s1 + $0x3b8] sm:$0xf0] }
 0x1c1   :  { %5546 = vmatpush.bf16.msrb.mxu1 %v6599_v19  ;;  %v6956_v19 = vld [vmem:[%s15455_s1 + $0x4d8] sm:$0xf0]  ;;  %v5328_v32 = vadd.f32 %v5327_v26, %v13248_v10  ;;  %v9654_v6 = vld [vmem:[%s15455_s1 + $0x3b4] sm:$0xf]  ;;  %v9700_v26 = vld [vmem:[%s15455_s1 + $0x524] sm:$0xf] }
 0x1c2   :  { %5559 = vmatpush.bf16.msrb.mxu2 %v6663_v35  ;;  %v7020_v35 = vld [vmem:[%s15455_s1 + $0x558] sm:$0xf0]  ;;  %v6959_v47 = vor.u32 %v9690_v17, %v6956_v19  ;;  %v9686_v10 = vld [vmem:[%s15455_s1 + $0x4b4] sm:$0xf] }
 0x1c3   :  { %5572 = vmatpush.bf16.msrb.mxu3 %v6727_v21  ;;  %5534 = vmatmul.bf16.vlgmr.msrb.gmra.mxu0 %v10720_v22  ;;  %v9706_v22 = vld [vmem:[%s15455_s1 + $0x554] sm:$0xf]  ;;  %v7004_v19 = vld [vmem:[%s15455_s1 + $0x538] sm:$0xf0] }
 0x1c4   :  { %5578 = vmatpush.bf16.msra.mxu0 %v6847_v46  ;;  %5547 = vmatmul.bf16.vlgmr.msrb.gmra.mxu1 %v10802_v58  ;;  %v6895_v46 = vor.u32 %v9674_v29, %v6892_v25  ;;  %v6820_v58 = vld [vmem:[%s15455_s1 + $0x3c8] sm:$0xf0]  ;;  %v7023_v36 = vor.u32 %v9706_v22, %v7020_v35  ;;  %v6815_v25 = vor.u32 %v9654_v6, %v6812_v20  ;;  %v9702_v17 = vld [vmem:[%s15455_s1 + $0x534] sm:$0xf]  ;;  %v9652_v22 = vld [vmem:[%s15455_s1 + $0x3a4] sm:$0xf] }
 0x1c5   :  { %5591 = vmatpush.bf16.msra.mxu1 %v6911_v48  ;;  %5560 = vmatmul.bf16.vlgmr.msrb.gmra.mxu2 %v10809_v63  ;;  %v9656_v63 = vld [vmem:[%s15455_s1 + $0x3c4] sm:$0xf]  ;;  %v6884_v48 = vld [vmem:[%s15455_s1 + $0x448] sm:$0xf0]  ;;  %v9666_v6 = vld [vmem:[%s15455_s1 + $0x414] sm:$0xf] }
 0x1c6   :  { %5604 = vmatpush.bf16.msra.mxu2 %v6975_v30  ;;  %5573 = vmatmul.bf16.vlgmr.msrb.gmra.mxu3 %v10800_v57  ;;  %v9688_v30 = vld [vmem:[%s15455_s1 + $0x4c4] sm:$0xf]  ;;  %v6823_v21 = vor.u32 %v9656_v63, %v6820_v58  ;;  %v6887_v34 = vor.u32 %v9672_v54, %v6884_v48  ;;  %v6804_v35 = vld [vmem:[%s15455_s1 + $0x3a8] sm:$0xf0] }
 0x1c7   :  { %5617 = vmatpush.bf16.msra.mxu3 %v7039_v53  ;;  %v9704_v57 = vld [vmem:[%s15455_s1 + $0x544] sm:$0xf]  ;;  %v6951_v53 = vor.u32 %v9688_v30, %v6948_v49  ;;  %v6868_v63 = vld [vmem:[%s15455_s1 + $0x428] sm:$0xf0]  ;;  %v7007_v30 = vor.u32 %v9702_v17, %v7004_v19 }
 0x1c8   :  { %5579 = vmatpush.bf16.msra.mxu0 %v6839_v55  ;;  %v5340_v55 = vpop.f32.mrf.mxu1  ;;  %v7015_v29 = vor.u32 %v9704_v57, %v7012_v62  ;;  %v9684_v58 = vld [vmem:[%s15455_s1 + $0x4a4] sm:$0xf]  ;;  %v6932_v54 = vld [vmem:[%s15455_s1 + $0x4a8] sm:$0xf0]  ;;  %v5329_v57 = vpop.f32.mrf.mxu0 }
 0x1c9   :  { %5592 = vmatpush.bf16.msra.mxu1 %v6903_v18  ;;  %v9670_v18 = vld [vmem:[%s15455_s1 + $0x434] sm:$0xf]  ;;  %v5341_v7 = vadd.f32 %v5340_v55, %v5328_v32  ;;  %v5366_v49 = vpop.f32.mrf.mxu3  ;;  %v6796_v55 = vld [vmem:[%s15455_s1 + $0x398] sm:$0xf0]  ;;  %v9648_v17 = vld [vmem:[%s15455_s1 + $0x384] sm:$0xf] }
 0x1ca   :  { %5605 = vmatpush.bf16.msra.mxu2 %v6967_v39  ;;  %v6876_v39 = vld [vmem:[%s15455_s1 + $0x438] sm:$0xf0]  ;;  %v6788_v19 = vld [vmem:[%s15455_s1 + $0x388] sm:$0xf0]  ;;  %v9696_v57 = vld [vmem:[%s15455_s1 + $0x504] sm:$0xf] }
 0x1cb   :  { %5618 = vmatpush.bf16.msra.mxu3 %v7031_v51  ;;  %v6879_v51 = vor.u32 %v9670_v18, %v6876_v39  ;;  %v6860_v18 = vld [vmem:[%s15455_s1 + $0x418] sm:$0xf0]  ;;  %v9682_v39 = vld [vmem:[%s15455_s1 + $0x494] sm:$0xf] }
 0x1cc   :  { %5580 = vmatpush.bf16.msra.mxu0 %v6831_v33  ;;  %v6943_v33 = vor.u32 %v9686_v10, %v6940_v50  ;;  %v6924_v10 = vld [vmem:[%s15455_s1 + $0x498] sm:$0xf0] }
 0x1cd   :  { %5593 = vmatpush.bf16.msra.mxu1 %v6895_v46  ;;  %v9668_v46 = vld [vmem:[%s15455_s1 + $0x424] sm:$0xf] }
 0x1ce   :  { %5606 = vmatpush.bf16.msra.mxu2 %v6959_v47  ;;  %v5353_v47 = vpop.f32.mrf.mxu2  ;;  %v6871_v32 = vor.u32 %v9668_v46, %v6868_v63  ;;  %v9680_v46 = vld [vmem:[%s15455_s1 + $0x484] sm:$0xf]  ;;  %v9726_v63 = vld [vmem:[%s15455_s1 + $0x5f4] sm:$0xf] }
 0x1cf   :  { %5619 = vmatpush.bf16.msra.mxu3 %v7023_v36  ;;  %v5354_v48 = vadd.f32 %v5353_v47, %v5341_v7  ;;  %v6807_v36 = vor.u32 %v9652_v22, %v6804_v35  ;;  %v9698_v7 = vld [vmem:[%s15455_s1 + $0x514] sm:$0xf]  ;;  %v9664_v22 = vld [vmem:[%s15455_s1 + $0x404] sm:$0xf]  ;;  %v6852_v35 = vld [vmem:[%s15455_s1 + $0x408] sm:$0xf0] }
 0x1d0   :  { %5581 = vmatpush.bf16.msra.mxu0 %v6823_v21  ;;  %v6996_v21 = vld [vmem:[%s15455_s1 + $0x528] sm:$0xf0]  ;;  %v5342_v20 = vpop.f32.mrf.mxu1 }
 0x1d1   :  { %5594 = vmatpush.bf16.msra.mxu1 %v6887_v34  ;;  %v13447_v62 = vadd.f32 %v5366_v49, %v5354_v48  ;;  %v6935_v34 = vor.u32 %v9684_v58, %v6932_v54  ;;  %v6999_v50 = vor.u32 %v9700_v26, %v6996_v21  ;;  %v6916_v47 = vld [vmem:[%s15455_s1 + $0x488] sm:$0xf0]  ;;  %v7100_v58 = vld [vmem:[%s15455_s1 + $0x5f8] sm:$0xf0]  ;;  %v6791_v26 = vor.u32 %v9648_v17, %v6788_v19  ;;  %v9756_v19 = vld [vmem:[%s15455_s1 + $0x6e4] sm:$0xf] }
 0x1d2   :  { %5607 = vmatpush.bf16.msra.mxu2 %v6951_v53  ;;  %v9650_v53 = vld [vmem:[%s15455_s1 + $0x394] sm:$0xf]  ;;  %v7164_v49 = vld [vmem:[%s15455_s1 + $0x678] sm:$0xf0]  ;;  %v7156_v17 = vld [vmem:[%s15455_s1 + $0x668] sm:$0xf0] }
 0x1d3   :  { %5620 = vmatpush.bf16.msra.mxu3 %v7015_v29  ;;  %v6799_v29 = vor.u32 %v9650_v53, %v6796_v55  ;;  %v7228_v21 = vld [vmem:[%s15455_s1 + $0x6f8] sm:$0xf0]  ;;  %v6855_v53 = vor.u32 %v9664_v22, %v6852_v35  ;;  %v6919_v55 = vor.u32 %v9680_v46, %v6916_v47  ;;  %v9772_v35 = vld [vmem:[%s15455_s1 + $0x764] sm:$0xf]  ;;  %v7284_v46 = vld [vmem:[%s15455_s1 + $0x768] sm:$0xf0] }
 0x1d4   :  { %5582 = vmatpush.bf16.msra.mxu0 %v6815_v25  ;;  %v6988_v25 = vld [vmem:[%s15455_s1 + $0x518] sm:$0xf0] }
 0x1d5   :  { %5595 = vmatpush.bf16.msra.mxu1 %v6879_v51  ;;  %v6863_v51 = vor.u32 %v9666_v6, %v6860_v18  ;;  %v6991_v48 = vor.u32 %v9698_v7, %v6988_v25  ;;  %v7103_v6 = vor.u32 %v9726_v63, %v7100_v58  ;;  %v9774_v18 = vld [vmem:[%s15455_s1 + $0x774] sm:$0xf]  ;;  %v9724_v7 = vld [vmem:[%s15455_s1 + $0x5e4] sm:$0xf] }
 0x1d6   :  { %5608 = vmatpush.bf16.msra.mxu2 %v6943_v33  ;;  %v6927_v33 = vor.u32 %v9682_v39, %v6924_v10  ;;  %v5355_v54 = vpop.f32.mrf.mxu2  ;;  %v7292_v39 = vld [vmem:[%s15455_s1 + $0x778] sm:$0xf0]  ;;  %v9740_v25 = vld [vmem:[%s15455_s1 + $0x664] sm:$0xf]  ;;  %v9722_v58 = vld [vmem:[%s15455_s1 + $0x5d4] sm:$0xf] }
 0x1d7   :  { %5621 = vmatpush.bf16.msra.mxu3 %v7007_v30  ;;  %v9742_v30 = vld [vmem:[%s15455_s1 + $0x674] sm:$0xf]  ;;  %v7159_v47 = vor.u32 %v9740_v25, %v7156_v17  ;;  %v7084_v54 = vld [vmem:[%s15455_s1 + $0x5d8] sm:$0xf0] }
 0x1d8   :  { %5583 = vmatpush.bf16.msra.mxu0 %v6807_v36  ;;  %v9758_v36 = vld [vmem:[%s15455_s1 + $0x6f4] sm:$0xf]  ;;  %v7167_v20 = vor.u32 %v9742_v30, %v7164_v49  ;;  %v7148_v30 = vld [vmem:[%s15455_s1 + $0x658] sm:$0xf0] }
 0x1d9   :  { %5596 = vmatpush.bf16.msra.mxu1 %v6871_v32  ;;  %v6980_v32 = vld [vmem:[%s15455_s1 + $0x508] sm:$0xf0]  ;;  %v7231_v10 = vor.u32 %v9758_v36, %v7228_v21  ;;  %v9754_v49 = vld [vmem:[%s15455_s1 + $0x6d4] sm:$0xf]  ;;  %v7212_v36 = vld [vmem:[%s15455_s1 + $0x6d8] sm:$0xf0] }
 0x1da   :  { %5609 = vmatpush.bf16.msra.mxu2 %v6935_v34  ;;  %v5368_v34 = vpop.f32.mrf.mxu3  ;;  %v7276_v21 = vld [vmem:[%s15455_s1 + $0x758] sm:$0xf0] }
 0x1db   :  { %5622 = vmatpush.bf16.msra.mxu3 %v6999_v50  ;;  %v6983_v50 = vor.u32 %v9696_v57, %v6980_v32  ;;  %v7215_v32 = vor.u32 %v9754_v49, %v7212_v36  ;;  %v9736_v34 = vld [vmem:[%s15455_s1 + $0x644] sm:$0xf]  ;;  %v7060_v36 = vld [vmem:[%s15455_s1 + $0x5a8] sm:$0xf0] }
 0x1dc   :  { %5584 = vmatpush.bf16.msra.mxu0 %v6799_v29  ;;  %v7092_v29 = vld [vmem:[%s15455_s1 + $0x5e8] sm:$0xf0]  ;;  %v9716_v49 = vld [vmem:[%s15455_s1 + $0x5a4] sm:$0xf] }
 0x1dd   :  { %5597 = vmatpush.bf16.msra.mxu1 %v6863_v51  ;;  %v7220_v51 = vld [vmem:[%s15455_s1 + $0x6e8] sm:$0xf0]  ;;  %v7095_v22 = vor.u32 %v9724_v7, %v7092_v29 }
 0x1de   :  { %5610 = vmatpush.bf16.msra.mxu2 %v6927_v33  ;;  %v7295_v33 = vor.u32 %v9774_v18, %v7292_v39  ;;  %v7223_v63 = vor.u32 %v9756_v19, %v7220_v51  ;;  %v9718_v19 = vld [vmem:[%s15455_s1 + $0x5b4] sm:$0xf]  ;;  %v7068_v51 = vld [vmem:[%s15455_s1 + $0x5b8] sm:$0xf0] }
 0x1df   :  { %5623 = vmatpush.bf16.msra.mxu3 %v6991_v48  ;;  %v9738_v48 = vld [vmem:[%s15455_s1 + $0x654] sm:$0xf] }
 0x1e0   :  { %5585 = vmatpush.bf16.msra.mxu0 %v6791_v26  ;;  %v7287_v26 = vor.u32 %v9772_v35, %v7284_v46  ;;  %v7151_v57 = vor.u32 %v9738_v48, %v7148_v30  ;;  %v5379_v18 = vpop.f32.mrf.mxu0  ;;  %v7196_v35 = vld [vmem:[%s15455_s1 + $0x6b8] sm:$0xf0] }
 0x1e1   :  { %5598 = vmatpush.bf16.msra.mxu1 %v6855_v53  ;;  %v7140_v53 = vld [vmem:[%s15455_s1 + $0x648] sm:$0xf0]  ;;  %v5380_v7 = vadd.f32 %v5379_v18, %v13447_v62  ;;  %v5392_v17 = vpop.f32.mrf.mxu1  ;;  %v9750_v62 = vld [vmem:[%s15455_s1 + $0x6b4] sm:$0xf] }
 0x1e2   :  { %5611 = vmatpush.bf16.msra.mxu2 %v6919_v55  ;;  %v9752_v55 = vld [vmem:[%s15455_s1 + $0x6c4] sm:$0xf]  ;;  %v7143_v29 = vor.u32 %v9736_v34, %v7140_v53  ;;  %v7199_v30 = vor.u32 %v9750_v62, %v7196_v35  ;;  %v7063_v34 = vor.u32 %v9716_v49, %v7060_v36  ;;  %v7244_v62 = vld [vmem:[%s15455_s1 + $0x718] sm:$0xf0]  ;;  %v9790_v49 = vld [vmem:[%s15455_s1 + $0x7f4] sm:$0xf] }
 0x1e3   :  { %5624 = vmatpush.bf16.msra.mxu3 %v6983_v50  ;;  %5586 = vmatmul.bf16.vlgmr.msra.gmra.mxu0 %v10804_v61  ;;  %v7087_v61 = vor.u32 %v9722_v58, %v7084_v54  ;;  %v7268_v50 = vld [vmem:[%s15455_s1 + $0x748] sm:$0xf0]  ;;  %v5393_v46 = vadd.f32 %v5392_v17, %v5380_v7  ;;  %v9766_v58 = vld [vmem:[%s15455_s1 + $0x734] sm:$0xf]  ;;  %v7260_v54 = vld [vmem:[%s15455_s1 + $0x738] sm:$0xf0] }
 0x1e4   :  { %5630 = vmatpush.bf16.msrb.mxu0 %v7103_v6  ;;  %5599 = vmatmul.bf16.vlgmr.msra.gmra.mxu1 %v11061_v11  ;;  %v9720_v11 = vld [vmem:[%s15455_s1 + $0x5c4] sm:$0xf]  ;;  %v7204_v6 = vld [vmem:[%s15455_s1 + $0x6c8] sm:$0xf0]  ;;  %v9730_v7 = vld [vmem:[%s15455_s1 + $0x614] sm:$0xf] }
 0x1e5   :  { %5643 = vmatpush.bf16.msrb.mxu1 %v7167_v20  ;;  %5612 = vmatmul.bf16.vlgmr.msra.gmra.mxu2 %v11065_v14  ;;  %v9770_v14 = vld [vmem:[%s15455_s1 + $0x754] sm:$0xf]  ;;  %v7207_v25 = vor.u32 %v9752_v55, %v7204_v6  ;;  %v9764_v53 = vld [vmem:[%s15455_s1 + $0x724] sm:$0xf]  ;;  %v7252_v55 = vld [vmem:[%s15455_s1 + $0x728] sm:$0xf0] }
 0x1e6   :  { %5656 = vmatpush.bf16.msrb.mxu2 %v7231_v10  ;;  %5625 = vmatmul.bf16.vlgmr.msra.gmra.mxu3 %v11063_v12  ;;  %v7076_v12 = vld [vmem:[%s15455_s1 + $0x5c8] sm:$0xf0]  ;;  %v7279_v20 = vor.u32 %v9770_v14, %v7276_v21  ;;  %v9768_v10 = vld [vmem:[%s15455_s1 + $0x744] sm:$0xf]  ;;  %v9746_v17 = vld [vmem:[%s15455_s1 + $0x694] sm:$0xf] }
 0x1e7   :  { %5669 = vmatpush.bf16.msrb.mxu3 %v7295_v33  ;;  %v7079_v39 = vor.u32 %v9720_v11, %v7076_v12  ;;  %v9734_v33 = vld [vmem:[%s15455_s1 + $0x634] sm:$0xf]  ;;  %v7124_v14 = vld [vmem:[%s15455_s1 + $0x628] sm:$0xf0]  ;;  %v9748_v21 = vld [vmem:[%s15455_s1 + $0x6a4] sm:$0xf]  ;;  %v7263_v11 = vor.u32 %v9766_v58, %v7260_v54 }
 0x1e8   :  { %5631 = vmatpush.bf16.msrb.mxu0 %v7095_v22  ;;  %v7132_v22 = vld [vmem:[%s15455_s1 + $0x638] sm:$0xf0]  ;;  %v5381_v6 = vpop.f32.mrf.mxu0  ;;  %v9712_v35 = vld [vmem:[%s15455_s1 + $0x584] sm:$0xf]  ;;  %v7108_v54 = vld [vmem:[%s15455_s1 + $0x608] sm:$0xf0] }
 0x1e9   :  { %5644 = vmatpush.bf16.msrb.mxu1 %v7159_v47  ;;  %v7271_v47 = vor.u32 %v9768_v10, %v7268_v50  ;;  %v7135_v48 = vor.u32 %v9734_v33, %v7132_v22  ;;  %v5418_v12 = vpop.f32.mrf.mxu3  ;;  %v9714_v10 = vld [vmem:[%s15455_s1 + $0x594] sm:$0xf]  ;;  %v7052_v50 = vld [vmem:[%s15455_s1 + $0x598] sm:$0xf0]  ;;  %v9728_v58 = vld [vmem:[%s15455_s1 + $0x604] sm:$0xf] }
 0x1ea   :  { %5657 = vmatpush.bf16.msrb.mxu2 %v7223_v63  ;;  %v7071_v63 = vor.u32 %v9718_v19, %v7068_v51  ;;  %v7180_v19 = vld [vmem:[%s15455_s1 + $0x698] sm:$0xf0]  ;;  %v7255_v51 = vor.u32 %v9764_v53, %v7252_v55  ;;  %v9762_v33 = vld [vmem:[%s15455_s1 + $0x714] sm:$0xf]  ;;  %v7055_v22 = vor.u32 %v9714_v10, %v7052_v50  ;;  %v7111_v55 = vor.u32 %v9728_v58, %v7108_v54 }
 0x1eb   :  { %5670 = vmatpush.bf16.msrb.mxu3 %v7287_v26  ;;  %v9732_v26 = vld [vmem:[%s15455_s1 + $0x624] sm:$0xf]  ;;  %v7356_v36 = vld [vmem:[%s15455_s1 + $0x7f8] sm:$0xf0]  ;;  %v9838_v10 = vld [vmem:[%s15455_s1 + $0x974] sm:$0xf] }
 0x1ec   :  { %5632 = vmatpush.bf16.msrb.mxu0 %v7087_v61  ;;  %v5405_v61 = vpop.f32.mrf.mxu2  ;;  %v7127_v18 = vor.u32 %v9732_v26, %v7124_v14  ;;  %v9806_v14 = vld [vmem:[%s15455_s1 + $0x874] sm:$0xf]  ;;  %v7548_v50 = vld [vmem:[%s15455_s1 + $0x978] sm:$0xf0] }
 0x1ed   :  { %5645 = vmatpush.bf16.msrb.mxu1 %v7151_v57  ;;  %v7188_v57 = vld [vmem:[%s15455_s1 + $0x6a8] sm:$0xf0]  ;;  %v9786_v54 = vld [vmem:[%s15455_s1 + $0x7d4] sm:$0xf] }
 0x1ee   :  { %5658 = vmatpush.bf16.msrb.mxu2 %v7215_v32  ;;  %v5406_v32 = vadd.f32 %v5405_v61, %v5393_v46  ;;  %v7044_v46 = vld [vmem:[%s15455_s1 + $0x588] sm:$0xf0]  ;;  %v7247_v61 = vor.u32 %v9762_v33, %v7244_v62  ;;  %v9820_v33 = vld [vmem:[%s15455_s1 + $0x8e4] sm:$0xf]  ;;  %v7551_v62 = vor.u32 %v9838_v10, %v7548_v50 }
 0x1ef   :  { %5671 = vmatpush.bf16.msrb.mxu3 %v7279_v20 }
 0x1f0   :  { %5633 = vmatpush.bf16.msrb.mxu0 %v7079_v39  ;;  %v13646_v20 = vadd.f32 %v5418_v12, %v5406_v32  ;;  %v7191_v39 = vor.u32 %v9748_v21, %v7188_v57  ;;  %v7420_v21 = vld [vmem:[%s15455_s1 + $0x878] sm:$0xf0]  ;;  %v9822_v57 = vld [vmem:[%s15455_s1 + $0x8f4] sm:$0xf]  ;;  %v7047_v32 = vor.u32 %v9712_v35, %v7044_v46  ;;  %v9760_v12 = vld [vmem:[%s15455_s1 + $0x704] sm:$0xf] }
 0x1f1   :  { %5646 = vmatpush.bf16.msrb.mxu1 %v7143_v29  ;;  %v5394_v29 = vpop.f32.mrf.mxu1  ;;  %v5420_v53 = vpop.f32.mrf.mxu3  ;;  %v9836_v46 = vld [vmem:[%s15455_s1 + $0x964] sm:$0xf] }
 0x1f2   :  { %5659 = vmatpush.bf16.msrb.mxu2 %v7207_v25  ;;  %v7116_v25 = vld [vmem:[%s15455_s1 + $0x618] sm:$0xf0] }
 0x1f3   :  { %5672 = vmatpush.bf16.msrb.mxu3 %v7271_v47  ;;  %v7119_v47 = vor.u32 %v9730_v7, %v7116_v25  ;;  %v9788_v25 = vld [vmem:[%s15455_s1 + $0x7e4] sm:$0xf] }
 0x1f4   :  { %5634 = vmatpush.bf16.msrb.mxu0 %v7071_v63  ;;  %v7183_v63 = vor.u32 %v9746_v17, %v7180_v19  ;;  %v5407_v26 = vpop.f32.mrf.mxu2  ;;  %v7348_v17 = vld [vmem:[%s15455_s1 + $0x7e8] sm:$0xf0]  ;;  %v9804_v19 = vld [vmem:[%s15455_s1 + $0x864] sm:$0xf] }
 0x1f5   :  { %5647 = vmatpush.bf16.msrb.mxu1 %v7135_v48  ;;  %v9744_v48 = vld [vmem:[%s15455_s1 + $0x684] sm:$0xf]  ;;  %v7351_v35 = vor.u32 %v9788_v25, %v7348_v17  ;;  %v7468_v26 = vld [vmem:[%s15455_s1 + $0x8d8] sm:$0xf0]  ;;  %v9782_v25 = vld [vmem:[%s15455_s1 + $0x7b4] sm:$0xf] }
 0x1f6   :  { %5660 = vmatpush.bf16.msrb.mxu2 %v7199_v30  ;;  %v7172_v30 = vld [vmem:[%s15455_s1 + $0x688] sm:$0xf0]  ;;  %v7324_v17 = vld [vmem:[%s15455_s1 + $0x7b8] sm:$0xf0] }
 0x1f7   :  { %5673 = vmatpush.bf16.msrb.mxu3 %v7263_v11  ;;  %v7484_v11 = vld [vmem:[%s15455_s1 + $0x8f8] sm:$0xf0]  ;;  %v7175_v6 = vor.u32 %v9744_v48, %v7172_v30  ;;  %v9802_v30 = vld [vmem:[%s15455_s1 + $0x854] sm:$0xf] }
 0x1f8   :  { %5635 = vmatpush.bf16.msrb.mxu0 %v7063_v34  ;;  %v7236_v34 = vld [vmem:[%s15455_s1 + $0x708] sm:$0xf0]  ;;  %v7487_v7 = vor.u32 %v9822_v57, %v7484_v11  ;;  %v7340_v48 = vld [vmem:[%s15455_s1 + $0x7d8] sm:$0xf0] }
 0x1f9   :  { %5648 = vmatpush.bf16.msrb.mxu1 %v7127_v18  ;;  %v7359_v18 = vor.u32 %v9790_v49, %v7356_v36  ;;  %v7239_v29 = vor.u32 %v9760_v12, %v7236_v34  ;;  %v7404_v49 = vld [vmem:[%s15455_s1 + $0x858] sm:$0xf0]  ;;  %v9818_v36 = vld [vmem:[%s15455_s1 + $0x8d4] sm:$0xf]  ;;  %v7396_v11 = vld [vmem:[%s15455_s1 + $0x848] sm:$0xf0] }
 0x1fa   :  { %5661 = vmatpush.bf16.msrb.mxu2 %v7191_v39  ;;  %v7423_v39 = vor.u32 %v9806_v14, %v7420_v21  ;;  %v7532_v14 = vld [vmem:[%s15455_s1 + $0x958] sm:$0xf0]  ;;  %v7407_v21 = vor.u32 %v9802_v30, %v7404_v49  ;;  %v7471_v57 = vor.u32 %v9818_v36, %v7468_v26  ;;  %v9816_v12 = vld [vmem:[%s15455_s1 + $0x8c4] sm:$0xf]  ;;  %v7460_v34 = vld [vmem:[%s15455_s1 + $0x8c8] sm:$0xf0] }
 0x1fb   :  { %5674 = vmatpush.bf16.msrb.mxu3 %v7255_v51  ;;  %v7412_v51 = vld [vmem:[%s15455_s1 + $0x868] sm:$0xf0]  ;;  %v9796_v30 = vld [vmem:[%s15455_s1 + $0x824] sm:$0xf] }
 0x1fc   :  { %5636 = vmatpush.bf16.msrb.mxu0 %v7055_v22  ;;  %v7476_v22 = vld [vmem:[%s15455_s1 + $0x8e8] sm:$0xf0]  ;;  %v9812_v26 = vld [vmem:[%s15455_s1 + $0x8a4] sm:$0xf] }
 0x1fd   :  { %5649 = vmatpush.bf16.msrb.mxu1 %v7119_v47  ;;  %v7540_v47 = vld [vmem:[%s15455_s1 + $0x968] sm:$0xf0]  ;;  %v7479_v58 = vor.u32 %v9820_v33, %v7476_v22  ;;  %v7452_v33 = vld [vmem:[%s15455_s1 + $0x8b8] sm:$0xf0] }
 0x1fe   :  { %5662 = vmatpush.bf16.msrb.mxu2 %v7183_v63  ;;  %v7415_v63 = vor.u32 %v9804_v19, %v7412_v51  ;;  %v9798_v19 = vld [vmem:[%s15455_s1 + $0x834] sm:$0xf]  ;;  %v7388_v51 = vld [vmem:[%s15455_s1 + $0x838] sm:$0xf0]  ;;  %v7380_v36 = vld [vmem:[%s15455_s1 + $0x828] sm:$0xf0] }
 0x1ff   :  { %5675 = vmatpush.bf16.msrb.mxu3 %v7247_v61  ;;  %v7543_v61 = vor.u32 %v9836_v46, %v7540_v47  ;;  %v9830_v46 = vld [vmem:[%s15455_s1 + $0x934] sm:$0xf]  ;;  %v7516_v47 = vld [vmem:[%s15455_s1 + $0x938] sm:$0xf0] }
 0x200   :  { %5637 = vmatpush.bf16.msrb.mxu0 %v7047_v32  ;;  %v9800_v32 = vld [vmem:[%s15455_s1 + $0x844] sm:$0xf] }
 0x201   :  { %5650 = vmatpush.bf16.msrb.mxu1 %v7111_v55  ;;  %v5431_v55 = vpop.f32.mrf.mxu0  ;;  %v7399_v50 = vor.u32 %v9800_v32, %v7396_v11  ;;  %v7383_v11 = vor.u32 %v9796_v30, %v7380_v36  ;;  %v9886_v30 = vld [vmem:[%s15455_s1 + $0xaf4] sm:$0xf]  ;;  %v7740_v36 = vld [vmem:[%s15455_s1 + $0xaf8] sm:$0xf0] }
 0x202   :  { %5663 = vmatpush.bf16.msrb.mxu2 %v7175_v6  ;;  %v5432_v10 = vadd.f32 %v5431_v55, %v13646_v20  ;;  %v9814_v20 = vld [vmem:[%s15455_s1 + $0x8b4] sm:$0xf] }
 0x203   :  { %5676 = vmatpush.bf16.msrb.mxu3 %v7239_v29  ;;  %5638 = vmatmul.bf16.vlgmr.msrb.gmra.mxu0 %v11067_v15  ;;  %v7343_v15 = vor.u32 %v9786_v54, %v7340_v48  ;;  %v5444_v29 = vpop.f32.mrf.mxu1  ;;  %v9780_v54 = vld [vmem:[%s15455_s1 + $0x7a4] sm:$0xf]  ;;  %v7316_v48 = vld [vmem:[%s15455_s1 + $0x7a8] sm:$0xf0]  ;;  %v9794_v55 = vld [vmem:[%s15455_s1 + $0x814] sm:$0xf] }
 0x204   :  { %5682 = vmatpush.bf16.msra.mxu0 %v7359_v18  ;;  %5651 = vmatmul.bf16.vlgmr.msrb.gmra.mxu1 %v11226_v42  ;;  %v9784_v42 = vld [vmem:[%s15455_s1 + $0x7c4] sm:$0xf]  ;;  %v5445_v22 = vadd.f32 %v5444_v29, %v5432_v10  ;;  %v7436_v10 = vld [vmem:[%s15455_s1 + $0x898] sm:$0xf0] }
 0x205   :  { %5695 = vmatpush.bf16.msra.mxu1 %v7423_v39  ;;  %5664 = vmatmul.bf16.vlgmr.msrb.gmra.mxu2 %v11230_v44  ;;  %v9834_v44 = vld [vmem:[%s15455_s1 + $0x954] sm:$0xf]  ;;  %v9832_v18 = vld [vmem:[%s15455_s1 + $0x944] sm:$0xf]  ;;  %v7524_v39 = vld [vmem:[%s15455_s1 + $0x948] sm:$0xf0] }
 0x206   :  { %5708 = vmatpush.bf16.msra.mxu2 %v7487_v7  ;;  %5677 = vmatmul.bf16.vlgmr.msrb.gmra.mxu3 %v11228_v43  ;;  %v7332_v43 = vld [vmem:[%s15455_s1 + $0x7c8] sm:$0xf0]  ;;  %v7535_v53 = vor.u32 %v9834_v44, %v7532_v14  ;;  %v7463_v7 = vor.u32 %v9816_v12, %v7460_v34  ;;  %v7519_v44 = vor.u32 %v9830_v46, %v7516_v47  ;;  %v9778_v34 = vld [vmem:[%s15455_s1 + $0x794] sm:$0xf]  ;;  %v7612_v47 = vld [vmem:[%s15455_s1 + $0x9f8] sm:$0xf0] }
 0x207   :  { %5721 = vmatpush.bf16.msra.mxu3 %v7551_v62  ;;  %v7335_v6 = vor.u32 %v9784_v42, %v7332_v43  ;;  %v7527_v62 = vor.u32 %v9832_v18, %v7524_v39  ;;  %v7508_v42 = vld [vmem:[%s15455_s1 + $0x928] sm:$0xf0]  ;;  %v7372_v18 = vld [vmem:[%s15455_s1 + $0x818] sm:$0xf0]  ;;  %v9810_v39 = vld [vmem:[%s15455_s1 + $0x894] sm:$0xf] }
 0x208   :  { %5683 = vmatpush.bf16.msra.mxu0 %v7351_v35  ;;  %v7327_v35 = vor.u32 %v9782_v25, %v7324_v17  ;;  %v5457_v49 = vpop.f32.mrf.mxu2  ;;  %v7500_v25 = vld [vmem:[%s15455_s1 + $0x918] sm:$0xf0]  ;;  %v9776_v17 = vld [vmem:[%s15455_s1 + $0x784] sm:$0xf]  ;;  %v9854_v46 = vld [vmem:[%s15455_s1 + $0x9f4] sm:$0xf] }
 0x209   :  { %5696 = vmatpush.bf16.msra.mxu1 %v7415_v63  ;;  %v7391_v63 = vor.u32 %v9798_v19, %v7388_v51  ;;  %v5470_v14 = vpop.f32.mrf.mxu3  ;;  %v5433_v43 = vpop.f32.mrf.mxu0  ;;  %v7300_v19 = vld [vmem:[%s15455_s1 + $0x788] sm:$0xf0]  ;;  %v7375_v51 = vor.u32 %v9794_v55, %v7372_v18  ;;  %v9868_v55 = vld [vmem:[%s15455_s1 + $0xa64] sm:$0xf] }
 0x20a   :  { %5709 = vmatpush.bf16.msra.mxu2 %v7479_v58  ;;  %v7455_v58 = vor.u32 %v9814_v20, %v7452_v33  ;;  %v7439_v20 = vor.u32 %v9810_v39, %v7436_v10  ;;  %v9792_v33 = vld [vmem:[%s15455_s1 + $0x804] sm:$0xf]  ;;  %v7804_v43 = vld [vmem:[%s15455_s1 + $0xb78] sm:$0xf0]  ;;  %v7732_v39 = vld [vmem:[%s15455_s1 + $0xae8] sm:$0xf0] }
 0x20b   :  { %5722 = vmatpush.bf16.msra.mxu3 %v7543_v61  ;;  %v7444_v61 = vld [vmem:[%s15455_s1 + $0x8a8] sm:$0xf0]  ;;  %v9884_v18 = vld [vmem:[%s15455_s1 + $0xae4] sm:$0xf] }
 0x20c   :  { %5684 = vmatpush.bf16.msra.mxu0 %v7343_v15  ;;  %v5458_v15 = vadd.f32 %v5457_v49, %v5445_v22  ;;  %v7447_v12 = vor.u32 %v9812_v26, %v7444_v61  ;;  %v7364_v22 = vld [vmem:[%s15455_s1 + $0x808] sm:$0xf0]  ;;  %v7303_v49 = vor.u32 %v9776_v17, %v7300_v19  ;;  %v9824_v26 = vld [vmem:[%s15455_s1 + $0x904] sm:$0xf]  ;;  %v7735_v17 = vor.u32 %v9884_v18, %v7732_v39  ;;  %v9850_v19 = vld [vmem:[%s15455_s1 + $0x9d4] sm:$0xf] }
 0x20d   :  { %5697 = vmatpush.bf16.msra.mxu1 %v7407_v21  ;;  %v7319_v21 = vor.u32 %v9780_v54, %v7316_v48  ;;  %v9870_v54 = vld [vmem:[%s15455_s1 + $0xa74] sm:$0xf]  ;;  %v7676_v48 = vld [vmem:[%s15455_s1 + $0xa78] sm:$0xf0]  ;;  %v7492_v61 = vld [vmem:[%s15455_s1 + $0x908] sm:$0xf0] }
 0x20e   :  { %5710 = vmatpush.bf16.msra.mxu2 %v7471_v57  ;;  %v9828_v57 = vld [vmem:[%s15455_s1 + $0x924] sm:$0xf]  ;;  %v13845_v32 = vadd.f32 %v5470_v14, %v5458_v15  ;;  %v9894_v39 = vld [vmem:[%s15455_s1 + $0xb34] sm:$0xf] }
 0x20f   :  { %5723 = vmatpush.bf16.msra.mxu3 %v7535_v53  ;;  %v7308_v53 = vld [vmem:[%s15455_s1 + $0x798] sm:$0xf0] }
 0x210   :  { %5685 = vmatpush.bf16.msra.mxu0 %v7335_v6  ;;  %v5446_v6 = vpop.f32.mrf.mxu1  ;;  %v7311_v29 = vor.u32 %v9778_v34, %v7308_v53  ;;  %v9852_v34 = vld [vmem:[%s15455_s1 + $0x9e4] sm:$0xf]  ;;  %v7604_v53 = vld [vmem:[%s15455_s1 + $0x9e8] sm:$0xf0] }
 0x211   :  { %5698 = vmatpush.bf16.msra.mxu1 %v7399_v50  ;;  %v7511_v50 = vor.u32 %v9828_v57, %v7508_v42  ;;  %v5472_v15 = vpop.f32.mrf.mxu3  ;;  %v7679_v57 = vor.u32 %v9870_v54, %v7676_v48  ;;  %v9902_v42 = vld [vmem:[%s15455_s1 + $0xb74] sm:$0xf]  ;;  %v7668_v6 = vld [vmem:[%s15455_s1 + $0xa68] sm:$0xf0]  ;;  %v9880_v48 = vld [vmem:[%s15455_s1 + $0xac4] sm:$0xf] }
 0x212   :  { %5711 = vmatpush.bf16.msra.mxu2 %v7463_v7  ;;  %v9826_v7 = vld [vmem:[%s15455_s1 + $0x914] sm:$0xf]  ;;  %v7807_v10 = vor.u32 %v9902_v42, %v7804_v43  ;;  %v7652_v54 = vld [vmem:[%s15455_s1 + $0xa48] sm:$0xf0]  ;;  %v7580_v42 = vld [vmem:[%s15455_s1 + $0x9b8] sm:$0xf0] }
 0x213   :  { %5724 = vmatpush.bf16.msra.mxu3 %v7527_v62  ;;  %v9808_v62 = vld [vmem:[%s15455_s1 + $0x884] sm:$0xf]  ;;  %v7780_v15 = vld [vmem:[%s15455_s1 + $0xb48] sm:$0xf0]  ;;  %v9862_v43 = vld [vmem:[%s15455_s1 + $0xa34] sm:$0xf] }
 0x214   :  { %5686 = vmatpush.bf16.msra.mxu0 %v7327_v35  ;;  %v7428_v35 = vld [vmem:[%s15455_s1 + $0x888] sm:$0xf0] }
 0x215   :  { %5699 = vmatpush.bf16.msra.mxu1 %v7391_v63  ;;  %v5459_v63 = vpop.f32.mrf.mxu2  ;;  %v7431_v14 = vor.u32 %v9808_v62, %v7428_v35  ;;  %v7724_v62 = vld [vmem:[%s15455_s1 + $0xad8] sm:$0xf0] }
 0x216   :  { %5712 = vmatpush.bf16.msra.mxu2 %v7455_v58  ;;  %v7503_v58 = vor.u32 %v9826_v7, %v7500_v25  ;;  %v9900_v7 = vld [vmem:[%s15455_s1 + $0xb64] sm:$0xf]  ;;  %v7671_v25 = vor.u32 %v9868_v55, %v7668_v6  ;;  %v7708_v55 = vld [vmem:[%s15455_s1 + $0xab8] sm:$0xf0] }
 0x217   :  { %5725 = vmatpush.bf16.msra.mxu3 %v7519_v44  ;;  %v7367_v44 = vor.u32 %v9792_v33, %v7364_v22  ;;  %v7660_v33 = vld [vmem:[%s15455_s1 + $0xa58] sm:$0xf0]  ;;  %v9882_v22 = vld [vmem:[%s15455_s1 + $0xad4] sm:$0xf] }
 0x218   :  { %5687 = vmatpush.bf16.msra.mxu0 %v7319_v21  ;;  %v7615_v21 = vor.u32 %v9854_v46, %v7612_v47  ;;  %v7788_v46 = vld [vmem:[%s15455_s1 + $0xb58] sm:$0xf0]  ;;  %v7727_v63 = vor.u32 %v9882_v22, %v7724_v62 }
 0x219   :  { %5700 = vmatpush.bf16.msra.mxu1 %v7383_v11  ;;  %v7743_v11 = vor.u32 %v9886_v30, %v7740_v36  ;;  %v7716_v30 = vld [vmem:[%s15455_s1 + $0xac8] sm:$0xf0] }
 0x21a   :  { %5713 = vmatpush.bf16.msra.mxu2 %v7447_v12  ;;  %v7495_v12 = vor.u32 %v9824_v26, %v7492_v61  ;;  %v9896_v61 = vld [vmem:[%s15455_s1 + $0xb44] sm:$0xf] }
 0x21b   :  { %5726 = vmatpush.bf16.msra.mxu3 %v7511_v50  ;;  %v7607_v50 = vor.u32 %v9852_v34, %v7604_v53  ;;  %v9878_v53 = vld [vmem:[%s15455_s1 + $0xab4] sm:$0xf]  ;;  %v7783_v6 = vor.u32 %v9896_v61, %v7780_v15 }
 0x21c   :  { %5688 = vmatpush.bf16.msra.mxu0 %v7311_v29  ;;  %v7796_v29 = vld [vmem:[%s15455_s1 + $0xb68] sm:$0xf0] }
 0x21d   :  { %5701 = vmatpush.bf16.msra.mxu1 %v7375_v51  ;;  %v7596_v51 = vld [vmem:[%s15455_s1 + $0x9d8] sm:$0xf0]  ;;  %v7799_v35 = vor.u32 %v9900_v7, %v7796_v29  ;;  %v7711_v29 = vor.u32 %v9878_v53, %v7708_v55  ;;  %v9872_v53 = vld [vmem:[%s15455_s1 + $0xa84] sm:$0xf]  ;;  %v7684_v55 = vld [vmem:[%s15455_s1 + $0xa88] sm:$0xf0] }
 0x21e   :  { %5714 = vmatpush.bf16.msra.mxu2 %v7439_v20  ;;  %v9866_v20 = vld [vmem:[%s15455_s1 + $0xa54] sm:$0xf] }
 0x21f   :  { %5727 = vmatpush.bf16.msra.mxu3 %v7503_v58  ;;  %v7663_v47 = vor.u32 %v9866_v20, %v7660_v33  ;;  %v9864_v58 = vld [vmem:[%s15455_s1 + $0xa44] sm:$0xf]  ;;  %v7700_v33 = vld [vmem:[%s15455_s1 + $0xaa8] sm:$0xf0] }
 0x220   :  { %5689 = vmatpush.bf16.msra.mxu0 %v7303_v49  ;;  %v5483_v36 = vpop.f32.mrf.mxu0  ;;  %v9876_v20 = vld [vmem:[%s15455_s1 + $0xaa4] sm:$0xf] }
 0x221   :  { %5702 = vmatpush.bf16.msra.mxu1 %v7367_v44  ;;  %v9846_v44 = vld [vmem:[%s15455_s1 + $0x9b4] sm:$0xf]  ;;  %v5496_v34 = vpop.f32.mrf.mxu1 }
 0x222   :  { %5715 = vmatpush.bf16.msra.mxu2 %v7431_v14  ;;  %v13999_v14 = vadd.f32 %v5483_v36, %v13845_v32  ;;  %v7644_v32 = vld [vmem:[%s15455_s1 + $0xa38] sm:$0xf0]  ;;  %v7583_v18 = vor.u32 %v9846_v44, %v7580_v42  ;;  %v9874_v36 = vld [vmem:[%s15455_s1 + $0xa94] sm:$0xf]  ;;  %v9840_v42 = vld [vmem:[%s15455_s1 + $0x984] sm:$0xf] }
 0x223   :  { %5728 = vmatpush.bf16.msra.mxu3 %v7495_v12  ;;  %5690 = vmatmul.bf16.vlgmr.msra.gmra.mxu0 %v11232_v45  ;;  %v7599_v45 = vor.u32 %v9850_v19, %v7596_v51  ;;  %v7647_v7 = vor.u32 %v9862_v43, %v7644_v32  ;;  %v9860_v19 = vld [vmem:[%s15455_s1 + $0xa24] sm:$0xf]  ;;  %v7636_v51 = vld [vmem:[%s15455_s1 + $0xa28] sm:$0xf0]  ;;  %v9890_v44 = vld [vmem:[%s15455_s1 + $0xb14] sm:$0xf] }
 0x224   :  { %5734 = vmatpush.bf16.msrb.mxu0 %v7615_v21  ;;  %5703 = vmatmul.bf16.vlgmr.msra.gmra.mxu1 %v11472_v8  ;;  %v9848_v8 = vld [vmem:[%s15455_s1 + $0x9c4] sm:$0xf]  ;;  %v7655_v21 = vor.u32 %v9864_v58, %v7652_v54  ;;  %v7564_v58 = vld [vmem:[%s15455_s1 + $0x998] sm:$0xf0]  ;;  %v9858_v54 = vld [vmem:[%s15455_s1 + $0xa14] sm:$0xf] }
 0x225   :  { %5747 = vmatpush.bf16.msrb.mxu1 %v7679_v57  ;;  %5716 = vmatmul.bf16.vlgmr.msra.gmra.mxu2 %v11476_v13  ;;  %v9898_v13 = vld [vmem:[%s15455_s1 + $0xb54] sm:$0xf]  ;;  %v7719_v57 = vor.u32 %v9880_v48, %v7716_v30  ;;  %v7556_v43 = vld [vmem:[%s15455_s1 + $0x988] sm:$0xf0] }
 0x226   :  { %5760 = vmatpush.bf16.msrb.mxu2 %v7743_v11  ;;  %5729 = vmatmul.bf16.vlgmr.msra.gmra.mxu3 %v11474_v9  ;;  %v7588_v9 = vld [vmem:[%s15455_s1 + $0x9c8] sm:$0xf0]  ;;  %v7791_v49 = vor.u32 %v9898_v13, %v7788_v46  ;;  %v10354_v11 = vld [vmem:[%s15456_s2] sm:$0x3]  ;;  %s6327_s2 = sshll.u32 %s15459_s5, 4  ;;  %s6328_s2 = int_to_ptr.hbm [resolvable:$true] %s6327_s2 }
 0x227   :  { %5773 = vmatpush.bf16.msrb.mxu3 %v7807_v10  ;;  %v7591_v26 = vor.u32 %v9848_v8, %v7588_v9  ;;  %v815_v12 = vperm.slane %v10354_v11, 1  ;;  %v7772_v10 = vld [vmem:[%s15455_s1 + $0xb38] sm:$0xf0]  ;;  %v7764_v13 = vld [vmem:[%s15455_s1 + $0xb28] sm:$0xf0]  ;;  %v7703_v8 = vor.u32 %v9876_v20, %v7700_v33  ;;  %v7687_v33 = vor.u32 %v9872_v53, %v7684_v55 }
 0x228   :  { %5735 = vmatpush.bf16.msrb.mxu0 %v7607_v50  ;;  %v7775_v22 = vor.u32 %v9894_v39, %v7772_v10  ;;  %v5509_v62 = vpop.f32.mrf.mxu2  ;;  %v9842_v9 = vld [vmem:[%s15455_s1 + $0x994] sm:$0xf]  ;;  %v7620_v32 = vld [vmem:[%s15455_s1 + $0xa08] sm:$0xf0] }
 0x229   :  { %5748 = vmatpush.bf16.msrb.mxu1 %v7671_v25  ;;  %v5497_v50 = vadd.f32 %v5496_v34, %v815_v12  ;;  %v9844_v25 = vld [vmem:[%s15455_s1 + $0x9a4] sm:$0xf]  ;;  %v5522_v48 = vpop.f32.mrf.mxu3  ;;  %v5498_v30 = vpop.f32.mrf.mxu1  ;;  %v9934_v10 = vld [vmem:[%s15455_s1 + $0xc74] sm:$0xf] }
 0x22a   :  { %5761 = vmatpush.bf16.msrb.mxu2 %v7735_v17  ;;  %v7572_v17 = vld [vmem:[%s15455_s1 + $0x9a8] sm:$0xf0]  ;;  %v9856_v34 = vld [vmem:[%s15455_s1 + $0xa04] sm:$0xf] }
 0x22b   :  { %5774 = vmatpush.bf16.msrb.mxu3 %v7799_v35  ;;  %v7575_v35 = vor.u32 %v9844_v25, %v7572_v17  ;;  %v5510_v46 = vadd.f32 %v5509_v62, %v5497_v50  ;;  %v7932_v50 = vld [vmem:[%s15455_s1 + $0xc78] sm:$0xf0]  ;;  %v7559_v25 = vor.u32 %v9840_v42, %v7556_v43  ;;  %v7623_v20 = vor.u32 %v9856_v34, %v7620_v32  ;;  %v9930_v42 = vld [vmem:[%s15455_s1 + $0xc54] sm:$0xf] }
 0x22c   :  { %5736 = vmatpush.bf16.msrb.mxu0 %v7599_v45  ;;  %v9892_v45 = vld [vmem:[%s15455_s1 + $0xb24] sm:$0xf]  ;;  %v7996_v17 = vld [vmem:[%s15455_s1 + $0xcf8] sm:$0xf0] }
 0x22d   :  { %5749 = vmatpush.bf16.msrb.mxu1 %v7663_v47  ;;  %v5485_v47 = vpop.f32.mrf.mxu0  ;;  %v14067_v61 = vadd.f32 %v5522_v48, %v5510_v46  ;;  %v7767_v15 = vor.u32 %v9892_v45, %v7764_v13  ;;  %v9966_v45 = vld [vmem:[%s15455_s1 + $0xd74] sm:$0xf]  ;;  %v8060_v13 = vld [vmem:[%s15455_s1 + $0xd78] sm:$0xf0]  ;;  %v7988_v48 = vld [vmem:[%s15455_s1 + $0xce8] sm:$0xf0] }
 0x22e   :  { %5762 = vmatpush.bf16.msrb.mxu2 %v7727_v63  ;;  %v7639_v63 = vor.u32 %v9860_v19, %v7636_v51  ;;  %v9888_v19 = vld [vmem:[%s15455_s1 + $0xb04] sm:$0xf]  ;;  %v7748_v51 = vld [vmem:[%s15455_s1 + $0xb08] sm:$0xf0]  ;;  %v8063_v30 = vor.u32 %v9966_v45, %v8060_v13  ;;  %v7916_v43 = vld [vmem:[%s15455_s1 + $0xc58] sm:$0xf0] }
 0x22f   :  { %5775 = vmatpush.bf16.msrb.mxu3 %v7791_v49  ;;  %v7628_v49 = vld [vmem:[%s15455_s1 + $0xa18] sm:$0xf0]  ;;  %v7751_v47 = vor.u32 %v9888_v19, %v7748_v51  ;;  %v7919_v53 = vor.u32 %v9930_v42, %v7916_v43  ;;  %v9942_v45 = vld [vmem:[%s15455_s1 + $0xcb4] sm:$0xf] }
 0x230   :  { %5737 = vmatpush.bf16.msrb.mxu0 %v7591_v26  ;;  %v7692_v26 = vld [vmem:[%s15455_s1 + $0xa98] sm:$0xf0]  ;;  %v7631_v11 = vor.u32 %v9858_v54, %v7628_v49  ;;  %v9948_v54 = vld [vmem:[%s15455_s1 + $0xce4] sm:$0xf] }
 0x231   :  { %5750 = vmatpush.bf16.msrb.mxu1 %v7655_v21  ;;  %v7567_v21 = vor.u32 %v9842_v9, %v7564_v58  ;;  %v7695_v12 = vor.u32 %v9874_v36, %v7692_v26  ;;  %v9932_v9 = vld [vmem:[%s15455_s1 + $0xc64] sm:$0xf]  ;;  %v7924_v58 = vld [vmem:[%s15455_s1 + $0xc68] sm:$0xf0]  ;;  %v8044_v32 = vld [vmem:[%s15455_s1 + $0xd58] sm:$0xf0] }
 0x232   :  { %5763 = vmatpush.bf16.msrb.mxu2 %v7719_v57  ;;  %v7756_v57 = vld [vmem:[%s15455_s1 + $0xb18] sm:$0xf0]  ;;  %v9964_v36 = vld [vmem:[%s15455_s1 + $0xd64] sm:$0xf]  ;;  %v8052_v26 = vld [vmem:[%s15455_s1 + $0xd68] sm:$0xf0] }
 0x233   :  { %5776 = vmatpush.bf16.msrb.mxu3 %v7783_v6  ;;  %v9918_v6 = vld [vmem:[%s15455_s1 + $0xbf4] sm:$0xf]  ;;  %v7759_v39 = vor.u32 %v9890_v44, %v7756_v57  ;;  %v7991_v44 = vor.u32 %v9948_v54, %v7988_v48  ;;  %v7852_v57 = vld [vmem:[%s15455_s1 + $0xbd8] sm:$0xf0]  ;;  %v8055_v34 = vor.u32 %v9964_v36, %v8052_v26  ;;  %v9908_v48 = vld [vmem:[%s15455_s1 + $0xba4] sm:$0xf] }
 0x234   :  { %5738 = vmatpush.bf16.msrb.mxu0 %v7583_v18  ;;  %v7868_v18 = vld [vmem:[%s15455_s1 + $0xbf8] sm:$0xf0]  ;;  %v7892_v36 = vld [vmem:[%s15455_s1 + $0xc28] sm:$0xf0]  ;;  %v9940_v26 = vld [vmem:[%s15455_s1 + $0xca4] sm:$0xf] }
 0x235   :  { %5751 = vmatpush.bf16.msrb.mxu1 %v7647_v7  ;;  %v9950_v7 = vld [vmem:[%s15455_s1 + $0xcf4] sm:$0xf]  ;;  %v7871_v62 = vor.u32 %v9918_v6, %v7868_v18  ;;  %v9928_v6 = vld [vmem:[%s15455_s1 + $0xc44] sm:$0xf]  ;;  %v7908_v18 = vld [vmem:[%s15455_s1 + $0xc48] sm:$0xf0] }
 0x236   :  { %5764 = vmatpush.bf16.msrb.mxu2 %v7711_v29  ;;  %v5511_v29 = vpop.f32.mrf.mxu2  ;;  %v7999_v46 = vor.u32 %v9950_v7, %v7996_v17  ;;  %v8036_v17 = vld [vmem:[%s15455_s1 + $0xd48] sm:$0xf0]  ;;  %v7911_v51 = vor.u32 %v9928_v6, %v7908_v18  ;;  %v7964_v13 = vld [vmem:[%s15455_s1 + $0xcb8] sm:$0xf0]  ;;  %v9938_v18 = vld [vmem:[%s15455_s1 + $0xc94] sm:$0xf] }
 0x237   :  { %5777 = vmatpush.bf16.msrb.mxu3 %v7775_v22  ;;  %v5524_v22 = vpop.f32.mrf.mxu3  ;;  %v7967_v54 = vor.u32 %v9942_v45, %v7964_v13  ;;  %v7884_v6 = vld [vmem:[%s15455_s1 + $0xc18] sm:$0xf0] }
 0x238   :  { %5739 = vmatpush.bf16.msrb.mxu0 %v7575_v35  ;;  %v7935_v35 = vor.u32 %v9934_v10, %v7932_v50  ;;  %v7972_v10 = vld [vmem:[%s15455_s1 + $0xcc8] sm:$0xf0]  ;;  %v7836_v22 = vld [vmem:[%s15455_s1 + $0xbb8] sm:$0xf0] }
 0x239   :  { %5752 = vmatpush.bf16.msrb.mxu1 %v7639_v63  ;;  %v9916_v63 = vld [vmem:[%s15455_s1 + $0xbe4] sm:$0xf] }
 0x23a   :  { %5765 = vmatpush.bf16.msrb.mxu2 %v7703_v8  ;;  %v7860_v8 = vld [vmem:[%s15455_s1 + $0xbe8] sm:$0xf0] }
 0x23b   :  { %5778 = vmatpush.bf16.msrb.mxu3 %v7767_v15  ;;  %v7863_v49 = vor.u32 %v9916_v63, %v7860_v8  ;;  %v7927_v15 = vor.u32 %v9932_v9, %v7924_v58  ;;  %v9958_v8 = vld [vmem:[%s15455_s1 + $0xd34] sm:$0xf]  ;;  %v8028_v9 = vld [vmem:[%s15455_s1 + $0xd38] sm:$0xf0] }
 0x23c   :  { %5740 = vmatpush.bf16.msrb.mxu0 %v7567_v21  ;;  %v9914_v21 = vld [vmem:[%s15455_s1 + $0xbd4] sm:$0xf] }
 0x23d   :  { %5753 = vmatpush.bf16.msrb.mxu1 %v7631_v11  ;;  %v9946_v11 = vld [vmem:[%s15455_s1 + $0xcd4] sm:$0xf] }
 0x23e   :  { %5766 = vmatpush.bf16.msrb.mxu2 %v7695_v12  ;;  %v7980_v12 = vld [vmem:[%s15455_s1 + $0xcd8] sm:$0xf0] }
 0x23f   :  { %5779 = vmatpush.bf16.msrb.mxu3 %v7759_v39  ;;  %v7983_v55 = vor.u32 %v9946_v11, %v7980_v12  ;;  %v9944_v39 = vld [vmem:[%s15455_s1 + $0xcc4] sm:$0xf]  ;;  %v8020_v12 = vld [vmem:[%s15455_s1 + $0xd28] sm:$0xf0] }
 0x240   :  { %5741 = vmatpush.bf16.msrb.mxu0 %v7559_v25  ;;  %v5535_v7 = vpop.f32.mrf.mxu0  ;;  %v9960_v25 = vld [vmem:[%s15455_s1 + $0xd44] sm:$0xf] }
 0x241   :  { %5754 = vmatpush.bf16.msrb.mxu1 %v7623_v20  ;;  %v5536_v19 = vadd.f32 %v5535_v7, %v14067_v61  ;;  %v7975_v20 = vor.u32 %v9944_v39, %v7972_v10  ;;  %v7900_v61 = vld [vmem:[%s15455_s1 + $0xc38] sm:$0xf0]  ;;  %v9956_v11 = vld [vmem:[%s15455_s1 + $0xd24] sm:$0xf] }
 0x242   :  { %5767 = vmatpush.bf16.msrb.mxu2 %v7687_v33  ;;  %v9910_v33 = vld [vmem:[%s15455_s1 + $0xbb4] sm:$0xf]  ;;  %v7948_v39 = vld [vmem:[%s15455_s1 + $0xc98] sm:$0xf0]  ;;  %v8023_v10 = vor.u32 %v9956_v11, %v8020_v12  ;;  %v9996_v11 = vld [vmem:[%s15455_s1 + $0xe64] sm:$0xf] }
 0x243   :  { %5780 = vmatpush.bf16.msrb.mxu3 %v7751_v47  ;;  %5742 = vmatmul.bf16.vlgmr.msrb.gmra.mxu0 %v11478_v16  ;;  %v7855_v16 = vor.u32 %v9914_v21, %v7852_v57  ;;  %v8039_v47 = vor.u32 %v9960_v25, %v8036_v17  ;;  %v7839_v63 = vor.u32 %v9910_v33, %v7836_v22  ;;  %v9904_v25 = vld [vmem:[%s15455_s1 + $0xb84] sm:$0xf]  ;;  %v7812_v17 = vld [vmem:[%s15455_s1 + $0xb88] sm:$0xf0] }
 0x244   :  { %5786 = vmatpush.bf16.msra.mxu0 %v7871_v62  ;;  %5755 = vmatmul.bf16.vlgmr.msrb.gmra.mxu1 %v11640_v1  ;;  %v9912_v1 = vld [vmem:[%s15455_s1 + $0xbc4] sm:$0xf]  ;;  %v9926_v62 = vld [vmem:[%s15455_s1 + $0xc34] sm:$0xf]  ;;  %v8031_v21 = vor.u32 %v9958_v8, %v8028_v9  ;;  %v7876_v33 = vld [vmem:[%s15455_s1 + $0xc08] sm:$0xf0]  ;;  %v7815_v8 = vor.u32 %v9904_v25, %v7812_v17 }
 0x245   :  { %5799 = vmatpush.bf16.msra.mxu1 %v7935_v35  ;;  %5768 = vmatmul.bf16.vlgmr.msrb.gmra.mxu2 %v11644_v3  ;;  %v9962_v3 = vld [vmem:[%s15455_s1 + $0xd54] sm:$0xf]  ;;  %v5548_v35 = vpop.f32.mrf.mxu1  ;;  %v7903_v58 = vor.u32 %v9926_v62, %v7900_v61  ;;  %v9936_v22 = vld [vmem:[%s15455_s1 + $0xc84] sm:$0xf]  ;;  %v7940_v62 = vld [vmem:[%s15455_s1 + $0xc88] sm:$0xf0] }
 0x246   :  { %5812 = vmatpush.bf16.msra.mxu2 %v7999_v46  ;;  %5781 = vmatmul.bf16.vlgmr.msrb.gmra.mxu3 %v11642_v2  ;;  %v7844_v2 = vld [vmem:[%s15455_s1 + $0xbc8] sm:$0xf0]  ;;  %v8047_v50 = vor.u32 %v9962_v3, %v8044_v32  ;;  %v5549_v46 = vadd.f32 %v5548_v35, %v5536_v19  ;;  %v9906_v32 = vld [vmem:[%s15455_s1 + $0xb94] sm:$0xf]  ;;  %v8124_v61 = vld [vmem:[%s15455_s1 + $0xdf8] sm:$0xf0] }
 0x247   :  { %5825 = vmatpush.bf16.msra.mxu3 %v8063_v30  ;;  %v7847_v29 = vor.u32 %v9912_v1, %v7844_v2  ;;  %v7828_v30 = vld [vmem:[%s15455_s1 + $0xba8] sm:$0xf0]  ;;  %v9982_v35 = vld [vmem:[%s15455_s1 + $0xdf4] sm:$0xf]  ;;  %v8252_v9 = vld [vmem:[%s15455_s1 + $0xef8] sm:$0xf0] }
 0x248   :  { %5787 = vmatpush.bf16.msra.mxu0 %v7863_v49  ;;  %v9924_v49 = vld [vmem:[%s15455_s1 + $0xc24] sm:$0xf]  ;;  %v5537_v42 = vpop.f32.mrf.mxu0  ;;  %v7831_v43 = vor.u32 %v9908_v48, %v7828_v30  ;;  %v7943_v30 = vor.u32 %v9936_v22, %v7940_v62  ;;  %v8180_v12 = vld [vmem:[%s15455_s1 + $0xe68] sm:$0xf0]  ;;  %v8300_v17 = vld [vmem:[%s15455_s1 + $0xf58] sm:$0xf0] }
 0x249   :  { %5800 = vmatpush.bf16.msra.mxu1 %v7927_v15  ;;  %v7956_v15 = vld [vmem:[%s15455_s1 + $0xca8] sm:$0xf0]  ;;  %v5574_v3 = vpop.f32.mrf.mxu3  ;;  %v9980_v42 = vld [vmem:[%s15455_s1 + $0xde4] sm:$0xf] }
 0x24a   :  { %5813 = vmatpush.bf16.msra.mxu2 %v7991_v44  ;;  %v5561_v44 = vpop.f32.mrf.mxu2  ;;  %v10008_v22 = vld [vmem:[%s15455_s1 + $0xec4] sm:$0xf]  ;;  %v8228_v62 = vld [vmem:[%s15455_s1 + $0xec8] sm:$0xf0] }
 0x24b   :  { %5826 = vmatpush.bf16.msra.mxu3 %v8055_v34  ;;  %v5562_v57 = vadd.f32 %v5561_v44, %v5549_v46  ;;  %v7895_v34 = vor.u32 %v9924_v49, %v7892_v36  ;;  %v9998_v46 = vld [vmem:[%s15455_s1 + $0xe74] sm:$0xf]  ;;  %v8127_v36 = vor.u32 %v9982_v35, %v8124_v61  ;;  %v8316_v44 = vld [vmem:[%s15455_s1 + $0xf78] sm:$0xf0] }
 0x24c   :  { %5788 = vmatpush.bf16.msra.mxu0 %v7855_v16  ;;  %v7959_v16 = vor.u32 %v9940_v26, %v7956_v15  ;;  %v10030_v15 = vld [vmem:[%s15455_s1 + $0xf74] sm:$0xf] }
 0x24d   :  { %5801 = vmatpush.bf16.msra.mxu1 %v7919_v53  ;;  %v7820_v53 = vld [vmem:[%s15455_s1 + $0xb98] sm:$0xf0]  ;;  %v5550_v1 = vpop.f32.mrf.mxu1  ;;  %v14257_v2 = vadd.f32 %v5574_v3, %v5562_v57  ;;  %v8319_v3 = vor.u32 %v10030_v15, %v8316_v44  ;;  %v10022_v44 = vld [vmem:[%s15455_s1 + $0xf34] sm:$0xf] }
 0x24e   :  { %5814 = vmatpush.bf16.msra.mxu2 %v7983_v55  ;;  %v9922_v55 = vld [vmem:[%s15455_s1 + $0xc14] sm:$0xf]  ;;  %v7823_v7 = vor.u32 %v9906_v32, %v7820_v53  ;;  %v10028_v53 = vld [vmem:[%s15455_s1 + $0xf64] sm:$0xf]  ;;  %v8183_v1 = vor.u32 %v9996_v11, %v8180_v12  ;;  %v8084_v12 = vld [vmem:[%s15455_s1 + $0xda8] sm:$0xf0] }
 0x24f   :  { %5827 = vmatpush.bf16.msra.mxu3 %v8047_v50  ;;  %v9954_v50 = vld [vmem:[%s15455_s1 + $0xd14] sm:$0xf]  ;;  %v7887_v19 = vor.u32 %v9922_v55, %v7884_v6  ;;  %v8308_v55 = vld [vmem:[%s15455_s1 + $0xf68] sm:$0xf0]  ;;  %v9972_v11 = vld [vmem:[%s15455_s1 + $0xda4] sm:$0xf] }
 0x250   :  { %5789 = vmatpush.bf16.msra.mxu0 %v7847_v29  ;;  %v8012_v29 = vld [vmem:[%s15455_s1 + $0xd18] sm:$0xf0]  ;;  %v8311_v25 = vor.u32 %v10028_v53, %v8308_v55  ;;  %v8212_v53 = vld [vmem:[%s15455_s1 + $0xea8] sm:$0xf0] }
 0x251   :  { %5802 = vmatpush.bf16.msra.mxu1 %v7911_v51  ;;  %v7951_v51 = vor.u32 %v9938_v18, %v7948_v39  ;;  %v8015_v13 = vor.u32 %v9954_v50, %v8012_v29  ;;  %v5576_v49 = vpop.f32.mrf.mxu3  ;;  %v9978_v18 = vld [vmem:[%s15455_s1 + $0xdd4] sm:$0xf]  ;;  %v8108_v39 = vld [vmem:[%s15455_s1 + $0xdd8] sm:$0xf0] }
 0x252   :  { %5815 = vmatpush.bf16.msra.mxu2 %v7975_v20  ;;  %v9920_v20 = vld [vmem:[%s15455_s1 + $0xc04] sm:$0xf]  ;;  %v5563_v45 = vpop.f32.mrf.mxu2  ;;  %v8172_v50 = vld [vmem:[%s15455_s1 + $0xe58] sm:$0xf0]  ;;  %v10006_v49 = vld [vmem:[%s15455_s1 + $0xeb4] sm:$0xf] }
 0x253   :  { %5828 = vmatpush.bf16.msra.mxu3 %v8039_v47  ;;  %v8188_v47 = vld [vmem:[%s15455_s1 + $0xe78] sm:$0xf0]  ;;  %v7879_v48 = vor.u32 %v9920_v20, %v7876_v33  ;;  %v9992_v20 = vld [vmem:[%s15455_s1 + $0xe44] sm:$0xf]  ;;  %v8164_v33 = vld [vmem:[%s15455_s1 + $0xe48] sm:$0xf0] }
 0x254   :  { %5790 = vmatpush.bf16.msra.mxu0 %v7839_v63  ;;  %v10014_v63 = vld [vmem:[%s15455_s1 + $0xef4] sm:$0xf]  ;;  %v8191_v26 = vor.u32 %v9998_v46, %v8188_v47  ;;  %v8236_v29 = vld [vmem:[%s15455_s1 + $0xed8] sm:$0xf0]  ;;  %v10024_v47 = vld [vmem:[%s15455_s1 + $0xf44] sm:$0xf] }
 0x255   :  { %5803 = vmatpush.bf16.msra.mxu1 %v7903_v58  ;;  %v9952_v58 = vld [vmem:[%s15455_s1 + $0xd04] sm:$0xf] }
 0x256   :  { %5816 = vmatpush.bf16.msra.mxu2 %v7967_v54  ;;  %v8004_v54 = vld [vmem:[%s15455_s1 + $0xd08] sm:$0xf0] }
 0x257   :  { %5829 = vmatpush.bf16.msra.mxu3 %v8031_v21  ;;  %v8255_v21 = vor.u32 %v10014_v63, %v8252_v9  ;;  %v8007_v57 = vor.u32 %v9952_v58, %v8004_v54  ;;  %v8292_v63 = vld [vmem:[%s15455_s1 + $0xf48] sm:$0xf0]  ;;  %v8231_v9 = vor.u32 %v10008_v22, %v8228_v62  ;;  %v9974_v58 = vld [vmem:[%s15455_s1 + $0xdb4] sm:$0xf]  ;;  %v8268_v22 = vld [vmem:[%s15455_s1 + $0xf18] sm:$0xf0] }
 0x258   :  { %5791 = vmatpush.bf16.msra.mxu0 %v7831_v43  ;;  %v8116_v43 = vld [vmem:[%s15455_s1 + $0xde8] sm:$0xf0]  ;;  %v9990_v54 = vld [vmem:[%s15455_s1 + $0xe34] sm:$0xf]  ;;  %v9968_v62 = vld [vmem:[%s15455_s1 + $0xd84] sm:$0xf] }
 0x259   :  { %5804 = vmatpush.bf16.msra.mxu1 %v7895_v34  ;;  %v10012_v34 = vld [vmem:[%s15455_s1 + $0xee4] sm:$0xf]  ;;  %v8119_v32 = vor.u32 %v9980_v42, %v8116_v43 }
 0x25a   :  { %5817 = vmatpush.bf16.msra.mxu2 %v7959_v16  ;;  %v8244_v16 = vld [vmem:[%s15455_s1 + $0xee8] sm:$0xf0] }
 0x25b   :  { %5830 = vmatpush.bf16.msra.mxu3 %v8023_v10  ;;  %v8247_v6 = vor.u32 %v10012_v34, %v8244_v16  ;;  %v9994_v10 = vld [vmem:[%s15455_s1 + $0xe54] sm:$0xf]  ;;  %v9988_v34 = vld [vmem:[%s15455_s1 + $0xe24] sm:$0xf] }
 0x25c   :  { %5792 = vmatpush.bf16.msra.mxu0 %v7823_v7  ;;  %v10010_v7 = vld [vmem:[%s15455_s1 + $0xed4] sm:$0xf] }
 0x25d   :  { %5805 = vmatpush.bf16.msra.mxu1 %v7887_v19  ;;  %v8175_v19 = vor.u32 %v9994_v10, %v8172_v50  ;;  %v10020_v10 = vld [vmem:[%s15455_s1 + $0xf24] sm:$0xf]  ;;  %v8276_v50 = vld [vmem:[%s15455_s1 + $0xf28] sm:$0xf0] }
 0x25e   :  { %5818 = vmatpush.bf16.msra.mxu2 %v7951_v51  ;;  %v8239_v51 = vor.u32 %v10010_v7, %v8236_v29 }
 0x25f   :  { %5831 = vmatpush.bf16.msra.mxu3 %v8015_v13 }
 0x260   :  { %5793 = vmatpush.bf16.msra.mxu0 %v7815_v8  ;;  %v5587_v61 = vpop.f32.mrf.mxu0  ;;  %v8167_v8 = vor.u32 %v9992_v20, %v8164_v33  ;;  %v10018_v20 = vld [vmem:[%s15455_s1 + $0xf14] sm:$0xf] }
 0x261   :  { %5806 = vmatpush.bf16.msra.mxu1 %v7879_v48  ;;  %v5588_v45 = vadd.f32 %v5587_v61, %v14257_v2  ;;  %v5600_v46 = vpop.f32.mrf.mxu1  ;;  %v8092_v2 = vld [vmem:[%s15455_s1 + $0xdb8] sm:$0xf0] }
 0x262   :  { %5819 = vmatpush.bf16.msra.mxu2 %v7943_v30  ;;  %v8156_v30 = vld [vmem:[%s15455_s1 + $0xe38] sm:$0xf0]  ;;  %v8095_v15 = vor.u32 %v9974_v58, %v8092_v2  ;;  %v8271_v2 = vor.u32 %v10018_v20, %v8268_v22 }
 0x263   :  { %5832 = vmatpush.bf16.msra.mxu3 %v8007_v57  ;;  %5794 = vmatmul.bf16.vlgmr.msra.gmra.mxu0 %v11646_v4  ;;  %v8111_v4 = vor.u32 %v9978_v18, %v8108_v39  ;;  %v5601_v48 = vadd.f32 %v5600_v46, %v5588_v45  ;;  %v8159_v57 = vor.u32 %v9990_v54, %v8156_v30  ;;  %v8132_v46 = vld [vmem:[%s15455_s1 + $0xe08] sm:$0xf0]  ;;  %v8380_v58 = vld [vmem:[%s15455_s1 + $0xff8] sm:$0xf0]  ;;  %v10062_v54 = vld [vmem:[%s15455_s1 + $0x1074] sm:$0xf] }
 0x264   :  { %5838 = vmatpush.bf16.msrb.mxu0 %v8127_v36  ;;  %5807 = vmatmul.bf16.vlgmr.msra.gmra.mxu1 %v11891_v37  ;;  %v9976_v37 = vld [vmem:[%s15455_s1 + $0xdc4] sm:$0xf]  ;;  %v8220_v36 = vld [vmem:[%s15455_s1 + $0xeb8] sm:$0xf0]  ;;  %v8087_v39 = vor.u32 %v9972_v11, %v8084_v12  ;;  %v10078_v30 = vld [vmem:[%s15455_s1 + $0x10f4] sm:$0xf] }
 0x265   :  { %5851 = vmatpush.bf16.msrb.mxu1 %v8191_v26  ;;  %5820 = vmatmul.bf16.vlgmr.msra.gmra.mxu2 %v11895_v40  ;;  %v10026_v40 = vld [vmem:[%s15455_s1 + $0xf54] sm:$0xf]  ;;  %v8295_v26 = vor.u32 %v10024_v47, %v8292_v63  ;;  %v8223_v42 = vor.u32 %v10006_v49, %v8220_v36  ;;  %v10000_v47 = vld [vmem:[%s15455_s1 + $0xe84] sm:$0xf]  ;;  %v8572_v12 = vld [vmem:[%s15455_s1 + $0x1178] sm:$0xf0] }
 0x266   :  { %5864 = vmatpush.bf16.msrb.mxu2 %v8255_v21  ;;  %5833 = vmatmul.bf16.vlgmr.msra.gmra.mxu3 %v11893_v38  ;;  %v8100_v38 = vld [vmem:[%s15455_s1 + $0xdc8] sm:$0xf0]  ;;  %v8303_v35 = vor.u32 %v10026_v40, %v8300_v17  ;;  %v8284_v21 = vld [vmem:[%s15455_s1 + $0xf38] sm:$0xf0]  ;;  %v9986_v17 = vld [vmem:[%s15455_s1 + $0xe14] sm:$0xf] }
 0x267   :  { %5877 = vmatpush.bf16.msrb.mxu3 %v8319_v3  ;;  %v8103_v13 = vor.u32 %v9976_v37, %v8100_v38  ;;  %v8148_v3 = vld [vmem:[%s15455_s1 + $0xe28] sm:$0xf0]  ;;  %v8287_v55 = vor.u32 %v10022_v44, %v8284_v21  ;;  %v8076_v40 = vld [vmem:[%s15455_s1 + $0xd98] sm:$0xf0]  ;;  %v8279_v38 = vor.u32 %v10020_v10, %v8276_v50  ;;  %v10094_v11 = vld [vmem:[%s15455_s1 + $0x1174] sm:$0xf] }
 0x268   :  { %5839 = vmatpush.bf16.msrb.mxu0 %v8119_v32  ;;  %v5613_v43 = vpop.f32.mrf.mxu2  ;;  %v10004_v32 = vld [vmem:[%s15455_s1 + $0xea4] sm:$0xf]  ;;  %v8151_v29 = vor.u32 %v9988_v34, %v8148_v3  ;;  %v8204_v37 = vld [vmem:[%s15455_s1 + $0xe98] sm:$0xf0]  ;;  %v8260_v44 = vld [vmem:[%s15455_s1 + $0xf08] sm:$0xf0] }
 0x269   :  { %5852 = vmatpush.bf16.msrb.mxu1 %v8183_v1  ;;  %v5614_v16 = vadd.f32 %v5613_v43, %v5601_v48  ;;  %v5626_v1 = vpop.f32.mrf.mxu3  ;;  %v5602_v7 = vpop.f32.mrf.mxu1  ;;  %v8444_v48 = vld [vmem:[%s15455_s1 + $0x1078] sm:$0xf0]  ;;  %v10044_v3 = vld [vmem:[%s15455_s1 + $0xfe4] sm:$0xf] }
 0x26a   :  { %5865 = vmatpush.bf16.msrb.mxu2 %v8247_v6  ;;  %v5589_v6 = vpop.f32.mrf.mxu0  ;;  %v8447_v43 = vor.u32 %v10062_v54, %v8444_v48  ;;  %v10092_v50 = vld [vmem:[%s15455_s1 + $0x1164] sm:$0xf]  ;;  %v8564_v7 = vld [vmem:[%s15455_s1 + $0x1168] sm:$0xf0]  ;;  %v8556_v20 = vld [vmem:[%s15455_s1 + $0x1158] sm:$0xf0] }
 0x26b   :  { %5878 = vmatpush.bf16.msrb.mxu3 %v8311_v25  ;;  %v14441_v18 = vadd.f32 %v5626_v1, %v5614_v16  ;;  %v8215_v25 = vor.u32 %v10004_v32, %v8212_v53  ;;  %v8372_v32 = vld [vmem:[%s15455_s1 + $0xfe8] sm:$0xf0]  ;;  %v10060_v53 = vld [vmem:[%s15455_s1 + $0x1064] sm:$0xf]  ;;  %v10038_v48 = vld [vmem:[%s15455_s1 + $0xfb4] sm:$0xf] }
 0x26c   :  { %5840 = vmatpush.bf16.msrb.mxu0 %v8111_v4  ;;  %v9970_v4 = vld [vmem:[%s15455_s1 + $0xd94] sm:$0xf]  ;;  %v10076_v1 = vld [vmem:[%s15455_s1 + $0x10e4] sm:$0xf]  ;;  %v8500_v6 = vld [vmem:[%s15455_s1 + $0x10e8] sm:$0xf0]  ;;  %v8375_v10 = vor.u32 %v10044_v3, %v8372_v32 }
 0x26d   :  { %5853 = vmatpush.bf16.msrb.mxu1 %v8175_v19  ;;  %v8140_v19 = vld [vmem:[%s15455_s1 + $0xe18] sm:$0xf0]  ;;  %v8079_v33 = vor.u32 %v9970_v4, %v8076_v40  ;;  %v10042_v4 = vld [vmem:[%s15455_s1 + $0xfd4] sm:$0xf]  ;;  %v10052_v3 = vld [vmem:[%s15455_s1 + $0x1024] sm:$0xf] }
 0x26e   :  { %5866 = vmatpush.bf16.msrb.mxu2 %v8239_v51  ;;  %v10002_v51 = vld [vmem:[%s15455_s1 + $0xe94] sm:$0xf]  ;;  %v8143_v61 = vor.u32 %v9986_v17, %v8140_v19  ;;  %v8364_v40 = vld [vmem:[%s15455_s1 + $0xfd8] sm:$0xf0] }
 0x26f   :  { %5879 = vmatpush.bf16.msrb.mxu3 %v8303_v35  ;;  %v8068_v35 = vld [vmem:[%s15455_s1 + $0xd88] sm:$0xf0]  ;;  %v8207_v45 = vor.u32 %v10002_v51, %v8204_v37  ;;  %v10058_v17 = vld [vmem:[%s15455_s1 + $0x1054] sm:$0xf]  ;;  %v8428_v19 = vld [vmem:[%s15455_s1 + $0x1058] sm:$0xf0] }
 0x270   :  { %5841 = vmatpush.bf16.msrb.mxu0 %v8103_v13  ;;  %v9984_v13 = vld [vmem:[%s15455_s1 + $0xe04] sm:$0xf]  ;;  %v5615_v63 = vpop.f32.mrf.mxu2  ;;  %v8071_v36 = vor.u32 %v9968_v62, %v8068_v35  ;;  %v10074_v51 = vld [vmem:[%s15455_s1 + $0x10d4] sm:$0xf]  ;;  %v8492_v37 = vld [vmem:[%s15455_s1 + $0x10d8] sm:$0xf0] }
 0x271   :  { %5854 = vmatpush.bf16.msrb.mxu1 %v8167_v8  ;;  %v8196_v8 = vld [vmem:[%s15455_s1 + $0xe88] sm:$0xf0]  ;;  %v5628_v49 = vpop.f32.mrf.mxu3  ;;  %v8135_v21 = vor.u32 %v9984_v13, %v8132_v46  ;;  %v8495_v22 = vor.u32 %v10074_v51, %v8492_v37  ;;  %v10056_v62 = vld [vmem:[%s15455_s1 + $0x1044] sm:$0xf]  ;;  %v8332_v51 = vld [vmem:[%s15455_s1 + $0xf98] sm:$0xf0] }
 0x272   :  { %5867 = vmatpush.bf16.msrb.mxu2 %v8231_v9  ;;  %v10046_v9 = vld [vmem:[%s15455_s1 + $0xff4] sm:$0xf]  ;;  %v8420_v35 = vld [vmem:[%s15455_s1 + $0x1048] sm:$0xf0] }
 0x273   :  { %5880 = vmatpush.bf16.msrb.mxu3 %v8295_v26  ;;  %v8508_v26 = vld [vmem:[%s15455_s1 + $0x10f8] sm:$0xf0]  ;;  %v10050_v37 = vld [vmem:[%s15455_s1 + $0x1014] sm:$0xf] }
 0x274   :  { %5842 = vmatpush.bf16.msrb.mxu0 %v8095_v15  ;;  %v10016_v15 = vld [vmem:[%s15455_s1 + $0xf04] sm:$0xf]  ;;  %v8511_v34 = vor.u32 %v10078_v30, %v8508_v26  ;;  %v10054_v30 = vld [vmem:[%s15455_s1 + $0x1034] sm:$0xf] }
 0x275   :  { %5855 = vmatpush.bf16.msrb.mxu1 %v8159_v57  ;;  %v8199_v57 = vor.u32 %v10000_v47, %v8196_v8  ;;  %v8263_v16 = vor.u32 %v10016_v15, %v8260_v44  ;;  %v10070_v26 = vld [vmem:[%s15455_s1 + $0x10b4] sm:$0xf]  ;;  %v8476_v15 = vld [vmem:[%s15455_s1 + $0x10b8] sm:$0xf0] }
 0x276   :  { %5868 = vmatpush.bf16.msrb.mxu2 %v8223_v42  ;;  %v8383_v42 = vor.u32 %v10046_v9, %v8380_v58  ;;  %v10088_v9 = vld [vmem:[%s15455_s1 + $0x1144] sm:$0xf]  ;;  %v8548_v58 = vld [vmem:[%s15455_s1 + $0x1148] sm:$0xf0] }
 0x277   :  { %5881 = vmatpush.bf16.msrb.mxu3 %v8287_v55  ;;  %v8436_v55 = vld [vmem:[%s15455_s1 + $0x1068] sm:$0xf0]  ;;  %v8551_v44 = vor.u32 %v10088_v9, %v8548_v58  ;;  %v8636_v9 = vld [vmem:[%s15455_s1 + $0x11f8] sm:$0xf0] }
 0x278   :  { %5843 = vmatpush.bf16.msrb.mxu0 %v8087_v39  ;;  %v8575_v39 = vor.u32 %v10094_v11, %v8572_v12  ;;  %v8479_v11 = vor.u32 %v10070_v26, %v8476_v15  ;;  %v8516_v26 = vld [vmem:[%s15455_s1 + $0x1108] sm:$0xf0] }
 0x279   :  { %5856 = vmatpush.bf16.msrb.mxu1 %v8151_v29  ;;  %v8439_v29 = vor.u32 %v10060_v53, %v8436_v55  ;;  %v8404_v53 = vld [vmem:[%s15455_s1 + $0x1028] sm:$0xf0]  ;;  %v10068_v55 = vld [vmem:[%s15455_s1 + $0x10a4] sm:$0xf] }
 0x27a   :  { %5869 = vmatpush.bf16.msrb.mxu2 %v8215_v25  ;;  %v8503_v25 = vor.u32 %v10076_v1, %v8500_v6  ;;  %v8468_v1 = vld [vmem:[%s15455_s1 + $0x10a8] sm:$0xf0] }
 0x27b   :  { %5882 = vmatpush.bf16.msrb.mxu3 %v8279_v38  ;;  %v8567_v38 = vor.u32 %v10092_v50, %v8564_v7 }
 0x27c   :  { %5844 = vmatpush.bf16.msrb.mxu0 %v8079_v33  ;;  %v8431_v33 = vor.u32 %v10058_v17, %v8428_v19  ;;  %v8471_v17 = vor.u32 %v10068_v55, %v8468_v1  ;;  %v10034_v19 = vld [vmem:[%s15455_s1 + $0xf94] sm:$0xf]  ;;  %v8756_v55 = vld [vmem:[%s15455_s1 + $0x12e8] sm:$0xf0] }
 0x27d   :  { %5857 = vmatpush.bf16.msrb.mxu1 %v8143_v61  ;;  %v10072_v61 = vld [vmem:[%s15455_s1 + $0x10c4] sm:$0xf] }
 0x27e   :  { %5870 = vmatpush.bf16.msrb.mxu2 %v8207_v45  ;;  %v8484_v45 = vld [vmem:[%s15455_s1 + $0x10c8] sm:$0xf0] }
 0x27f   :  { %5883 = vmatpush.bf16.msrb.mxu3 %v8271_v2  ;;  %v8423_v2 = vor.u32 %v10056_v62, %v8420_v35  ;;  %v8487_v54 = vor.u32 %v10072_v61, %v8484_v45  ;;  %v8324_v62 = vld [vmem:[%s15455_s1 + $0xf88] sm:$0xf0]  ;;  %v10048_v45 = vld [vmem:[%s15455_s1 + $0x1004] sm:$0xf] }
 0x280   :  { %5845 = vmatpush.bf16.msrb.mxu0 %v8071_v36  ;;  %v5639_v46 = vpop.f32.mrf.mxu0  ;;  %v8412_v36 = vld [vmem:[%s15455_s1 + $0x1038] sm:$0xf0] }
 0x281   :  { %5858 = vmatpush.bf16.msrb.mxu1 %v8135_v21  ;;  %v5640_v47 = vadd.f32 %v5639_v46, %v14441_v18  ;;  %v5652_v8 = vpop.f32.mrf.mxu1  ;;  %v8348_v18 = vld [vmem:[%s15455_s1 + $0xfb8] sm:$0xf0]  ;;  %v10064_v46 = vld [vmem:[%s15455_s1 + $0x1084] sm:$0xf] }
 0x282   :  { %5871 = vmatpush.bf16.msrb.mxu2 %v8199_v57  ;;  %v8351_v21 = vor.u32 %v10038_v48, %v8348_v18  ;;  %v10086_v57 = vld [vmem:[%s15455_s1 + $0x1134] sm:$0xf] }
 0x283   :  { %5884 = vmatpush.bf16.msrb.mxu3 %v8263_v16  ;;  %5846 = vmatmul.bf16.vlgmr.msrb.gmra.mxu0 %v11897_v41  ;;  %v8367_v41 = vor.u32 %v10042_v4, %v8364_v40  ;;  %v5653_v49 = vadd.f32 %v5652_v8, %v5640_v47  ;;  %v8340_v16 = vld [vmem:[%s15455_s1 + $0xfa8] sm:$0xf0]  ;;  %v8407_v40 = vor.u32 %v10052_v3, %v8404_v53  ;;  %v10110_v8 = vld [vmem:[%s15455_s1 + $0x11f4] sm:$0xf]  ;;  %v10124_v3 = vld [vmem:[%s15455_s1 + $0x1264] sm:$0xf] }
 0x284   :  { %5890 = vmatpush.bf16.msra.mxu0 %v8383_v42  ;;  %5859 = vmatmul.bf16.vlgmr.msrb.gmra.mxu1 %v12059_v59  ;;  %v10040_v59 = vld [vmem:[%s15455_s1 + $0xfc4] sm:$0xf]  ;;  %v8540_v42 = vld [vmem:[%s15455_s1 + $0x1138] sm:$0xf0]  ;;  %v10142_v48 = vld [vmem:[%s15455_s1 + $0x12f4] sm:$0xf] }
 0x285   :  { %5903 = vmatpush.bf16.msra.mxu1 %v8447_v43  ;;  %5872 = vmatmul.bf16.vlgmr.msrb.gmra.mxu2 %v12063_v0  ;;  %v10090_v0 = vld [vmem:[%s15455_s1 + $0x1154] sm:$0xf]  ;;  %v8415_v43 = vor.u32 %v10054_v30, %v8412_v36  ;;  %v8543_v6 = vor.u32 %v10086_v57, %v8540_v42  ;;  %v10080_v36 = vld [vmem:[%s15455_s1 + $0x1104] sm:$0xf] }
 0x286   :  { %5916 = vmatpush.bf16.msra.mxu2 %v8511_v34  ;;  %5885 = vmatmul.bf16.vlgmr.msrb.gmra.mxu3 %v12061_v60  ;;  %v8356_v60 = vld [vmem:[%s15455_s1 + $0xfc8] sm:$0xf0]  ;;  %v8559_v13 = vor.u32 %v10090_v0, %v8556_v20  ;;  %v10036_v34 = vld [vmem:[%s15455_s1 + $0xfa4] sm:$0xf]  ;;  %v8460_v0 = vld [vmem:[%s15455_s1 + $0x1098] sm:$0xf0] }
 0x287   :  { %5929 = vmatpush.bf16.msra.mxu3 %v8575_v39  ;;  %v8359_v63 = vor.u32 %v10040_v59, %v8356_v60  ;;  %v8343_v7 = vor.u32 %v10036_v34, %v8340_v16  ;;  %v8524_v59 = vld [vmem:[%s15455_s1 + $0x1118] sm:$0xf0]  ;;  %v10032_v60 = vld [vmem:[%s15455_s1 + $0xf84] sm:$0xf]  ;;  %v10158_v42 = vld [vmem:[%s15455_s1 + $0x1374] sm:$0xf] }
 0x288   :  { %5891 = vmatpush.bf16.msra.mxu0 %v8375_v10  ;;  %v5665_v12 = vpop.f32.mrf.mxu2  ;;  %v5641_v10 = vpop.f32.mrf.mxu0  ;;  %v8327_v30 = vor.u32 %v10032_v60, %v8324_v62  ;;  %v10108_v34 = vld [vmem:[%s15455_s1 + $0x11e4] sm:$0xf]  ;;  %v8628_v16 = vld [vmem:[%s15455_s1 + $0x11e8] sm:$0xf0] }
 0x289   :  { %5904 = vmatpush.bf16.msra.mxu1 %v8439_v29  ;;  %v5666_v32 = vadd.f32 %v5665_v12, %v5653_v49  ;;  %v5678_v39 = vpop.f32.mrf.mxu3  ;;  %v10084_v29 = vld [vmem:[%s15455_s1 + $0x1124] sm:$0xf]  ;;  %v5654_v4 = vpop.f32.mrf.mxu1  ;;  %v8764_v49 = vld [vmem:[%s15455_s1 + $0x12f8] sm:$0xf0]  ;;  %v8519_v12 = vor.u32 %v10080_v36, %v8516_v26  ;;  %v8820_v10 = vld [vmem:[%s15455_s1 + $0x1368] sm:$0xf0] }
 0x28a   :  { %5917 = vmatpush.bf16.msra.mxu2 %v8503_v25  ;;  %v8532_v25 = vld [vmem:[%s15455_s1 + $0x1128] sm:$0xf0]  ;;  %v10140_v53 = vld [vmem:[%s15455_s1 + $0x12e4] sm:$0xf]  ;;  %v8620_v4 = vld [vmem:[%s15455_s1 + $0x11d8] sm:$0xf0] }
 0x28b   :  { %5930 = vmatpush.bf16.msra.mxu3 %v8567_v38  ;;  %v14640_v50 = vadd.f32 %v5678_v39, %v5666_v32  ;;  %v8396_v38 = vld [vmem:[%s15455_s1 + $0x1018] sm:$0xf0]  ;;  %v8535_v20 = vor.u32 %v10084_v29, %v8532_v25  ;;  %v8692_v32 = vld [vmem:[%s15455_s1 + $0x1268] sm:$0xf0]  ;;  %v10156_v39 = vld [vmem:[%s15455_s1 + $0x1364] sm:$0xf]  ;;  %v8759_v29 = vor.u32 %v10140_v53, %v8756_v55 }
 0x28c   :  { %5892 = vmatpush.bf16.msra.mxu0 %v8367_v41  ;;  %v10066_v41 = vld [vmem:[%s15455_s1 + $0x1094] sm:$0xf]  ;;  %v8399_v35 = vor.u32 %v10050_v37, %v8396_v38  ;;  %v8823_v37 = vor.u32 %v10156_v39, %v8820_v10  ;;  %v8812_v38 = vld [vmem:[%s15455_s1 + $0x1358] sm:$0xf0] }
 0x28d   :  { %5905 = vmatpush.bf16.msra.mxu1 %v8431_v33  ;;  %v10082_v33 = vld [vmem:[%s15455_s1 + $0x1114] sm:$0xf]  ;;  %v8463_v61 = vor.u32 %v10066_v41, %v8460_v0  ;;  %v8796_v36 = vld [vmem:[%s15455_s1 + $0x1338] sm:$0xf0] }
 0x28e   :  { %5918 = vmatpush.bf16.msra.mxu2 %v8495_v22  ;;  %v8335_v22 = vor.u32 %v10034_v19, %v8332_v51  ;;  %v8527_v58 = vor.u32 %v10082_v33, %v8524_v59  ;;  %v10106_v25 = vld [vmem:[%s15455_s1 + $0x11d4] sm:$0xf]  ;;  %v8748_v51 = vld [vmem:[%s15455_s1 + $0x12d8] sm:$0xf0]  ;;  %v8676_v33 = vld [vmem:[%s15455_s1 + $0x1248] sm:$0xf0] }
 0x28f   :  { %5931 = vmatpush.bf16.msra.mxu3 %v8559_v13  ;;  %v8388_v13 = vld [vmem:[%s15455_s1 + $0x1008] sm:$0xf0]  ;;  %v10138_v19 = vld [vmem:[%s15455_s1 + $0x12d4] sm:$0xf] }
 0x290   :  { %5893 = vmatpush.bf16.msra.mxu0 %v8359_v63  ;;  %v5667_v47 = vpop.f32.mrf.mxu2  ;;  %v8452_v63 = vld [vmem:[%s15455_s1 + $0x1088] sm:$0xf0]  ;;  %v8391_v15 = vor.u32 %v10048_v45, %v8388_v13  ;;  %v8751_v0 = vor.u32 %v10138_v19, %v8748_v51  ;;  %v10152_v13 = vld [vmem:[%s15455_s1 + $0x1344] sm:$0xf]  ;;  %v8716_v19 = vld [vmem:[%s15455_s1 + $0x1298] sm:$0xf0] }
 0x291   :  { %5906 = vmatpush.bf16.msra.mxu1 %v8423_v2  ;;  %v10126_v2 = vld [vmem:[%s15455_s1 + $0x1274] sm:$0xf]  ;;  %v5680_v18 = vpop.f32.mrf.mxu3  ;;  %v8740_v59 = vld [vmem:[%s15455_s1 + $0x12c8] sm:$0xf0] }
 0x292   :  { %5919 = vmatpush.bf16.msra.mxu2 %v8487_v54  ;;  %v8700_v54 = vld [vmem:[%s15455_s1 + $0x1278] sm:$0xf0] }
 0x293   :  { %5932 = vmatpush.bf16.msra.mxu3 %v8551_v44  ;;  %v8455_v44 = vor.u32 %v10064_v46, %v8452_v63  ;;  %v8703_v57 = vor.u32 %v10126_v2, %v8700_v54  ;;  %v8804_v46 = vld [vmem:[%s15455_s1 + $0x1348] sm:$0xf0]  ;;  %v8668_v2 = vld [vmem:[%s15455_s1 + $0x1238] sm:$0xf0]  ;;  %v10134_v54 = vld [vmem:[%s15455_s1 + $0x12b4] sm:$0xf] }
 0x294   :  { %5894 = vmatpush.bf16.msra.mxu0 %v8351_v21  ;;  %v8639_v21 = vor.u32 %v10110_v8, %v8636_v9  ;;  %v10102_v8 = vld [vmem:[%s15455_s1 + $0x11b4] sm:$0xf]  ;;  %v8807_v18 = vor.u32 %v10152_v13, %v8804_v46 }
 0x295   :  { %5907 = vmatpush.bf16.msra.mxu1 %v8415_v43  ;;  %v8828_v43 = vld [vmem:[%s15455_s1 + $0x1378] sm:$0xf0]  ;;  %v10118_v9 = vld [vmem:[%s15455_s1 + $0x1234] sm:$0xf] }
 0x296   :  { %5920 = vmatpush.bf16.msra.mxu2 %v8479_v11  ;;  %v8767_v11 = vor.u32 %v10142_v48, %v8764_v49  ;;  %v8831_v1 = vor.u32 %v10158_v42, %v8828_v43  ;;  %v8732_v48 = vld [vmem:[%s15455_s1 + $0x12b8] sm:$0xf0]  ;;  %v10150_v49 = vld [vmem:[%s15455_s1 + $0x1334] sm:$0xf]  ;;  %v8671_v26 = vor.u32 %v10118_v9, %v8668_v2  ;;  %v10116_v42 = vld [vmem:[%s15455_s1 + $0x1224] sm:$0xf] }
 0x297   :  { %5933 = vmatpush.bf16.msra.mxu3 %v8543_v6  ;;  %v8631_v6 = vor.u32 %v10108_v34, %v8628_v16  ;;  %v8724_v34 = vld [vmem:[%s15455_s1 + $0x12a8] sm:$0xf0]  ;;  %v8799_v16 = vor.u32 %v10150_v49, %v8796_v36  ;;  %v10206_v13 = vld [vmem:[%s15455_s1 + $0x14f4] sm:$0xf]  ;;  %v10172_v36 = vld [vmem:[%s15455_s1 + $0x13e4] sm:$0xf] }
 0x298   :  { %5895 = vmatpush.bf16.msra.mxu0 %v8343_v7  ;;  %v8695_v7 = vor.u32 %v10124_v3, %v8692_v32 }
 0x299   :  { %5908 = vmatpush.bf16.msra.mxu1 %v8407_v40  ;;  %v10122_v40 = vld [vmem:[%s15455_s1 + $0x1254] sm:$0xf] }
 0x29a   :  { %5921 = vmatpush.bf16.msra.mxu2 %v8471_v17  ;;  %v8684_v17 = vld [vmem:[%s15455_s1 + $0x1258] sm:$0xf0] }
 0x29b   :  { %5934 = vmatpush.bf16.msra.mxu3 %v8535_v20  ;;  %v8687_v41 = vor.u32 %v10122_v40, %v8684_v17  ;;  %v10120_v20 = vld [vmem:[%s15455_s1 + $0x1244] sm:$0xf]  ;;  %v8652_v40 = vld [vmem:[%s15455_s1 + $0x1218] sm:$0xf0]  ;;  %v10130_v17 = vld [vmem:[%s15455_s1 + $0x1294] sm:$0xf] }
 0x29c   :  { %5896 = vmatpush.bf16.msra.mxu0 %v8335_v22  ;;  %v10136_v22 = vld [vmem:[%s15455_s1 + $0x12c4] sm:$0xf]  ;;  %v8679_v47 = vor.u32 %v10120_v20, %v8676_v33  ;;  %v8644_v20 = vld [vmem:[%s15455_s1 + $0x1208] sm:$0xf0] }
 0x29d   :  { %5909 = vmatpush.bf16.msra.mxu1 %v8399_v35  ;;  %v8743_v63 = vor.u32 %v10136_v22, %v8740_v59  ;;  %v10128_v33 = vld [vmem:[%s15455_s1 + $0x1284] sm:$0xf]  ;;  %v8708_v59 = vld [vmem:[%s15455_s1 + $0x1288] sm:$0xf0] }
 0x29e   :  { %5922 = vmatpush.bf16.msra.mxu2 %v8463_v61 }
 0x29f   :  { %5935 = vmatpush.bf16.msra.mxu3 %v8527_v58 }
 0x2a0   :  { %5897 = vmatpush.bf16.msra.mxu0 %v8327_v30  ;;  %v5691_v62 = vpop.f32.mrf.mxu0 }
 0x2a1   :  { %5910 = vmatpush.bf16.msra.mxu1 %v8391_v15  ;;  %v5692_v35 = vadd.f32 %v5691_v62, %v14640_v50  ;;  %v5704_v45 = vpop.f32.mrf.mxu1  ;;  %v8604_v50 = vld [vmem:[%s15455_s1 + $0x11b8] sm:$0xf0]  ;;  %v8735_v15 = vor.u32 %v10134_v54, %v8732_v48  ;;  %v10222_v48 = vld [vmem:[%s15455_s1 + $0x1574] sm:$0xf] }
 0x2a2   :  { %5923 = vmatpush.bf16.msra.mxu2 %v8455_v44  ;;  %v8607_v30 = vor.u32 %v10102_v8, %v8604_v50  ;;  %v8892_v62 = vld [vmem:[%s15455_s1 + $0x13f8] sm:$0xf0]  ;;  %v10144_v8 = vld [vmem:[%s15455_s1 + $0x1304] sm:$0xf]  ;;  %v8772_v50 = vld [vmem:[%s15455_s1 + $0x1308] sm:$0xf0] }
 0x2a3   :  { %5936 = vmatpush.bf16.msra.mxu3 %v8519_v12  ;;  %5898 = vmatmul.bf16.vlgmr.msra.gmra.mxu0 %v12065_v5  ;;  %v8623_v5 = vor.u32 %v10106_v25, %v8620_v4  ;;  %v5705_v58 = vadd.f32 %v5704_v45, %v5692_v35  ;;  %v10132_v12 = vld [vmem:[%s15455_s1 + $0x12a4] sm:$0xf]  ;;  %v8588_v25 = vld [vmem:[%s15455_s1 + $0x1198] sm:$0xf0]  ;;  %v10114_v4 = vld [vmem:[%s15455_s1 + $0x1214] sm:$0xf]  ;;  %v8775_v49 = vor.u32 %v10144_v8, %v8772_v50 }
 0x2a4   :  { %5942 = vmatpush.bf16.msrb.mxu0 %v8639_v21  ;;  %5911 = vmatmul.bf16.vlgmr.msra.gmra.mxu1 %v12308_v23  ;;  %v10104_v23 = vld [vmem:[%s15455_s1 + $0x11c4] sm:$0xf]  ;;  %v8956_v45 = vld [vmem:[%s15455_s1 + $0x1478] sm:$0xf0] }
 0x2a5   :  { %5955 = vmatpush.bf16.msrb.mxu1 %v8703_v57  ;;  %5924 = vmatmul.bf16.vlgmr.msra.gmra.mxu2 %v12312_v27  ;;  %v10154_v27 = vld [vmem:[%s15455_s1 + $0x1354] sm:$0xf]  ;;  %v10100_v21 = vld [vmem:[%s15455_s1 + $0x11a4] sm:$0xf]  ;;  %v8596_v57 = vld [vmem:[%s15455_s1 + $0x11a8] sm:$0xf0] }
 0x2a6   :  { %5968 = vmatpush.bf16.msrb.mxu2 %v8767_v11  ;;  %5937 = vmatmul.bf16.vlgmr.msra.gmra.mxu3 %v12310_v24  ;;  %v8612_v24 = vld [vmem:[%s15455_s1 + $0x11c8] sm:$0xf0]  ;;  %v8815_v60 = vor.u32 %v10154_v27, %v8812_v38  ;;  %v8599_v55 = vor.u32 %v10100_v21, %v8596_v57  ;;  %v8780_v27 = vld [vmem:[%s15455_s1 + $0x1318] sm:$0xf0]  ;;  %v10096_v38 = vld [vmem:[%s15455_s1 + $0x1184] sm:$0xf] }
 0x2a7   :  { %5981 = vmatpush.bf16.msrb.mxu3 %v8831_v1  ;;  %v8615_v61 = vor.u32 %v10104_v23, %v8612_v24  ;;  %v8660_v11 = vld [vmem:[%s15455_s1 + $0x1228] sm:$0xf0]  ;;  %v10148_v1 = vld [vmem:[%s15455_s1 + $0x1324] sm:$0xf]  ;;  %v8719_v23 = vor.u32 %v10130_v17, %v8716_v19  ;;  %v10218_v17 = vld [vmem:[%s15455_s1 + $0x1554] sm:$0xf] }
 0x2a8   :  { %5943 = vmatpush.bf16.msrb.mxu0 %v8631_v6  ;;  %v5717_v44 = vpop.f32.mrf.mxu2  ;;  %v5693_v32 = vpop.f32.mrf.mxu0  ;;  %v8788_v6 = vld [vmem:[%s15455_s1 + $0x1328] sm:$0xf0]  ;;  %v8663_v10 = vor.u32 %v10116_v42, %v8660_v11  ;;  %v10112_v24 = vld [vmem:[%s15455_s1 + $0x1204] sm:$0xf]  ;;  %v9068_v19 = vld [vmem:[%s15455_s1 + $0x1558] sm:$0xf0] }
 0x2a9   :  { %5956 = vmatpush.bf16.msrb.mxu1 %v8695_v7  ;;  %v5718_v43 = vadd.f32 %v5717_v44, %v5705_v58  ;;  %v5730_v3 = vpop.f32.mrf.mxu3  ;;  %v5706_v39 = vpop.f32.mrf.mxu1  ;;  %v8727_v7 = vor.u32 %v10132_v12, %v8724_v34  ;;  %v8791_v51 = vor.u32 %v10148_v1, %v8788_v6  ;;  %v8647_v9 = vor.u32 %v10112_v24, %v8644_v20  ;;  %v8948_v44 = vld [vmem:[%s15455_s1 + $0x1468] sm:$0xf0]  ;;  %v10204_v21 = vld [vmem:[%s15455_s1 + $0x14e4] sm:$0xf]  ;;  %v8876_v32 = vld [vmem:[%s15455_s1 + $0x13d8] sm:$0xf0] }
 0x2aa   :  { %5969 = vmatpush.bf16.msrb.mxu2 %v8759_v29  ;;  %v10098_v29 = vld [vmem:[%s15455_s1 + $0x1194] sm:$0xf]  ;;  %v8711_v58 = vor.u32 %v10128_v33, %v8708_v59  ;;  %v9012_v57 = vld [vmem:[%s15455_s1 + $0x14e8] sm:$0xf0]  ;;  %v10220_v11 = vld [vmem:[%s15455_s1 + $0x1564] sm:$0xf]  ;;  %v9071_v24 = vor.u32 %v10218_v17, %v9068_v19 }
 0x2ab   :  { %5982 = vmatpush.bf16.msrb.mxu3 %v8823_v37  ;;  %v14839_v53 = vadd.f32 %v5730_v3, %v5718_v43  ;;  %v10146_v37 = vld [vmem:[%s15455_s1 + $0x1314] sm:$0xf]  ;;  %v9076_v12 = vld [vmem:[%s15455_s1 + $0x1568] sm:$0xf0]  ;;  %v15479_v6 = vld [vmem:[#allocation8_spill] sm:$0xff] }
 0x2ac   :  { %5944 = vmatpush.bf16.msrb.mxu0 %v8623_v5  ;;  %v8591_v5 = vor.u32 %v10098_v29, %v8588_v25  ;;  %v8783_v35 = vor.u32 %v10146_v37, %v8780_v27  ;;  %v10170_v3 = vld [vmem:[%s15455_s1 + $0x13d4] sm:$0xf]  ;;  %v15478_v1 = vld [vmem:[#allocation5_spill] sm:$0xff]  ;;  %v8940_v39 = vld [vmem:[%s15455_s1 + $0x1458] sm:$0xf0]  ;;  %v9079_v25 = vor.u32 %v10220_v11, %v9076_v12 }
 0x2ad   :  { %5957 = vmatpush.bf16.msrb.mxu1 %v8687_v41  ;;  %v8580_v41 = vld [vmem:[%s15455_s1 + $0x1188] sm:$0xf0]  ;;  %v15480_v29 = vld [vmem:[#allocation6_spill] sm:$0xff]  ;;  %v8988_v8 = vld [vmem:[%s15455_s1 + $0x14b8] sm:$0xf0] }
 0x2ae   :  { %5970 = vmatpush.bf16.msrb.mxu2 %v8751_v0  ;;  %v8655_v0 = vor.u32 %v10114_v4, %v8652_v40  ;;  %v15481_v4 = vld [vmem:[#allocation7_spill] sm:$0xff]  ;;  %v8879_v40 = vor.u32 %v10170_v3, %v8876_v32  ;;  %v8868_v27 = vld [vmem:[%s15455_s1 + $0x13c8] sm:$0xf0]  ;;  %v10160_v19 = vld [vmem:[%s15455_s1 + $0x1384] sm:$0xf] }
 0x2af   :  { %5983 = vmatpush.bf16.msrb.mxu3 %v8815_v60  ;;  %v10174_v60 = vld [vmem:[%s15455_s1 + $0x13f4] sm:$0xf]  ;;  %v9036_v17 = vld [vmem:[%s15455_s1 + $0x1518] sm:$0xf0] }
 0x2b0   :  { %5945 = vmatpush.bf16.msrb.mxu0 %v8615_v61  ;;  %v5719_v22 = vpop.f32.mrf.mxu2  ;;  %v10190_v61 = vld [vmem:[%s15455_s1 + $0x1474] sm:$0xf]  ;;  %v8895_v2 = vor.u32 %v10174_v60, %v8892_v62  ;;  %v10216_v60 = vld [vmem:[%s15455_s1 + $0x1544] sm:$0xf]  ;;  %v9060_v62 = vld [vmem:[%s15455_s1 + $0x1548] sm:$0xf0] }
 0x2b1   :  { %5958 = vmatpush.bf16.msrb.mxu1 %v8679_v47  ;;  %v5732_v46 = vpop.f32.mrf.mxu3  ;;  %v8583_v47 = vor.u32 %v10096_v38, %v8580_v41  ;;  %v8959_v54 = vor.u32 %v10190_v61, %v8956_v45  ;;  %v10184_v38 = vld [vmem:[%s15455_s1 + $0x1444] sm:$0xf]  ;;  %v8932_v41 = vld [vmem:[%s15455_s1 + $0x1448] sm:$0xf0]  ;;  %v10166_v45 = vld [vmem:[%s15455_s1 + $0x13b4] sm:$0xf]  ;;  %v9063_v50 = vor.u32 %v10216_v60, %v9060_v62 }
 0x2b2   :  { %5971 = vmatpush.bf16.msrb.mxu2 %v8743_v63  ;;  %v9020_v63 = vld [vmem:[%s15455_s1 + $0x14f8] sm:$0xf0]  ;;  %v10270_v60 = vld [vmem:[%s15455_s1 + $0x16f4] sm:$0xf] }
 0x2b3   :  { %5984 = vmatpush.bf16.msrb.mxu3 %v8807_v18  ;;  %v9084_v18 = vld [vmem:[%s15455_s1 + $0x1578] sm:$0xf0] }
 0x2b4   :  { %5946 = vmatpush.bf16.msrb.mxu0 %v8607_v30  ;;  %v9023_v30 = vor.u32 %v10206_v13, %v9020_v63  ;;  %v9087_v42 = vor.u32 %v10222_v48, %v9084_v18  ;;  %v10182_v13 = vld [vmem:[%s15455_s1 + $0x1434] sm:$0xf] }
 0x2b5   :  { %5959 = vmatpush.bf16.msrb.mxu1 %v8671_v26  ;;  %v8884_v26 = vld [vmem:[%s15455_s1 + $0x13e8] sm:$0xf0]  ;;  %v10198_v63 = vld [vmem:[%s15455_s1 + $0x14b4] sm:$0xf] }
 0x2b6   :  { %5972 = vmatpush.bf16.msrb.mxu2 %v8735_v15  ;;  %v10188_v15 = vld [vmem:[%s15455_s1 + $0x1464] sm:$0xf]  ;;  %v8887_v43 = vor.u32 %v10172_v36, %v8884_v26  ;;  %v8991_v48 = vor.u32 %v10198_v63, %v8988_v8  ;;  %v10286_v8 = vld [vmem:[%s15455_s1 + $0x1774] sm:$0xf] }
 0x2b7   :  { %5985 = vmatpush.bf16.msrb.mxu3 %v8799_v16  ;;  %v8951_v34 = vor.u32 %v10188_v15, %v8948_v44  ;;  %v9015_v16 = vor.u32 %v10204_v21, %v9012_v57  ;;  %v10180_v36 = vld [vmem:[%s15455_s1 + $0x1424] sm:$0xf]  ;;  %v8916_v15 = vld [vmem:[%s15455_s1 + $0x1428] sm:$0xf0] }
 0x2b8   :  { %5947 = vmatpush.bf16.msrb.mxu0 %v8599_v55  ;;  %v10186_v55 = vld [vmem:[%s15455_s1 + $0x1454] sm:$0xf]  ;;  %v10196_v44 = vld [vmem:[%s15455_s1 + $0x14a4] sm:$0xf]  ;;  %v8980_v21 = vld [vmem:[%s15455_s1 + $0x14a8] sm:$0xf0]  ;;  %v8919_v32 = vor.u32 %v10180_v36, %v8916_v15 }
 0x2b9   :  { %5960 = vmatpush.bf16.msrb.mxu1 %v8663_v10  ;;  %v10202_v10 = vld [vmem:[%s15455_s1 + $0x14d4] sm:$0xf] }
 0x2ba   :  { %5973 = vmatpush.bf16.msrb.mxu2 %v8727_v7  ;;  %v9004_v7 = vld [vmem:[%s15455_s1 + $0x14d8] sm:$0xf0] }
 0x2bb   :  { %5986 = vmatpush.bf16.msrb.mxu3 %v8791_v51  ;;  %v8943_v51 = vor.u32 %v10186_v55, %v8940_v39  ;;  %v9007_v37 = vor.u32 %v10202_v10, %v9004_v7  ;;  %v8983_v55 = vor.u32 %v10196_v44, %v8980_v21  ;;  %v10178_v39 = vld [vmem:[%s15455_s1 + $0x1414] sm:$0xf]  ;;  %v8908_v10 = vld [vmem:[%s15455_s1 + $0x1418] sm:$0xf0]  ;;  %v10284_v44 = vld [vmem:[%s15455_s1 + $0x1764] sm:$0xf] }
 0x2bc   :  { %5948 = vmatpush.bf16.msrb.mxu0 %v8591_v5  ;;  %v10168_v5 = vld [vmem:[%s15455_s1 + $0x13c4] sm:$0xf]  ;;  %v10194_v7 = vld [vmem:[%s15455_s1 + $0x1494] sm:$0xf]  ;;  %v9332_v21 = vld [vmem:[%s15455_s1 + $0x1768] sm:$0xf0] }
 0x2bd   :  { %5961 = vmatpush.bf16.msrb.mxu1 %v8655_v0  ;;  %v10200_v0 = vld [vmem:[%s15455_s1 + $0x14c4] sm:$0xf]  ;;  %v8871_v22 = vor.u32 %v10168_v5, %v8868_v27 }
 0x2be   :  { %5974 = vmatpush.bf16.msrb.mxu2 %v8719_v23  ;;  %v8996_v23 = vld [vmem:[%s15455_s1 + $0x14c8] sm:$0xf0]  ;;  %v10176_v27 = vld [vmem:[%s15455_s1 + $0x1404] sm:$0xf] }
 0x2bf   :  { %5987 = vmatpush.bf16.msrb.mxu3 %v8783_v35  ;;  %v8935_v35 = vor.u32 %v10184_v38, %v8932_v41  ;;  %v8999_v61 = vor.u32 %v10200_v0, %v8996_v23  ;;  %v8900_v38 = vld [vmem:[%s15455_s1 + $0x1408] sm:$0xf0]  ;;  %v10192_v41 = vld [vmem:[%s15455_s1 + $0x1484] sm:$0xf] }
 0x2c0   :  { %5949 = vmatpush.bf16.msrb.mxu0 %v8583_v47  ;;  %v5743_v20 = vpop.f32.mrf.mxu0  ;;  %v8924_v47 = vld [vmem:[%s15455_s1 + $0x1438] sm:$0xf0]  ;;  %v8964_v23 = vld [vmem:[%s15455_s1 + $0x1488] sm:$0xf0] }
 0x2c1   :  { %5962 = vmatpush.bf16.msrb.mxu1 %v8647_v9  ;;  %v5744_v33 = vadd.f32 %v5743_v20, %v14839_v53  ;;  %v5756_v59 = vpop.f32.mrf.mxu1  ;;  %v8860_v53 = vld [vmem:[%s15455_s1 + $0x13b8] sm:$0xf0] }
 0x2c2   :  { %5975 = vmatpush.bf16.msrb.mxu2 %v8711_v58  ;;  %v8863_v9 = vor.u32 %v10166_v45, %v8860_v53  ;;  %v10214_v58 = vld [vmem:[%s15455_s1 + $0x1534] sm:$0xf]  ;;  %v9148_v20 = vld [vmem:[%s15455_s1 + $0x15f8] sm:$0xf0]  ;;  %v10208_v45 = vld [vmem:[%s15455_s1 + $0x1504] sm:$0xf] }
 0x2c3   :  { %5988 = vmatpush.bf16.msrb.mxu3 %v8775_v49  ;;  %5950 = vmatmul.bf16.vlgmr.msrb.gmra.mxu0 %v15478_v1  ;;  %v5757_v46 = vadd.f32 %v5756_v59, %v5744_v33  ;;  %v8852_v49 = vld [vmem:[%s15455_s1 + $0x13a8] sm:$0xf0]  ;;  %v10162_v1 = vld [vmem:[%s15455_s1 + $0x1394] sm:$0xf]  ;;  %v9212_v59 = vld [vmem:[%s15455_s1 + $0x1678] sm:$0xf0] }
 0x2c4   :  { %5994 = vmatpush.bf16.msra.mxu0 %v8895_v2  ;;  %5963 = vmatmul.bf16.vlgmr.msrb.gmra.mxu1 %v15480_v29  ;;  %v9052_v2 = vld [vmem:[%s15455_s1 + $0x1538] sm:$0xf0]  ;;  %v9028_v53 = vld [vmem:[%s15455_s1 + $0x1508] sm:$0xf0] }
 0x2c5   :  { %6007 = vmatpush.bf16.msra.mxu1 %v8959_v54  ;;  %5976 = vmatmul.bf16.vlgmr.msrb.gmra.mxu2 %v15479_v6  ;;  %v8927_v54 = vor.u32 %v10182_v13, %v8924_v47  ;;  %v9055_v57 = vor.u32 %v10214_v58, %v9052_v2  ;;  %v8844_v6 = vld [vmem:[%s15455_s1 + $0x1398] sm:$0xf0]  ;;  %v8903_v13 = vor.u32 %v10176_v27, %v8900_v38  ;;  %v10236_v2 = vld [vmem:[%s15455_s1 + $0x15e4] sm:$0xf]  ;;  %v9252_v38 = vld [vmem:[%s15455_s1 + $0x16c8] sm:$0xf0] }
 0x2c6   :  { %6020 = vmatpush.bf16.msra.mxu2 %v9023_v30  ;;  %5989 = vmatmul.bf16.vlgmr.msrb.gmra.mxu3 %v15481_v4  ;;  %v10164_v30 = vld [vmem:[%s15455_s1 + $0x13a4] sm:$0xf]  ;;  %v8972_v29 = vld [vmem:[%s15455_s1 + $0x1498] sm:$0xf0]  ;;  %v10210_v4 = vld [vmem:[%s15455_s1 + $0x1514] sm:$0xf]  ;;  %v9031_v58 = vor.u32 %v10208_v45, %v9028_v53 }
 0x2c7   :  { %6033 = vmatpush.bf16.msra.mxu3 %v9087_v42  ;;  %v8855_v12 = vor.u32 %v10164_v30, %v8852_v49  ;;  %v8975_v5 = vor.u32 %v10194_v7, %v8972_v29  ;;  %v9039_v33 = vor.u32 %v10210_v4, %v9036_v17  ;;  %v10268_v30 = vld [vmem:[%s15455_s1 + $0x16e4] sm:$0xf]  ;;  %v9268_v49 = vld [vmem:[%s15455_s1 + $0x16e8] sm:$0xf0]  ;;  %v15485_v7 = vld [vmem:[#allocation11_spill] sm:$0xff] }
 0x2c8   :  { %5995 = vmatpush.bf16.msra.mxu0 %v8887_v43  ;;  %v5769_v18 = vpop.f32.mrf.mxu2  ;;  %v5745_v43 = vpop.f32.mrf.mxu0  ;;  %v9324_v4 = vld [vmem:[%s15455_s1 + $0x1758] sm:$0xf0]  ;;  %v10264_v27 = vld [vmem:[%s15455_s1 + $0x16c4] sm:$0xf]  ;;  %v10262_v53 = vld [vmem:[%s15455_s1 + $0x16b4] sm:$0xf] }
 0x2c9   :  { %6008 = vmatpush.bf16.msra.mxu1 %v8951_v34  ;;  %v5770_v26 = vadd.f32 %v5769_v18, %v5757_v46  ;;  %v5782_v42 = vpop.f32.mrf.mxu3  ;;  %v10212_v34 = vld [vmem:[%s15455_s1 + $0x1524] sm:$0xf]  ;;  %v5758_v3 = vpop.f32.mrf.mxu1  ;;  %v8967_v46 = vor.u32 %v10192_v41, %v8964_v23  ;;  %v9204_v18 = vld [vmem:[%s15455_s1 + $0x1668] sm:$0xf0]  ;;  %v10234_v43 = vld [vmem:[%s15455_s1 + $0x15d4] sm:$0xf] }
 0x2ca   :  { %6021 = vmatpush.bf16.msra.mxu2 %v9015_v16  ;;  %v9044_v16 = vld [vmem:[%s15455_s1 + $0x1528] sm:$0xf0]  ;;  %v15483_v3 = vld [vmem:[#allocation12_spill] sm:$0xff]  ;;  %v9180_v45 = vld [vmem:[%s15455_s1 + $0x1638] sm:$0xf0] }
 0x2cb   :  { %6034 = vmatpush.bf16.msra.mxu3 %v9079_v25  ;;  %v15038_v11 = vadd.f32 %v5782_v42, %v5770_v26  ;;  %v9047_v25 = vor.u32 %v10212_v34, %v9044_v16  ;;  %v6124_v26 = vsub.f32 0.0, %v13999_v14  ;;  %v9271_v42 = vor.u32 %v10268_v30, %v9268_v49  ;;  %v10250_v34 = vld [vmem:[%s15455_s1 + $0x1654] sm:$0xf]  ;;  %v15482_v16 = vld [vmem:[#allocation9_spill] sm:$0xff]  ;;  %v10260_v49 = vld [vmem:[%s15455_s1 + $0x16a4] sm:$0xf] }
 0x2cc   :  { %5996 = vmatpush.bf16.msra.mxu0 %v8879_v40  ;;  %v8847_v40 = vor.u32 %v10162_v1, %v8844_v6  ;;  %v9260_v1 = vld [vmem:[%s15455_s1 + $0x16d8] sm:$0xf0]  ;;  %v15484_v6 = vld [vmem:[#allocation10_spill] sm:$0xff]  ;;  %v9172_v30 = vld [vmem:[%s15455_s1 + $0x1628] sm:$0xf0] }
 0x2cd   :  { %6009 = vmatpush.bf16.msra.mxu1 %v8943_v51  ;;  %v8836_v51 = vld [vmem:[%s15455_s1 + $0x1388] sm:$0xf0] }
 0x2ce   :  { %6022 = vmatpush.bf16.msra.mxu2 %v9007_v37  ;;  %v8911_v37 = vor.u32 %v10178_v39, %v8908_v10  ;;  %v9335_v39 = vor.u32 %v10284_v44, %v9332_v21  ;;  %v6126_v10 = vmul.f32 1.442695, %v6124_v26 }
 0x2cf   :  { %6035 = vmatpush.bf16.msra.mxu3 %v9071_v24  ;;  %v10238_v24 = vld [vmem:[%s15455_s1 + $0x15f4] sm:$0xf] }
 0x2d0   :  { %5997 = vmatpush.bf16.msra.mxu0 %v8871_v22  ;;  %v5771_v0 = vpop.f32.mrf.mxu2  ;;  %v10254_v22 = vld [vmem:[%s15455_s1 + $0x1674] sm:$0xf]  ;;  %v9151_v47 = vor.u32 %v10238_v24, %v9148_v20  ;;  %10338 = vpow2.f32 %v6126_v10  ;;  %v9228_v10 = vld [vmem:[%s15455_s1 + $0x1698] sm:$0xf0] }
 0x2d1   :  { %6010 = vmatpush.bf16.msra.mxu1 %v8935_v35  ;;  %v5784_v62 = vpop.f32.mrf.mxu3  ;;  %v8839_v35 = vor.u32 %v10160_v19, %v8836_v51  ;;  %v9215_v63 = vor.u32 %v10254_v22, %v9212_v59  ;;  %v10232_v19 = vld [vmem:[%s15455_s1 + $0x15c4] sm:$0xf]  ;;  %v9124_v51 = vld [vmem:[%s15455_s1 + $0x15c8] sm:$0xf0] }
 0x2d2   :  { %6023 = vmatpush.bf16.msra.mxu2 %v8999_v61  ;;  %v9276_v61 = vld [vmem:[%s15455_s1 + $0x16f8] sm:$0xf0]  ;;  %v9127_v24 = vor.u32 %v10232_v19, %v9124_v51  ;;  %v9316_v22 = vld [vmem:[%s15455_s1 + $0x1748] sm:$0xf0]  ;;  %v10230_v62 = vld [vmem:[%s15455_s1 + $0x15b4] sm:$0xf] }
 0x2d3   :  { %6036 = vmatpush.bf16.msra.mxu3 %v9063_v50  ;;  %v9340_v50 = vld [vmem:[%s15455_s1 + $0x1778] sm:$0xf0] }
 0x2d4   :  { %5998 = vmatpush.bf16.msra.mxu0 %v8863_v9  ;;  %v9279_v9 = vor.u32 %v10270_v60, %v9276_v61  ;;  %v9343_v36 = vor.u32 %v10286_v8, %v9340_v50  ;;  %v9255_v60 = vor.u32 %v10264_v27, %v9252_v38  ;;  %v9308_v8 = vld [vmem:[%s15455_s1 + $0x1738] sm:$0xf0]  ;;  %v9156_v27 = vld [vmem:[%s15455_s1 + $0x1608] sm:$0xf0] }
 0x2d5   :  { %6011 = vmatpush.bf16.msra.mxu1 %v8927_v54  ;;  %v9140_v54 = vld [vmem:[%s15455_s1 + $0x15e8] sm:$0xf0] }
 0x2d6   :  { %6024 = vmatpush.bf16.msra.mxu2 %v8991_v48  ;;  %v10252_v48 = vld [vmem:[%s15455_s1 + $0x1664] sm:$0xf]  ;;  %v9143_v15 = vor.u32 %v10236_v2, %v9140_v54  ;;  %v9108_v54 = vld [vmem:[%s15455_s1 + $0x15a8] sm:$0xf0]  ;;  %v10339_v21 = vpop.eup %10338 }
 0x2d7   :  { %6037 = vmatpush.bf16.msra.mxu3 %v9055_v57  ;;  %v9207_v57 = vor.u32 %v10252_v48, %v9204_v18  ;;  %v10228_v2 = vld [vmem:[%s15455_s1 + $0x15a4] sm:$0xf] }
 0x2d8   :  { %5999 = vmatpush.bf16.msra.mxu0 %v8855_v12  ;;  %v9132_v12 = vld [vmem:[%s15455_s1 + $0x15d8] sm:$0xf0]  ;;  %v10244_v48 = vld [vmem:[%s15455_s1 + $0x1624] sm:$0xf] }
 0x2d9   :  { %6012 = vmatpush.bf16.msra.mxu1 %v8919_v32  ;;  %v9196_v32 = vld [vmem:[%s15455_s1 + $0x1658] sm:$0xf0]  ;;  %v9135_v29 = vor.u32 %v10234_v43, %v9132_v12  ;;  %v10276_v43 = vld [vmem:[%s15455_s1 + $0x1724] sm:$0xf]  ;;  %v9300_v12 = vld [vmem:[%s15455_s1 + $0x1728] sm:$0xf0] }
 0x2da   :  { %6025 = vmatpush.bf16.msra.mxu2 %v8983_v55  ;;  %v10266_v55 = vld [vmem:[%s15455_s1 + $0x16d4] sm:$0xf] }
 0x2db   :  { %6038 = vmatpush.bf16.msra.mxu3 %v9047_v25  ;;  %v10282_v25 = vld [vmem:[%s15455_s1 + $0x1754] sm:$0xf]  ;;  %v9263_v17 = vor.u32 %v10266_v55, %v9260_v1  ;;  %v9100_v55 = vld [vmem:[%s15455_s1 + $0x1598] sm:$0xf0] }
 0x2dc   :  { %6000 = vmatpush.bf16.msra.mxu0 %v8847_v40  ;;  %v9199_v40 = vor.u32 %v10250_v34, %v9196_v32  ;;  %v9327_v41 = vor.u32 %v10282_v25, %v9324_v4  ;;  %v10226_v32 = vld [vmem:[%s15455_s1 + $0x1594] sm:$0xf] }
 0x2dd   :  { %6013 = vmatpush.bf16.msra.mxu1 %v8911_v37  ;;  %v10248_v37 = vld [vmem:[%s15455_s1 + $0x1644] sm:$0xf]  ;;  %v10242_v1 = vld [vmem:[%s15455_s1 + $0x1614] sm:$0xf]  ;;  %v9103_v25 = vor.u32 %v10226_v32, %v9100_v55 }
 0x2de   :  { %6026 = vmatpush.bf16.msra.mxu2 %v8975_v5  ;;  %v9188_v5 = vld [vmem:[%s15455_s1 + $0x1648] sm:$0xf0]  ;;  %v10274_v4 = vld [vmem:[%s15455_s1 + $0x1714] sm:$0xf]  ;;  %v10324_v55 = vld [vmem:[%s15457_s3 + $0x20] sm:$0xff] }
 0x2df   :  { %6039 = vmatpush.bf16.msra.mxu3 %v9039_v33  ;;  %v10280_v33 = vld [vmem:[%s15455_s1 + $0x1744] sm:$0xf]  ;;  %v9191_v59 = vor.u32 %v10248_v37, %v9188_v5  ;;  %v9092_v37 = vld [vmem:[%s15455_s1 + $0x1588] sm:$0xf0] }
 0x2e0   :  { %6001 = vmatpush.bf16.msra.mxu0 %v8839_v35  ;;  %v5795_v0 = vpop.f32.mrf.mxu0  ;;  %v10246_v35 = vld [vmem:[%s15455_s1 + $0x1634] sm:$0xf]  ;;  %v10240_v5 = vld [vmem:[%s15455_s1 + $0x1604] sm:$0xf] }
 0x2e1   :  { %6014 = vmatpush.bf16.msra.mxu1 %v8903_v13  ;;  %v5796_v23 = vadd.f32 %v5795_v0, %v15038_v11  ;;  %v5808_v20 = vpop.f32.mrf.mxu1  ;;  %v9116_v11 = vld [vmem:[%s15455_s1 + $0x15b8] sm:$0xf0]  ;;  %v9183_v50 = vor.u32 %v10246_v35, %v9180_v45  ;;  %v9220_v0 = vld [vmem:[%s15455_s1 + $0x1688] sm:$0xf0]  ;;  %v9159_v35 = vor.u32 %v10240_v5, %v9156_v27 }
 0x2e2   :  { %6027 = vmatpush.bf16.msra.mxu2 %v8967_v46  ;;  %v9244_v13 = vld [vmem:[%s15455_s1 + $0x16b8] sm:$0xf0]  ;;  %v9319_v46 = vor.u32 %v10280_v33, %v9316_v22  ;;  %v10318_v33 = vld [vmem:[%s15455_s1 + $0x1874] sm:$0xf]  ;;  %v9428_v5 = vld [vmem:[%s15455_s1 + $0x1828] sm:$0xf0] }
 0x2e3   :  { %6040 = vmatpush.bf16.msra.mxu3 %v9031_v58  ;;  %6002 = vmatmul.bf16.vlgmr.msra.gmra.mxu0 %v15482_v16  ;;  %v5809_v61 = vadd.f32 %v5808_v20, %v5796_v23  ;;  %v9175_v16 = vor.u32 %v10244_v48, %v9172_v30  ;;  %v10302_v23 = vld [vmem:[%s15455_s1 + $0x17f4] sm:$0xf]  ;;  %v9404_v20 = vld [vmem:[%s15455_s1 + $0x17f8] sm:$0xf0]  ;;  %v15486_v30 = vld [vmem:[#allocation13_spill] sm:$0xff] }
 0x2e4   :  { %6046 = vmatpush.bf16.msrb.mxu0 %v9151_v47  ;;  %6015 = vmatmul.bf16.vlgmr.msra.gmra.mxu1 %v15484_v6  ;;  %v9119_v47 = vor.u32 %v10230_v62, %v9116_v11  ;;  %v9164_v6 = vld [vmem:[%s15455_s1 + $0x1618] sm:$0xf0]  ;;  %v10272_v62 = vld [vmem:[%s15455_s1 + $0x1704] sm:$0xf]  ;;  %v9284_v11 = vld [vmem:[%s15455_s1 + $0x1708] sm:$0xf0]  ;;  %v9407_v45 = vor.u32 %v10302_v23, %v9404_v20 }
 0x2e5   :  { %6059 = vmatpush.bf16.msrb.mxu1 %v9215_v63  ;;  %6028 = vmatmul.bf16.vlgmr.msra.gmra.mxu2 %v15483_v3  ;;  %v10278_v63 = vld [vmem:[%s15455_s1 + $0x1734] sm:$0xf]  ;;  %v9167_v19 = vor.u32 %v10242_v1, %v9164_v6  ;;  %v9468_v22 = vld [vmem:[%s15455_s1 + $0x1878] sm:$0xf0] }
 0x2e6   :  { %6072 = vmatpush.bf16.msrb.mxu2 %v9279_v9  ;;  %6041 = vmatmul.bf16.vlgmr.msra.gmra.mxu3 %v15485_v7  ;;  %v9247_v9 = vor.u32 %v10262_v53, %v9244_v13  ;;  %v9311_v26 = vor.u32 %v10278_v63, %v9308_v8  ;;  %v6130_v7 = vadd.f32 1.0, %v10339_v21  ;;  %v9471_v53 = vor.u32 %v10318_v33, %v9468_v22  ;;  %v10327_v13 = vld [vmem:[%s15457_s3 + $0x38] sm:$0xff]  ;;  %v9396_v63 = vld [vmem:[%s15455_s1 + $0x17e8] sm:$0xf0]  ;;  %v10316_v8 = vld [vmem:[%s15455_s1 + $0x1864] sm:$0xf] }
 0x2e7   :  { %6085 = vmatpush.bf16.msrb.mxu3 %v9343_v36  ;;  %v9236_v36 = vld [vmem:[%s15455_s1 + $0x16a8] sm:$0xf0]  ;;  %v9388_v48 = vld [vmem:[%s15455_s1 + $0x17d8] sm:$0xf0]  ;;  %v10296_v21 = vld [vmem:[%s15455_s1 + $0x17c4] sm:$0xf] }
 0x2e8   :  { %6047 = vmatpush.bf16.msrb.mxu0 %v9143_v15  ;;  %v5821_v58 = vpop.f32.mrf.mxu2  ;;  %v5797_v44 = vpop.f32.mrf.mxu0  ;;  %v9239_v3 = vor.u32 %v10260_v49, %v9236_v36  ;;  %10340 = vrcp.f32 %v6130_v7  ;;  %v10314_v49 = vld [vmem:[%s15455_s1 + $0x1854] sm:$0xf]  ;;  %v9452_v36 = vld [vmem:[%s15455_s1 + $0x1858] sm:$0xf0] }
 0x2e9   :  { %6060 = vmatpush.bf16.msrb.mxu1 %v9207_v57  ;;  %v5822_v18 = vadd.f32 %v5821_v58, %v5809_v61  ;;  %v5834_v15 = vpop.f32.mrf.mxu3  ;;  %v5810_v34 = vpop.f32.mrf.mxu1  ;;  %v9455_v44 = vor.u32 %v10314_v49, %v9452_v36  ;;  %v10294_v1 = vld [vmem:[%s15455_s1 + $0x17b4] sm:$0xf]  ;;  %v9372_v6 = vld [vmem:[%s15455_s1 + $0x17b8] sm:$0xf0] }
 0x2ea   :  { %6073 = vmatpush.bf16.msrb.mxu2 %v9271_v42  ;;  %v9111_v42 = vor.u32 %v10228_v2, %v9108_v54  ;;  %v10326_v2 = vld [vmem:[%s15457_s3 + $0x30] sm:$0xff]  ;;  %v9375_v7 = vor.u32 %v10294_v1, %v9372_v6  ;;  %v9356_v22 = vld [vmem:[%s15455_s1 + $0x1798] sm:$0xf0] }
 0x2eb   :  { %6086 = vmatpush.bf16.msrb.mxu3 %v9335_v39  ;;  %v15238_v57 = vadd.f32 %v5834_v15, %v5822_v18  ;;  %v10258_v39 = vld [vmem:[%s15455_s1 + $0x1694] sm:$0xf] }
 0x2ec   :  { %6048 = vmatpush.bf16.msrb.mxu0 %v9135_v29  ;;  %v9303_v29 = vor.u32 %v10276_v43, %v9300_v12  ;;  %v9231_v51 = vor.u32 %v10258_v39, %v9228_v10  ;;  %v10298_v54 = vld [vmem:[%s15455_s1 + $0x17d4] sm:$0xf]  ;;  %v9436_v10 = vld [vmem:[%s15455_s1 + $0x1838] sm:$0xf0] }
 0x2ed   :  { %6061 = vmatpush.bf16.msrb.mxu1 %v9199_v40  ;;  %v9292_v40 = vld [vmem:[%s15455_s1 + $0x1718] sm:$0xf0]  ;;  %v10322_v20 = vld [vmem:[%s15457_s3 + $0x10] sm:$0xff] }
 0x2ee   :  { %6074 = vmatpush.bf16.msrb.mxu2 %v9263_v17  ;;  %v10224_v17 = vld [vmem:[%s15455_s1 + $0x1584] sm:$0xf]  ;;  %v10341_v18 = vpop.eup %10340  ;;  %v10290_v33 = vld [vmem:[%s15455_s1 + $0x1794] sm:$0xf] }
 0x2ef   :  { %6087 = vmatpush.bf16.msrb.mxu3 %v9327_v41  ;;  %v10256_v41 = vld [vmem:[%s15455_s1 + $0x1684] sm:$0xf]  ;;  %v6134_v15 = vadd.f32 2.0, %v10341_v18 }
 0x2f0   :  { %6049 = vmatpush.bf16.msrb.mxu0 %v9127_v24  ;;  %v5823_v38 = vpop.f32.mrf.mxu2  ;;  %v9295_v24 = vor.u32 %v10274_v4, %v9292_v40  ;;  %v9223_v61 = vor.u32 %v10256_v41, %v9220_v0  ;;  %v10323_v4 = vld [vmem:[%s15457_s3 + $0x18] sm:$0xff] }
 0x2f1   :  { %6062 = vmatpush.bf16.msrb.mxu1 %v9191_v59  ;;  %v5836_v59 = vpop.f32.mrf.mxu3 }
 0x2f2   :  { %6075 = vmatpush.bf16.msrb.mxu2 %v9255_v60  ;;  %v9095_v60 = vor.u32 %v10224_v17, %v9092_v37  ;;  %v10292_v17 = vld [vmem:[%s15455_s1 + $0x17a4] sm:$0xf]  ;;  %v10306_v59 = vld [vmem:[%s15455_s1 + $0x1814] sm:$0xf] }
 0x2f3   :  { %6088 = vmatpush.bf16.msrb.mxu3 %v9319_v46  ;;  %v9287_v46 = vor.u32 %v10272_v62, %v9284_v11  ;;  %v10308_v37 = vld [vmem:[%s15455_s1 + $0x1824] sm:$0xf]  ;;  %v9359_v62 = vor.u32 %v10290_v33, %v9356_v22  ;;  %v10333_v22 = vld [vmem:[%s15457_s3 + $0x68] sm:$0xff] }
 0x2f4   :  { %6050 = vmatpush.bf16.msrb.mxu0 %v9119_v47  ;;  %v10300_v47 = vld [vmem:[%s15455_s1 + $0x17e4] sm:$0xf] }
 0x2f5   :  { %6063 = vmatpush.bf16.msrb.mxu1 %v9183_v50  ;;  %v9460_v50 = vld [vmem:[%s15455_s1 + $0x1868] sm:$0xf0] }
 0x2f6   :  { %6076 = vmatpush.bf16.msrb.mxu2 %v9247_v9  ;;  %v9399_v9 = vor.u32 %v10300_v47, %v9396_v63  ;;  %v9463_v58 = vor.u32 %v10316_v8, %v9460_v50 }
 0x2f7   :  { %6089 = vmatpush.bf16.msrb.mxu3 %v9311_v26  ;;  %v9391_v26 = vor.u32 %v10298_v54, %v9388_v48  ;;  %v10355_v48 = vld [vmem:[#allocation1] sm:$0xff] }
 0x2f8   :  { %6051 = vmatpush.bf16.msrb.mxu0 %v9111_v42  ;;  %v9444_v42 = vld [vmem:[%s15455_s1 + $0x1848] sm:$0xf0] }
 0x2f9   :  { %6064 = vmatpush.bf16.msrb.mxu1 %v9175_v16 }
 0x2fa   :  { %6077 = vmatpush.bf16.msrb.mxu2 %v9239_v3  ;;  %v6136_v3 = vmul.f32 %v10341_v18, %v6134_v15 }
 0x2fb   :  { %6090 = vmatpush.bf16.msrb.mxu3 %v9303_v29 }
 0x2fc   :  { %6052 = vmatpush.bf16.msrb.mxu0 %v9103_v25  ;;  %v6140_v29 = vadd.f32 2.0, %v6136_v3  ;;  %v6138_v8 = vmul.f32 %v6136_v3, %v13999_v14 }
 0x2fd   :  { %6065 = vmatpush.bf16.msrb.mxu1 %v9167_v19  ;;  %v9364_v19 = vld [vmem:[%s15455_s1 + $0x17a8] sm:$0xf0] }
 0x2fe   :  { %6078 = vmatpush.bf16.msrb.mxu2 %v9231_v51  ;;  %v9367_v0 = vor.u32 %v10292_v17, %v9364_v19  ;;  %10342 = vrcp.f32 %v6140_v29 }
 0x2ff   :  { %6091 = vmatpush.bf16.msrb.mxu3 %v9295_v24  ;;  %v9431_v24 = vor.u32 %v10308_v37, %v9428_v5 }
 0x300   :  { %6053 = vmatpush.bf16.msrb.mxu0 %v9095_v60  ;;  %v5847_v43 = vpop.f32.mrf.mxu0  ;;  %v9420_v60 = vld [vmem:[%s15455_s1 + $0x1818] sm:$0xf0] }
 0x301   :  { %6066 = vmatpush.bf16.msrb.mxu1 %v9159_v35  ;;  %v5848_v12 = vadd.f32 %v5847_v43, %v15238_v57  ;;  %v5860_v16 = vpop.f32.mrf.mxu1  ;;  %v10310_v57 = vld [vmem:[%s15455_s1 + $0x1834] sm:$0xf]  ;;  %v9423_v11 = vor.u32 %v10306_v59, %v9420_v60  ;;  %v10321_v35 = vld [vmem:[%s15457_s3 + $0x8] sm:$0xff] }
 0x302   :  { %6079 = vmatpush.bf16.msrb.mxu2 %v9223_v61  ;;  %v9439_v25 = vor.u32 %v10310_v57, %v9436_v10  ;;  %v10288_v61 = vld [vmem:[%s15455_s1 + $0x1784] sm:$0xf] }
 0x303   :  { %6092 = vmatpush.bf16.msrb.mxu3 %v9287_v46  ;;  %6054 = vmatmul.bf16.vlgmr.msrb.gmra.mxu0 %v15486_v30  ;;  %v5861_v39 = vadd.f32 %v5860_v16, %v5848_v12  ;;  %v9412_v46 = vld [vmem:[%s15455_s1 + $0x1808] sm:$0xf0] }
 0x304   :  { %6098 = vmatpush.bf16.msra.mxu0 %v9407_v45  ;;  %6067 = vmatmul.bf16.vlgmr.msrb.gmra.mxu1 %v12893_v52  ;;  %v9380_v52 = vld [vmem:[%s15455_s1 + $0x17c8] sm:$0xf0]  ;;  %v10343_v47 = vpop.eup %10342 }
 0x305   :  { %6111 = vmatpush.bf16.msra.mxu1 %v9471_v53  ;;  %6080 = vmatmul.bf16.vlgmr.msrb.gmra.mxu2 %v12897_v28  ;;  %v10325_v28 = vld [vmem:[%s15457_s3 + $0x28] sm:$0xff]  ;;  %v9383_v34 = vor.u32 %v10296_v21, %v9380_v52 }
 0x306   :  { %6280 = vmatpush.bf16.msra.mxu2 %v10327_v13  ;;  %6093 = vmatmul.bf16.vlgmr.msrb.gmra.mxu3 %v12895_v31  ;;  %v10312_v31 = vld [vmem:[%s15455_s1 + $0x1844] sm:$0xf]  ;;  %v9348_v45 = vld [vmem:[%s15455_s1 + $0x1788] sm:$0xf0] }
 0x307   :  { %v9447_v32 = vor.u32 %v10312_v31, %v9444_v42  ;;  %v10304_v13 = vld [vmem:[%s15455_s1 + $0x1804] sm:$0xf]  ;;  %v9351_v50 = vor.u32 %v10288_v61, %v9348_v45  ;;  %v10331_v61 = vld [vmem:[%s15457_s3 + $0x58] sm:$0xff] }
 0x308   :  { %6099 = vmatpush.bf16.msra.mxu0 %v9399_v9  ;;  %v5873_v40 = vpop.f32.mrf.mxu2  ;;  %v5849_v38 = vpop.f32.mrf.mxu0  ;;  %v9415_v9 = vor.u32 %v10304_v13, %v9412_v46 }
 0x309   :  { %6112 = vmatpush.bf16.msra.mxu1 %v9463_v58  ;;  %v5874_v51 = vadd.f32 %v5873_v40, %v5861_v39  ;;  %v5886_v27 = vpop.f32.mrf.mxu3  ;;  %v5862_v23 = vpop.f32.mrf.mxu1  ;;  %v10320_v58 = vld [vmem:[%s15457_s3] sm:$0xff] }
 0x30a   :  { %6281 = vmatpush.bf16.msra.mxu2 %v10326_v2  ;;  %v6144_v2 = vmul.f32 %v10343_v47, %v6138_v8  ;;  %v10329_v8 = vld [vmem:[%s15457_s3 + $0x48] sm:$0xff] }
 0x30b   :  { %v5887_v41 = vadd.f32 %v5886_v27, %v5874_v51  ;;  %v10335_v27 = vld [vmem:[%s15457_s3 + $0x78] sm:$0xff] }
 0x30c   :  { %6100 = vmatpush.bf16.msra.mxu0 %v9391_v26  ;;  %v6146_v54 = vpack.c.bf16 %v6144_v2, %v6144_v2  ;;  %6293 = vmatpush.bf16.msra.mxu3 %v10335_v27 }
 0x30d   :  { %6113 = vmatpush.bf16.msra.mxu1 %v9455_v44 }
 0x30e   :  { %6282 = vmatpush.bf16.msra.mxu2 %v10325_v28 }
 0x310   :  { %6101 = vmatpush.bf16.msra.mxu0 %v9383_v34  ;;  %v5875_v53 = vpop.f32.mrf.mxu2 }
 0x311   :  { %6114 = vmatpush.bf16.msra.mxu1 %v9447_v32  ;;  %v5888_v63 = vpop.f32.mrf.mxu3  ;;  %v10330_v53 = vld [vmem:[%s15457_s3 + $0x50] sm:$0xff] }
 0x312   :  { %6283 = vmatpush.bf16.msra.mxu2 %v10324_v55 }
 0x314   :  { %6102 = vmatpush.bf16.msra.mxu0 %v9375_v7 }
 0x315   :  { %6115 = vmatpush.bf16.msra.mxu1 %v9439_v25 }
 0x316   :  { %6284 = vmatpush.bf16.msra.mxu2 %v10323_v4 }
 0x318   :  { %6103 = vmatpush.bf16.msra.mxu0 %v9367_v0 }
 0x319   :  { %6116 = vmatpush.bf16.msra.mxu1 %v9431_v24  ;;  %v10334_v24 = vld [vmem:[%s15457_s3 + $0x70] sm:$0xff] }
 0x31a   :  { %6285 = vmatpush.bf16.msra.mxu2 %v10322_v20  ;;  %6294 = vmatpush.bf16.msra.mxu3 %v10334_v24 }
 0x31c   :  { %6104 = vmatpush.bf16.msra.mxu0 %v9359_v62 }
 0x31d   :  { %6117 = vmatpush.bf16.msra.mxu1 %v9423_v11  ;;  %v10332_v11 = vld [vmem:[%s15457_s3 + $0x60] sm:$0xff] }
 0x31e   :  { %6286 = vmatpush.bf16.msra.mxu2 %v10321_v35  ;;  %6295 = vmatpush.bf16.msra.mxu3 %v10333_v22 }
 0x320   :  { %6105 = vmatpush.bf16.msra.mxu0 %v9351_v50  ;;  %v5899_v14 = vpop.f32.mrf.mxu0 }
 0x321   :  { %6118 = vmatpush.bf16.msra.mxu1 %v9415_v9  ;;  %v5900_v18 = vadd.f32 %v5899_v14, %v5887_v41  ;;  %v5912_v30 = vpop.f32.mrf.mxu1 }
 0x322   :  { %6287 = vmatpush.bf16.msra.mxu2 %v10320_v58  ;;  %6296 = vmatpush.bf16.msra.mxu3 %v10332_v11  ;;  %v10328_v58 = vld [vmem:[%s15457_s3 + $0x40] sm:$0xff] }
 0x323   :  { %6106 = vmatmul.bf16.vlgmr.msra.gmra.mxu0 %v12899_v56  ;;  %v5913_v49 = vadd.f32 %v5912_v30, %v5900_v18 }
 0x324   :  { %6119 = vmatmul.bf16.vlgmr.msra.gmra.mxu1 %v10355_v48 }
 0x325   :  { %6288 = vmatmul.bf16.vlgmr.msra.gmra.mxu2 %v6146_v54 }
 0x326   :  { %6297 = vmatpush.bf16.msra.mxu3 %v10331_v61 }
 0x328   :  { %v5925_v36 = vpop.f32.mrf.mxu2  ;;  %v5901_v44 = vpop.f32.mrf.mxu0 }
 0x329   :  { %v5926_v26 = vadd.f32 %v5925_v36, %v5913_v49  ;;  %v5938_v15 = vpop.f32.mrf.mxu3  ;;  %v5914_v21 = vpop.f32.mrf.mxu1 }
 0x32a   :  { %6298 = vmatpush.bf16.msra.mxu3 %v10330_v53 }
 0x32b   :  { %v5939_v28 = vadd.f32 %v5938_v15, %v5926_v26 }
 0x32e   :  { %6299 = vmatpush.bf16.msra.mxu3 %v10329_v8 }
 0x330   :  { %v5927_v52 = vpop.f32.mrf.mxu2 }
 0x331   :  { %v5940_v31 = vpop.f32.mrf.mxu3 }
 0x332   :  { %6300 = vmatpush.bf16.msra.mxu3 %v10328_v58 }
 0x340   :  { %v5951_v42 = vpop.f32.mrf.mxu0 }
 0x341   :  { %v5952_v43 = vadd.f32 %v5951_v42, %v5939_v28  ;;  %v5964_v12 = vpop.f32.mrf.mxu1  ;;  %v10337_v42 = vld [vmem:[%s15458_s4] ss:$0 sm:$0xff]  ;;  %s10382_s4 = smov [#allocation2]  }
 0x342   :  { %s6325_s8 = sshll.u32 %s10382_s4, 4  ;;  %s6326_s8 = int_to_ptr.vmem [resolvable:$true] %s6325_s8 }
 0x343   :  { %v5965_v34 = vadd.f32 %v5964_v12, %v5952_v43 }
 0x348   :  { %v5977_v56 = vpop.f32.mrf.mxu2  ;;  %v5953_v3 = vpop.f32.mrf.mxu0 }
 0x349   :  { %v5990_v16 = vpop.f32.mrf.mxu3  ;;  %v5966_v32 = vpop.f32.mrf.mxu1  ;;  %v5978_v40 = vadd.f32 %v5977_v56, %v5965_v34 }
 0x34b   :  { %v5991_v51 = vadd.f32 %v5990_v16, %v5978_v40 }
 0x350   :  { %v5979_v55 = vpop.f32.mrf.mxu2 }
 0x351   :  { %v5992_v1 = vpop.f32.mrf.mxu3 }
 0x360   :  { %v6003_v6 = vpop.f32.mrf.mxu0 }
 0x361   :  { %v6016_v39 = vpop.f32.mrf.mxu1  ;;  %v6004_v37 = vadd.f32 %v6003_v6, %v5991_v51 }
 0x363   :  { %v6017_v23 = vadd.f32 %v6016_v39, %v6004_v37 }
 0x368   :  { %v6029_v57 = vpop.f32.mrf.mxu2  ;;  %v6005_v7 = vpop.f32.mrf.mxu0 }
 0x369   :  { %v6042_v10 = vpop.f32.mrf.mxu3  ;;  %v6018_v29 = vpop.f32.mrf.mxu1  ;;  %v6030_v20 = vadd.f32 %v6029_v57, %v6017_v23 }
 0x36b   :  { %v6043_v59 = vadd.f32 %v6042_v10, %v6030_v20 }
 0x370   :  { %v6031_v25 = vpop.f32.mrf.mxu2 }
 0x371   :  { %v6044_v4 = vpop.f32.mrf.mxu3 }
 0x380   :  { %v6055_v17 = vpop.f32.mrf.mxu0 }
 0x381   :  { %v6068_v19 = vpop.f32.mrf.mxu1  ;;  %v6056_v62 = vadd.f32 %v6055_v17, %v6043_v59 }
 0x383   :  { %v6069_v35 = vadd.f32 %v6068_v19, %v6056_v62 }
 0x388   :  { %v6081_v5 = vpop.f32.mrf.mxu2  ;;  %v6057_v41 = vpop.f32.mrf.mxu0 }
 0x389   :  { %v6094_v38 = vpop.f32.mrf.mxu3  ;;  %v6070_v0 = vpop.f32.mrf.mxu1  ;;  %v6082_v45 = vadd.f32 %v6081_v5, %v6069_v35 }
 0x38b   :  { %v6095_v13 = vadd.f32 %v6094_v38, %v6082_v45 }
 0x390   :  { %v6083_v33 = vpop.f32.mrf.mxu2 }
 0x391   :  { %v6096_v60 = vpop.f32.mrf.mxu3 }
 0x3a0   :  { %v6107_v46 = vpop.f32.mrf.mxu0 }
 0x3a1   :  { %v6108_v47 = vadd.f32 %v6107_v46, %v6095_v13  ;;  %v6120_v63 = vpop.f32.mrf.mxu1 }
 0x3a3   :  { %v6121_v50 = vadd.f32 %v6120_v63, %v6108_v47 }
 0x3a5   :  { %v6125_v9 = vsub.f32 0.0, %v6121_v50 }
 0x3a7   :  { %v6128_v2 = vmul.f32 1.442695, %v6125_v9 }
 0x3a8   :  { %v6289_v54 = vpop.f32.mrf.mxu2  ;;  %v6109_v48 = vpop.f32.mrf.mxu0 }
 0x3a9   :  { %10344 = vpow2.f32 %v6128_v2  ;;  %v6122_v14 = vpop.f32.mrf.mxu1  ;;  %v6290_v43 = vadd.f32 %v10337_v42, %v6289_v54 }
 0x3af   :  { %v10345_v18 = vpop.eup %10344 }
 0x3b0   :  { %v6291_v30 = vpop.f32.mrf.mxu2  ;;  %v6131_v49 = vadd.f32 1.0, %v10345_v18 }
 0x3b2   :  { %10346 = vrcp.f32 %v6131_v49 }
 0x3b8   :  { %v10347_v36 = vpop.eup %10346 }
 0x3b9   :  { %v6135_v26 = vadd.f32 2.0, %v10347_v36 }
 0x3bb   :  { %v6137_v15 = vmul.f32 %v10347_v36, %v6135_v26 }
 0x3bd   :  { %v6141_v44 = vadd.f32 2.0, %v6137_v15  ;;  %v6139_v28 = vmul.f32 %v6137_v15, %v6121_v50 }
 0x3bf   :  { %10348 = vrcp.f32 %v6141_v44 }
 0x3c5   :  { %v10349_v21 = vpop.eup %10348 }
 0x3c6   :  { %v6145_v52 = vmul.f32 %v10349_v21, %v6139_v28 }
 0x3c8   :  { %v6147_v31 = vpack.c.bf16 %v6145_v52, %v6145_v52 }
 0x3ca   :  { %6301 = vmatmul.bf16.vlgmr.msra.gmra.mxu3 %v6147_v31 }
 0x44d   :  { %v6302_v12 = vpop.f32.mrf.mxu3 }
 0x44e   :  { %v6303_v34 = vadd.f32 %v6302_v12, %v6290_v43 }
 0x450   :  { %v6307_v56 = vsel %vm6306_vm0, %v6303_v34, -inf }
 0x451   :  { %6308 = vmax.xlane.f32.xlu0 %v6307_v56 }
 0x455   :  { %v6304_v16 = vpop.f32.mrf.mxu3 }
 0x4c4   :  { %v6309_v3 = vpop.xlane.xlu0 %6308 }
 0x4c5   :  { %v6310_v32 = vsub.f32 %v6303_v34, %v6309_v3 }
 0x4c7   :  { %v6311_v55 = vmul.f32 1.442695, %v6310_v32 }
 0x4c9   :  { %10350 = vpow2.f32 %v6311_v55 }
 0x4cf   :  { %v10351_v1 = vpop.eup %10350 }
 0x4d0   :  { %v6313_v6 = vsel %vm6306_vm0, %v10351_v1, 0.0 }
 0x4d1   :  { %6314 = vadd.xlane.f32.xlu0 %v6313_v6 }
 0x544   :  { %v6315_v39 = vpop.xlane.xlu0 %6314 }
 0x545   :  { %10352 = vlog2.f32 %v6315_v39 }
 0x54b   :  { %v10353_v57 = vpop.eup %10352 }
 0x54c   :  { %v6317_v10 = vmul.f32 0.6931472, %v10353_v57 }
 0x54e   :  { %v6318_v7 = vsub.f32 %v6310_v32, %v6317_v10 }
 0x550   :  { %6319 = vst.msk [vmem:[#allocation2] sm:$0x3] %vm6306_vm0, %v6318_v7 }
 0x551   :  { %6330 = dma.vmem_to_hbm [thread:$0]  %s6326_s8, 32, %s6328_s2, [#allocation3]  }
 0x552   :  { %10380 = dma.done.wait [#allocation3], 32  }
 0x553   :  { %10381 = vsyncadd [#allocation3], 4294967264 }
 0x554   :  { %6335 = vsyncpa [#allocation3], 1 }

</bundles_post_ra>
